<compile_context>
chip_gen: v6e
topology: v6e:2x2x1
jax: 0.10.0
libtpu: 0.0.40
codegen_flags: <defaults>
</compile_context>

<pallas_src>
import numpy as np
import jax
import jax.numpy as jnp
from jax import lax
from jax.experimental import pallas as pl
from jax.experimental.pallas import tpu as pltpu


# --------------------------------------------------------------------------
# Kernel 1: fused 3x3 conv (padding=1, no bias) + optional fused input
#           BN-apply/ReLU + BatchNorm batch-statistics epilogue.
# --------------------------------------------------------------------------
def _make_conv3x3_kernel(H, W, cin, cout, fuse_in_bn_relu):
    HW = H * W
    Hp, Wp = H + 2, W + 2

    def kernel(*refs):
        if fuse_in_bn_relu:
            x_ref, w_ref, sc_ref, sh_ref, y_ref, s_ref, q_ref, act_ref = refs
            # Previous layer's BN affine + ReLU applied ONCE per image (not per
            # tap).  The stored halo is zero in the pre-BN domain; keep it zero
            # in the activation domain too by masking the padded border.
            xin = x_ref[0].astype(jnp.float32)                     # (Hp, Wp, cin)
            scale = sc_ref[...].reshape(1, 1, cin)
            shift = sh_ref[...].reshape(1, 1, cin)
            a = jnp.maximum(xin * scale + shift, 0.0)
            row = lax.broadcasted_iota(jnp.int32, (Hp, Wp, 1), 0)
            col = lax.broadcasted_iota(jnp.int32, (Hp, Wp, 1), 1)
            interior = jnp.logical_and(
                jnp.logical_and(row > 0, row < Hp - 1),
                jnp.logical_and(col > 0, col < Wp - 1))
            act_ref[...] = jnp.where(interior, a, 0.0).astype(act_ref.dtype)
        else:
            x_ref, w_ref, y_ref, s_ref, q_ref = refs
            act_ref = None

        # 9 shifted-window taps of the zero-padded image (fused im2col).
        # Accumulator is a tiny (HW, cout) f32 tile -> lives in vregs.
        acc = jnp.zeros((HW, cout), jnp.float32)
        for dh in range(3):
            for dw in range(3):
                if fuse_in_bn_relu:
                    win = act_ref[dh:dh + H, dw:dw + W, :]          # (H, W, cin)
                else:
                    win = x_ref[0, dh:dh + H, dw:dw + W, :]
                acc = acc + jnp.dot(win.reshape(HW, cin),
                                    w_ref[3 * dh + dw],
                                    preferred_element_type=jnp.float32)

        y_ref[0] = acc.astype(y_ref.dtype)                          # bf16 store
        # BatchNorm batch statistics fused into the epilogue (f32).
        s_ref[0] = jnp.sum(acc, axis=0, keepdims=True)
        q_ref[0] = jnp.sum(acc * acc, axis=0, keepdims=True)

    return kernel


def conv3x3_bn_stats(x_pad, w9, in_scale=None, in_shift=None):
    """x_pad: (N,H+2,W+2,Cin) bf16 zero-padded NHWC; w9: (9,Cin,Cout) bf16.

    Returns (y, sum, sumsq):
      y    : (N, H*W, Cout) bf16  pre-BN conv output
      sum  : (N, 1, Cout)   f32   per-image channel sums   (for this BN)
      sumsq: (N, 1, Cout)   f32   per-image channel sums of squares
    If in_scale/in_shift (1,Cin) f32 are given, relu(x*scale+shift) is applied
    to the (pre-BN) input on the fly (previous BN+ReLU fused into this conv).
    """
    N, Hp, Wp, cin = x_pad.shape
    H, W = Hp - 2, Wp - 2
    cout = w9.shape[-1]
    HW = H * W
    assert W % 8 == 0, "kernel assumes image width is a multiple of 8"

    fuse = in_scale is not None
    kernel = _make_conv3x3_kernel(H, W, cin, cout, fuse)

    in_specs = [
        pl.BlockSpec((1, Hp, Wp, cin), lambda n: (n, 0, 0, 0)),   # one image / step
        pl.BlockSpec((9, cin, cout), lambda n: (0, 0, 0)),        # weights resident
    ]
    inputs = [x_pad, w9]
    scratch = []
    if fuse:
        in_specs += [pl.BlockSpec((1, cin), lambda n: (0, 0)),
                     pl.BlockSpec((1, cin), lambda n: (0, 0))]
        inputs += [in_scale, in_shift]
        scratch = [pltpu.VMEM((Hp, Wp, cin), jnp.bfloat16)]       # activated image

    return pl.pallas_call(
        kernel,
        out_shape=(jax.ShapeDtypeStruct((N, HW, cout), jnp.bfloat16),
                   jax.ShapeDtypeStruct((N, 1, cout), jnp.float32),
                   jax.ShapeDtypeStruct((N, 1, cout), jnp.float32)),
        grid=(N,),
        in_specs=in_specs,
        out_specs=(pl.BlockSpec((1, HW, cout), lambda n: (n, 0, 0)),
                   pl.BlockSpec((1, 1, cout), lambda n: (n, 0, 0)),
                   pl.BlockSpec((1, 1, cout), lambda n: (n, 0, 0))),
        scratch_shapes=scratch,
        compiler_params=pltpu.CompilerParams(
            dimension_semantics=("parallel",)),
    )(*inputs)


# --------------------------------------------------------------------------
# Kernel 2: final BatchNorm affine + ReLU (only needed after the last conv).
# --------------------------------------------------------------------------
def _scale_shift_relu_kernel(y_ref, sc_ref, sh_ref, o_ref):
    y = y_ref[...].astype(jnp.float32)                            # f32 epilogue
    o_ref[...] = jnp.maximum(y * sc_ref[...] + sh_ref[...], 0.0).astype(o_ref.dtype)


def scale_shift_relu(y, scale, shift, out_dtype=jnp.float32):
    M, C = y.shape
    tm = M if M <= 4096 else 4096
    while M % tm:
        tm //= 2
    return pl.pallas_call(
        _scale_shift_relu_kernel,
        out_shape=jax.ShapeDtypeStruct((M, C), out_dtype),
        grid=(M // tm,),
        in_specs=[pl.BlockSpec((tm, C), lambda i: (i, 0)),
                  pl.BlockSpec((1, C), lambda i: (0, 0)),
                  pl.BlockSpec((1, C), lambda i: (0, 0))],
        out_specs=pl.BlockSpec((tm, C), lambda i: (i, 0)),
        compiler_params=pltpu.CompilerParams(
            dimension_semantics=("parallel",)),
    )(y, scale, shift)


# --------------------------------------------------------------------------
# Kernel 3: bilinear 2x upsample (align_corners=True) as one matmul / image.
# --------------------------------------------------------------------------
def _upsample_kernel(m_ref, x_ref, o_ref):
    o_ref[0] = jnp.dot(m_ref[...], x_ref[0],
                       preferred_element_type=jnp.float32).astype(o_ref.dtype)


def upsample_bilinear_2x(x_nhwc, mup):
    """x: (N,H,W,C) f32; mup: (4*H*W, H*W) f32 = kron(Ry, Rx)."""
    N, H, W, C = x_nhwc.shape
    Ho, Wo = 2 * H, 2 * W
    x_flat = x_nhwc.reshape(N, H * W, C)
    out = pl.pallas_call(
        _upsample_kernel,
        out_shape=jax.ShapeDtypeStruct((N, Ho * Wo, C), jnp.float32),
        grid=(N,),
        in_specs=[pl.BlockSpec((Ho * Wo, H * W), lambda n: (0, 0)),
                  pl.BlockSpec((1, H * W, C), lambda n: (n, 0, 0))],
        out_specs=pl.BlockSpec((1, Ho * Wo, C), lambda n: (n, 0, 0)),
        compiler_params=pltpu.CompilerParams(
            dimension_semantics=("parallel",)),
    )(mup, x_flat)
    return out.reshape(N, Ho, Wo, C)


# --------------------------------------------------------------------------
# Host-side glue
# --------------------------------------------------------------------------
def _lin_interp_matrix(n_in, n_out):
    """1-D bilinear weights, align_corners=True (matches nn.Upsample)."""
    m = np.zeros((n_out, n_in), np.float32)
    if n_in == 1:
        m[:, 0] = 1.0
        return m
    src = np.arange(n_out, dtype=np.float64) * (n_in - 1) / (n_out - 1)
    i0 = np.minimum(np.floor(src).astype(np.int64), n_in - 1)
    i1 = np.minimum(i0 + 1, n_in - 1)
    f = src - i0
    for o in range(n_out):
        m[o, i0[o]] += 1.0 - f[o]
        m[o, i1[o]] += f[o]
    return m


def make_upsample_operator(h, w):
    ry = _lin_interp_matrix(h, 2 * h)
    rx = _lin_interp_matrix(w, 2 * w)
    return np.kron(ry, rx).astype(np.float32), ry, rx


def bn_affine(s, q, gamma, beta, count, eps=1e-5):
    """Finalize fused BN stats -> per-channel (scale, shift)."""
    mean = jnp.sum(s, axis=0) / count                    # (1, C)
    ex2 = jnp.sum(q, axis=0) / count
    var = jnp.maximum(ex2 - mean * mean, 0.0)            # cancellation guard
    inv = lax.rsqrt(var + eps)
    scale = gamma.reshape(1, -1) * inv
    shift = beta.reshape(1, -1) - mean * scale
    return scale, shift


@jax.jit
def upconv_forward(x1_nchw, x2_nchw, params, mup):
    """UpConv.forward(x1, x2) with bilinear=True, train-mode BatchNorm."""
    x1 = jnp.transpose(x1_nchw, (0, 2, 3, 1)).astype(jnp.float32)   # NCHW->NHWC
    x2 = jnp.transpose(x2_nchw, (0, 2, 3, 1)).astype(jnp.float32)

    # upsample (Pallas matmul) + pad + concat (XLA layout glue).
    x1u = upsample_bilinear_2x(x1, mup)
    dy = x2.shape[1] - x1u.shape[1]
    dx = x2.shape[2] - x1u.shape[2]
    x1u = jnp.pad(x1u, ((0, 0), (dy // 2, dy - dy // 2),
                        (dx // 2, dx - dx // 2), (0, 0)))
    x = jnp.concatenate([x2, x1u], axis=-1).astype(jnp.bfloat16)    # [x2, x1]
    N, H, W, cin = x.shape
    cnt = N * H * W

    # DoubleConv(in, out, mid=in//2) — conv bias dropped (cancelled by train BN).
    w1 = params["w1"].astype(jnp.bfloat16).reshape(9, cin, -1)
    cm = w1.shape[-1]
    xp = jnp.pad(x, ((0, 0), (1, 1), (1, 1), (0, 0)))               # 1-px halo
    y1, s1, q1 = conv3x3_bn_stats(xp, w1)                           # conv1 + stats
    scale1, shift1 = bn_affine(s1, q1, params["g1"], params["be1"], cnt)

    w2 = params["w2"].astype(jnp.bfloat16).reshape(9, cm, -1)
    cout = w2.shape[-1]
    y1p = jnp.pad(y1.reshape(N, H, W, cm), ((0, 0), (1, 1), (1, 1), (0, 0)))
    # conv2 with BN1-apply + ReLU fused into its input stage, + BN2 stats.
    y2, s2, q2 = conv3x3_bn_stats(y1p, w2, scale1, shift1)
    scale2, shift2 = bn_affine(s2, q2, params["g2"], params["be2"], cnt)

    out = scale_shift_relu(y2.reshape(N * H * W, cout), scale2, shift2)
    out = out.reshape(N, H, W, cout)
    return jnp.transpose(out, (0, 3, 1, 2))                         # NHWC->NCHW


# --------------------------------------------------------------------------
# Pure-JAX reference (f32) for a numerics check
# --------------------------------------------------------------------------
def upconv_reference(x1_nchw, x2_nchw, params, ry, rx):
    x1 = jnp.transpose(x1_nchw, (0, 2, 3, 1)).astype(jnp.float32)
    x2 = jnp.transpose(x2_nchw, (0, 2, 3, 1)).astype(jnp.float32)
    x1u = jnp.einsum("oh,nhwc->nowc", ry, x1)
    x1u = jnp.einsum("pw,nowc->nopc", rx, x1u)
    dy = x2.shape[1] - x1u.shape[1]
    dx = x2.shape[2] - x1u.shape[2]
    x1u = jnp.pad(x1u, ((0, 0), (dy // 2, dy - dy // 2),
                        (dx // 2, dx - dx // 2), (0, 0)))
    x = jnp.concatenate([x2, x1u], axis=-1)

    def conv_bn_relu(z, w, g, b):
        y = lax.conv_general_dilated(z, w, (1, 1), "SAME",
                                     dimension_numbers=("NHWC", "HWIO", "NHWC"))
        mean = jnp.mean(y, axis=(0, 1, 2))
        var = jnp.var(y, axis=(0, 1, 2))
        return jnp.maximum((y - mean) * lax.rsqrt(var + 1e-5) * g + b, 0.0)

    y = conv_bn_relu(x, params["w1"], params["g1"], params["be1"])
    y = conv_bn_relu(y, params["w2"], params["g2"], params["be2"])
    return jnp.transpose(y, (0, 3, 1, 2))


# --------------------------------------------------------------------------
# Deterministic synthetic parameters (same shapes as the nn.Module)
# --------------------------------------------------------------------------
def init_upconv_params(key, in_channels, out_channels):
    cm = in_channels // 2
    k = jax.random.split(key, 6)
    # Conv2d biases omitted: exactly cancelled by the train-mode BatchNorm
    # mean subtraction that follows each conv.
    return dict(
        w1=jax.random.normal(k[0], (3, 3, in_channels, cm), jnp.float32)
           / np.sqrt(9 * in_channels),
        g1=1.0 + 0.1 * jax.random.normal(k[1], (cm,), jnp.float32),
        be1=0.1 * jax.random.normal(k[2], (cm,), jnp.float32),
        w2=jax.random.normal(k[3], (3, 3, cm, out_channels), jnp.float32)
           / np.sqrt(9 * cm),
        g2=1.0 + 0.1 * jax.random.normal(k[4], (out_channels,), jnp.float32),
        be2=0.1 * jax.random.normal(k[5], (out_channels,), jnp.float32),
    )


if __name__ == "__main__":
    key = jax.random.PRNGKey(0)
    pkey, k1, k2 = jax.random.split(key, 3)

    N = 2
    in_channels, out_channels = 128, 64          # UpConv(128, 64, bilinear=True)
    c1 = in_channels // 2                        # x1 (low-res) channels
    c2 = in_channels - c1                        # x2 (skip) channels
    h1 = w1s = 8                                 # x1 spatial
    h2 = w2s = 16                                # x2 spatial (= 2 * x1)

    params = init_upconv_params(pkey, in_channels, out_channels)
    x1 = jax.random.normal(k1, (N, c1, h1, w1s), jnp.float32)
    x2 = jax.random.normal(k2, (N, c2, h2, w2s), jnp.float32)

    mup, ry, rx = make_upsample_operator(h1, w1s)

    out = jax.block_until_ready(upconv_forward(x1, x2, params, jnp.asarray(mup)))
    assert out.shape == (N, out_channels, h2, w2s), out.shape
    assert bool(jnp.all(jnp.isfinite(out)))

    ref = upconv_reference(x1, x2, params, jnp.asarray(ry), jnp.asarray(rx))
    err = float(jnp.max(jnp.abs(out - ref)))
    assert err < 1e-1, f"max abs diff vs reference too large: {err}"

    print("KERNEL_OK")
</pallas_src>

<mosaic_0001>
module attributes {stable_mosaic.version = 11 : i64} {
  func.func @_upsample_kernel(%arg0: i32, %arg1: memref<256x64xf32, #tpu.memory_space<vmem>>, %arg2: memref<1x64x64xf32, #tpu.memory_space<vmem>>, %arg3: memref<1x256x64xf32, #tpu.memory_space<vmem>>) attributes {dimension_semantics = [#tpu.dimension_semantics<parallel>], iteration_bounds = array<i64: 2>, scalar_prefetch = 0 : i64, scratch_operands = 0 : i64, tpu.core_type = #tpu.core_type<tc>, window_params = [{pipeline_mode = #tpu.pipeline_mode<synchronous>, transform_indices = @transform_0, window_bounds = array<i64: 256, 64>}, {transform_indices = @transform_1, window_bounds = array<i64: 1, 64, 64>}, {transform_indices = @transform_2, window_bounds = array<i64: 1, 256, 64>}]} {
    %c0 = arith.constant 0 : index
    %c0_0 = arith.constant 0 : index
    %0 = vector.load %arg1[%c0, %c0_0] : memref<256x64xf32, #tpu.memory_space<vmem>>, vector<256x64xf32>
    %c0_1 = arith.constant 0 : index
    %c0_2 = arith.constant 0 : index
    %c0_3 = arith.constant 0 : index
    %1 = vector.load %arg2[%c0_1, %c0_2, %c0_3] : memref<1x64x64xf32, #tpu.memory_space<vmem>>, vector<1x64x64xf32>
    %2 = vector.shape_cast %1 : vector<1x64x64xf32> to vector<64x64xf32>
    %cst = arith.constant dense<0.000000e+00> : vector<256x64xf32>
    %3 = tpu.matmul %0, %2, %cst {dimension_numbers = #tpu.dot_dimension_numbers<[1], [0], [0], [1], [0, 0, 1, 1], [], []>} : vector<256x64xf32>, vector<64x64xf32>, vector<256x64xf32> -> vector<256x64xf32>
    %c0_4 = arith.constant 0 : index
    %c0_5 = arith.constant 0 : index
    %c0_6 = arith.constant 0 : index
    %4 = vector.load %arg3[%c0_4, %c0_5, %c0_6] : memref<1x256x64xf32, #tpu.memory_space<vmem>>, vector<1x256x64xf32>
    %5 = vector.shape_cast %4 : vector<1x256x64xf32> to vector<256x64xf32>
    %6 = vector.shape_cast %3 : vector<256x64xf32> to vector<1x256x64xf32>
    tpu.vector_store %arg3[%c0_4, %c0_5, %c0_6], %6 {strides = array<i32>} : memref<1x256x64xf32, #tpu.memory_space<vmem>>, vector<1x256x64xf32>,
    return
  }
  func.func @transform_0(%arg0: i32) -> (i32, i32) {
    %c0_i32 = arith.constant 0 : i32
    %c0_i32_0 = arith.constant 0 : i32
    %c0_i32_1 = arith.constant 0 : i32
    return %c0_i32, %c0_i32_0 : i32, i32
  }
  func.func @transform_1(%arg0: i32) -> (i32, i32, i32) {
    %c0_i32 = arith.constant 0 : i32
    %c0_i32_0 = arith.constant 0 : i32
    %c0_i32_1 = arith.constant 0 : i32
    return %arg0, %c0_i32, %c0_i32_0 : i32, i32, i32
  }
  func.func @transform_2(%arg0: i32) -> (i32, i32, i32) {
    %c0_i32 = arith.constant 0 : i32
    %c0_i32_0 = arith.constant 0 : i32
    %c0_i32_1 = arith.constant 0 : i32
    return %arg0, %c0_i32, %c0_i32_0 : i32, i32, i32
  }
}

module attributes {stable_mosaic.version = 11 : i64} {
  func.func @kernel(%arg0: i32, %arg1: memref<1x18x18x128xbf16, #tpu.memory_space<vmem>>, %arg2: memref<9x128x64xbf16, #tpu.memory_space<vmem>>, %arg3: memref<1x256x64xbf16, #tpu.memory_space<vmem>>, %arg4: memref<1x1x64xf32, #tpu.memory_space<vmem>>, %arg5: memref<1x1x64xf32, #tpu.memory_space<vmem>>) attributes {dimension_semantics = [#tpu.dimension_semantics<parallel>], iteration_bounds = array<i64: 2>, scalar_prefetch = 0 : i64, scratch_operands = 0 : i64, tpu.core_type = #tpu.core_type<tc>, window_params = [{transform_indices = @transform_0, window_bounds = array<i64: 1, 18, 18, 128>}, {pipeline_mode = #tpu.pipeline_mode<synchronous>, transform_indices = @transform_1, window_bounds = array<i64: 9, 128, 64>}, {transform_indices = @transform_2, window_bounds = array<i64: 1, 256, 64>}, {transform_indices = @transform_3, window_bounds = array<i64: 1, 1, 64>}, {transform_indices = @transform_4, window_bounds = array<i64: 1, 1, 64>}]} {
    %cst = arith.constant 0.000000e+00 : f32
    %0 = vector.broadcast %cst : f32 to vector<256x64xf32>
    %c0 = arith.constant 0 : index
    %c0_0 = arith.constant 0 : index
    %c0_1 = arith.constant 0 : index
    %c0_2 = arith.constant 0 : index
    %1 = vector.load %arg1[%c0, %c0_0, %c0_1, %c0_2] : memref<1x18x18x128xbf16, #tpu.memory_space<vmem>>, vector<1x16x16x128xbf16>
    %2 = vector.shape_cast %1 : vector<1x16x16x128xbf16> to vector<16x16x128xbf16>
    %3 = vector.shape_cast %2 : vector<16x16x128xbf16> to vector<256x128xbf16>
    %c0_3 = arith.constant 0 : index
    %c0_4 = arith.constant 0 : index
    %c0_5 = arith.constant 0 : index
    %4 = vector.load %arg2[%c0_3, %c0_4, %c0_5] : memref<9x128x64xbf16, #tpu.memory_space<vmem>>, vector<1x128x64xbf16>
    %5 = vector.shape_cast %4 : vector<1x128x64xbf16> to vector<128x64xbf16>
    %cst_6 = arith.constant dense<0.000000e+00> : vector<256x64xf32>
    %6 = tpu.matmul %3, %5, %cst_6 {dimension_numbers = #tpu.dot_dimension_numbers<[1], [0], [0], [1], [0, 0, 1, 1], [], []>} : vector<256x128xbf16>, vector<128x64xbf16>, vector<256x64xf32> -> vector<256x64xf32>
    %7 = arith.addf %0, %6 : vector<256x64xf32>
    %c0_7 = arith.constant 0 : index
    %c0_8 = arith.constant 0 : index
    %c1 = arith.constant 1 : index
    %c0_9 = arith.constant 0 : index
    %8 = vector.load %arg1[%c0_7, %c0_8, %c1, %c0_9] : memref<1x18x18x128xbf16, #tpu.memory_space<vmem>>, vector<1x16x16x128xbf16>
    %9 = vector.shape_cast %8 : vector<1x16x16x128xbf16> to vector<16x16x128xbf16>
    %10 = vector.shape_cast %9 : vector<16x16x128xbf16> to vector<256x128xbf16>
    %c1_10 = arith.constant 1 : index
    %c0_11 = arith.constant 0 : index
    %c0_12 = arith.constant 0 : index
    %11 = vector.load %arg2[%c1_10, %c0_11, %c0_12] : memref<9x128x64xbf16, #tpu.memory_space<vmem>>, vector<1x128x64xbf16>
    %12 = vector.shape_cast %11 : vector<1x128x64xbf16> to vector<128x64xbf16>
    %cst_13 = arith.constant dense<0.000000e+00> : vector<256x64xf32>
    %13 = tpu.matmul %10, %12, %cst_13 {dimension_numbers = #tpu.dot_dimension_numbers<[1], [0], [0], [1], [0, 0, 1, 1], [], []>} : vector<256x128xbf16>, vector<128x64xbf16>, vector<256x64xf32> -> vector<256x64xf32>
    %14 = arith.addf %7, %13 : vector<256x64xf32>
    %c0_14 = arith.constant 0 : index
    %c0_15 = arith.constant 0 : index
    %c2 = arith.constant 2 : index
    %c0_16 = arith.constant 0 : index
    %15 = vector.load %arg1[%c0_14, %c0_15, %c2, %c0_16] : memref<1x18x18x128xbf16, #tpu.memory_space<vmem>>, vector<1x16x16x128xbf16>
    %16 = vector.shape_cast %15 : vector<1x16x16x128xbf16> to vector<16x16x128xbf16>
    %17 = vector.shape_cast %16 : vector<16x16x128xbf16> to vector<256x128xbf16>
    %c2_17 = arith.constant 2 : index
    %c0_18 = arith.constant 0 : index
    %c0_19 = arith.constant 0 : index
    %18 = vector.load %arg2[%c2_17, %c0_18, %c0_19] : memref<9x128x64xbf16, #tpu.memory_space<vmem>>, vector<1x128x64xbf16>
    %19 = vector.shape_cast %18 : vector<1x128x64xbf16> to vector<128x64xbf16>
    %cst_20 = arith.constant dense<0.000000e+00> : vector<256x64xf32>
    %20 = tpu.matmul %17, %19, %cst_20 {dimension_numbers = #tpu.dot_dimension_numbers<[1], [0], [0], [1], [0, 0, 1, 1], [], []>} : vector<256x128xbf16>, vector<128x64xbf16>, vector<256x64xf32> -> vector<256x64xf32>
    %21 = arith.addf %14, %20 : vector<256x64xf32>
    %c0_21 = arith.constant 0 : index
    %c1_22 = arith.constant 1 : index
    %c0_23 = arith.constant 0 : index
    %c0_24 = arith.constant 0 : index
    %22 = vector.load %arg1[%c0_21, %c1_22, %c0_23, %c0_24] : memref<1x18x18x128xbf16, #tpu.memory_space<vmem>>, vector<1x16x16x128xbf16>
    %23 = vector.shape_cast %22 : vector<1x16x16x128xbf16> to vector<16x16x128xbf16>
    %24 = vector.shape_cast %23 : vector<16x16x128xbf16> to vector<256x128xbf16>
    %c3 = arith.constant 3 : index
    %c0_25 = arith.constant 0 : index
    %c0_26 = arith.constant 0 : index
    %25 = vector.load %arg2[%c3, %c0_25, %c0_26] : memref<9x128x64xbf16, #tpu.memory_space<vmem>>, vector<1x128x64xbf16>
    %26 = vector.shape_cast %25 : vector<1x128x64xbf16> to vector<128x64xbf16>
    %cst_27 = arith.constant dense<0.000000e+00> : vector<256x64xf32>
    %27 = tpu.matmul %24, %26, %cst_27 {dimension_numbers = #tpu.dot_dimension_numbers<[1], [0], [0], [1], [0, 0, 1, 1], [], []>} : vector<256x128xbf16>, vector<128x64xbf16>, vector<256x64xf32> -> vector<256x64xf32>
    %28 = arith.addf %21, %27 : vector<256x64xf32>
    %c0_28 = arith.constant 0 : index
    %c1_29 = arith.constant 1 : index
    %c1_30 = arith.constant 1 : index
    %c0_31 = arith.constant 0 : index
    %29 = vector.load %arg1[%c0_28, %c1_29, %c1_30, %c0_31] : memref<1x18x18x128xbf16, #tpu.memory_space<vmem>>, vector<1x16x16x128xbf16>
    %30 = vector.shape_cast %29 : vector<1x16x16x128xbf16> to vector<16x16x128xbf16>
    %31 = vector.shape_cast %30 : vector<16x16x128xbf16> to vector<256x128xbf16>
    %c4 = arith.constant 4 : index
    %c0_32 = arith.constant 0 : index
    %c0_33 = arith.constant 0 : index
    %32 = vector.load %arg2[%c4, %c0_32, %c0_33] : memref<9x128x64xbf16, #tpu.memory_space<vmem>>, vector<1x128x64xbf16>
    %33 = vector.shape_cast %32 : vector<1x128x64xbf16> to vector<128x64xbf16>
    %cst_34 = arith.constant dense<0.000000e+00> : vector<256x64xf32>
    %34 = tpu.matmul %31, %33, %cst_34 {dimension_numbers = #tpu.dot_dimension_numbers<[1], [0], [0], [1], [0, 0, 1, 1], [], []>} : vector<256x128xbf16>, vector<128x64xbf16>, vector<256x64xf32> -> vector<256x64xf32>
    %35 = arith.addf %28, %34 : vector<256x64xf32>
    %c0_35 = arith.constant 0 : index
    %c1_36 = arith.constant 1 : index
    %c2_37 = arith.constant 2 : index
    %c0_38 = arith.constant 0 : index
    %36 = vector.load %arg1[%c0_35, %c1_36, %c2_37, %c0_38] : memref<1x18x18x128xbf16, #tpu.memory_space<vmem>>, vector<1x16x16x128xbf16>
    %37 = vector.shape_cast %36 : vector<1x16x16x128xbf16> to vector<16x16x128xbf16>
    %38 = vector.shape_cast %37 : vector<16x16x128xbf16> to vector<256x128xbf16>
    %c5 = arith.constant 5 : index
    %c0_39 = arith.constant 0 : index
    %c0_40 = arith.constant 0 : index
    %39 = vector.load %arg2[%c5, %c0_39, %c0_40] : memref<9x128x64xbf16, #tpu.memory_space<vmem>>, vector<1x128x64xbf16>
    %40 = vector.shape_cast %39 : vector<1x128x64xbf16> to vector<128x64xbf16>
    %cst_41 = arith.constant dense<0.000000e+00> : vector<256x64xf32>
    %41 = tpu.matmul %38, %40, %cst_41 {dimension_numbers = #tpu.dot_dimension_numbers<[1], [0], [0], [1], [0, 0, 1, 1], [], []>} : vector<256x128xbf16>, vector<128x64xbf16>, vector<256x64xf32> -> vector<256x64xf32>
    %42 = arith.addf %35, %41 : vector<256x64xf32>
    %c0_42 = arith.constant 0 : index
    %c2_43 = arith.constant 2 : index
    %c0_44 = arith.constant 0 : index
    %c0_45 = arith.constant 0 : index
    %43 = vector.load %arg1[%c0_42, %c2_43, %c0_44, %c0_45] : memref<1x18x18x128xbf16, #tpu.memory_space<vmem>>, vector<1x16x16x128xbf16>
    %44 = vector.shape_cast %43 : vector<1x16x16x128xbf16> to vector<16x16x128xbf16>
    %45 = vector.shape_cast %44 : vector<16x16x128xbf16> to vector<256x128xbf16>
    %c6 = arith.constant 6 : index
    %c0_46 = arith.constant 0 : index
    %c0_47 = arith.constant 0 : index
    %46 = vector.load %arg2[%c6, %c0_46, %c0_47] : memref<9x128x64xbf16, #tpu.memory_space<vmem>>, vector<1x128x64xbf16>
    %47 = vector.shape_cast %46 : vector<1x128x64xbf16> to vector<128x64xbf16>
    %cst_48 = arith.constant dense<0.000000e+00> : vector<256x64xf32>
    %48 = tpu.matmul %45, %47, %cst_48 {dimension_numbers = #tpu.dot_dimension_numbers<[1], [0], [0], [1], [0, 0, 1, 1], [], []>} : vector<256x128xbf16>, vector<128x64xbf16>, vector<256x64xf32> -> vector<256x64xf32>
    %49 = arith.addf %42, %48 : vector<256x64xf32>
    %c0_49 = arith.constant 0 : index
    %c2_50 = arith.constant 2 : index
    %c1_51 = arith.constant 1 : index
    %c0_52 = arith.constant 0 : index
    %50 = vector.load %arg1[%c0_49, %c2_50, %c1_51, %c0_52] : memref<1x18x18x128xbf16, #tpu.memory_space<vmem>>, vector<1x16x16x128xbf16>
    %51 = vector.shape_cast %50 : vector<1x16x16x128xbf16> to vector<16x16x128xbf16>
    %52 = vector.shape_cast %51 : vector<16x16x128xbf16> to vector<256x128xbf16>
    %c7 = arith.constant 7 : index
    %c0_53 = arith.constant 0 : index
    %c0_54 = arith.constant 0 : index
    %53 = vector.load %arg2[%c7, %c0_53, %c0_54] : memref<9x128x64xbf16, #tpu.memory_space<vmem>>, vector<1x128x64xbf16>
    %54 = vector.shape_cast %53 : vector<1x128x64xbf16> to vector<128x64xbf16>
    %cst_55 = arith.constant dense<0.000000e+00> : vector<256x64xf32>
    %55 = tpu.matmul %52, %54, %cst_55 {dimension_numbers = #tpu.dot_dimension_numbers<[1], [0], [0], [1], [0, 0, 1, 1], [], []>} : vector<256x128xbf16>, vector<128x64xbf16>, vector<256x64xf32> -> vector<256x64xf32>
    %56 = arith.addf %49, %55 : vector<256x64xf32>
    %c0_56 = arith.constant 0 : index
    %c2_57 = arith.constant 2 : index
    %c2_58 = arith.constant 2 : index
    %c0_59 = arith.constant 0 : index
    %57 = vector.load %arg1[%c0_56, %c2_57, %c2_58, %c0_59] : memref<1x18x18x128xbf16, #tpu.memory_space<vmem>>, vector<1x16x16x128xbf16>
    %58 = vector.shape_cast %57 : vector<1x16x16x128xbf16> to vector<16x16x128xbf16>
    %59 = vector.shape_cast %58 : vector<16x16x128xbf16> to vector<256x128xbf16>
    %c8 = arith.constant 8 : index
    %c0_60 = arith.constant 0 : index
    %c0_61 = arith.constant 0 : index
    %60 = vector.load %arg2[%c8, %c0_60, %c0_61] : memref<9x128x64xbf16, #tpu.memory_space<vmem>>, vector<1x128x64xbf16>
    %61 = vector.shape_cast %60 : vector<1x128x64xbf16> to vector<128x64xbf16>
    %cst_62 = arith.constant dense<0.000000e+00> : vector<256x64xf32>
    %62 = tpu.matmul %59, %61, %cst_62 {dimension_numbers = #tpu.dot_dimension_numbers<[1], [0], [0], [1], [0, 0, 1, 1], [], []>} : vector<256x128xbf16>, vector<128x64xbf16>, vector<256x64xf32> -> vector<256x64xf32>
    %63 = arith.addf %56, %62 : vector<256x64xf32>
    %64 = arith.truncf %63 : vector<256x64xf32> to vector<256x64xbf16>
    %c0_63 = arith.constant 0 : index
    %c0_64 = arith.constant 0 : index
    %c0_65 = arith.constant 0 : index
    %65 = vector.load %arg3[%c0_63, %c0_64, %c0_65] : memref<1x256x64xbf16, #tpu.memory_space<vmem>>, vector<1x256x64xbf16>
    %66 = vector.shape_cast %65 : vector<1x256x64xbf16> to vector<256x64xbf16>
    %67 = vector.shape_cast %64 : vector<256x64xbf16> to vector<1x256x64xbf16>
    tpu.vector_store %arg3[%c0_63, %c0_64, %c0_65], %67 {strides = array<i32>} : memref<1x256x64xbf16, #tpu.memory_space<vmem>>, vector<1x256x64xbf16>,
    %cst_66 = arith.constant dense<0.000000e+00> : vector<64xf32>
    %68 = vector.multi_reduction <add>, %63, %cst_66 [0] : vector<256x64xf32> to vector<64xf32>
    %69 = vector.shape_cast %68 : vector<64xf32> to vector<1x64xf32>
    %c0_67 = arith.constant 0 : index
    %c0_68 = arith.constant 0 : index
    %c0_69 = arith.constant 0 : index
    %70 = vector.load %arg4[%c0_67, %c0_68, %c0_69] : memref<1x1x64xf32, #tpu.memory_space<vmem>>, vector<1x1x64xf32>
    %71 = vector.shape_cast %70 : vector<1x1x64xf32> to vector<1x64xf32>
    %72 = vector.shape_cast %69 : vector<1x64xf32> to vector<1x1x64xf32>
    tpu.vector_store %arg4[%c0_67, %c0_68, %c0_69], %72 {strides = array<i32>} : memref<1x1x64xf32, #tpu.memory_space<vmem>>, vector<1x1x64xf32>,
    %73 = arith.mulf %63, %63 : vector<256x64xf32>
    %cst_70 = arith.constant dense<0.000000e+00> : vector<64xf32>
    %74 = vector.multi_reduction <add>, %73, %cst_70 [0] : vector<256x64xf32> to vector<64xf32>
    %75 = vector.shape_cast %74 : vector<64xf32> to vector<1x64xf32>
    %c0_71 = arith.constant 0 : index
    %c0_72 = arith.constant 0 : index
    %c0_73 = arith.constant 0 : index
    %76 = vector.load %arg5[%c0_71, %c0_72, %c0_73] : memref<1x1x64xf32, #tpu.memory_space<vmem>>, vector<1x1x64xf32>
    %77 = vector.shape_cast %76 : vector<1x1x64xf32> to vector<1x64xf32>
    %78 = vector.shape_cast %75 : vector<1x64xf32> to vector<1x1x64xf32>
    tpu.vector_store %arg5[%c0_71, %c0_72, %c0_73], %78 {strides = array<i32>} : memref<1x1x64xf32, #tpu.memory_space<vmem>>, vector<1x1x64xf32>,
    return
  }
  func.func @transform_0(%arg0: i32) -> (i32, i32, i32, i32) {
    %c0_i32 = arith.constant 0 : i32
    %c0_i32_0 = arith.constant 0 : i32
    %c0_i32_1 = arith.constant 0 : i32
    %c0_i32_2 = arith.constant 0 : i32
    return %arg0, %c0_i32, %c0_i32_0, %c0_i32_1 : i32, i32, i32, i32
  }
  func.func @transform_1(%arg0: i32) -> (i32, i32, i32) {
    %c0_i32 = arith.constant 0 : i32
    %c0_i32_0 = arith.constant 0 : i32
    %c0_i32_1 = arith.constant 0 : i32
    %c0_i32_2 = arith.constant 0 : i32
    return %c0_i32, %c0_i32_0, %c0_i32_1 : i32, i32, i32
  }
  func.func @transform_2(%arg0: i32) -> (i32, i32, i32) {
    %c0_i32 = arith.constant 0 : i32
    %c0_i32_0 = arith.constant 0 : i32
    %c0_i32_1 = arith.constant 0 : i32
    return %arg0, %c0_i32, %c0_i32_0 : i32, i32, i32
  }
  func.func @transform_3(%arg0: i32) -> (i32, i32, i32) {
    %c0_i32 = arith.constant 0 : i32
    %c0_i32_0 = arith.constant 0 : i32
    %c0_i32_1 = arith.constant 0 : i32
    return %arg0, %c0_i32, %c0_i32_0 : i32, i32, i32
  }
  func.func @transform_4(%arg0: i32) -> (i32, i32, i32) {
    %c0_i32 = arith.constant 0 : i32
    %c0_i32_0 = arith.constant 0 : i32
    %c0_i32_1 = arith.constant 0 : i32
    return %arg0, %c0_i32, %c0_i32_0 : i32, i32, i32
  }
}

module attributes {stable_mosaic.version = 11 : i64} {
  func.func @kernel(%arg0: i32, %arg1: memref<1x18x18x64xbf16, #tpu.memory_space<vmem>>, %arg2: memref<9x64x64xbf16, #tpu.memory_space<vmem>>, %arg3: memref<1x64xf32, #tpu.memory_space<vmem>>, %arg4: memref<1x64xf32, #tpu.memory_space<vmem>>, %arg5: memref<1x256x64xbf16, #tpu.memory_space<vmem>>, %arg6: memref<1x1x64xf32, #tpu.memory_space<vmem>>, %arg7: memref<1x1x64xf32, #tpu.memory_space<vmem>>, %arg8: memref<18x18x64xbf16, #tpu.memory_space<vmem>>) attributes {dimension_semantics = [#tpu.dimension_semantics<parallel>], iteration_bounds = array<i64: 2>, scalar_prefetch = 0 : i64, scratch_operands = 1 : i64, tpu.core_type = #tpu.core_type<tc>, window_params = [{transform_indices = @transform_0, window_bounds = array<i64: 1, 18, 18, 64>}, {pipeline_mode = #tpu.pipeline_mode<synchronous>, transform_indices = @transform_1, window_bounds = array<i64: 9, 64, 64>}, {pipeline_mode = #tpu.pipeline_mode<synchronous>, transform_indices = @transform_2, window_bounds = array<i64: 1, 64>}, {pipeline_mode = #tpu.pipeline_mode<synchronous>, transform_indices = @transform_3, window_bounds = array<i64: 1, 64>}, {transform_indices = @transform_4, window_bounds = array<i64: 1, 256, 64>}, {transform_indices = @transform_5, window_bounds = array<i64: 1, 1, 64>}, {transform_indices = @transform_6, window_bounds = array<i64: 1, 1, 64>}]} {
    %c0 = arith.constant 0 : index
    %c0_0 = arith.constant 0 : index
    %c0_1 = arith.constant 0 : index
    %c0_2 = arith.constant 0 : index
    %0 = vector.load %arg1[%c0, %c0_0, %c0_1, %c0_2] : memref<1x18x18x64xbf16, #tpu.memory_space<vmem>>, vector<1x18x18x64xbf16>
    %1 = vector.shape_cast %0 : vector<1x18x18x64xbf16> to vector<18x18x64xbf16>
    %2 = arith.extf %1 : vector<18x18x64xbf16> to vector<18x18x64xf32>
    %c0_3 = arith.constant 0 : index
    %c0_4 = arith.constant 0 : index
    %3 = vector.load %arg3[%c0_3, %c0_4] : memref<1x64xf32, #tpu.memory_space<vmem>>, vector<1x64xf32>
    %4 = vector.shape_cast %3 : vector<1x64xf32> to vector<1x1x64xf32>
    %c0_5 = arith.constant 0 : index
    %c0_6 = arith.constant 0 : index
    %5 = vector.load %arg4[%c0_5, %c0_6] : memref<1x64xf32, #tpu.memory_space<vmem>>, vector<1x64xf32>
    %6 = vector.shape_cast %5 : vector<1x64xf32> to vector<1x1x64xf32>
    %7 = vector.broadcast %4 : vector<1x1x64xf32> to vector<18x18x64xf32>
    %8 = arith.mulf %2, %7 : vector<18x18x64xf32>
    %9 = vector.broadcast %6 : vector<1x1x64xf32> to vector<18x18x64xf32>
    %10 = arith.addf %8, %9 : vector<18x18x64xf32>
    %cst = arith.constant 0.000000e+00 : f32
    %11 = vector.broadcast %cst : f32 to vector<18x18x64xf32>
    %12 = arith.maximumf %10, %11 : vector<18x18x64xf32>
    %13 = tpu.iota {dimensions = array<i32: 0>} : vector<18x18x1xi32>
    %14 = tpu.iota {dimensions = array<i32: 1>} : vector<18x18x1xi32>
    %c0_i32 = arith.constant 0 : i32
    %15 = vector.broadcast %c0_i32 : i32 to vector<18x18x1xi32>
    %16 = arith.cmpi sgt, %13, %15 : vector<18x18x1xi32>
    %c17_i32 = arith.constant 17 : i32
    %17 = vector.broadcast %c17_i32 : i32 to vector<18x18x1xi32>
    %18 = arith.cmpi slt, %13, %17 : vector<18x18x1xi32>
    %19 = arith.andi %16, %18 : vector<18x18x1xi1>
    %c0_i32_7 = arith.constant 0 : i32
    %20 = vector.broadcast %c0_i32_7 : i32 to vector<18x18x1xi32>
    %21 = arith.cmpi sgt, %14, %20 : vector<18x18x1xi32>
    %c17_i32_8 = arith.constant 17 : i32
    %22 = vector.broadcast %c17_i32_8 : i32 to vector<18x18x1xi32>
    %23 = arith.cmpi slt, %14, %22 : vector<18x18x1xi32>
    %24 = arith.andi %21, %23 : vector<18x18x1xi1>
    %25 = arith.andi %19, %24 : vector<18x18x1xi1>
    %cst_9 = arith.constant 0.000000e+00 : f32
    %26 = vector.shape_cast %25 : vector<18x18x1xi1> to vector<18x18x1xi1>
    %27 = vector.broadcast %26 : vector<18x18x1xi1> to vector<18x18x64xi1>
    %28 = vector.broadcast %cst_9 : f32 to vector<18x18x64xf32>
    %29 = arith.select %27, %12, %28 : vector<18x18x64xi1>, vector<18x18x64xf32>
    %30 = arith.truncf %29 : vector<18x18x64xf32> to vector<18x18x64xbf16>
    %c0_10 = arith.constant 0 : index
    %c0_11 = arith.constant 0 : index
    %c0_12 = arith.constant 0 : index
    %31 = vector.load %arg8[%c0_10, %c0_11, %c0_12] : memref<18x18x64xbf16, #tpu.memory_space<vmem>>, vector<18x18x64xbf16>
    tpu.vector_store %arg8[%c0_10, %c0_11, %c0_12], %30 {strides = array<i32>} : memref<18x18x64xbf16, #tpu.memory_space<vmem>>, vector<18x18x64xbf16>,
    %cst_13 = arith.constant 0.000000e+00 : f32
    %32 = vector.broadcast %cst_13 : f32 to vector<256x64xf32>
    %c0_14 = arith.constant 0 : index
    %c0_15 = arith.constant 0 : index
    %c0_16 = arith.constant 0 : index
    %33 = vector.load %arg8[%c0_14, %c0_15, %c0_16] : memref<18x18x64xbf16, #tpu.memory_space<vmem>>, vector<16x16x64xbf16>
    %34 = vector.shape_cast %33 : vector<16x16x64xbf16> to vector<256x64xbf16>
    %c0_17 = arith.constant 0 : index
    %c0_18 = arith.constant 0 : index
    %c0_19 = arith.constant 0 : index
    %35 = vector.load %arg2[%c0_17, %c0_18, %c0_19] : memref<9x64x64xbf16, #tpu.memory_space<vmem>>, vector<1x64x64xbf16>
    %36 = vector.shape_cast %35 : vector<1x64x64xbf16> to vector<64x64xbf16>
    %cst_20 = arith.constant dense<0.000000e+00> : vector<256x64xf32>
    %37 = tpu.matmul %34, %36, %cst_20 {dimension_numbers = #tpu.dot_dimension_numbers<[1], [0], [0], [1], [0, 0, 1, 1], [], []>} : vector<256x64xbf16>, vector<64x64xbf16>, vector<256x64xf32> -> vector<256x64xf32>
    %38 = arith.addf %32, %37 : vector<256x64xf32>
    %c0_21 = arith.constant 0 : index
    %c1 = arith.constant 1 : index
    %c0_22 = arith.constant 0 : index
    %39 = vector.load %arg8[%c0_21, %c1, %c0_22] : memref<18x18x64xbf16, #tpu.memory_space<vmem>>, vector<16x16x64xbf16>
    %40 = vector.shape_cast %39 : vector<16x16x64xbf16> to vector<256x64xbf16>
    %c1_23 = arith.constant 1 : index
    %c0_24 = arith.constant 0 : index
    %c0_25 = arith.constant 0 : index
    %41 = vector.load %arg2[%c1_23, %c0_24, %c0_25] : memref<9x64x64xbf16, #tpu.memory_space<vmem>>, vector<1x64x64xbf16>
    %42 = vector.shape_cast %41 : vector<1x64x64xbf16> to vector<64x64xbf16>
    %cst_26 = arith.constant dense<0.000000e+00> : vector<256x64xf32>
    %43 = tpu.matmul %40, %42, %cst_26 {dimension_numbers = #tpu.dot_dimension_numbers<[1], [0], [0], [1], [0, 0, 1, 1], [], []>} : vector<256x64xbf16>, vector<64x64xbf16>, vector<256x64xf32> -> vector<256x64xf32>
    %44 = arith.addf %38, %43 : vector<256x64xf32>
    %c0_27 = arith.constant 0 : index
    %c2 = arith.constant 2 : index
    %c0_28 = arith.constant 0 : index
    %45 = vector.load %arg8[%c0_27, %c2, %c0_28] : memref<18x18x64xbf16, #tpu.memory_space<vmem>>, vector<16x16x64xbf16>
    %46 = vector.shape_cast %45 : vector<16x16x64xbf16> to vector<256x64xbf16>
    %c2_29 = arith.constant 2 : index
    %c0_30 = arith.constant 0 : index
    %c0_31 = arith.constant 0 : index
    %47 = vector.load %arg2[%c2_29, %c0_30, %c0_31] : memref<9x64x64xbf16, #tpu.memory_space<vmem>>, vector<1x64x64xbf16>
    %48 = vector.shape_cast %47 : vector<1x64x64xbf16> to vector<64x64xbf16>
    %cst_32 = arith.constant dense<0.000000e+00> : vector<256x64xf32>
    %49 = tpu.matmul %46, %48, %cst_32 {dimension_numbers = #tpu.dot_dimension_numbers<[1], [0], [0], [1], [0, 0, 1, 1], [], []>} : vector<256x64xbf16>, vector<64x64xbf16>, vector<256x64xf32> -> vector<256x64xf32>
    %50 = arith.addf %44, %49 : vector<256x64xf32>
    %c1_33 = arith.constant 1 : index
    %c0_34 = arith.constant 0 : index
    %c0_35 = arith.constant 0 : index
    %51 = vector.load %arg8[%c1_33, %c0_34, %c0_35] : memref<18x18x64xbf16, #tpu.memory_space<vmem>>, vector<16x16x64xbf16>
    %52 = vector.shape_cast %51 : vector<16x16x64xbf16> to vector<256x64xbf16>
    %c3 = arith.constant 3 : index
    %c0_36 = arith.constant 0 : index
    %c0_37 = arith.constant 0 : index
    %53 = vector.load %arg2[%c3, %c0_36, %c0_37] : memref<9x64x64xbf16, #tpu.memory_space<vmem>>, vector<1x64x64xbf16>
    %54 = vector.shape_cast %53 : vector<1x64x64xbf16> to vector<64x64xbf16>
    %cst_38 = arith.constant dense<0.000000e+00> : vector<256x64xf32>
    %55 = tpu.matmul %52, %54, %cst_38 {dimension_numbers = #tpu.dot_dimension_numbers<[1], [0], [0], [1], [0, 0, 1, 1], [], []>} : vector<256x64xbf16>, vector<64x64xbf16>, vector<256x64xf32> -> vector<256x64xf32>
    %56 = arith.addf %50, %55 : vector<256x64xf32>
    %c1_39 = arith.constant 1 : index
    %c1_40 = arith.constant 1 : index
    %c0_41 = arith.constant 0 : index
    %57 = vector.load %arg8[%c1_39, %c1_40, %c0_41] : memref<18x18x64xbf16, #tpu.memory_space<vmem>>, vector<16x16x64xbf16>
    %58 = vector.shape_cast %57 : vector<16x16x64xbf16> to vector<256x64xbf16>
    %c4 = arith.constant 4 : index
    %c0_42 = arith.constant 0 : index
    %c0_43 = arith.constant 0 : index
    %59 = vector.load %arg2[%c4, %c0_42, %c0_43] : memref<9x64x64xbf16, #tpu.memory_space<vmem>>, vector<1x64x64xbf16>
    %60 = vector.shape_cast %59 : vector<1x64x64xbf16> to vector<64x64xbf16>
    %cst_44 = arith.constant dense<0.000000e+00> : vector<256x64xf32>
    %61 = tpu.matmul %58, %60, %cst_44 {dimension_numbers = #tpu.dot_dimension_numbers<[1], [0], [0], [1], [0, 0, 1, 1], [], []>} : vector<256x64xbf16>, vector<64x64xbf16>, vector<256x64xf32> -> vector<256x64xf32>
    %62 = arith.addf %56, %61 : vector<256x64xf32>
    %c1_45 = arith.constant 1 : index
    %c2_46 = arith.constant 2 : index
    %c0_47 = arith.constant 0 : index
    %63 = vector.load %arg8[%c1_45, %c2_46, %c0_47] : memref<18x18x64xbf16, #tpu.memory_space<vmem>>, vector<16x16x64xbf16>
    %64 = vector.shape_cast %63 : vector<16x16x64xbf16> to vector<256x64xbf16>
    %c5 = arith.constant 5 : index
    %c0_48 = arith.constant 0 : index
    %c0_49 = arith.constant 0 : index
    %65 = vector.load %arg2[%c5, %c0_48, %c0_49] : memref<9x64x64xbf16, #tpu.memory_space<vmem>>, vector<1x64x64xbf16>
    %66 = vector.shape_cast %65 : vector<1x64x64xbf16> to vector<64x64xbf16>
    %cst_50 = arith.constant dense<0.000000e+00> : vector<256x64xf32>
    %67 = tpu.matmul %64, %66, %cst_50 {dimension_numbers = #tpu.dot_dimension_numbers<[1], [0], [0], [1], [0, 0, 1, 1], [], []>} : vector<256x64xbf16>, vector<64x64xbf16>, vector<256x64xf32> -> vector<256x64xf32>
    %68 = arith.addf %62, %67 : vector<256x64xf32>
    %c2_51 = arith.constant 2 : index
    %c0_52 = arith.constant 0 : index
    %c0_53 = arith.constant 0 : index
    %69 = vector.load %arg8[%c2_51, %c0_52, %c0_53] : memref<18x18x64xbf16, #tpu.memory_space<vmem>>, vector<16x16x64xbf16>
    %70 = vector.shape_cast %69 : vector<16x16x64xbf16> to vector<256x64xbf16>
    %c6 = arith.constant 6 : index
    %c0_54 = arith.constant 0 : index
    %c0_55 = arith.constant 0 : index
    %71 = vector.load %arg2[%c6, %c0_54, %c0_55] : memref<9x64x64xbf16, #tpu.memory_space<vmem>>, vector<1x64x64xbf16>
    %72 = vector.shape_cast %71 : vector<1x64x64xbf16> to vector<64x64xbf16>
    %cst_56 = arith.constant dense<0.000000e+00> : vector<256x64xf32>
    %73 = tpu.matmul %70, %72, %cst_56 {dimension_numbers = #tpu.dot_dimension_numbers<[1], [0], [0], [1], [0, 0, 1, 1], [], []>} : vector<256x64xbf16>, vector<64x64xbf16>, vector<256x64xf32> -> vector<256x64xf32>
    %74 = arith.addf %68, %73 : vector<256x64xf32>
    %c2_57 = arith.constant 2 : index
    %c1_58 = arith.constant 1 : index
    %c0_59 = arith.constant 0 : index
    %75 = vector.load %arg8[%c2_57, %c1_58, %c0_59] : memref<18x18x64xbf16, #tpu.memory_space<vmem>>, vector<16x16x64xbf16>
    %76 = vector.shape_cast %75 : vector<16x16x64xbf16> to vector<256x64xbf16>
    %c7 = arith.constant 7 : index
    %c0_60 = arith.constant 0 : index
    %c0_61 = arith.constant 0 : index
    %77 = vector.load %arg2[%c7, %c0_60, %c0_61] : memref<9x64x64xbf16, #tpu.memory_space<vmem>>, vector<1x64x64xbf16>
    %78 = vector.shape_cast %77 : vector<1x64x64xbf16> to vector<64x64xbf16>
    %cst_62 = arith.constant dense<0.000000e+00> : vector<256x64xf32>
    %79 = tpu.matmul %76, %78, %cst_62 {dimension_numbers = #tpu.dot_dimension_numbers<[1], [0], [0], [1], [0, 0, 1, 1], [], []>} : vector<256x64xbf16>, vector<64x64xbf16>, vector<256x64xf32> -> vector<256x64xf32>
    %80 = arith.addf %74, %79 : vector<256x64xf32>
    %c2_63 = arith.constant 2 : index
    %c2_64 = arith.constant 2 : index
    %c0_65 = arith.constant 0 : index
    %81 = vector.load %arg8[%c2_63, %c2_64, %c0_65] : memref<18x18x64xbf16, #tpu.memory_space<vmem>>, vector<16x16x64xbf16>
    %82 = vector.shape_cast %81 : vector<16x16x64xbf16> to vector<256x64xbf16>
    %c8 = arith.constant 8 : index
    %c0_66 = arith.constant 0 : index
    %c0_67 = arith.constant 0 : index
    %83 = vector.load %arg2[%c8, %c0_66, %c0_67] : memref<9x64x64xbf16, #tpu.memory_space<vmem>>, vector<1x64x64xbf16>
    %84 = vector.shape_cast %83 : vector<1x64x64xbf16> to vector<64x64xbf16>
    %cst_68 = arith.constant dense<0.000000e+00> : vector<256x64xf32>
    %85 = tpu.matmul %82, %84, %cst_68 {dimension_numbers = #tpu.dot_dimension_numbers<[1], [0], [0], [1], [0, 0, 1, 1], [], []>} : vector<256x64xbf16>, vector<64x64xbf16>, vector<256x64xf32> -> vector<256x64xf32>
    %86 = arith.addf %80, %85 : vector<256x64xf32>
    %87 = arith.truncf %86 : vector<256x64xf32> to vector<256x64xbf16>
    %c0_69 = arith.constant 0 : index
    %c0_70 = arith.constant 0 : index
    %c0_71 = arith.constant 0 : index
    %88 = vector.load %arg5[%c0_69, %c0_70, %c0_71] : memref<1x256x64xbf16, #tpu.memory_space<vmem>>, vector<1x256x64xbf16>
    %89 = vector.shape_cast %88 : vector<1x256x64xbf16> to vector<256x64xbf16>
    %90 = vector.shape_cast %87 : vector<256x64xbf16> to vector<1x256x64xbf16>
    tpu.vector_store %arg5[%c0_69, %c0_70, %c0_71], %90 {strides = array<i32>} : memref<1x256x64xbf16, #tpu.memory_space<vmem>>, vector<1x256x64xbf16>,
    %cst_72 = arith.constant dense<0.000000e+00> : vector<64xf32>
    %91 = vector.multi_reduction <add>, %86, %cst_72 [0] : vector<256x64xf32> to vector<64xf32>
    %92 = vector.shape_cast %91 : vector<64xf32> to vector<1x64xf32>
    %c0_73 = arith.constant 0 : index
    %c0_74 = arith.constant 0 : index
    %c0_75 = arith.constant 0 : index
    %93 = vector.load %arg6[%c0_73, %c0_74, %c0_75] : memref<1x1x64xf32, #tpu.memory_space<vmem>>, vector<1x1x64xf32>
    %94 = vector.shape_cast %93 : vector<1x1x64xf32> to vector<1x64xf32>
    %95 = vector.shape_cast %92 : vector<1x64xf32> to vector<1x1x64xf32>
    tpu.vector_store %arg6[%c0_73, %c0_74, %c0_75], %95 {strides = array<i32>} : memref<1x1x64xf32, #tpu.memory_space<vmem>>, vector<1x1x64xf32>,
    %96 = arith.mulf %86, %86 : vector<256x64xf32>
    %cst_76 = arith.constant dense<0.000000e+00> : vector<64xf32>
    %97 = vector.multi_reduction <add>, %96, %cst_76 [0] : vector<256x64xf32> to vector<64xf32>
    %98 = vector.shape_cast %97 : vector<64xf32> to vector<1x64xf32>
    %c0_77 = arith.constant 0 : index
    %c0_78 = arith.constant 0 : index
    %c0_79 = arith.constant 0 : index
    %99 = vector.load %arg7[%c0_77, %c0_78, %c0_79] : memref<1x1x64xf32, #tpu.memory_space<vmem>>, vector<1x1x64xf32>
    %100 = vector.shape_cast %99 : vector<1x1x64xf32> to vector<1x64xf32>
    %101 = vector.shape_cast %98 : vector<1x64xf32> to vector<1x1x64xf32>
    tpu.vector_store %arg7[%c0_77, %c0_78, %c0_79], %101 {strides = array<i32>} : memref<1x1x64xf32, #tpu.memory_space<vmem>>, vector<1x1x64xf32>,
    return
  }
  func.func @transform_0(%arg0: i32) -> (i32, i32, i32, i32) {
    %c0_i32 = arith.constant 0 : i32
    %c0_i32_0 = arith.constant 0 : i32
    %c0_i32_1 = arith.constant 0 : i32
    %c0_i32_2 = arith.constant 0 : i32
    return %arg0, %c0_i32, %c0_i32_0, %c0_i32_1 : i32, i32, i32, i32
  }
  func.func @transform_1(%arg0: i32) -> (i32, i32, i32) {
    %c0_i32 = arith.constant 0 : i32
    %c0_i32_0 = arith.constant 0 : i32
    %c0_i32_1 = arith.constant 0 : i32
    %c0_i32_2 = arith.constant 0 : i32
    return %c0_i32, %c0_i32_0, %c0_i32_1 : i32, i32, i32
  }
  func.func @transform_2(%arg0: i32) -> (i32, i32) {
    %c0_i32 = arith.constant 0 : i32
    %c0_i32_0 = arith.constant 0 : i32
    %c0_i32_1 = arith.constant 0 : i32
    return %c0_i32, %c0_i32_0 : i32, i32
  }
  func.func @transform_3(%arg0: i32) -> (i32, i32) {
    %c0_i32 = arith.constant 0 : i32
    %c0_i32_0 = arith.constant 0 : i32
    %c0_i32_1 = arith.constant 0 : i32
    return %c0_i32, %c0_i32_0 : i32, i32
  }
  func.func @transform_4(%arg0: i32) -> (i32, i32, i32) {
    %c0_i32 = arith.constant 0 : i32
    %c0_i32_0 = arith.constant 0 : i32
    %c0_i32_1 = arith.constant 0 : i32
    return %arg0, %c0_i32, %c0_i32_0 : i32, i32, i32
  }
  func.func @transform_5(%arg0: i32) -> (i32, i32, i32) {
    %c0_i32 = arith.constant 0 : i32
    %c0_i32_0 = arith.constant 0 : i32
    %c0_i32_1 = arith.constant 0 : i32
    return %arg0, %c0_i32, %c0_i32_0 : i32, i32, i32
  }
  func.func @transform_6(%arg0: i32) -> (i32, i32, i32) {
    %c0_i32 = arith.constant 0 : i32
    %c0_i32_0 = arith.constant 0 : i32
    %c0_i32_1 = arith.constant 0 : i32
    return %arg0, %c0_i32, %c0_i32_0 : i32, i32, i32
  }
}

module attributes {stable_mosaic.version = 11 : i64} {
  func.func @_scale_shift_relu_kernel(%arg0: i32, %arg1: memref<512x64xbf16, #tpu.memory_space<vmem>>, %arg2: memref<1x64xf32, #tpu.memory_space<vmem>>, %arg3: memref<1x64xf32, #tpu.memory_space<vmem>>, %arg4: memref<512x64xf32, #tpu.memory_space<vmem>>) attributes {dimension_semantics = [#tpu.dimension_semantics<parallel>], iteration_bounds = array<i64: 1>, scalar_prefetch = 0 : i64, scratch_operands = 0 : i64, tpu.core_type = #tpu.core_type<tc>, window_params = [{transform_indices = @transform_0, window_bounds = array<i64: 512, 64>}, {pipeline_mode = #tpu.pipeline_mode<synchronous>, transform_indices = @transform_1, window_bounds = array<i64: 1, 64>}, {pipeline_mode = #tpu.pipeline_mode<synchronous>, transform_indices = @transform_2, window_bounds = array<i64: 1, 64>}, {transform_indices = @transform_3, window_bounds = array<i64: 512, 64>}]} {
    %c0 = arith.constant 0 : index
    %c0_0 = arith.constant 0 : index
    %0 = vector.load %arg1[%c0, %c0_0] : memref<512x64xbf16, #tpu.memory_space<vmem>>, vector<512x64xbf16>
    %1 = arith.extf %0 : vector<512x64xbf16> to vector<512x64xf32>
    %c0_1 = arith.constant 0 : index
    %c0_2 = arith.constant 0 : index
    %2 = vector.load %arg2[%c0_1, %c0_2] : memref<1x64xf32, #tpu.memory_space<vmem>>, vector<1x64xf32>
    %3 = vector.broadcast %2 : vector<1x64xf32> to vector<512x64xf32>
    %4 = arith.mulf %1, %3 : vector<512x64xf32>
    %c0_3 = arith.constant 0 : index
    %c0_4 = arith.constant 0 : index
    %5 = vector.load %arg3[%c0_3, %c0_4] : memref<1x64xf32, #tpu.memory_space<vmem>>, vector<1x64xf32>
    %6 = vector.broadcast %5 : vector<1x64xf32> to vector<512x64xf32>
    %7 = arith.addf %4, %6 : vector<512x64xf32>
    %cst = arith.constant 0.000000e+00 : f32
    %8 = vector.broadcast %cst : f32 to vector<512x64xf32>
    %9 = arith.maximumf %7, %8 : vector<512x64xf32>
    %c0_5 = arith.constant 0 : index
    %c0_6 = arith.constant 0 : index
    %10 = vector.load %arg4[%c0_5, %c0_6] : memref<512x64xf32, #tpu.memory_space<vmem>>, vector<512x64xf32>
    tpu.vector_store %arg4[%c0_5, %c0_6], %9 {strides = array<i32>} : memref<512x64xf32, #tpu.memory_space<vmem>>, vector<512x64xf32>,
    return
  }
  func.func @transform_0(%arg0: i32) -> (i32, i32) {
    %c0_i32 = arith.constant 0 : i32
    %c0_i32_0 = arith.constant 0 : i32
    return %arg0, %c0_i32 : i32, i32
  }
  func.func @transform_1(%arg0: i32) -> (i32, i32) {
    %c0_i32 = arith.constant 0 : i32
    %c0_i32_0 = arith.constant 0 : i32
    %c0_i32_1 = arith.constant 0 : i32
    return %c0_i32, %c0_i32_0 : i32, i32
  }
  func.func @transform_2(%arg0: i32) -> (i32, i32) {
    %c0_i32 = arith.constant 0 : i32
    %c0_i32_0 = arith.constant 0 : i32
    %c0_i32_1 = arith.constant 0 : i32
    return %c0_i32, %c0_i32_0 : i32, i32
  }
  func.func @transform_3(%arg0: i32) -> (i32, i32) {
    %c0_i32 = arith.constant 0 : i32
    %c0_i32_0 = arith.constant 0 : i32
    return %arg0, %c0_i32 : i32, i32
  }
}

</mosaic_0001>

<bundles_post_ra>
// kernel: upconv_forward.4
= control target key start
LH: loop header
LB: loop body
LE: loop exit
PB: predicated region body
PF: predicated region fallthrough
CT: control target
= control target key end

     0   :  { %s789_s9 = smov 0   ;;  %s1014_s0 = inlined_call_operand.vmem [shape: f32[256,64], index: 0, kind: input, shape index: {}]   ;;  %s1015_s1 = inlined_call_operand.vmem [shape: f32[2,64,64], index: 1, kind: input, shape index: {}]   ;;  %s1016_s2 = inlined_call_operand.vmem [shape: f32[2,256,64], index: 2, kind: output, shape index: {}]  }
   0x1 LB: > { %s593_s10 = sadd.s32 4294967295, %s772_s9   ;;  %p597_p0 = scmp.ge.s32.totalorder %s772_s9, 1  ;;  %s772_s9 = sphi %s789_s9, %s12_s9  }
   0x2   : > { %p112_p1 = scmp.lt.s32.totalorder %s772_s9, 3 }
   0x4   : > { %p113_p2 = pnand %p597_p0, %p112_p1 }
   0x5   : > { %p134_p3 = scmp.lt.s32.totalorder (!%p113_p2), %s593_s10, 1 }
   0x6   : > { %116 = sbr.rel (%p113_p2) target bundleno = 255 (0xff), region = 28 }
   0xb   : > { %v144_v0 = vld [vmem:[%s1014_s0] sm:$0xff]  ;;  %vm184_vm0 = vcmask 523264   ;;  %s1018_s10 = smov (!%p134_p3, %s593_s10), 1  ;;  %v145_v10 = vld [vmem:[%s1014_s0 + $0x8] sm:$0xff]  ;;  %v146_v12 = vld [vmem:[%s1014_s0 + $0x10] sm:$0xff] }
   0xc   : > { %v160_v1 = vld [vmem:[%s1014_s0 + $0x80] sm:$0xff]  ;;  %694 = vmatprep.mubr.msk.f32.mxu0 %vm184_vm0, %v144_v0  ;;  %s636_s15 = sshll.u32 %s1018_s10, 6  ;;  %v161_v11 = vld [vmem:[%s1014_s0 + $0x88] sm:$0xff]  ;;  %v162_v13 = vld [vmem:[%s1014_s0 + $0x90] sm:$0xff]  ;;  %s637_s27 = sshll.u32 %s1018_s10, 8 }
   0xd   : > { %718 = vmatprep.mubr.msk.f32.mxu1 %vm184_vm0, %v160_v1  ;;  %s811_s18 = scalar_lea.vmem %s1015_s1, %s636_s15  ;;  %v147_v14 = vld [vmem:[%s1014_s0 + $0x18] sm:$0xff]  ;;  %v148_v16 = vld [vmem:[%s1014_s0 + $0x20] sm:$0xff]  ;;  %v149_v18 = vld [vmem:[%s1014_s0 + $0x28] sm:$0xff]  ;;  %s945_s30 = scalar_lea.vmem %s1016_s2, %s637_s27 }
   0xe   : > { %v183_v2 = vld [vmem:[%s811_s18 + $0x38] sm:$0xff]  ;;  %v182_v3 = vld [vmem:[%s811_s18 + $0x30] sm:$0xff]  ;;  %v181_v4 = vld [vmem:[%s811_s18 + $0x28] sm:$0xff] }
   0xf   : > { %678 = vmatprep.subr.mxu0 %v183_v2  ;;  %742 = vmatprep.subr.mxu1 %v183_v2  ;;  %v180_v5 = vld [vmem:[%s811_s18 + $0x20] sm:$0xff]  ;;  %v179_v6 = vld [vmem:[%s811_s18 + $0x18] sm:$0xff]  ;;  %v178_v7 = vld [vmem:[%s811_s18 + $0x10] sm:$0xff] }
  0x10   : > { %679 = vmatpush3.msra.mxu0 %v183_v2  ;;  %750 = vmatpush3.msra.mxu1 %v183_v2  ;;  %v177_v8 = vld [vmem:[%s811_s18 + $0x8] sm:$0xff]  ;;  %v176_v9 = vld [vmem:[%s811_s18] sm:$0xff]  ;;  %v163_v15 = vld [vmem:[%s1014_s0 + $0x98] sm:$0xff] }
  0x11   : > { %680 = vmatprep.subr.mxu0 %v182_v3  ;;  %743 = vmatprep.subr.mxu1 %v182_v3  ;;  %v164_v17 = vld [vmem:[%s1014_s0 + $0xa0] sm:$0xff]  ;;  %v165_v19 = vld [vmem:[%s1014_s0 + $0xa8] sm:$0xff]  ;;  %v150_v20 = vld [vmem:[%s1014_s0 + $0x30] sm:$0xff] }
  0x12   : > { %681 = vmatpush3.msra.mxu0 %v182_v3  ;;  %751 = vmatpush3.msra.mxu1 %v182_v3  ;;  %v166_v21 = vld [vmem:[%s1014_s0 + $0xb0] sm:$0xff]  ;;  %v151_v22 = vld [vmem:[%s1014_s0 + $0x38] sm:$0xff]  ;;  %v152_v24 = vld [vmem:[%s1014_s0 + $0x40] sm:$0xff] }
  0x13   : > { %682 = vmatprep.subr.mxu0 %v181_v4  ;;  %744 = vmatprep.subr.mxu1 %v181_v4  ;;  %v167_v23 = vld [vmem:[%s1014_s0 + $0xb8] sm:$0xff]  ;;  %v168_v25 = vld [vmem:[%s1014_s0 + $0xc0] sm:$0xff]  ;;  %v153_v26 = vld [vmem:[%s1014_s0 + $0x48] sm:$0xff] }
  0x14   : > { %683 = vmatpush3.msra.mxu0 %v181_v4  ;;  %752 = vmatpush3.msra.mxu1 %v181_v4  ;;  %v169_v27 = vld [vmem:[%s1014_s0 + $0xc8] sm:$0xff]  ;;  %v154_v28 = vld [vmem:[%s1014_s0 + $0x50] sm:$0xff]  ;;  %v155_v30 = vld [vmem:[%s1014_s0 + $0x58] sm:$0xff] }
  0x15   : > { %684 = vmatprep.subr.mxu0 %v180_v5  ;;  %745 = vmatprep.subr.mxu1 %v180_v5  ;;  %v170_v29 = vld [vmem:[%s1014_s0 + $0xd0] sm:$0xff]  ;;  %v171_v31 = vld [vmem:[%s1014_s0 + $0xd8] sm:$0xff]  ;;  %v156_v32 = vld [vmem:[%s1014_s0 + $0x60] sm:$0xff] }
  0x16   : > { %685 = vmatpush3.msra.mxu0 %v180_v5  ;;  %753 = vmatpush3.msra.mxu1 %v180_v5  ;;  %v172_v33 = vld [vmem:[%s1014_s0 + $0xe0] sm:$0xff]  ;;  %v157_v34 = vld [vmem:[%s1014_s0 + $0x68] sm:$0xff]  ;;  %v158_v36 = vld [vmem:[%s1014_s0 + $0x70] sm:$0xff] }
  0x17   : > { %686 = vmatprep.subr.mxu0 %v179_v6  ;;  %746 = vmatprep.subr.mxu1 %v179_v6  ;;  %v173_v35 = vld [vmem:[%s1014_s0 + $0xe8] sm:$0xff]  ;;  %v174_v37 = vld [vmem:[%s1014_s0 + $0xf0] sm:$0xff]  ;;  %v159_v38 = vld [vmem:[%s1014_s0 + $0x78] sm:$0xff] }
  0x18   : > { %687 = vmatpush3.msra.mxu0 %v179_v6  ;;  %754 = vmatpush3.msra.mxu1 %v179_v6  ;;  %v175_v39 = vld [vmem:[%s1014_s0 + $0xf8] sm:$0xff] }
  0x19   : > { %688 = vmatprep.subr.mxu0 %v178_v7  ;;  %747 = vmatprep.subr.mxu1 %v178_v7 }
  0x1a   : > { %689 = vmatpush3.msra.mxu0 %v178_v7  ;;  %755 = vmatpush3.msra.mxu1 %v178_v7 }
  0x1b   : > { %690 = vmatprep.subr.mxu0 %v177_v8  ;;  %748 = vmatprep.subr.mxu1 %v177_v8 }
  0x1c   : > { %691 = vmatpush3.msra.mxu0 %v177_v8  ;;  %756 = vmatpush3.msra.mxu1 %v177_v8 }
  0x1d   : > { %692 = vmatprep.subr.mxu0 %v176_v9  ;;  %749 = vmatprep.subr.mxu1 %v176_v9 }
  0x1e   : > { %693 = vmatpush3.msra.mxu0 %v176_v9  ;;  %757 = vmatpush3.msra.mxu1 %v176_v9 }
  0x1f   : > { %695 = vmatmul.mubr.msk.f32.vlgmr.msra.gmra.mxu0 %vm184_vm0, %v145_v10  ;;  %719 = vmatmul.mubr.msk.f32.vlgmr.msra.gmra.mxu1 %vm184_vm0, %v161_v11 }
  0x20   : > { %697 = vmatprep.mubr.msk.f32.mxu0 %vm184_vm0, %v146_v12  ;;  %721 = vmatprep.mubr.msk.f32.mxu1 %vm184_vm0, %v162_v13 }
  0x23   : > { %698 = vmatmul.mubr.msk.f32.gmra.mxu0 %vm184_vm0, %v147_v14  ;;  %722 = vmatmul.mubr.msk.f32.gmra.mxu1 %vm184_vm0, %v163_v15 }
  0x24   : > { %700 = vmatprep.mubr.msk.f32.mxu0 %vm184_vm0, %v148_v16  ;;  %724 = vmatprep.mubr.msk.f32.mxu1 %vm184_vm0, %v164_v17 }
  0x27   : > { %701 = vmatmul.mubr.msk.f32.gmra.mxu0 %vm184_vm0, %v149_v18  ;;  %725 = vmatmul.mubr.msk.f32.gmra.mxu1 %vm184_vm0, %v165_v19 }
  0x28   : > { %703 = vmatprep.mubr.msk.f32.mxu0 %vm184_vm0, %v150_v20  ;;  %727 = vmatprep.mubr.msk.f32.mxu1 %vm184_vm0, %v166_v21 }
  0x2b   : > { %704 = vmatmul.mubr.msk.f32.gmra.mxu0 %vm184_vm0, %v151_v22  ;;  %728 = vmatmul.mubr.msk.f32.gmra.mxu1 %vm184_vm0, %v167_v23 }
  0x2c   : > { %706 = vmatprep.mubr.msk.f32.mxu0 %vm184_vm0, %v152_v24  ;;  %730 = vmatprep.mubr.msk.f32.mxu1 %vm184_vm0, %v168_v25 }
  0x2f   : > { %707 = vmatmul.mubr.msk.f32.gmra.mxu0 %vm184_vm0, %v153_v26  ;;  %731 = vmatmul.mubr.msk.f32.gmra.mxu1 %vm184_vm0, %v169_v27 }
  0x30   : > { %709 = vmatprep.mubr.msk.f32.mxu0 %vm184_vm0, %v154_v28  ;;  %733 = vmatprep.mubr.msk.f32.mxu1 %vm184_vm0, %v170_v29 }
  0x33   : > { %710 = vmatmul.mubr.msk.f32.gmra.mxu0 %vm184_vm0, %v155_v30  ;;  %734 = vmatmul.mubr.msk.f32.gmra.mxu1 %vm184_vm0, %v171_v31 }
  0x34   : > { %712 = vmatprep.mubr.msk.f32.mxu0 %vm184_vm0, %v156_v32  ;;  %736 = vmatprep.mubr.msk.f32.mxu1 %vm184_vm0, %v172_v33 }
  0x37   : > { %713 = vmatmul.mubr.msk.f32.gmra.mxu0 %vm184_vm0, %v157_v34  ;;  %737 = vmatmul.mubr.msk.f32.gmra.mxu1 %vm184_vm0, %v173_v35 }
  0x38   : > { %715 = vmatprep.mubr.msk.f32.mxu0 %vm184_vm0, %v158_v36  ;;  %739 = vmatprep.mubr.msk.f32.mxu1 %vm184_vm0, %v174_v37 }
  0x3b   : > { %716 = vmatmul.mubr.msk.f32.gmra.mxu0 %vm184_vm0, %v159_v38  ;;  %740 = vmatmul.mubr.msk.f32.gmra.mxu1 %vm184_vm0, %v175_v39 }
  0xdf   : > { %v696_v40 = vpop.f32.mrf.mxu0  ;;  %v720_v41 = vpop.f32.mrf.mxu1 }
  0xe0   : > { %507 = vst.msk [vmem:[%s945_s30 + $0x8] sm:$0xff] %vm184_vm0, %v696_v40  ;;  %523 = vst.msk [vmem:[%s945_s30 + $0x88] sm:$0xff] %vm184_vm0, %v720_v41 }
  0xe1   : > { %v347_v42 = vpop.f32.mrf.mxu0  ;;  %v427_v43 = vpop.f32.mrf.mxu1 }
  0xe2   : > { %506 = vst.msk [vmem:[%s945_s30] sm:$0xff] %vm184_vm0, %v347_v42  ;;  %522 = vst.msk [vmem:[%s945_s30 + $0x80] sm:$0xff] %vm184_vm0, %v427_v43 }
  0xe3   : > { %v699_v44 = vpop.f32.mrf.mxu0  ;;  %v723_v45 = vpop.f32.mrf.mxu1 }
  0xe4   : > { %509 = vst.msk [vmem:[%s945_s30 + $0x18] sm:$0xff] %vm184_vm0, %v699_v44  ;;  %525 = vst.msk [vmem:[%s945_s30 + $0x98] sm:$0xff] %vm184_vm0, %v723_v45 }
  0xe5   : > { %v357_v46 = vpop.f32.mrf.mxu0  ;;  %v437_v47 = vpop.f32.mrf.mxu1 }
  0xe6   : > { %508 = vst.msk [vmem:[%s945_s30 + $0x10] sm:$0xff] %vm184_vm0, %v357_v46  ;;  %524 = vst.msk [vmem:[%s945_s30 + $0x90] sm:$0xff] %vm184_vm0, %v437_v47 }
  0xe7   : > { %v702_v48 = vpop.f32.mrf.mxu0  ;;  %v726_v49 = vpop.f32.mrf.mxu1 }
  0xe8   : > { %511 = vst.msk [vmem:[%s945_s30 + $0x28] sm:$0xff] %vm184_vm0, %v702_v48  ;;  %527 = vst.msk [vmem:[%s945_s30 + $0xa8] sm:$0xff] %vm184_vm0, %v726_v49 }
  0xe9   : > { %v367_v50 = vpop.f32.mrf.mxu0  ;;  %v447_v51 = vpop.f32.mrf.mxu1 }
  0xea   : > { %510 = vst.msk [vmem:[%s945_s30 + $0x20] sm:$0xff] %vm184_vm0, %v367_v50  ;;  %526 = vst.msk [vmem:[%s945_s30 + $0xa0] sm:$0xff] %vm184_vm0, %v447_v51 }
  0xeb   : > { %v705_v52 = vpop.f32.mrf.mxu0  ;;  %v729_v53 = vpop.f32.mrf.mxu1 }
  0xec   : > { %513 = vst.msk [vmem:[%s945_s30 + $0x38] sm:$0xff] %vm184_vm0, %v705_v52  ;;  %529 = vst.msk [vmem:[%s945_s30 + $0xb8] sm:$0xff] %vm184_vm0, %v729_v53 }
  0xed   : > { %v377_v54 = vpop.f32.mrf.mxu0  ;;  %v457_v55 = vpop.f32.mrf.mxu1 }
  0xee   : > { %512 = vst.msk [vmem:[%s945_s30 + $0x30] sm:$0xff] %vm184_vm0, %v377_v54  ;;  %528 = vst.msk [vmem:[%s945_s30 + $0xb0] sm:$0xff] %vm184_vm0, %v457_v55 }
  0xef   : > { %v708_v56 = vpop.f32.mrf.mxu0  ;;  %v732_v57 = vpop.f32.mrf.mxu1 }
  0xf0   : > { %515 = vst.msk [vmem:[%s945_s30 + $0x48] sm:$0xff] %vm184_vm0, %v708_v56  ;;  %531 = vst.msk [vmem:[%s945_s30 + $0xc8] sm:$0xff] %vm184_vm0, %v732_v57 }
  0xf1   : > { %v387_v58 = vpop.f32.mrf.mxu0  ;;  %v467_v59 = vpop.f32.mrf.mxu1 }
  0xf2   : > { %514 = vst.msk [vmem:[%s945_s30 + $0x40] sm:$0xff] %vm184_vm0, %v387_v58  ;;  %530 = vst.msk [vmem:[%s945_s30 + $0xc0] sm:$0xff] %vm184_vm0, %v467_v59 }
  0xf3   : > { %v711_v60 = vpop.f32.mrf.mxu0  ;;  %v735_v61 = vpop.f32.mrf.mxu1 }
  0xf4   : > { %517 = vst.msk [vmem:[%s945_s30 + $0x58] sm:$0xff] %vm184_vm0, %v711_v60  ;;  %533 = vst.msk [vmem:[%s945_s30 + $0xd8] sm:$0xff] %vm184_vm0, %v735_v61 }
  0xf5   : > { %v397_v62 = vpop.f32.mrf.mxu0  ;;  %v477_v63 = vpop.f32.mrf.mxu1 }
  0xf6   : > { %516 = vst.msk [vmem:[%s945_s30 + $0x50] sm:$0xff] %vm184_vm0, %v397_v62  ;;  %532 = vst.msk [vmem:[%s945_s30 + $0xd0] sm:$0xff] %vm184_vm0, %v477_v63 }
  0xf7   : > { %v714_v0 = vpop.f32.mrf.mxu0  ;;  %v738_v1 = vpop.f32.mrf.mxu1 }
  0xf8   : > { %519 = vst.msk [vmem:[%s945_s30 + $0x68] sm:$0xff] %vm184_vm0, %v714_v0  ;;  %535 = vst.msk [vmem:[%s945_s30 + $0xe8] sm:$0xff] %vm184_vm0, %v738_v1 }
  0xf9   : > { %v407_v2 = vpop.f32.mrf.mxu0  ;;  %v487_v3 = vpop.f32.mrf.mxu1 }
  0xfa   : > { %518 = vst.msk [vmem:[%s945_s30 + $0x60] sm:$0xff] %vm184_vm0, %v407_v2  ;;  %534 = vst.msk [vmem:[%s945_s30 + $0xe0] sm:$0xff] %vm184_vm0, %v487_v3 }
  0xfb   : > { %v717_v4 = vpop.f32.mrf.mxu0  ;;  %v741_v5 = vpop.f32.mrf.mxu1 }
  0xfc   : > { %521 = vst.msk [vmem:[%s945_s30 + $0x78] sm:$0xff] %vm184_vm0, %v717_v4  ;;  %537 = vst.msk [vmem:[%s945_s30 + $0xf8] sm:$0xff] %vm184_vm0, %v741_v5 }
  0xfd   : > { %v417_v6 = vpop.f32.mrf.mxu0  ;;  %v497_v7 = vpop.f32.mrf.mxu1 }
  0xfe   : > { %520 = vst.msk [vmem:[%s945_s30 + $0x70] sm:$0xff] %vm184_vm0, %v417_v6  ;;  %536 = vst.msk [vmem:[%s945_s30 + $0xf0] sm:$0xff] %vm184_vm0, %v497_v7 }
  0xff PF: > { %s12_s9 = sadd.s32 1, %s772_s9  }
 0x100   : > { %p9_p4 = scmp.ge.s32.totalorder %s12_s9, 4  }
 0x102   :  { %11 = sbr.rel (!%p9_p4) target bundleno = 1 (0x1), region = 58 }

// kernel: upconv_forward.7
= control target key start
LH: loop header
LB: loop body
LE: loop exit
PB: predicated region body
PF: predicated region fallthrough
CT: control target
= control target key end

     0   :  { %vm349_vm0 = vcmask 523264   ;;  %s940_s0 = inlined_call_operand.vmem [shape: bf16[512,64], index: 0, kind: input, shape index: {}]   ;;  %s941_s1 = inlined_call_operand.vmem [shape: f32[1,64], index: 1, kind: input, shape index: {}]   ;;  %s942_s2 = inlined_call_operand.vmem [shape: f32[1,64], index: 2, kind: input, shape index: {}]   ;;  %s943_s3 = inlined_call_operand.hbm [shape: f32[512,64], index: 3, kind: output, shape index: {}]  }
   0x1   :  { %v433_v0 = vld [vmem:[%s940_s0] sm:$0xff]   ;;  %v560_v4 = vld [vmem:[%s940_s0 + $0x8] sm:$0xff]   ;;  %v561_v5 = vld [vmem:[%s940_s0 + $0x10] sm:$0xff]  }
   0x2   :  { %v645_v1 = vld [vmem:[%s941_s1] ss:$0 sm:$0xff]  ;;  %v434_v2 = vunpack.c.l.bf16 %v433_v0  ;;  %v435_v3 = vunpack.c.h.bf16 %v433_v0  ;;  %v562_v6 = vld [vmem:[%s940_s0 + $0x18] sm:$0xff]   ;;  %v438_v8 = vunpack.c.l.bf16 %v560_v4  ;;  %v439_v9 = vunpack.c.h.bf16 %v560_v4  ;;  %v564_v33 = vld [vmem:[%s940_s0 + $0x28] sm:$0xff]  }
   0x3   :  { %v659_v7 = vld [vmem:[%s942_s2] ss:$0 sm:$0xff]  ;;  %v442_v10 = vunpack.c.l.bf16 %v561_v5  ;;  %v443_v11 = vunpack.c.h.bf16 %v561_v5  ;;  %v446_v14 = vunpack.c.l.bf16 %v562_v6  ;;  %v447_v15 = vunpack.c.h.bf16 %v562_v6  ;;  %v565_v34 = vld [vmem:[%s940_s0 + $0x30] sm:$0xff]   ;;  %v566_v39 = vld [vmem:[%s940_s0 + $0x38] sm:$0xff]  }
   0x4   :  { %v150_v12 = vmul.f32 %v434_v2, %v645_v1  ;;  %v151_v13 = vmul.f32 %v435_v3, %v645_v1  ;;  %v152_v16 = vmul.f32 %v438_v8, %v645_v1  ;;  %v153_v17 = vmul.f32 %v439_v9, %v645_v1  ;;  %v563_v28 = vld [vmem:[%s940_s0 + $0x20] sm:$0xff]  }
   0x5   :  { %v154_v18 = vmul.f32 %v442_v10, %v645_v1  ;;  %v155_v19 = vmul.f32 %v443_v11, %v645_v1  ;;  %v156_v22 = vmul.f32 %v446_v14, %v645_v1  ;;  %v157_v23 = vmul.f32 %v447_v15, %v645_v1 }
   0x6   :  { %v221_v20 = vadd.f32 %v659_v7, %v150_v12  ;;  %v222_v21 = vadd.f32 %v659_v7, %v151_v13  ;;  %v223_v24 = vadd.f32 %v659_v7, %v152_v16  ;;  %v224_v25 = vadd.f32 %v659_v7, %v153_v17 }
   0x7   :  { %v225_v26 = vadd.f32 %v659_v7, %v154_v18  ;;  %v226_v27 = vadd.f32 %v659_v7, %v155_v19  ;;  %v227_v31 = vadd.f32 %v659_v7, %v156_v22  ;;  %v228_v32 = vadd.f32 %v659_v7, %v157_v23 }
   0x8   :  { %v285_v29 = vmax.f32 %v221_v20, 0.0  ;;  %v286_v30 = vmax.f32 %v222_v21, 0.0  ;;  %v287_v35 = vmax.f32 %v223_v24, 0.0  ;;  %v288_v36 = vmax.f32 %v224_v25, 0.0 }
   0x9   :  { %v289_v37 = vmax.f32 %v225_v26, 0.0  ;;  %v290_v38 = vmax.f32 %v226_v27, 0.0  ;;  %v291_v40 = vmax.f32 %v227_v31, 0.0  ;;  %v292_v41 = vmax.f32 %v228_v32, 0.0 }
   0xa   :  { %350 = vst.msk [vmem:[#allocation2] sm:$0xff] %vm349_vm0, %v285_v29  ;;  %351 = vst.msk [vmem:[#allocation2 + $0x8] sm:$0xff] %vm349_vm0, %v286_v30  ;;  %v450_v42 = vunpack.c.l.bf16 %v563_v28  ;;  %v451_v43 = vunpack.c.h.bf16 %v563_v28  ;;  %v454_v44 = vunpack.c.l.bf16 %v564_v33  ;;  %v455_v45 = vunpack.c.h.bf16 %v564_v33 }
   0xb   :  { %352 = vst.msk [vmem:[#allocation2 + $0x10] sm:$0xff] %vm349_vm0, %v287_v35  ;;  %353 = vst.msk [vmem:[#allocation2 + $0x18] sm:$0xff] %vm349_vm0, %v288_v36  ;;  %v458_v46 = vunpack.c.l.bf16 %v565_v34  ;;  %v459_v47 = vunpack.c.h.bf16 %v565_v34  ;;  %v462_v50 = vunpack.c.l.bf16 %v566_v39  ;;  %v463_v51 = vunpack.c.h.bf16 %v566_v39 }
   0xc   :  { %354 = vst.msk [vmem:[#allocation2 + $0x20] sm:$0xff] %vm349_vm0, %v289_v37  ;;  %355 = vst.msk [vmem:[#allocation2 + $0x28] sm:$0xff] %vm349_vm0, %v290_v38  ;;  %v158_v48 = vmul.f32 %v450_v42, %v645_v1  ;;  %v159_v49 = vmul.f32 %v451_v43, %v645_v1 }
   0xd   :  { %356 = vst.msk [vmem:[#allocation2 + $0x30] sm:$0xff] %vm349_vm0, %v291_v40  ;;  %357 = vst.msk [vmem:[#allocation2 + $0x38] sm:$0xff] %vm349_vm0, %v292_v41 }
   0xe   :  { %8 = vsyncpa [#allocation3], 0  ;;  %v160_v52 = vmul.f32 %v454_v44, %v645_v1  ;;  %v161_v53 = vmul.f32 %v455_v45, %v645_v1  ;;  %v162_v54 = vmul.f32 %v458_v46, %v645_v1  ;;  %v163_v55 = vmul.f32 %v459_v47, %v645_v1  ;;  %v567_v0 = vld [vmem:[%s940_s0 + $0x40] sm:$0xff]   ;;  %v568_v6 = vld [vmem:[%s940_s0 + $0x48] sm:$0xff]  }
   0xf   :  { %v229_v56 = vadd.f32 %v659_v7, %v158_v48  ;;  %v230_v57 = vadd.f32 %v659_v7, %v159_v49  ;;  %v164_v58 = vmul.f32 %v462_v50, %v645_v1  ;;  %v165_v59 = vmul.f32 %v463_v51, %v645_v1  ;;  %v569_v8 = vld [vmem:[%s940_s0 + $0x50] sm:$0xff]   ;;  %v570_v13 = vld [vmem:[%s940_s0 + $0x58] sm:$0xff]   ;;  %v571_v38 = vld [vmem:[%s940_s0 + $0x60] sm:$0xff]  }
  0x10   :  { %v231_v60 = vadd.f32 %v659_v7, %v160_v52  ;;  %v232_v61 = vadd.f32 %v659_v7, %v161_v53  ;;  %v233_v62 = vadd.f32 %v659_v7, %v162_v54  ;;  %v234_v63 = vadd.f32 %v659_v7, %v163_v55  ;;  %v572_v43 = vld [vmem:[%s940_s0 + $0x68] sm:$0xff]   ;;  %v573_v44 = vld [vmem:[%s940_s0 + $0x70] sm:$0xff]   ;;  %v574_v49 = vld [vmem:[%s940_s0 + $0x78] sm:$0xff]  }
  0x11   :  { %v293_v2 = vmax.f32 %v229_v56, 0.0  ;;  %v294_v3 = vmax.f32 %v230_v57, 0.0  ;;  %v235_v4 = vadd.f32 %v659_v7, %v164_v58  ;;  %v236_v5 = vadd.f32 %v659_v7, %v165_v59 }
  0x12   :  { %v295_v9 = vmax.f32 %v231_v60, 0.0  ;;  %v296_v10 = vmax.f32 %v232_v61, 0.0  ;;  %v297_v11 = vmax.f32 %v233_v62, 0.0  ;;  %v298_v12 = vmax.f32 %v234_v63, 0.0 }
  0x13   :  { %358 = vst.msk [vmem:[#allocation2 + $0x40] sm:$0xff] %vm349_vm0, %v293_v2  ;;  %359 = vst.msk [vmem:[#allocation2 + $0x48] sm:$0xff] %vm349_vm0, %v294_v3  ;;  %v299_v14 = vmax.f32 %v235_v4, 0.0  ;;  %v300_v15 = vmax.f32 %v236_v5, 0.0  ;;  %v466_v16 = vunpack.c.l.bf16 %v567_v0  ;;  %v467_v17 = vunpack.c.h.bf16 %v567_v0 }
  0x14   :  { %360 = vst.msk [vmem:[#allocation2 + $0x50] sm:$0xff] %vm349_vm0, %v295_v9  ;;  %361 = vst.msk [vmem:[#allocation2 + $0x58] sm:$0xff] %vm349_vm0, %v296_v10  ;;  %v470_v18 = vunpack.c.l.bf16 %v568_v6  ;;  %v471_v19 = vunpack.c.h.bf16 %v568_v6  ;;  %v474_v20 = vunpack.c.l.bf16 %v569_v8  ;;  %v475_v21 = vunpack.c.h.bf16 %v569_v8 }
  0x15   :  { %362 = vst.msk [vmem:[#allocation2 + $0x60] sm:$0xff] %vm349_vm0, %v297_v11  ;;  %363 = vst.msk [vmem:[#allocation2 + $0x68] sm:$0xff] %vm349_vm0, %v298_v12  ;;  %v166_v22 = vmul.f32 %v466_v16, %v645_v1  ;;  %v167_v23 = vmul.f32 %v467_v17, %v645_v1  ;;  %v478_v24 = vunpack.c.l.bf16 %v570_v13  ;;  %v479_v25 = vunpack.c.h.bf16 %v570_v13  ;;  %v575_v12 = vld [vmem:[%s940_s0 + $0x80] sm:$0xff]   ;;  %v576_v17 = vld [vmem:[%s940_s0 + $0x88] sm:$0xff]  }
  0x16   :  { %364 = vst.msk [vmem:[#allocation2 + $0x70] sm:$0xff] %vm349_vm0, %v299_v14  ;;  %365 = vst.msk [vmem:[#allocation2 + $0x78] sm:$0xff] %vm349_vm0, %v300_v15  ;;  %v168_v26 = vmul.f32 %v470_v18, %v645_v1  ;;  %v169_v27 = vmul.f32 %v471_v19, %v645_v1  ;;  %v170_v28 = vmul.f32 %v474_v20, %v645_v1  ;;  %v482_v52 = vunpack.c.l.bf16 %v571_v38  ;;  %v577_v18 = vld [vmem:[%s940_s0 + $0x90] sm:$0xff]  }
  0x17   :  { %v171_v29 = vmul.f32 %v475_v21, %v645_v1  ;;  %v237_v30 = vadd.f32 %v659_v7, %v166_v22  ;;  %v238_v31 = vadd.f32 %v659_v7, %v167_v23  ;;  %v172_v32 = vmul.f32 %v478_v24, %v645_v1  ;;  %v578_v23 = vld [vmem:[%s940_s0 + $0x98] sm:$0xff]  }
  0x18   :  { %v173_v33 = vmul.f32 %v479_v25, %v645_v1  ;;  %v239_v34 = vadd.f32 %v659_v7, %v168_v26  ;;  %v240_v35 = vadd.f32 %v659_v7, %v169_v27  ;;  %v241_v36 = vadd.f32 %v659_v7, %v170_v28 }
  0x19   :  { %v242_v37 = vadd.f32 %v659_v7, %v171_v29  ;;  %v301_v39 = vmax.f32 %v237_v30, 0.0  ;;  %v302_v40 = vmax.f32 %v238_v31, 0.0  ;;  %v243_v41 = vadd.f32 %v659_v7, %v172_v32 }
  0x1a   :  { %v244_v42 = vadd.f32 %v659_v7, %v173_v33  ;;  %v303_v45 = vmax.f32 %v239_v34, 0.0  ;;  %v304_v46 = vmax.f32 %v240_v35, 0.0  ;;  %v305_v47 = vmax.f32 %v241_v36, 0.0 }
  0x1b   :  { %v306_v48 = vmax.f32 %v242_v37, 0.0  ;;  %366 = vst.msk [vmem:[#allocation2 + $0x80] sm:$0xff] %vm349_vm0, %v301_v39  ;;  %367 = vst.msk [vmem:[#allocation2 + $0x88] sm:$0xff] %vm349_vm0, %v302_v40  ;;  %v307_v50 = vmax.f32 %v243_v41, 0.0  ;;  %v483_v53 = vunpack.c.h.bf16 %v571_v38  ;;  %v486_v54 = vunpack.c.l.bf16 %v572_v43 }
  0x1c   :  { %v308_v51 = vmax.f32 %v244_v42, 0.0  ;;  %368 = vst.msk [vmem:[#allocation2 + $0x90] sm:$0xff] %vm349_vm0, %v303_v45  ;;  %369 = vst.msk [vmem:[#allocation2 + $0x98] sm:$0xff] %vm349_vm0, %v304_v46  ;;  %v487_v55 = vunpack.c.h.bf16 %v572_v43  ;;  %v490_v56 = vunpack.c.l.bf16 %v573_v44  ;;  %v491_v57 = vunpack.c.h.bf16 %v573_v44 }
  0x1d   :  { %370 = vst.msk [vmem:[#allocation2 + $0xa0] sm:$0xff] %vm349_vm0, %v305_v47  ;;  %371 = vst.msk [vmem:[#allocation2 + $0xa8] sm:$0xff] %vm349_vm0, %v306_v48  ;;  %v174_v58 = vmul.f32 %v482_v52, %v645_v1  ;;  %v175_v59 = vmul.f32 %v483_v53, %v645_v1  ;;  %v494_v60 = vunpack.c.l.bf16 %v574_v49  ;;  %v495_v61 = vunpack.c.h.bf16 %v574_v49  ;;  %v579_v48 = vld [vmem:[%s940_s0 + $0xa0] sm:$0xff]   ;;  %v580_v53 = vld [vmem:[%s940_s0 + $0xa8] sm:$0xff]  }
  0x1e   :  { %372 = vst.msk [vmem:[#allocation2 + $0xb0] sm:$0xff] %vm349_vm0, %v307_v50  ;;  %373 = vst.msk [vmem:[#allocation2 + $0xb8] sm:$0xff] %vm349_vm0, %v308_v51  ;;  %v176_v62 = vmul.f32 %v486_v54, %v645_v1  ;;  %v177_v63 = vmul.f32 %v487_v55, %v645_v1  ;;  %v178_v0 = vmul.f32 %v490_v56, %v645_v1  ;;  %v498_v26 = vunpack.c.l.bf16 %v575_v12  ;;  %v581_v54 = vld [vmem:[%s940_s0 + $0xb0] sm:$0xff]  }
  0x1f   :  { %v179_v2 = vmul.f32 %v491_v57, %v645_v1  ;;  %v245_v3 = vadd.f32 %v659_v7, %v174_v58  ;;  %v246_v4 = vadd.f32 %v659_v7, %v175_v59  ;;  %v180_v5 = vmul.f32 %v494_v60, %v645_v1  ;;  %v582_v59 = vld [vmem:[%s940_s0 + $0xb8] sm:$0xff]  }
  0x20   :  { %v181_v6 = vmul.f32 %v495_v61, %v645_v1  ;;  %v247_v8 = vadd.f32 %v659_v7, %v176_v62  ;;  %v248_v9 = vadd.f32 %v659_v7, %v177_v63  ;;  %v249_v10 = vadd.f32 %v659_v7, %v178_v0 }
  0x21   :  { %v250_v11 = vadd.f32 %v659_v7, %v179_v2  ;;  %v309_v13 = vmax.f32 %v245_v3, 0.0  ;;  %v310_v14 = vmax.f32 %v246_v4, 0.0  ;;  %v251_v15 = vadd.f32 %v659_v7, %v180_v5 }
  0x22   :  { %v252_v16 = vadd.f32 %v659_v7, %v181_v6  ;;  %v311_v19 = vmax.f32 %v247_v8, 0.0  ;;  %v312_v20 = vmax.f32 %v248_v9, 0.0  ;;  %v313_v21 = vmax.f32 %v249_v10, 0.0 }
  0x23   :  { %v314_v22 = vmax.f32 %v250_v11, 0.0  ;;  %374 = vst.msk [vmem:[#allocation2 + $0xc0] sm:$0xff] %vm349_vm0, %v309_v13  ;;  %375 = vst.msk [vmem:[#allocation2 + $0xc8] sm:$0xff] %vm349_vm0, %v310_v14  ;;  %v315_v24 = vmax.f32 %v251_v15, 0.0  ;;  %v499_v27 = vunpack.c.h.bf16 %v575_v12  ;;  %v502_v28 = vunpack.c.l.bf16 %v576_v17 }
  0x24   :  { %v316_v25 = vmax.f32 %v252_v16, 0.0  ;;  %376 = vst.msk [vmem:[#allocation2 + $0xd0] sm:$0xff] %vm349_vm0, %v311_v19  ;;  %377 = vst.msk [vmem:[#allocation2 + $0xd8] sm:$0xff] %vm349_vm0, %v312_v20  ;;  %v503_v29 = vunpack.c.h.bf16 %v576_v17  ;;  %v506_v30 = vunpack.c.l.bf16 %v577_v18  ;;  %v507_v31 = vunpack.c.h.bf16 %v577_v18 }
  0x25   :  { %378 = vst.msk [vmem:[#allocation2 + $0xe0] sm:$0xff] %vm349_vm0, %v313_v21  ;;  %379 = vst.msk [vmem:[#allocation2 + $0xe8] sm:$0xff] %vm349_vm0, %v314_v22  ;;  %v182_v32 = vmul.f32 %v498_v26, %v645_v1  ;;  %v183_v33 = vmul.f32 %v499_v27, %v645_v1  ;;  %v510_v34 = vunpack.c.l.bf16 %v578_v23  ;;  %v511_v35 = vunpack.c.h.bf16 %v578_v23  ;;  %v583_v22 = vld [vmem:[%s940_s0 + $0xc0] sm:$0xff]   ;;  %v584_v27 = vld [vmem:[%s940_s0 + $0xc8] sm:$0xff]  }
  0x26   :  { %380 = vst.msk [vmem:[#allocation2 + $0xf0] sm:$0xff] %vm349_vm0, %v315_v24  ;;  %381 = vst.msk [vmem:[#allocation2 + $0xf8] sm:$0xff] %vm349_vm0, %v316_v25  ;;  %v184_v36 = vmul.f32 %v502_v28, %v645_v1  ;;  %v185_v37 = vmul.f32 %v503_v29, %v645_v1  ;;  %v186_v38 = vmul.f32 %v506_v30, %v645_v1  ;;  %v514_v62 = vunpack.c.l.bf16 %v579_v48  ;;  %v585_v28 = vld [vmem:[%s940_s0 + $0xd0] sm:$0xff]  }
  0x27   :  { %v187_v39 = vmul.f32 %v507_v31, %v645_v1  ;;  %v253_v40 = vadd.f32 %v659_v7, %v182_v32  ;;  %v254_v41 = vadd.f32 %v659_v7, %v183_v33  ;;  %v188_v42 = vmul.f32 %v510_v34, %v645_v1  ;;  %v586_v33 = vld [vmem:[%s940_s0 + $0xd8] sm:$0xff]  }
  0x28   :  { %v189_v43 = vmul.f32 %v511_v35, %v645_v1  ;;  %v255_v44 = vadd.f32 %v659_v7, %v184_v36  ;;  %v256_v45 = vadd.f32 %v659_v7, %v185_v37  ;;  %v257_v46 = vadd.f32 %v659_v7, %v186_v38 }
  0x29   :  { %v258_v47 = vadd.f32 %v659_v7, %v187_v39  ;;  %v317_v49 = vmax.f32 %v253_v40, 0.0  ;;  %v318_v50 = vmax.f32 %v254_v41, 0.0  ;;  %v259_v51 = vadd.f32 %v659_v7, %v188_v42 }
  0x2a   :  { %v260_v52 = vadd.f32 %v659_v7, %v189_v43  ;;  %v319_v55 = vmax.f32 %v255_v44, 0.0  ;;  %v320_v56 = vmax.f32 %v256_v45, 0.0  ;;  %v321_v57 = vmax.f32 %v257_v46, 0.0 }
  0x2b   :  { %v322_v58 = vmax.f32 %v258_v47, 0.0  ;;  %382 = vst.msk [vmem:[#allocation2 + $0x100] sm:$0xff] %vm349_vm0, %v317_v49  ;;  %383 = vst.msk [vmem:[#allocation2 + $0x108] sm:$0xff] %vm349_vm0, %v318_v50  ;;  %v323_v60 = vmax.f32 %v259_v51, 0.0  ;;  %v515_v63 = vunpack.c.h.bf16 %v579_v48  ;;  %v518_v0 = vunpack.c.l.bf16 %v580_v53 }
  0x2c   :  { %v324_v61 = vmax.f32 %v260_v52, 0.0  ;;  %384 = vst.msk [vmem:[#allocation2 + $0x110] sm:$0xff] %vm349_vm0, %v319_v55  ;;  %385 = vst.msk [vmem:[#allocation2 + $0x118] sm:$0xff] %vm349_vm0, %v320_v56  ;;  %v519_v2 = vunpack.c.h.bf16 %v580_v53  ;;  %v522_v3 = vunpack.c.l.bf16 %v581_v54  ;;  %v523_v4 = vunpack.c.h.bf16 %v581_v54 }
  0x2d   :  { %386 = vst.msk [vmem:[#allocation2 + $0x120] sm:$0xff] %vm349_vm0, %v321_v57  ;;  %387 = vst.msk [vmem:[#allocation2 + $0x128] sm:$0xff] %vm349_vm0, %v322_v58  ;;  %v190_v5 = vmul.f32 %v514_v62, %v645_v1  ;;  %v191_v6 = vmul.f32 %v515_v63, %v645_v1  ;;  %v526_v8 = vunpack.c.l.bf16 %v582_v59  ;;  %v527_v9 = vunpack.c.h.bf16 %v582_v59  ;;  %v587_v58 = vld [vmem:[%s940_s0 + $0xe0] sm:$0xff]   ;;  %v588_v63 = vld [vmem:[%s940_s0 + $0xe8] sm:$0xff]  }
  0x2e   :  { %388 = vst.msk [vmem:[#allocation2 + $0x130] sm:$0xff] %vm349_vm0, %v323_v60  ;;  %389 = vst.msk [vmem:[#allocation2 + $0x138] sm:$0xff] %vm349_vm0, %v324_v61  ;;  %v192_v10 = vmul.f32 %v518_v0, %v645_v1  ;;  %v193_v11 = vmul.f32 %v519_v2, %v645_v1  ;;  %v194_v12 = vmul.f32 %v522_v3, %v645_v1  ;;  %v530_v36 = vunpack.c.l.bf16 %v583_v22  ;;  %v589_v0 = vld [vmem:[%s940_s0 + $0xf0] sm:$0xff]  }
  0x2f   :  { %v195_v13 = vmul.f32 %v523_v4, %v645_v1  ;;  %v261_v14 = vadd.f32 %v659_v7, %v190_v5  ;;  %v262_v15 = vadd.f32 %v659_v7, %v191_v6  ;;  %v196_v16 = vmul.f32 %v526_v8, %v645_v1  ;;  %v590_v6 = vld [vmem:[%s940_s0 + $0xf8] sm:$0xff]   ;;  %s616_s0 = smov [#allocation2]  }
  0x30   :  { %v197_v17 = vmul.f32 %v527_v9, %v645_v1  ;;  %v263_v18 = vadd.f32 %v659_v7, %v192_v10  ;;  %v264_v19 = vadd.f32 %v659_v7, %v193_v11  ;;  %v265_v20 = vadd.f32 %v659_v7, %v194_v12  ;;  %s419_s22 = sshll.u32 %s616_s0, 4  ;;  %s420_s22 = int_to_ptr.vmem [resolvable:$true] %s419_s22 }
  0x31   :  { %v266_v21 = vadd.f32 %v659_v7, %v195_v13  ;;  %v325_v23 = vmax.f32 %v261_v14, 0.0  ;;  %v326_v24 = vmax.f32 %v262_v15, 0.0  ;;  %v267_v25 = vadd.f32 %v659_v7, %v196_v16  ;;  %s594_s23 = scalar_lea.vmem %s420_s22, 8192  ;;  %p599_p1 = scmp.lt.s32.totalorder %s420_s22, %s420_s22 }
  0x32   :  { %v268_v26 = vadd.f32 %v659_v7, %v197_v17  ;;  %v327_v29 = vmax.f32 %v263_v18, 0.0  ;;  %v328_v30 = vmax.f32 %v264_v19, 0.0  ;;  %v329_v31 = vmax.f32 %v265_v20, 0.0  ;;  %p595_p0 = scmp.ne.s32.totalorder %s420_s22, %s594_s23  ;;  %p600_p2 = scmp.lt.s32.totalorder %s594_s23, %s594_s23 }
  0x33   :  { %v330_v32 = vmax.f32 %v266_v21, 0.0  ;;  %390 = vst.msk [vmem:[#allocation2 + $0x140] sm:$0xff] %vm349_vm0, %v325_v23  ;;  %391 = vst.msk [vmem:[#allocation2 + $0x148] sm:$0xff] %vm349_vm0, %v326_v24  ;;  %v331_v34 = vmax.f32 %v267_v25, 0.0  ;;  %v531_v37 = vunpack.c.h.bf16 %v583_v22  ;;  %v534_v38 = vunpack.c.l.bf16 %v584_v27 }
  0x34   :  { %v332_v35 = vmax.f32 %v268_v26, 0.0  ;;  %392 = vst.msk [vmem:[#allocation2 + $0x150] sm:$0xff] %vm349_vm0, %v327_v29  ;;  %393 = vst.msk [vmem:[#allocation2 + $0x158] sm:$0xff] %vm349_vm0, %v328_v30  ;;  %v535_v39 = vunpack.c.h.bf16 %v584_v27  ;;  %v538_v40 = vunpack.c.l.bf16 %v585_v28  ;;  %v539_v41 = vunpack.c.h.bf16 %v585_v28  ;;  %p601_p3 = por %p600_p2, %p599_p1 }
  0x35   :  { %394 = vst.msk [vmem:[#allocation2 + $0x160] sm:$0xff] %vm349_vm0, %v329_v31  ;;  %395 = vst.msk [vmem:[#allocation2 + $0x168] sm:$0xff] %vm349_vm0, %v330_v32  ;;  %v198_v42 = vmul.f32 %v530_v36, %v645_v1  ;;  %v199_v43 = vmul.f32 %v531_v37, %v645_v1  ;;  %v542_v44 = vunpack.c.l.bf16 %v586_v33  ;;  %v543_v45 = vunpack.c.h.bf16 %v586_v33 }
  0x36   :  { %396 = vst.msk [vmem:[#allocation2 + $0x170] sm:$0xff] %vm349_vm0, %v331_v34  ;;  %397 = vst.msk [vmem:[#allocation2 + $0x178] sm:$0xff] %vm349_vm0, %v332_v35  ;;  %v200_v46 = vmul.f32 %v534_v38, %v645_v1  ;;  %v201_v47 = vmul.f32 %v535_v39, %v645_v1  ;;  %v202_v48 = vmul.f32 %v538_v40, %v645_v1  ;;  %v546_v10 = vunpack.c.l.bf16 %v587_v58  ;;  %p602_p4 = pnand %p601_p3, %p595_p0 }
  0x37   :  { %v203_v49 = vmul.f32 %v539_v41, %v645_v1  ;;  %v269_v50 = vadd.f32 %v659_v7, %v198_v42  ;;  %v270_v51 = vadd.f32 %v659_v7, %v199_v43  ;;  %v204_v52 = vmul.f32 %v542_v44, %v645_v1 }
  0x38   :  { %v205_v53 = vmul.f32 %v543_v45, %v645_v1  ;;  %v271_v54 = vadd.f32 %v659_v7, %v200_v46  ;;  %v272_v55 = vadd.f32 %v659_v7, %v201_v47  ;;  %v273_v56 = vadd.f32 %v659_v7, %v202_v48 }
  0x39   :  { %v274_v57 = vadd.f32 %v659_v7, %v203_v49  ;;  %v333_v59 = vmax.f32 %v269_v50, 0.0  ;;  %v334_v60 = vmax.f32 %v270_v51, 0.0  ;;  %v275_v61 = vadd.f32 %v659_v7, %v204_v52 }
  0x3a   :  { %v276_v62 = vadd.f32 %v659_v7, %v205_v53  ;;  %v335_v2 = vmax.f32 %v271_v54, 0.0  ;;  %v336_v3 = vmax.f32 %v272_v55, 0.0  ;;  %v337_v4 = vmax.f32 %v273_v56, 0.0 }
  0x3b   :  { %v338_v5 = vmax.f32 %v274_v57, 0.0  ;;  %398 = vst.msk [vmem:[#allocation2 + $0x180] sm:$0xff] %vm349_vm0, %v333_v59  ;;  %399 = vst.msk [vmem:[#allocation2 + $0x188] sm:$0xff] %vm349_vm0, %v334_v60  ;;  %v339_v8 = vmax.f32 %v275_v61, 0.0  ;;  %v547_v11 = vunpack.c.h.bf16 %v587_v58  ;;  %v550_v12 = vunpack.c.l.bf16 %v588_v63 }
  0x3c   :  { %v340_v9 = vmax.f32 %v276_v62, 0.0  ;;  %400 = vst.msk [vmem:[#allocation2 + $0x190] sm:$0xff] %vm349_vm0, %v335_v2  ;;  %401 = vst.msk [vmem:[#allocation2 + $0x198] sm:$0xff] %vm349_vm0, %v336_v3  ;;  %v551_v13 = vunpack.c.h.bf16 %v588_v63  ;;  %v554_v14 = vunpack.c.l.bf16 %v589_v0  ;;  %v555_v15 = vunpack.c.h.bf16 %v589_v0 }
  0x3d   :  { %402 = vst.msk [vmem:[#allocation2 + $0x1a0] sm:$0xff] %vm349_vm0, %v337_v4  ;;  %403 = vst.msk [vmem:[#allocation2 + $0x1a8] sm:$0xff] %vm349_vm0, %v338_v5  ;;  %v206_v16 = vmul.f32 %v546_v10, %v645_v1  ;;  %v207_v17 = vmul.f32 %v547_v11, %v645_v1  ;;  %v558_v18 = vunpack.c.l.bf16 %v590_v6  ;;  %v559_v19 = vunpack.c.h.bf16 %v590_v6 }
  0x3e   :  { %404 = vst.msk [vmem:[#allocation2 + $0x1b0] sm:$0xff] %vm349_vm0, %v339_v8  ;;  %405 = vst.msk [vmem:[#allocation2 + $0x1b8] sm:$0xff] %vm349_vm0, %v340_v9  ;;  %v208_v20 = vmul.f32 %v550_v12, %v645_v1  ;;  %v209_v21 = vmul.f32 %v551_v13, %v645_v1  ;;  %v210_v22 = vmul.f32 %v554_v14, %v645_v1 }
  0x3f   :  { %v211_v23 = vmul.f32 %v555_v15, %v645_v1  ;;  %v277_v24 = vadd.f32 %v659_v7, %v206_v16  ;;  %v278_v25 = vadd.f32 %v659_v7, %v207_v17  ;;  %v212_v26 = vmul.f32 %v558_v18, %v645_v1 }
  0x40   :  { %v213_v27 = vmul.f32 %v559_v19, %v645_v1  ;;  %v279_v28 = vadd.f32 %v659_v7, %v208_v20  ;;  %v280_v29 = vadd.f32 %v659_v7, %v209_v21  ;;  %v281_v30 = vadd.f32 %v659_v7, %v210_v22 }
  0x41   :  { %v282_v31 = vadd.f32 %v659_v7, %v211_v23  ;;  %v341_v32 = vmax.f32 %v277_v24, 0.0  ;;  %v342_v33 = vmax.f32 %v278_v25, 0.0  ;;  %v283_v34 = vadd.f32 %v659_v7, %v212_v26 }
  0x42   :  { %v284_v35 = vadd.f32 %v659_v7, %v213_v27  ;;  %v343_v36 = vmax.f32 %v279_v28, 0.0  ;;  %v344_v37 = vmax.f32 %v280_v29, 0.0  ;;  %v345_v38 = vmax.f32 %v281_v30, 0.0 }
  0x43   :  { %v346_v1 = vmax.f32 %v282_v31, 0.0  ;;  %406 = vst.msk [vmem:[#allocation2 + $0x1c0] sm:$0xff] %vm349_vm0, %v341_v32  ;;  %407 = vst.msk [vmem:[#allocation2 + $0x1c8] sm:$0xff] %vm349_vm0, %v342_v33  ;;  %v347_v39 = vmax.f32 %v283_v34, 0.0 }
  0x44   :  { %v348_v40 = vmax.f32 %v284_v35, 0.0  ;;  %408 = vst.msk [vmem:[#allocation2 + $0x1d0] sm:$0xff] %vm349_vm0, %v343_v36  ;;  %409 = vst.msk [vmem:[#allocation2 + $0x1d8] sm:$0xff] %vm349_vm0, %v344_v37 }
  0x45   :  { %410 = vst.msk [vmem:[#allocation2 + $0x1e0] sm:$0xff] %vm349_vm0, %v345_v38  ;;  %411 = vst.msk [vmem:[#allocation2 + $0x1e8] sm:$0xff] %vm349_vm0, %v346_v1 }
  0x46   :  { %412 = vst.msk [vmem:[#allocation2 + $0x1f0] sm:$0xff] %vm349_vm0, %v347_v39  ;;  %413 = vst.msk [vmem:[#allocation2 + $0x1f8] sm:$0xff] %vm349_vm0, %v348_v40 }
  0x47   :  { %605 = shalt.err (!%p602_p4)
}
  0x48   :  { %s617_s1 = smov 128   ;;  %s618_s2 = smov 8  }
  0x49   :  { %425 = dma.vmem_to_hbm [thread:$0]  %s420_s22, 8192, %s943_s3, [#allocation3], %s617_s1, %s617_s1, %s618_s2  }
  0x4a   :  { %614 = dma.done.wait [#allocation3], 8192  }
  0x4b   :  { %615 = vsyncadd [#allocation3], 4294959104 }
  0x4c   :  { %429 = vsyncpa [#allocation3], 1 }

// kernel: upconv_forward.5
= control target key start
LH: loop header
LB: loop body
LE: loop exit
PB: predicated region body
PF: predicated region fallthrough
CT: control target
= control target key end

     0   :  { %s6959_s15 = smov 0   ;;  %s9787_s0 = inlined_call_operand.vmem [shape: bf16[2,18,18,128], index: 0, kind: input, shape index: {}]   ;;  %s9788_s1 = inlined_call_operand.vmem [shape: bf16[9,128,64], index: 1, kind: input, shape index: {}]   ;;  %s9789_s2 = inlined_call_operand.vmem [shape: bf16[2,256,64], index: 2, kind: output, shape index: {0}]   ;;  %s9790_s3 = inlined_call_operand.vmem [shape: f32[2,1,64], index: 3, kind: output, shape index: {1}]   ;;  %s9791_s4 = inlined_call_operand.vmem [shape: f32[2,1,64], index: 4, kind: output, shape index: {2}]  }
   0x1 LB: > { %s5465_s16 = sadd.s32 4294967295, %s6932_s15   ;;  %p5469_p0 = scmp.ge.s32.totalorder %s6932_s15, 1  ;;  %s6932_s15 = sphi %s6959_s15, %s15_s15  }
   0x2   : > { %p167_p1 = scmp.lt.s32.totalorder %s6932_s15, 3 }
   0x4   : > { %p168_p2 = pnand %p5469_p0, %p167_p1 }
   0x6   : > { %171 = sbr.rel (%p168_p2) target bundleno = 574 (0x23e), region = 28 }
   0xb   : > { %v6797_v0 = vld [vmem:[%s9788_s1 + $0x78] sm:$0xff]   ;;  %p199_p3 = scmp.lt.s32.totalorder %s5465_s16, 1  ;;  %v6798_v1 = vld [vmem:[%s9788_s1 + $0x70] sm:$0xff]   ;;  %v6799_v2 = vld [vmem:[%s9788_s1 + $0x68] sm:$0xff]   ;;  %vm280_vm0 = vsmask.f32 3328 }
   0xc   : > { %6340 = vmatprep.subr.bf16.mxu0 %v6797_v0  ;;  %6772 = vmatprep.subr.bf16.mxu1 %v6797_v0  ;;  %v6800_v3 = vld [vmem:[%s9788_s1 + $0x60] sm:$0xff]   ;;  %vm281_vm1 = vsmask.f32 7440  ;;  %v6801_v17 = vld [vmem:[%s9788_s1 + $0x58] sm:$0xff]   ;;  %v6802_v33 = vld [vmem:[%s9788_s1 + $0x50] sm:$0xff]   ;;  %vm1310_vm3 = vcmask 1042432  }
   0xd   : > { %s10024_s16 = smov (!%p199_p3, %s5465_s16), 1  ;;  %6341 = vmatpush3.bf16.msra.mxu0 %v6797_v0  ;;  %6780 = vmatpush3.bf16.msra.mxu1 %v6797_v0  ;;  %vm7013_vm2 = vmor %vm280_vm0, %vm281_vm1  ;;  %v6803_v58 = vld [vmem:[%s9788_s1 + $0x48] sm:$0xff]   ;;  %vm1311_vm4 = vcmask 1046532   ;;  %vm5153_vm6 = vcmask 519168   ;;  %vm5186_vm7 = vcmask 523264   ;;  %vm5256_vm8 = vcmask 516096  }
   0xe   : > { %6342 = vmatprep.subr.bf16.mxu0 %v6798_v1  ;;  %6773 = vmatprep.subr.bf16.mxu1 %v6798_v1  ;;  %s6788_s23 = smul.u32 216, %s10024_s16  ;;  %vm7324_vm5 = vmor %vm1310_vm3, %vm1311_vm4  ;;  %s211_s6 = scalar_lea.vmem %s9790_s3, %s10024_s16 }
   0xf   : > { %s214_s9 = scalar_lea.vmem %s9791_s4, %s10024_s16 }
  0x10   : > { %s6982_s26 = scalar_lea.vmem %s9787_s0, %s6788_s23 }
  0x11   : > { %6343 = vmatpush3.bf16.msra.mxu0 %v6798_v1  ;;  %6781 = vmatpush3.bf16.msra.mxu1 %v6798_v1  ;;  %v6988_v4 = vld [vmem:[%s6982_s26] sm:$0xf]  ;;  %v6991_v5 = vld [vmem:[%s6982_s26 + $0x4] sm:$0xf]  ;;  %v6994_v6 = vld [vmem:[%s6982_s26 + $0x8] sm:$0x1] }
  0x12   : > { %6344 = vmatprep.subr.bf16.mxu0 %v6799_v2  ;;  %6774 = vmatprep.subr.bf16.mxu1 %v6799_v2  ;;  %v284_v7 = vshrl.u32 %v6988_v4, 16  ;;  %v287_v8 = vshll.u32 %v6988_v4, 16  ;;  %v293_v9 = vshll.u32 %v6991_v5, 16  ;;  %v297_v10 = vshrl.u32 %v6991_v5, 16  ;;  %v232_v12 = vld [vmem:[%s6982_s26 + $0x60] sm:$0xf] }
  0x13   : > { %v303_v11 = vshll.u32 %v6994_v6, 16  ;;  %v233_v15 = vld [vmem:[%s6982_s26 + $0x64] sm:$0xf]  ;;  %v272_v16 = vld [vmem:[%s6982_s26 + $0x68] sm:$0x1]  ;;  %v476_v21 = vshrl.u32 %v232_v12, 16 }
  0x14   : > { %v286_v13 = vrot.slane %v284_v7, 4  ;;  %v289_v14 = vrot.slane %v287_v8, 5  ;;  %v295_v18 = vrot.slane %v293_v9, 5  ;;  %v299_v19 = vrot.slane %v297_v10, 4  ;;  %v7009_v26 = vld [vmem:[%s6982_s26 + $0xc] sm:$0xf] }
  0x15   : > { %6345 = vmatpush3.bf16.msra.mxu0 %v6799_v2  ;;  %6782 = vmatpush3.bf16.msra.mxu1 %v6799_v2  ;;  %v479_v23 = vshll.u32 %v232_v12, 16  ;;  %v485_v24 = vshll.u32 %v233_v15, 16  ;;  %v489_v25 = vshrl.u32 %v233_v15, 16  ;;  %v305_v29 = vrot.slane %v303_v11, 5  ;;  %v7018_v32 = vld [vmem:[%s6982_s26 + $0x10] sm:$0xf] }
  0x16   : > { %6346 = vmatprep.subr.bf16.mxu0 %v6800_v3  ;;  %6775 = vmatprep.subr.bf16.mxu1 %v6800_v3  ;;  %v290_v22 = vor.u32 %v289_v14, %v286_v13  ;;  %v300_v28 = vor.u32 %v299_v19, %v295_v18  ;;  %v478_v30 = vrot.slane %v476_v21, 4  ;;  %v495_v31 = vshll.u32 %v272_v16, 16  ;;  %v7024_v40 = vld [vmem:[%s6982_s26 + $0x14] sm:$0x1]  ;;  %v234_v47 = vld [vmem:[%s6982_s26 + $0x6c] sm:$0xf] }
  0x17   : > { %v481_v35 = vrot.slane %v479_v23, 5  ;;  %v487_v36 = vrot.slane %v485_v24, 5  ;;  %v491_v37 = vrot.slane %v489_v25, 4  ;;  %v308_v41 = vshrl.u32 %v7009_v26, 16  ;;  %v235_v52 = vld [vmem:[%s6982_s26 + $0x70] sm:$0xf] }
  0x18   : > { %v291_v34 = vrot.slane %v290_v22, 4  ;;  %v301_v38 = vrot.slane %v300_v28, 4  ;;  %v497_v39 = vrot.slane %v495_v31, 5  ;;  %v311_v42 = vshll.u32 %v7009_v26, 16  ;;  %v273_v57 = vld [vmem:[%s6982_s26 + $0x74] sm:$0x1] }
  0x19   : > { %6347 = vmatpush3.bf16.msra.mxu0 %v6800_v3  ;;  %6783 = vmatpush3.bf16.msra.mxu1 %v6800_v3  ;;  %v482_v44 = vor.u32 %v481_v35, %v478_v30  ;;  %v492_v45 = vor.u32 %v491_v37, %v487_v36  ;;  %v317_v46 = vshll.u32 %v7018_v32, 16  ;;  %v310_v49 = vrot.slane %v308_v41, 4  ;;  %v7047_v14 = vld [vmem:[%s6982_s26 + $0x18] sm:$0xf]  ;;  %v6804_v15 = vld [vmem:[%s9788_s1 + $0x40] sm:$0xff]  }
  0x1a   : > { %6348 = vmatprep.subr.bf16.mxu0 %v6801_v17  ;;  %6776 = vmatprep.subr.bf16.mxu1 %v6801_v17  ;;  %v296_v43 = vsel %vm7013_vm2, %v291_v34, %v295_v18  ;;  %v306_v48 = vsel %vm7013_vm2, %v301_v38, %v305_v29  ;;  %v313_v50 = vrot.slane %v311_v42, 5  ;;  %v321_v51 = vshrl.u32 %v7018_v32, 16  ;;  %v7055_v19 = vld [vmem:[%s6982_s26 + $0x1c] sm:$0xf]  ;;  %v7060_v25 = vld [vmem:[%s6982_s26 + $0x20] sm:$0x1] }
  0x1b   : > { %v5489_v53 = vcombine.low %v296_v43, %v306_v48  ;;  %v483_v54 = vrot.slane %v482_v44, 4  ;;  %v493_v55 = vrot.slane %v492_v45, 4  ;;  %v319_v56 = vrot.slane %v317_v46, 5  ;;  %v236_v34 = vld [vmem:[%s6982_s26 + $0x78] sm:$0xf] }
  0x1c   : > { %v314_v59 = vor.u32 %v313_v50, %v310_v49  ;;  %v323_v60 = vrot.slane %v321_v51, 4  ;;  %v327_v61 = vshll.u32 %v7024_v40, 16  ;;  %v500_v1 = vshrl.u32 %v234_v47, 16  ;;  %v6805_v41 = vld [vmem:[%s9788_s1 + $0x38] sm:$0xff]   ;;  %v274_v49 = vld [vmem:[%s6982_s26 + $0x80] sm:$0x1] }
  0x1d   : > { %6349 = vmatpush3.bf16.msra.mxu0 %v6801_v17  ;;  %6784 = vmatpush3.bf16.msra.mxu1 %v6801_v17  ;;  %v488_v63 = vsel %vm7013_vm2, %v483_v54, %v487_v36  ;;  %v498_v0 = vsel %vm7013_vm2, %v493_v55, %v497_v39  ;;  %v503_v2 = vshll.u32 %v234_v47, 16  ;;  %v509_v12 = vshll.u32 %v235_v52, 16  ;;  %v7069_v39 = vld [vmem:[%s6982_s26 + $0x7c] sm:$0xf] }
  0x1e   : > { %6350 = vmatprep.subr.bf16.mxu0 %v6802_v33  ;;  %6777 = vmatprep.subr.bf16.mxu1 %v6802_v33  ;;  %v5497_v3 = vcombine.low %v488_v63, %v498_v0  ;;  %v315_v7 = vrot.slane %v314_v59, 4  ;;  %v324_v8 = vor.u32 %v323_v60, %v319_v56  ;;  %v329_v9 = vrot.slane %v327_v61, 5  ;;  %v6806_v42 = vld [vmem:[%s9788_s1 + $0xb8] sm:$0xff]   ;;  %v6808_v59 = vld [vmem:[%s9788_s1 + $0xb0] sm:$0xff]   ;;  %v7096_v0 = vld [vmem:[%s6982_s26 + $0x28] sm:$0xf] }
  0x1f   : > { %6356 = vmatprep.mubr.bf16.mxu0 %v5489_v53  ;;  %v502_v10 = vrot.slane %v500_v1, 4  ;;  %v505_v11 = vrot.slane %v503_v2, 5  ;;  %v513_v13 = vshrl.u32 %v235_v52, 16  ;;  %v519_v18 = vshll.u32 %v273_v57, 16  ;;  %v6807_v52 = vld [vmem:[%s9788_s1 + $0x30] sm:$0xff]  }
  0x20   : > { %v320_v16 = vsel %vm7013_vm2, %v315_v7, %v319_v56  ;;  %v325_v17 = vrot.slane %v324_v8, 4  ;;  %6372 = vmatprep.mubr.bf16.mxu1 %v5497_v3  ;;  %v511_v23 = vrot.slane %v509_v12, 5  ;;  %v332_v28 = vshrl.u32 %v7047_v14, 16  ;;  %v7087_v57 = vld [vmem:[%s6982_s26 + $0x24] sm:$0xf] }
  0x21   : > { %6351 = vmatpush3.bf16.msra.mxu0 %v6802_v33  ;;  %6785 = vmatpush3.bf16.msra.mxu1 %v6802_v33  ;;  %v506_v22 = vor.u32 %v505_v11, %v502_v10  ;;  %v515_v24 = vrot.slane %v513_v13, 4  ;;  %v521_v30 = vrot.slane %v519_v18, 5  ;;  %v335_v31 = vshll.u32 %v7047_v14, 16  ;;  %v7099_v8 = vld [vmem:[%s6982_s26 + $0x2c] sm:$0x1] }
  0x22   : > { %6352 = vmatprep.subr.bf16.mxu0 %v6803_v58  ;;  %6778 = vmatprep.subr.bf16.mxu1 %v6803_v58  ;;  %v330_v29 = vsel %vm7013_vm2, %v325_v17, %v329_v9  ;;  %v341_v33 = vshll.u32 %v7055_v19, 16  ;;  %v334_v38 = vrot.slane %v332_v28, 4  ;;  %v345_v45 = vshrl.u32 %v7055_v19, 16  ;;  %v7103_v13 = vld [vmem:[%s6982_s26 + $0x84] sm:$0xf] }
  0x23   : > { %v5490_v35 = vcombine.low %v320_v16, %v330_v29  ;;  %v507_v36 = vrot.slane %v506_v22, 4  ;;  %v516_v37 = vor.u32 %v515_v24, %v511_v23  ;;  %v337_v43 = vrot.slane %v335_v31, 5  ;;  %v7110_v22 = vld [vmem:[%s6982_s26 + $0x88] sm:$0xf] }
  0x24   : > { %v343_v44 = vrot.slane %v341_v33, 5  ;;  %v351_v46 = vshll.u32 %v7060_v25, 16  ;;  %v524_v50 = vshrl.u32 %v236_v34, 16  ;;  %v527_v51 = vshll.u32 %v236_v34, 16 }
  0x25   : > { %6353 = vmatpush3.bf16.msra.mxu0 %v6803_v58  ;;  %6786 = vmatpush3.bf16.msra.mxu1 %v6803_v58  ;;  %v512_v47 = vsel %vm7013_vm2, %v507_v36, %v511_v23  ;;  %v517_v48 = vrot.slane %v516_v37, 4  ;;  %v338_v53 = vor.u32 %v337_v43, %v334_v38  ;;  %v347_v54 = vrot.slane %v345_v45, 4  ;;  %v7119_v36 = vld [vmem:[%s6982_s26 + $0x8c] sm:$0x1] }
  0x26   : > { %6354 = vmatprep.subr.bf16.mxu0 %v6804_v15  ;;  %6779 = vmatprep.subr.bf16.mxu1 %v6804_v15  ;;  %v353_v55 = vrot.slane %v351_v46, 5  ;;  %v533_v56 = vshll.u32 %v7069_v39, 16  ;;  %v526_v60 = vrot.slane %v524_v50, 4  ;;  %v529_v61 = vrot.slane %v527_v51, 5  ;;  %v6810_v37 = vld [vmem:[%s9788_s1 + $0xa8] sm:$0xff]  }
  0x27   : > { %v522_v58 = vsel %vm7013_vm2, %v517_v48, %v521_v30  ;;  %v537_v63 = vshrl.u32 %v7069_v39, 16  ;;  %v339_v2 = vrot.slane %v338_v53, 4  ;;  %v348_v3 = vor.u32 %v347_v54, %v343_v44  ;;  %v6809_v30 = vld [vmem:[%s9788_s1 + $0x28] sm:$0xff]   ;;  %v7134_v53 = vld [vmem:[%s6982_s26 + $0x30] sm:$0xf] }
  0x28   : > { %v5498_v1 = vcombine.low %v512_v47, %v522_v58  ;;  %v535_v7 = vrot.slane %v533_v56, 5  ;;  %v530_v9 = vor.u32 %v529_v61, %v526_v60  ;;  %v543_v11 = vshll.u32 %v274_v49, 16  ;;  %v7143_v60 = vld [vmem:[%s6982_s26 + $0x34] sm:$0xf] }
  0x29   : > { %6355 = vmatpush3.bf16.msra.mxu0 %v6804_v15  ;;  %6787 = vmatpush3.bf16.msra.mxu1 %v6804_v15  ;;  %v539_v10 = vrot.slane %v537_v63, 4  ;;  %v356_v12 = vshrl.u32 %v7087_v57, 16  ;;  %v344_v15 = vsel %vm7013_vm2, %v339_v2, %v343_v44  ;;  %v349_v16 = vrot.slane %v348_v3, 4 }
  0x2a   : > { %6388 = vmatprep.subr.bf16.mxu1 %v6805_v41  ;;  %6436 = vmatprep.subr.bf16.mxu0 %v6806_v42  ;;  %v359_v17 = vshll.u32 %v7087_v57, 16  ;;  %v365_v18 = vshll.u32 %v7096_v0, 16  ;;  %v531_v23 = vrot.slane %v530_v9, 4  ;;  %v545_v28 = vrot.slane %v543_v11, 5 }
  0x2b   : > { %v540_v24 = vor.u32 %v539_v10, %v535_v7  ;;  %v358_v29 = vrot.slane %v356_v12, 4  ;;  %v354_v31 = vsel %vm7013_vm2, %v349_v16, %v353_v55  ;;  %v375_v43 = vshll.u32 %v7099_v8, 16  ;;  %v7151_v16 = vld [vmem:[%s6982_s26 + $0x38] sm:$0x1] }
  0x2c   : > { %6357 = vmatmul.mubr.bf16.vlgmr.msra.gmra.mxu0 %v5490_v35  ;;  %6373 = vmatmul.mubr.bf16.vlgmr.msra.gmra.mxu1 %v5498_v1  ;;  %v361_v33 = vrot.slane %v359_v17, 5  ;;  %v367_v34 = vrot.slane %v365_v18, 5  ;;  %v369_v35 = vshrl.u32 %v7096_v0, 16  ;;  %v5491_v38 = vcombine.low %v344_v15, %v354_v31  ;;  %v7155_v18 = vld [vmem:[%s6982_s26 + $0x90] sm:$0xf] }
  0x2d   : > { %6389 = vmatpush3.bf16.msra.mxu1 %v6805_v41  ;;  %6437 = vmatpush3.bf16.msra.mxu0 %v6806_v42  ;;  %v536_v41 = vsel %vm7013_vm2, %v531_v23, %v535_v7  ;;  %v541_v42 = vrot.slane %v540_v24, 4  ;;  %v548_v46 = vshrl.u32 %v7103_v13, 16  ;;  %v551_v47 = vshll.u32 %v7103_v13, 16  ;;  %v7161_v31 = vld [vmem:[%s6982_s26 + $0x94] sm:$0xf] }
  0x2e   : > { %6390 = vmatprep.subr.bf16.mxu1 %v6807_v52  ;;  %6438 = vmatprep.subr.bf16.mxu0 %v6808_v59  ;;  %v362_v44 = vor.u32 %v361_v33, %v358_v29  ;;  %v371_v45 = vrot.slane %v369_v35, 4  ;;  %v377_v49 = vrot.slane %v375_v43, 5  ;;  %v557_v50 = vshll.u32 %v7110_v22, 16 }
  0x2f   : > { %v546_v48 = vsel %vm7013_vm2, %v541_v42, %v545_v28  ;;  %v561_v51 = vshrl.u32 %v7110_v22, 16  ;;  %6360 = vmatprep.mubr.bf16.mxu0 %v5491_v38  ;;  %v550_v58 = vrot.slane %v548_v46, 4  ;;  %v553_v61 = vrot.slane %v551_v47, 5  ;;  %v6814_v38 = vld [vmem:[%s9788_s1 + $0x98] sm:$0xff]   ;;  %v6815_v46 = vld [vmem:[%s9788_s1 + $0x10] sm:$0xff]  }
  0x30   : > { %v5499_v54 = vcombine.low %v536_v41, %v546_v48  ;;  %v363_v55 = vrot.slane %v362_v44, 4  ;;  %v372_v56 = vor.u32 %v371_v45, %v367_v34  ;;  %v559_v63 = vrot.slane %v557_v50, 5  ;;  %v7171_v44 = vld [vmem:[%s6982_s26 + $0x98] sm:$0x1] }
  0x31   : > { %6391 = vmatpush3.bf16.msra.mxu1 %v6807_v52  ;;  %6439 = vmatpush3.bf16.msra.mxu0 %v6808_v59  ;;  %v6811_v52 = vld [vmem:[%s9788_s1 + $0x20] sm:$0xff]   ;;  %v563_v1 = vrot.slane %v561_v51, 4  ;;  %v567_v2 = vshll.u32 %v7119_v36, 16  ;;  %v380_v9 = vshrl.u32 %v7134_v53, 16  ;;  %v383_v10 = vshll.u32 %v7134_v53, 16 }
  0x32   : > { %6392 = vmatprep.subr.bf16.mxu1 %v6809_v30  ;;  %v6812_v59 = vld [vmem:[%s9788_s1 + $0xa0] sm:$0xff]   ;;  %6440 = vmatprep.subr.bf16.mxu0 %v6810_v37  ;;  %v368_v3 = vsel %vm7013_vm2, %v363_v55, %v367_v34  ;;  %v373_v7 = vrot.slane %v372_v56, 4  ;;  %v554_v11 = vor.u32 %v553_v61, %v550_v58  ;;  %v389_v17 = vshll.u32 %v7143_v60, 16  ;;  %v7184_v51 = vld [vmem:[%s6982_s26 + $0x3c] sm:$0xf]  ;;  %v6816_v55 = vld [vmem:[%s9788_s1 + $0x90] sm:$0xff]  }
  0x33   : > { %6376 = vmatprep.mubr.bf16.mxu1 %v5499_v54  ;;  %v564_v12 = vor.u32 %v563_v1, %v559_v63  ;;  %v569_v15 = vrot.slane %v567_v2, 5  ;;  %v382_v24 = vrot.slane %v380_v9, 4  ;;  %v385_v28 = vrot.slane %v383_v10, 5  ;;  %v7187_v54 = vld [vmem:[%s6982_s26 + $0x40] sm:$0xf] }
  0x34   : > { %v378_v23 = vsel %vm7013_vm2, %v373_v7, %v377_v49  ;;  %v393_v29 = vshrl.u32 %v7143_v60, 16  ;;  %v555_v34 = vrot.slane %v554_v11, 4  ;;  %v399_v43 = vshll.u32 %v7151_v16, 16  ;;  %v7194_v7 = vld [vmem:[%s6982_s26 + $0x44] sm:$0x1] }
  0x35   : > { %6393 = vmatpush3.bf16.msra.mxu1 %v6809_v30  ;;  %6441 = vmatpush3.bf16.msra.mxu0 %v6810_v37  ;;  %v6813_v30 = vld [vmem:[%s9788_s1 + $0x18] sm:$0xff]   ;;  %v5492_v33 = vcombine.low %v368_v3, %v378_v23  ;;  %v565_v35 = vrot.slane %v564_v12, 4  ;;  %v391_v37 = vrot.slane %v389_v17, 5  ;;  %v386_v41 = vor.u32 %v385_v28, %v382_v24  ;;  %v7206_v28 = vld [vmem:[%s6982_s26 + $0xa0] sm:$0xf] }
  0x36   : > { %6394 = vmatprep.subr.bf16.mxu1 %v6811_v52  ;;  %6442 = vmatprep.subr.bf16.mxu0 %v6812_v59  ;;  %v395_v42 = vrot.slane %v393_v29, 4  ;;  %v572_v45 = vshrl.u32 %v7155_v18, 16  ;;  %v560_v47 = vsel %vm7013_vm2, %v555_v34, %v559_v63  ;;  %v575_v49 = vshll.u32 %v7155_v18, 16  ;;  %v7197_v9 = vld [vmem:[%s6982_s26 + $0x9c] sm:$0xf]  ;;  %v6817_v29 = vld [vmem:[%s9788_s1 + $0x8] sm:$0xff]  }
  0x37   : > { %6361 = vmatmul.mubr.bf16.gmra.mxu0 %v5492_v33  ;;  %v570_v48 = vsel %vm7013_vm2, %v565_v35, %v569_v15  ;;  %v581_v50 = vshll.u32 %v7161_v31, 16  ;;  %v387_v58 = vrot.slane %v386_v41, 4  ;;  %v401_v63 = vrot.slane %v399_v43, 5  ;;  %v6818_v41 = vld [vmem:[%s9788_s1 + $0x88] sm:$0xff]  }
  0x38   : > { %v5500_v56 = vcombine.low %v560_v47, %v570_v48  ;;  %v396_v61 = vor.u32 %v395_v42, %v391_v37  ;;  %v577_v1 = vrot.slane %v575_v49, 5  ;;  %v585_v3 = vshrl.u32 %v7161_v31, 16 }
  0x39   : > { %6395 = vmatpush3.bf16.msra.mxu1 %v6811_v52  ;;  %6443 = vmatpush3.bf16.msra.mxu0 %v6812_v59  ;;  %v574_v52 = vrot.slane %v572_v45, 4  ;;  %v583_v2 = vrot.slane %v581_v50, 5  ;;  %v392_v10 = vsel %vm7013_vm2, %v387_v58, %v391_v37  ;;  %v591_v11 = vshll.u32 %v7171_v44, 16 }
  0x3a   : > { %6396 = vmatprep.subr.bf16.mxu1 %v6813_v30  ;;  %6444 = vmatprep.subr.bf16.mxu0 %v6814_v38  ;;  %v397_v59 = vrot.slane %v396_v61, 4  ;;  %v404_v12 = vshrl.u32 %v7184_v51, 16  ;;  %v587_v17 = vrot.slane %v585_v3, 4  ;;  %v407_v23 = vshll.u32 %v7184_v51, 16  ;;  %v7222_v61 = vld [vmem:[%s6982_s26 + $0xa4] sm:$0x1] }
  0x3b   : > { %6377 = vmatmul.mubr.bf16.gmra.mxu1 %v5500_v56  ;;  %v578_v15 = vor.u32 %v577_v1, %v574_v52  ;;  %v413_v24 = vshll.u32 %v7187_v54, 16  ;;  %v593_v34 = vrot.slane %v591_v11, 5  ;;  %v417_v37 = vshrl.u32 %v7187_v54, 16 }
  0x3c   : > { %v402_v33 = vsel %vm7013_vm2, %v397_v59, %v401_v63  ;;  %v406_v35 = vrot.slane %v404_v12, 4  ;;  %v588_v43 = vor.u32 %v587_v17, %v583_v2  ;;  %v409_v45 = vrot.slane %v407_v23, 5  ;;  %v7227_v59 = vld [vmem:[%s6982_s26 + $0x48] sm:$0xf]  ;;  %v7236_v17 = vld [vmem:[%s6982_s26 + $0x4c] sm:$0xf] }
  0x3d   : > { %6397 = vmatpush3.bf16.msra.mxu1 %v6813_v30  ;;  %6445 = vmatpush3.bf16.msra.mxu0 %v6814_v38  ;;  %v5493_v42 = vcombine.low %v392_v10, %v402_v33  ;;  %v579_v30 = vrot.slane %v578_v15, 4  ;;  %v415_v47 = vrot.slane %v413_v24, 5  ;;  %v419_v48 = vrot.slane %v417_v37, 4 }
  0x3e   : > { %6398 = vmatprep.subr.bf16.mxu1 %v6815_v46  ;;  %6446 = vmatprep.subr.bf16.mxu0 %v6816_v55  ;;  %v423_v49 = vshll.u32 %v7194_v7, 16  ;;  %v596_v50 = vshrl.u32 %v7197_v9, 16  ;;  %v589_v56 = vrot.slane %v588_v43, 4  ;;  %v410_v58 = vor.u32 %v409_v45, %v406_v35 }
  0x3f   : > { %6364 = vmatprep.mubr.bf16.mxu0 %v5493_v42  ;;  %v584_v38 = vsel %vm7013_vm2, %v579_v30, %v583_v2  ;;  %v599_v63 = vshll.u32 %v7197_v9, 16  ;;  %v420_v52 = vor.u32 %v419_v48, %v415_v47  ;;  %v605_v10 = vshll.u32 %v7206_v28, 16  ;;  %v6819_v2 = vld [vmem:[%s9788_s1] sm:$0xff]   ;;  %v7245_v30 = vld [vmem:[%s6982_s26 + $0x50] sm:$0x1] }
  0x40   : > { %v425_v1 = vrot.slane %v423_v49, 5  ;;  %v598_v3 = vrot.slane %v596_v50, 4  ;;  %v594_v11 = vsel %vm7013_vm2, %v589_v56, %v593_v34  ;;  %v411_v12 = vrot.slane %v410_v58, 4 }
  0x41   : > { %6399 = vmatpush3.bf16.msra.mxu1 %v6815_v46  ;;  %6447 = vmatpush3.bf16.msra.mxu0 %v6816_v55  ;;  %v601_v15 = vrot.slane %v599_v63, 5  ;;  %v609_v46 = vshrl.u32 %v7206_v28, 16  ;;  %v6820_v55 = vld [vmem:[%s9788_s1 + $0x80] sm:$0xff]   ;;  %v5501_v23 = vcombine.low %v584_v38, %v594_v11  ;;  %v421_v24 = vrot.slane %v420_v52, 4  ;;  %v7253_v38 = vld [vmem:[%s6982_s26 + $0xa8] sm:$0xf] }
  0x42   : > { %6400 = vmatprep.subr.bf16.mxu1 %v6817_v29  ;;  %6448 = vmatprep.subr.bf16.mxu0 %v6818_v41  ;;  %v607_v33 = vrot.slane %v605_v10, 5  ;;  %v615_v35 = vshll.u32 %v7222_v61, 16  ;;  %v416_v34 = vsel %vm7013_vm2, %v411_v12, %v415_v47  ;;  %v428_v43 = vshrl.u32 %v7227_v59, 16  ;;  %9818 = vst [vmem:[#allocation2_spill] sm:$0xff] %v7253_v38  ;;  %v7258_v47 = vld [vmem:[%s9788_s1 + $0xf8] sm:$0xff]  }
  0x43   : > { %v602_v37 = vor.u32 %v601_v15, %v598_v3  ;;  %v611_v42 = vrot.slane %v609_v46, 4  ;;  %6380 = vmatprep.mubr.bf16.mxu1 %v5501_v23  ;;  %v426_v45 = vsel %vm7013_vm2, %v421_v24, %v425_v1  ;;  %v431_v49 = vshll.u32 %v7227_v59, 16  ;;  %v7261_v52 = vld [vmem:[%s6982_s26 + $0xac] sm:$0xf]  ;;  %v7266_v1 = vld [vmem:[%s9788_s1 + $0x138] sm:$0xff]  }
  0x44   : > { %v617_v48 = vrot.slane %v615_v35, 5  ;;  %v437_v50 = vshll.u32 %v7236_v17, 16  ;;  %v430_v63 = vrot.slane %v428_v43, 4  ;;  %v441_v10 = vshrl.u32 %v7236_v17, 16  ;;  %v7271_v12 = vld [vmem:[%s6982_s26 + $0xb0] sm:$0x1] }
  0x45   : > { %6401 = vmatpush3.bf16.msra.mxu1 %v6817_v29  ;;  %6449 = vmatpush3.bf16.msra.mxu0 %v6818_v41  ;;  %v5494_v29 = vcombine.low %v416_v34, %v426_v45  ;;  %v603_v56 = vrot.slane %v602_v37, 4  ;;  %v612_v58 = vor.u32 %v611_v42, %v607_v33  ;;  %v433_v41 = vrot.slane %v431_v49, 5  ;;  %9819 = vst [vmem:[#allocation3_spill] sm:$0xff] %v7271_v12  ;;  %v7274_v15 = vld [vmem:[%s6982_s26 + $0x54] sm:$0xf] }
  0x46   : > { %6402 = vmatprep.subr.bf16.mxu1 %v6819_v2  ;;  %6450 = vmatprep.subr.bf16.mxu0 %v6820_v55  ;;  %v439_v3 = vrot.slane %v437_v50, 5  ;;  %v447_v11 = vshll.u32 %v7245_v30, 16  ;;  %v620_v24 = vshrl.u32 %v7253_v38, 16  ;;  %v623_v35 = vshll.u32 %v7253_v38, 16  ;;  %v7281_v34 = vld [vmem:[%s6982_s26 + $0x58] sm:$0xf] }
  0x47   : > { %6365 = vmatmul.mubr.bf16.gmra.mxu0 %v5494_v29  ;;  %v608_v46 = vsel %vm7013_vm2, %v603_v56, %v607_v33  ;;  %v613_v23 = vrot.slane %v612_v58, 4  ;;  %v434_v37 = vor.u32 %v433_v41, %v430_v63  ;;  %v443_v42 = vrot.slane %v441_v10, 4 }
  0x48   : > { %v449_v43 = vrot.slane %v447_v11, 5  ;;  %v629_v45 = vshll.u32 %v7261_v52, 16  ;;  %v622_v49 = vrot.slane %v620_v24, 4  ;;  %v625_v50 = vrot.slane %v623_v35, 5 }
  0x49   : > { %6403 = vmatpush3.bf16.msra.mxu1 %v6819_v2  ;;  %6451 = vmatpush3.bf16.msra.mxu0 %v6820_v55  ;;  %v618_v33 = vsel %vm7013_vm2, %v613_v23, %v617_v48  ;;  %v633_v29 = vshrl.u32 %v7261_v52, 16  ;;  %v435_v56 = vrot.slane %v434_v37, 4  ;;  %v444_v58 = vor.u32 %v443_v42, %v439_v3  ;;  %v7290_v55 = vld [vmem:[%s6982_s26 + $0x5c] sm:$0x1]  ;;  %v7295_v48 = vld [vmem:[%s6982_s26 + $0xb4] sm:$0xf] }
  0x4a   : > { %6484 = vmatprep.subr.bf16.mxu1 %v7258_v47  ;;  %6532 = vmatprep.subr.bf16.mxu0 %v7266_v1  ;;  %v5502_v2 = vcombine.low %v608_v46, %v618_v33  ;;  %v631_v63 = vrot.slane %v629_v45, 5  ;;  %v626_v41 = vor.u32 %v625_v50, %v622_v49  ;;  %v639_v11 = vshll.u32 %v7271_v12, 16  ;;  %9820 = vst [vmem:[#allocation4_spill] sm:$0xff] %v7295_v48  ;;  %v7302_v37 = vld [vmem:[%s6982_s26 + $0xb8] sm:$0xf] }
  0x4b   : > { %v635_v10 = vrot.slane %v633_v29, 4  ;;  %v452_v21 = vshrl.u32 %v7274_v15, 16  ;;  %v440_v23 = vsel %vm7013_vm2, %v435_v56, %v439_v3  ;;  %v445_v24 = vrot.slane %v444_v58, 4  ;;  %9821 = vst [vmem:[#allocation5_spill] sm:$0xff] %v7302_v37  ;;  %v7308_v3 = vld [vmem:[%s6982_s26 + $0xbc] sm:$0x1] }
  0x4c   : > { %6381 = vmatmul.mubr.bf16.gmra.mxu1 %v5502_v2  ;;  %v455_v46 = vshll.u32 %v7274_v15, 16  ;;  %v461_v35 = vshll.u32 %v7281_v34, 16  ;;  %v627_v42 = vrot.slane %v626_v41, 4  ;;  %v641_v33 = vrot.slane %v639_v11, 5  ;;  %9822 = vst [vmem:[#allocation6_spill] sm:$0xff] %v7308_v3 }
  0x4d   : > { %v636_v45 = vor.u32 %v635_v10, %v631_v63  ;;  %v454_v49 = vrot.slane %v452_v21, 4  ;;  %v450_v50 = vsel %vm7013_vm2, %v445_v24, %v449_v43  ;;  %v465_v62 = vshrl.u32 %v7281_v34, 16  ;;  %v1262_v10 = vld [vmem:[%s6982_s26] sm:$0xe] }
  0x4e   : > { %v457_v29 = vrot.slane %v455_v46, 5  ;;  %v463_v2 = vrot.slane %v461_v35, 5  ;;  %v5495_v56 = vcombine.low %v440_v23, %v450_v50  ;;  %v632_v58 = vsel %vm7013_vm2, %v627_v42, %v631_v63 }
  0x4f   : > { %v637_v20 = vrot.slane %v636_v45, 4  ;;  %v471_v41 = vshll.u32 %v7290_v55, 16  ;;  %v467_v21 = vrot.slane %v465_v62, 4  ;;  %v644_v12 = vshrl.u32 %v7295_v48, 16 }
  0x50   : > { %v458_v11 = vor.u32 %v457_v29, %v454_v49  ;;  %v647_v43 = vshll.u32 %v7295_v48, 16  ;;  %6368 = vmatprep.mubr.bf16.mxu0 %v5495_v56  ;;  %v653_v46 = vshll.u32 %v7302_v37, 16  ;;  %v657_v63 = vshrl.u32 %v7302_v37, 16  ;;  %v1263_v49 = vld [vmem:[%s6982_s26 + $0xc] sm:$0xe] }
  0x51   : > { %v642_v24 = vsel %vm7013_vm2, %v637_v20, %v641_v33  ;;  %v473_v23 = vrot.slane %v471_v41, 5  ;;  %v468_v45 = vor.u32 %v467_v21, %v463_v2  ;;  %v646_v50 = vrot.slane %v644_v12, 4  ;;  %v1264_v20 = vld [vmem:[%s6982_s26 + $0x18] sm:$0xe] }
  0x52   : > { %v5503_v35 = vcombine.low %v632_v58, %v642_v24  ;;  %v459_v42 = vrot.slane %v458_v11, 4  ;;  %v649_v62 = vrot.slane %v647_v43, 5  ;;  %v655_v29 = vrot.slane %v653_v46, 5 }
  0x53   : > { %v659_v38 = vrot.slane %v657_v63, 4  ;;  %v663_v48 = vshll.u32 %v7308_v3, 16  ;;  %v469_v58 = vrot.slane %v468_v45, 4  ;;  %v5537_v41 = vrot.slane %v1262_v10, 9 }
  0x54   : > { %6384 = vmatprep.mubr.bf16.mxu1 %v5503_v35  ;;  %v464_v33 = vsel %vm7013_vm2, %v459_v42, %v463_v2  ;;  %v1315_v12 = vrot.slane %v6991_v5, 5  ;;  %v650_v11 = vor.u32 %v649_v62, %v646_v50  ;;  %v5538_v24 = vrot.slane %v1263_v49, 9 }
  0x55   : > { %v660_v21 = vor.u32 %v659_v38, %v655_v29  ;;  %v665_v43 = vrot.slane %v663_v48, 5  ;;  %v474_v46 = vsel %vm7013_vm2, %v469_v58, %v473_v23  ;;  %v1322_v35 = vrot.slane %v7018_v32, 5 }
  0x56   : > { %v1316_v63 = vsel %vm7324_vm5, %v5537_v41, %v1315_v12  ;;  %v1317_v3 = vrot.slane %v1315_v12, 4  ;;  %v5496_v37 = vcombine.low %v464_v33, %v474_v46  ;;  %v651_v2 = vrot.slane %v650_v11, 4  ;;  %v1266_v12 = vld [vmem:[%s6982_s26 + $0x30] sm:$0xe]  ;;  %v1268_v46 = vld [vmem:[%s6982_s26 + $0x48] sm:$0xe] }
  0x57   : > { %v661_v42 = vrot.slane %v660_v21, 4  ;;  %v5513_v10 = vcombine.low %v6988_v4, %v6991_v5  ;;  %v9825_v38 = vrot.slane %v6994_v6, 5  ;;  %v1324_v45 = vrot.slane %v1322_v35, 4 }
  0x58   : > { %v5539_v23 = vrot.slane %v1264_v20, 9  ;;  %6369 = vmatmul.mubr.bf16.gmra.mxu0 %v5496_v37  ;;  %v656_v50 = vsel %vm7013_vm2, %v651_v2, %v655_v29  ;;  %v1329_v33 = vrot.slane %v7055_v19, 5  ;;  %v1323_v4 = vsel %vm7324_vm5, %v5538_v24, %v1322_v35  ;;  %v1267_v24 = vld [vmem:[%s6982_s26 + $0x3c] sm:$0xe] }
  0x59   : > { %v1319_v48 = vsel %vm7324_vm5, %v1317_v3, %v9825_v38  ;;  %v666_v49 = vsel %vm7013_vm2, %v661_v42, %v665_v43  ;;  %v9826_v5 = vrot.slane %v7024_v40, 5  ;;  %v1332_v37 = vrot.slane %v7060_v25, 5  ;;  %v1265_v3 = vld [vmem:[%s6982_s26 + $0x24] sm:$0xe]  ;;  %v6828_v25 = vld [vmem:[%s9788_s1 + $0x130] sm:$0xff]  }
  0x5a   : > { %v5569_v62 = vcombine.low %v1316_v63, %v1319_v48  ;;  %v5504_v58 = vcombine.low %v656_v50, %v666_v49  ;;  %v1330_v29 = vsel %vm7324_vm5, %v5539_v23, %v1329_v33  ;;  %v1331_v20 = vrot.slane %v1329_v33, 4  ;;  %v6827_v23 = vld [vmem:[%s9788_s1 + $0xf0] sm:$0xff]  }
  0x5b   : > { %v1326_v6 = vsel %vm7324_vm5, %v1324_v45, %v9826_v5  ;;  %v1336_v41 = vrot.slane %v7096_v0, 5  ;;  %v5540_v21 = vrot.slane %v1265_v3, 9  ;;  %v1343_v43 = vrot.slane %v7143_v60, 5  ;;  %v7399_v3 = vld [vmem:[%s6982_s26 + $0x68] sm:$0x1] }
  0x5c   : > { %6452 = vmatprep.mubr.bf16.mxu0 %v5569_v62  ;;  %6385 = vmatmul.mubr.bf16.gmra.mxu1 %v5504_v58  ;;  %v5570_v11 = vcombine.low %v1323_v4, %v1326_v6  ;;  %v1333_v40 = vsel %vm7324_vm5, %v1331_v20, %v1332_v37  ;;  %v1339_v2 = vrot.slane %v7099_v8, 5  ;;  %v5541_v42 = vrot.slane %v1266_v12, 9  ;;  %v1269_v37 = vld [vmem:[%s6982_s26 + $0x54] sm:$0xe]  ;;  %v7423_v12 = vld [vmem:[%s6982_s26 + $0x60] sm:$0xe] }
  0x5d   : > { %6404 = vmatprep.mubr.bf16.mxu1 %v5513_v10  ;;  %v5571_v63 = vcombine.low %v1330_v29, %v1333_v40  ;;  %v1338_v35 = vrot.slane %v1336_v41, 4  ;;  %v1345_v38 = vrot.slane %v1343_v43, 4  ;;  %v1346_v10 = vrot.slane %v7151_v16, 5 }
  0x5e   : > { %v1350_v48 = vrot.slane %v7187_v54, 5  ;;  %v5515_v45 = vcombine.low %v7047_v14, %v7055_v19  ;;  %v1357_v50 = vrot.slane %v7236_v17, 5  ;;  %v5542_v49 = vrot.slane %v1267_v24, 9  ;;  %v6836_v24 = vld [vmem:[%s9788_s1 + $0x120] sm:$0xff]  }
  0x5f   : > { %v1353_v8 = vrot.slane %v7194_v7, 5  ;;  %v5543_v33 = vrot.slane %v1268_v46, 9  ;;  %v1337_v14 = vsel %vm7324_vm5, %v5540_v21, %v1336_v41  ;;  %v1340_v19 = vsel %vm7324_vm5, %v1338_v35, %v1339_v2  ;;  %v7435_v46 = vld [vmem:[%s6982_s26 + $0x78] sm:$0xe]  ;;  %v6835_v2 = vld [vmem:[%s9788_s1 + $0xe0] sm:$0xff]  }
  0x60   : > { %6453 = vmatmul.mubr.bf16.vlgmr.msra.gmra.mxu0 %v5570_v11  ;;  %v1352_v62 = vrot.slane %v1350_v48, 4  ;;  %v1359_v16 = vrot.slane %v1357_v50, 4  ;;  %v1360_v58 = vrot.slane %v7245_v30, 5  ;;  %v1344_v4 = vsel %vm7324_vm5, %v5541_v42, %v1343_v43  ;;  %v7426_v11 = vld [vmem:[%s6982_s26 + $0x6c] sm:$0xe] }
  0x61   : > { %6533 = vmatpush3.bf16.msra.mxu0 %v7266_v1  ;;  %6456 = vmatprep.mubr.bf16.mxu0 %v5571_v63  ;;  %v1347_v7 = vsel %vm7324_vm5, %v1345_v38, %v1346_v10  ;;  %v6832_v1 = vld [vmem:[%s9788_s1 + $0x128] sm:$0xff]   ;;  %v1364_v5 = vrot.slane %v7281_v34, 5  ;;  %v9827_v6 = vcombine.low %v7009_v26, %v7018_v32  ;;  %v5516_v30 = vcombine.low %v7087_v57, %v7096_v0  ;;  %v1273_v63 = vld [vmem:[%s6982_s26 + $0x84] sm:$0xe]  ;;  %v1274_v42 = vld [vmem:[%s6982_s26 + $0x90] sm:$0xe] }
  0x62   : > { %6534 = vmatprep.subr.bf16.mxu0 %v6828_v25  ;;  %v1374_v29 = vrot.slane %v7399_v3, 5  ;;  %v5572_v20 = vcombine.low %v1337_v14, %v1340_v19  ;;  %v7405_v41 = vsel %vm7324_vm5, %v5542_v49, %v1350_v48  ;;  %v7409_v26 = vsel %vm7324_vm5, %v1352_v62, %v1353_v8  ;;  %v6831_v32 = vld [vmem:[%s9788_s1 + $0xe8] sm:$0xff]   ;;  %v7454_v48 = vld [vmem:[%s6982_s26 + $0x64] sm:$0xf]  ;;  %v1275_v49 = vld [vmem:[%s6982_s26 + $0x9c] sm:$0xe] }
  0x63   : > { %v5573_v57 = vcombine.low %v1344_v4, %v1347_v7  ;;  %v7416_v0 = vsel %vm7324_vm5, %v5543_v33, %v1357_v50  ;;  %v5517_v40 = vcombine.low %v7134_v53, %v7143_v60  ;;  %v5544_v21 = vrot.slane %v1269_v37, 9  ;;  %v7476_v4 = vld [vmem:[%s6982_s26 + $0x74] sm:$0x1] }
  0x64   : > { %6405 = vmatmul.mubr.bf16.vlgmr.msra.gmra.mxu1 %v9827_v6  ;;  %v1367_v43 = vrot.slane %v7290_v55, 5  ;;  %v5518_v35 = vcombine.low %v7184_v51, %v7187_v54  ;;  %v5574_v53 = vcombine.low %v7405_v41, %v7409_v26  ;;  %v5519_v60 = vcombine.low %v7227_v59, %v7236_v17  ;;  %v6921_v54 = vld [vmem:[%s6982_s26 + $0x80] sm:$0x1] }
  0x65   : > { %6485 = vmatpush3.bf16.msra.mxu1 %v7258_v47  ;;  %6408 = vmatprep.mubr.bf16.mxu1 %v5515_v45  ;;  %v7420_v47 = vsel %vm7324_vm5, %v1359_v16, %v1360_v58  ;;  %v5520_v55 = vcombine.low %v7274_v15, %v7281_v34  ;;  %v5545_v10 = vrot.slane %v7423_v12, 9  ;;  %v1371_v45 = vrot.slane %v7454_v48, 5  ;;  %v7472_v16 = vld [vmem:[%s6982_s26 + $0x70] sm:$0xf]  ;;  %v6922_v17 = vld [vmem:[%s6982_s26 + $0x60] sm:$0xf] }
  0x66   : > { %6486 = vmatprep.subr.bf16.mxu1 %v6827_v23  ;;  %6535 = vmatpush3.bf16.msra.mxu0 %v6828_v25  ;;  %v1366_v25 = vrot.slane %v1364_v5, 4  ;;  %v5575_v38 = vcombine.low %v7416_v0, %v7420_v47  ;;  %v5546_v62 = vrot.slane %v7426_v11, 9  ;;  %v1392_v8 = vrot.slane %v7110_v22, 5  ;;  %v1276_v0 = vld [vmem:[%s6982_s26 + $0xa8] sm:$0xe]  ;;  %v7656_v15 = vld [vmem:[%s9788_s1 + $0x1b8] sm:$0xff]  }
  0x67   : > { %6536 = vmatprep.subr.bf16.mxu0 %v6832_v1  ;;  %v1395_v33 = vrot.slane %v7119_v36, 5  ;;  %v7465_v14 = vsel %vm7324_vm5, %v5544_v21, %v1364_v5  ;;  %v1378_v58 = vrot.slane %v7472_v16, 5  ;;  %v1381_v7 = vrot.slane %v7476_v4, 5  ;;  %v6839_v36 = vld [vmem:[%s9788_s1 + $0xd8] sm:$0xff]  }
  0x68   : > { %6457 = vmatmul.mubr.bf16.gmra.mxu0 %v5572_v20  ;;  %v7469_v19 = vsel %vm7324_vm5, %v1366_v25, %v1367_v43  ;;  %v5547_v5 = vrot.slane %v7435_v46, 9  ;;  %v1394_v37 = vrot.slane %v1392_v8, 4  ;;  %v5549_v41 = vrot.slane %v1274_v42, 9  ;;  %v5665_v42 = vld [vmem:[%s6982_s26 + $0xc] sm:$0xf] }
  0x69   : > { %6487 = vmatpush3.bf16.msra.mxu1 %v6827_v23  ;;  %6460 = vmatprep.mubr.bf16.mxu0 %v5573_v57  ;;  %v5548_v23 = vrot.slane %v1273_v63, 9  ;;  %v1399_v26 = vrot.slane %v7161_v31, 5  ;;  %v1402_v57 = vrot.slane %v7171_v44, 5  ;;  %v1385_v47 = vrot.slane %v7069_v39, 5 }
  0x6a   : > { %6488 = vmatprep.subr.bf16.mxu1 %v6831_v32  ;;  %6537 = vmatpush3.bf16.msra.mxu0 %v6832_v1  ;;  %v6840_v1 = vld [vmem:[%s9788_s1 + $0x118] sm:$0xff]   ;;  %v7500_v21 = vsel %vm7324_vm5, %v1394_v37, %v1395_v33  ;;  %v1406_v63 = vrot.slane %v7206_v28, 5  ;;  %v5551_v33 = vrot.slane %v1276_v0, 9  ;;  %v1413_v37 = vrot.slane %v7261_v52, 5  ;;  %v6843_v0 = vld [vmem:[%s9788_s1 + $0xd0] sm:$0xff]  }
  0x6b   : > { %6538 = vmatprep.subr.bf16.mxu0 %v6836_v24  ;;  %v7488_v6 = vsel %vm7324_vm5, %v5548_v23, %v1392_v8  ;;  %v7508_v44 = vsel %vm7324_vm5, %v5549_v41, %v1399_v26  ;;  %v1401_v43 = vrot.slane %v1399_v26, 4  ;;  %v6844_v23 = vld [vmem:[%s9788_s1 + $0x110] sm:$0xff]   ;;  %v1409_v8 = vrot.slane %v7222_v61, 5  ;;  %v9829_v61 = vld [vmem:[#allocation3_spill] sm:$0xff] }
  0x6c   : > { %6409 = vmatmul.mubr.bf16.gmra.mxu1 %v5516_v30  ;;  %v1373_v30 = vrot.slane %v1371_v45, 4  ;;  %v1408_v20 = vrot.slane %v1406_v63, 4  ;;  %v1416_v50 = vrot.slane %v9829_v61, 5  ;;  %v1372_v61 = vsel %vm7324_vm5, %v5545_v10, %v1371_v45  ;;  %v5668_v45 = vld [vmem:[%s6982_s26 + $0x18] sm:$0xf] }
  0x6d   : > { %6412 = vmatprep.mubr.bf16.mxu1 %v5517_v40  ;;  %6489 = vmatpush3.bf16.msra.mxu1 %v6831_v32  ;;  %v5550_v40 = vrot.slane %v1275_v49, 9  ;;  %v7520_v32 = vld [vmem:[%s6982_s26 + $0x10] sm:$0xf]  ;;  %v7524_v41 = vsel %vm7324_vm5, %v1401_v43, %v1402_v57  ;;  %v1415_v57 = vrot.slane %v1413_v37, 4  ;;  %v2183_v12 = vshrl.u32 %v5665_v42, 16 }
  0x6e   : > { %6490 = vmatprep.subr.bf16.mxu1 %v6835_v2  ;;  %6539 = vmatpush3.bf16.msra.mxu0 %v6836_v24  ;;  %v9828_v24 = vld [vmem:[#allocation2_spill] sm:$0xff]  ;;  %v9831_v43 = vld [vmem:[#allocation4_spill] sm:$0xff]  ;;  %v2186_v10 = vshll.u32 %v5665_v42, 16  ;;  %v1380_v51 = vrot.slane %v1378_v58, 4  ;;  %v2192_v59 = vshll.u32 %v7520_v32, 16  ;;  %v1386_v4 = vsel %vm7324_vm5, %v5547_v5, %v1385_v47 }
  0x6f   : > { %6540 = vmatprep.subr.bf16.mxu0 %v6840_v1  ;;  %v7528_v26 = vsel %vm7324_vm5, %v5550_v40, %v1406_v63  ;;  %v9830_v40 = vld [vmem:[#allocation5_spill] sm:$0xff]  ;;  %v7594_v42 = vld [vmem:[%s6982_s26 + $0x14] sm:$0x1]  ;;  %v2185_v63 = vrot.slane %v2183_v12, 4  ;;  %v9833_v5 = vld [vmem:[#allocation6_spill] sm:$0xff] }
  0x70   : > { %6461 = vmatmul.mubr.bf16.gmra.mxu0 %v5574_v53  ;;  %v2188_v49 = vrot.slane %v2186_v10, 5  ;;  %v5671_v53 = vld [vmem:[%s6982_s26 + $0x24] sm:$0xf]  ;;  %v1382_v11 = vsel %vm7324_vm5, %v1380_v51, %v1381_v7 }
  0x71   : > { %6491 = vmatpush3.bf16.msra.mxu1 %v6835_v2  ;;  %6464 = vmatprep.mubr.bf16.mxu0 %v5575_v38  ;;  %v7538_v2 = vsel %vm7324_vm5, %v5551_v33, %v1413_v37  ;;  %v5576_v38 = vcombine.low %v7465_v14, %v7469_v19  ;;  %v1375_v33 = vsel %vm7324_vm5, %v1373_v30, %v1374_v29  ;;  %v6848_v14 = vld [vmem:[%s9788_s1 + $0x108] sm:$0xff]   ;;  %v6852_v30 = vld [vmem:[%s9788_s1 + $0x100] sm:$0xff]   ;;  %v7613_v19 = vrot.slane %v2192_v59, 5 }
  0x72   : > { %6492 = vmatprep.subr.bf16.mxu1 %v6839_v36  ;;  %6541 = vmatpush3.bf16.msra.mxu0 %v6840_v1  ;;  %v7556_v37 = vsel %vm7324_vm5, %v1408_v20, %v1409_v8  ;;  %v7568_v29 = vsel %vm7324_vm5, %v1415_v57, %v1416_v50  ;;  %v6847_v50 = vld [vmem:[%s9788_s1 + $0xc8] sm:$0xff]   ;;  %v7583_v1 = vld [vmem:[%s6982_s26 + $0xb4] sm:$0xe]  ;;  %v5577_v20 = vcombine.low %v1372_v61, %v1375_v33  ;;  %v2196_v8 = vshrl.u32 %v7520_v32, 16  ;;  %v7611_v61 = vld [vmem:[%s6982_s26 + $0x1c] sm:$0xf] }
  0x73   : > { %6542 = vmatprep.subr.bf16.mxu0 %v6844_v23  ;;  %v7598_v57 = vld [vmem:[%s6982_s26 + $0x6c] sm:$0xf]  ;;  %v2207_v33 = vshrl.u32 %v5668_v45, 16  ;;  %v2216_v51 = vshll.u32 %v7611_v61, 16  ;;  %v2220_v39 = vshrl.u32 %v7611_v61, 16  ;;  %v2231_v59 = vshrl.u32 %v5671_v53, 16 }
  0x74   : > { %6413 = vmatmul.mubr.bf16.gmra.mxu1 %v5518_v35  ;;  %v1388_v35 = vrot.slane %v6921_v54, 5  ;;  %v5522_v54 = vcombine.low %v7598_v57, %v7472_v16  ;;  %v2198_v3 = vrot.slane %v2196_v8, 4  ;;  %v2234_v46 = vshll.u32 %v5671_v53, 16  ;;  %v6925_v8 = vld [vmem:[%s6982_s26 + $0x7c] sm:$0xf] }
  0x75   : > { %6416 = vmatprep.mubr.bf16.mxu1 %v5519_v60  ;;  %6493 = vmatpush3.bf16.msra.mxu1 %v6839_v36  ;;  %v5521_v60 = vcombine.low %v6922_v17, %v7454_v48  ;;  %v1387_v36 = vrot.slane %v1385_v47, 4  ;;  %v7608_v48 = vsel %vm7324_vm5, %v5546_v62, %v1378_v58  ;;  %v2210_v17 = vshll.u32 %v5668_v45, 16  ;;  %v6851_v58 = vld [vmem:[%s9788_s1 + $0xc0] sm:$0xff]   ;;  %v7638_v45 = vld [vmem:[%s6982_s26 + $0x28] sm:$0xf] }
  0x76   : > { %6494 = vmatprep.subr.bf16.mxu1 %v6843_v0  ;;  %6543 = vmatpush3.bf16.msra.mxu0 %v6844_v23  ;;  %v9801_v62 = vrot.slane %v9830_v40, 5  ;;  %v7625_v23 = vld [vmem:[%s6982_s26 + $0x20] sm:$0x1]  ;;  %v2209_v12 = vrot.slane %v2207_v33, 4  ;;  %9832 = vst [vmem:[#allocation2_spill] sm:$0xff] %v7638_v45  ;;  %v5578_v34 = vcombine.low %v7608_v48, %v1382_v11  ;;  %v2240_v53 = vshll.u32 %v7638_v45, 16 }
  0x77   : > { %6544 = vmatprep.subr.bf16.mxu0 %v6848_v14  ;;  %v2212_v10 = vrot.slane %v2210_v17, 5  ;;  %v1389_v7 = vsel %vm7324_vm5, %v1387_v36, %v1388_v35  ;;  %v2189_v35 = vor.u32 %v2188_v49, %v2185_v63  ;;  %v7651_v36 = vld [vmem:[%s9788_s1 + $0x178] sm:$0xff]   ;;  %v5674_v63 = vld [vmem:[%s6982_s26 + $0x30] sm:$0xf]  ;;  %v7672_v48 = vld [vmem:[%s6982_s26 + $0x34] sm:$0xf] }
  0x78   : > { %6465 = vmatmul.mubr.bf16.gmra.mxu0 %v5576_v38  ;;  %v2202_v38 = vshll.u32 %v7594_v42, 16  ;;  %v5579_v17 = vcombine.low %v1386_v4, %v1389_v7  ;;  %9835 = vst [vmem:[#allocation5_spill] sm:$0xff] %v7672_v48  ;;  %v7674_v11 = vrot.slane %v2216_v51, 5  ;;  %v2236_v47 = vrot.slane %v2234_v46, 5  ;;  %v7693_v46 = vld [vmem:[%s6982_s26 + $0x40] sm:$0xf] }
  0x79   : > { %6495 = vmatpush3.bf16.msra.mxu1 %v6843_v0  ;;  %6468 = vmatprep.mubr.bf16.mxu0 %v5577_v20  ;;  %v2199_v20 = vor.u32 %v2198_v3, %v7613_v19  ;;  %v2213_v49 = vor.u32 %v2212_v10, %v2209_v12  ;;  %v6924_v3 = vld [vmem:[%s6982_s26 + $0x78] sm:$0xf]  ;;  %v2222_v12 = vrot.slane %v2220_v39, 4  ;;  %v2233_v10 = vrot.slane %v2231_v59, 4  ;;  %9836 = vst [vmem:[#allocation4_spill] sm:$0xff] %v7693_v46 }
  0x7a   : > { %6496 = vmatprep.subr.bf16.mxu1 %v6847_v50  ;;  %6545 = vmatpush3.bf16.msra.mxu0 %v6848_v14  ;;  %v2226_v14 = vshll.u32 %v7625_v23, 16  ;;  %v5523_v33 = vcombine.low %v6924_v3, %v6925_v8  ;;  %v7665_v25 = vrot.slane %v2202_v38, 5  ;;  %v7677_v0 = vld [vmem:[%s6982_s26 + $0x38] sm:$0x1]  ;;  %v7679_v4 = vrot.slane %v2189_v35, 4 }
  0x7b   : > { %6546 = vmatprep.subr.bf16.mxu0 %v6852_v30  ;;  %v7681_v7 = vrot.slane %v2199_v20, 4  ;;  %v2255_v3 = vshrl.u32 %v5674_v63, 16  ;;  %v5677_v8 = vld [vmem:[%s6982_s26 + $0x3c] sm:$0xf]  ;;  %v7689_v51 = vrot.slane %v2240_v53, 5  ;;  %v2258_v39 = vshll.u32 %v5674_v63, 16 }
  0x7c   : > { %6417 = vmatmul.mubr.bf16.gmra.mxu1 %v5520_v55  ;;  %v1422_v55 = vrot.slane %v9801_v62, 4  ;;  %v7683_v38 = vrot.slane %v2226_v14, 5  ;;  %v2264_v59 = vshll.u32 %v7672_v48, 16  ;;  %v2268_v20 = vshrl.u32 %v7672_v48, 16 }
  0x7d   : > { %6420 = vmatprep.mubr.bf16.mxu1 %v5521_v60  ;;  %6497 = vmatpush3.bf16.msra.mxu1 %v6847_v50  ;;  %v7668_v60 = vld [vmem:[%s6982_s26 + $0x2c] sm:$0x1]  ;;  %v2244_v50 = vshrl.u32 %v7638_v45, 16  ;;  %v2223_v14 = vor.u32 %v2222_v12, %v7674_v11  ;;  %v2257_v53 = vrot.slane %v2255_v3, 4  ;;  %v2260_v63 = vrot.slane %v2258_v39, 5 }
  0x7e   : > { %6498 = vmatprep.subr.bf16.mxu1 %v6851_v58  ;;  %9834 = vst [vmem:[#allocation3_spill] sm:$0xff] %v7668_v60  ;;  %6547 = vmatpush3.bf16.msra.mxu0 %v6852_v30  ;;  %v7687_v30 = vrot.slane %v2213_v49, 4  ;;  %v2279_v49 = vshrl.u32 %v5677_v8, 16  ;;  %v2282_v62 = vshll.u32 %v5677_v8, 16  ;;  %v2270_v48 = vrot.slane %v2268_v20, 4 }
  0x7f   : > { %6628 = vmatprep.subr.bf16.mxu0 %v7656_v15  ;;  %v2246_v35 = vrot.slane %v2244_v50, 4  ;;  %v7703_v50 = vrot.slane %v2264_v59, 5  ;;  %v7706_v45 = vld [vmem:[%s6982_s26 + $0x44] sm:$0x1]  ;;  %v2292_v12 = vshrl.u32 %v7693_v46, 16  ;;  %v9837_v16 = vrot.slane %v9830_v40, 5 }
  0x80   : > { %6469 = vmatmul.mubr.bf16.gmra.mxu0 %v5578_v34  ;;  %v2250_v34 = vshll.u32 %v7668_v60, 16  ;;  %v9838_v57 = vrot.slane %v7583_v1, 9  ;;  %v7727_v39 = vld [vmem:[%s6982_s26 + $0x4c] sm:$0xf]  ;;  %v2281_v59 = vrot.slane %v2279_v49, 4  ;;  %v2284_v20 = vrot.slane %v2282_v62, 5 }
  0x81   : > { %6499 = vmatpush3.bf16.msra.mxu1 %v6851_v58  ;;  %6472 = vmatprep.mubr.bf16.mxu0 %v5579_v17  ;;  %v2237_v58 = vor.u32 %v2236_v47, %v2233_v10  ;;  %v2274_v17 = vshll.u32 %v7677_v0, 16  ;;  %v2288_v47 = vshll.u32 %v7693_v46, 16  ;;  %v5680_v10 = vld [vmem:[%s6982_s26 + $0x48] sm:$0xf]  ;;  %v2247_v8 = vor.u32 %v2246_v35, %v7689_v51 }
  0x82   : > { %6580 = vmatprep.subr.bf16.mxu1 %v7651_v36  ;;  %v2294_v1 = vrot.slane %v2292_v12, 4  ;;  %v7731_v46 = vrot.slane %v2223_v14, 4  ;;  %v2195_v62 = vsel %vm7013_vm2, %v7679_v4, %v7613_v19  ;;  %v2205_v35 = vsel %vm7013_vm2, %v7681_v7, %v7665_v25  ;;  %v5683_v4 = vld [vmem:[%s6982_s26 + $0x54] sm:$0xf] }
  0x83   : > { %v7729_v60 = vrot.slane %v2288_v47, 5  ;;  %v2306_v14 = vshll.u32 %v5680_v10, 16  ;;  %v2298_v49 = vshll.u32 %v7706_v45, 16  ;;  %v2316_v19 = vshrl.u32 %v7727_v39, 16 }
  0x84   : > { %6421 = vmatmul.mubr.bf16.gmra.mxu1 %v5522_v54  ;;  %v7717_v54 = vsel %vm7324_vm5, %v9838_v57, %v9837_v16  ;;  %v7733_v16 = vrot.slane %v2237_v58, 4  ;;  %v7735_v57 = vrot.slane %v2250_v34, 5  ;;  %v2312_v58 = vshll.u32 %v7727_v39, 16 }
  0x85   : > { %6424 = vmatprep.mubr.bf16.mxu1 %v5523_v33  ;;  %v9839_v33 = vrot.slane %v9833_v5, 5  ;;  %v2303_v5 = vshrl.u32 %v5680_v10, 16  ;;  %v9841_v34 = vcombine.low %v7508_v44, %v7524_v41  ;;  %v7756_v47 = vrot.slane %v2247_v8, 4  ;;  %v7762_v10 = vld [vmem:[%s6982_s26 + $0x58] sm:$0xf] }
  0x86   : > { %v7758_v12 = vrot.slane %v2274_v17, 5  ;;  %v2285_v25 = vor.u32 %v2284_v20, %v2281_v59  ;;  %v2295_v7 = vor.u32 %v2294_v1, %v7729_v60  ;;  %v9842_v44 = vcombine.low %v7103_v13, %v7110_v22  ;;  %v7768_v41 = vld [vmem:[%s6982_s26 + $0x50] sm:$0x1] }
  0x87   : > { %v7723_v3 = vsel %vm7324_vm5, %v1422_v55, %v9839_v33  ;;  %v9840_v55 = vcombine.low %v7488_v6, %v7500_v21  ;;  %v2261_v6 = vor.u32 %v2260_v63, %v2257_v53  ;;  %v2271_v21 = vor.u32 %v2270_v48, %v7703_v50 }
  0x88   : > { %v2305_v48 = vrot.slane %v2303_v5, 4  ;;  %v2308_v53 = vrot.slane %v2306_v14, 5  ;;  %v7770_v63 = vrot.slane %v2312_v58, 5  ;;  %v2318_v17 = vrot.slane %v2316_v19, 4  ;;  %v5686_v5 = vld [vmem:[%s6982_s26 + $0x60] sm:$0xf] }
  0x89   : > { %6473 = vmatmul.mubr.bf16.gmra.mxu0 %v9840_v55  ;;  %v9843_v33 = vcombine.low %v7155_v18, %v7161_v31  ;;  %v2327_v8 = vshrl.u32 %v5683_v4, 16  ;;  %v2330_v59 = vshll.u32 %v5683_v4, 16  ;;  %v7775_v20 = vrot.slane %v2261_v6, 4  ;;  %v7792_v31 = vld [vmem:[%s6982_s26 + $0x64] sm:$0xf] }
  0x8a   : > { %6476 = vmatprep.mubr.bf16.mxu0 %v9841_v34  ;;  %v7777_v1 = vrot.slane %v2271_v21, 4  ;;  %v7779_v13 = vrot.slane %v2298_v49, 5  ;;  %v2336_v22 = vshll.u32 %v7762_v10, 16  ;;  %v5584_v55 = vcombine.low %v7717_v54, %v7723_v3  ;;  %v7788_v34 = vld [vmem:[%s6982_s26 + $0x5c] sm:$0x1] }
  0x8b   : > { %v5729_v14 = vcombine.low %v2195_v62, %v2205_v35  ;;  %v7785_v58 = vrot.slane %v2285_v25, 4  ;;  %v2340_v18 = vshrl.u32 %v7762_v10, 16  ;;  %v7794_v6 = vrot.slane %v2295_v7, 4 }
  0x8c   : > { %6425 = vmatmul.mubr.bf16.gmra.mxu1 %v9842_v44  ;;  %v2322_v21 = vshll.u32 %v7768_v41, 16  ;;  %v2351_v49 = vshrl.u32 %v5686_v5, 16  ;;  %v2354_v19 = vshll.u32 %v5686_v5, 16  ;;  %v9844_v4 = vcombine.low %v7528_v26, %v7556_v37 }
  0x8d   : > { %6428 = vmatprep.mubr.bf16.mxu1 %v9843_v33  ;;  %v2309_v54 = vor.u32 %v2308_v53, %v2305_v48  ;;  %v2319_v3 = vor.u32 %v2318_v17, %v7770_v63  ;;  %v2329_v62 = vrot.slane %v2327_v8, 4  ;;  %v2332_v35 = vrot.slane %v2330_v59, 5  ;;  %v7832_v8 = vld [vmem:[%s6982_s26 + $0x70] sm:$0xf] }
  0x8e   : > { %v9845_v25 = vcombine.low %v7538_v2, %v7568_v29  ;;  %v7804_v7 = vrot.slane %v2336_v22, 5  ;;  %v2342_v44 = vrot.slane %v2340_v18, 4  ;;  %v2346_v33 = vshll.u32 %v7788_v34, 16 }
  0x8f   : > { %v2360_v26 = vshll.u32 %v7792_v31, 16  ;;  %v2219_v37 = vsel %vm7013_vm2, %v7687_v30, %v7674_v11  ;;  %v2229_v2 = vsel %vm7013_vm2, %v7731_v46, %v7683_v38  ;;  %v2353_v29 = vrot.slane %v2351_v49, 4  ;;  %v5689_v46 = vld [vmem:[%s6982_s26 + $0x6c] sm:$0xf] }
  0x90   : > { %v2356_v48 = vrot.slane %v2354_v19, 5  ;;  %v9846_v53 = vcombine.low %v7197_v9, %v7206_v28  ;;  %v2243_v17 = vsel %vm7013_vm2, %v7733_v16, %v7689_v51  ;;  %v2253_v11 = vsel %vm7013_vm2, %v7756_v47, %v7735_v57  ;;  %v7840_v16 = vld [vmem:[%s6982_s26 + $0x68] sm:$0x1] }
  0x91   : > { %6477 = vmatmul.mubr.bf16.gmra.mxu0 %v9844_v4  ;;  %v7827_v30 = vrot.slane %v2322_v21, 5  ;;  %v2364_v38 = vshrl.u32 %v7792_v31, 16  ;;  %v9847_v9 = vcombine.low %v9828_v24, %v7261_v52  ;;  %v7837_v28 = vrot.slane %v2309_v54, 4  ;;  %v6853_v52 = vld [vmem:[%s6982_s26 + $0xc] sm:$0xff]  }
  0x92   : > { %6480 = vmatprep.mubr.bf16.mxu0 %v9845_v25  ;;  %v2333_v51 = vor.u32 %v2332_v35, %v2329_v62  ;;  %v2375_v59 = vshrl.u32 %v5689_v46, 16  ;;  %v2378_v57 = vshll.u32 %v5689_v46, 16  ;;  %v7842_v47 = vrot.slane %v2319_v3, 4  ;;  %v7853_v62 = vld [vmem:[%s6982_s26 + $0x74] sm:$0x1] }
  0x93   : > { %v2343_v22 = vor.u32 %v2342_v44, %v7804_v7  ;;  %v7845_v5 = vrot.slane %v2346_v33, 5  ;;  %v2384_v18 = vshll.u32 %v7832_v8, 16  ;;  %v2357_v24 = vor.u32 %v2356_v48, %v2353_v29  ;;  %v5692_v25 = vld [vmem:[%s6982_s26 + $0x78] sm:$0xf]  ;;  %v7857_v44 = vld [vmem:[%s6982_s26 + $0x7c] sm:$0xf] }
  0x94   : > { %6429 = vmatmul.mubr.bf16.gmra.mxu1 %v9846_v53  ;;  %v7849_v21 = vrot.slane %v2360_v26, 5  ;;  %v2366_v49 = vrot.slane %v2364_v38, 4  ;;  %v2388_v19 = vshrl.u32 %v7832_v8, 16  ;;  %v5730_v4 = vcombine.low %v2219_v37, %v2229_v2  ;;  %v7864_v26 = vld [vmem:[%s6982_s26 + $0x80] sm:$0x1] }
  0x95   : > { %6432 = vmatprep.mubr.bf16.mxu1 %v9847_v9  ;;  %v5731_v54 = vcombine.low %v2243_v17, %v2253_v11  ;;  %v2377_v3 = vrot.slane %v2375_v59, 4  ;;  %v2380_v35 = vrot.slane %v2378_v57, 5  ;;  %v7859_v33 = vrot.slane %v2333_v51, 4 }
  0x96   : > { %v7861_v53 = vrot.slane %v2384_v18, 5  ;;  %v2390_v29 = vrot.slane %v2388_v19, 4  ;;  %v2399_v48 = vshrl.u32 %v5692_v25, 16  ;;  %v2370_v37 = vshll.u32 %v7840_v16, 16  ;;  %v5695_v19 = vld [vmem:[%s6982_s26 + $0x84] sm:$0xf] }
  0x97   : > { %v2402_v2 = vshll.u32 %v5692_v25, 16  ;;  %v2408_v17 = vshll.u32 %v7857_v44, 16  ;;  %v2412_v11 = vshrl.u32 %v7857_v44, 16  ;;  %v7869_v38 = vrot.slane %v2343_v22, 4  ;;  %v6857_v25 = vld [vmem:[%s6982_s26 + $0x24] sm:$0xff]  }
  0x98   : > { %v7871_v46 = vrot.slane %v2357_v24, 4  ;;  %v2401_v9 = vrot.slane %v2399_v48, 4  ;;  %v9848_v51 = vcombine.low %v9831_v43, %v9830_v40  ;;  %v2267_v22 = vsel %vm7013_vm2, %v7775_v20, %v7703_v50 }
  0x99   : > { %6481 = vmatmul.mubr.bf16.gmra.mxu0 %v5584_v55  ;;  %v2367_v55 = vor.u32 %v2366_v49, %v7849_v21  ;;  %v2404_v59 = vrot.slane %v2402_v2, 5  ;;  %v7877_v57 = vrot.slane %v2408_v17, 5  ;;  %v2414_v18 = vrot.slane %v2412_v11, 4  ;;  %v7926_v17 = vld [vmem:[%s6982_s26 + $0x8c] sm:$0x1] }
  0x9a   : > { %6548 = vmatprep.mubr.bf16.mxu0 %v5729_v14  ;;  %v2381_v14 = vor.u32 %v2380_v35, %v2377_v3  ;;  %v2391_v24 = vor.u32 %v2390_v29, %v7861_v53  ;;  %v2394_v49 = vshll.u32 %v7853_v62, 16  ;;  %v2418_v40 = vshll.u32 %v7864_v26, 16  ;;  %v7900_v3 = vld [vmem:[%s6982_s26 + $0x88] sm:$0xf]  ;;  %v6854_v35 = vld [vmem:[%s6982_s26 + $0x18] sm:$0xff]  }
  0x9b   : > { %v2277_v43 = vsel %vm7013_vm2, %v7777_v1, %v7758_v12  ;;  %v2301_v50 = vsel %vm7013_vm2, %v7794_v6, %v7779_v13  ;;  %v2405_v20 = vor.u32 %v2404_v59, %v2401_v9  ;;  %v6860_v12 = vld [vmem:[%s9788_s1 + $0x1b0] sm:$0xff]   ;;  %v7907_v1 = vrot.slane %v2370_v37, 5  ;;  %v7931_v11 = vld [vmem:[%s9788_s1 + $0x1a8] sm:$0xff]  }
  0x9c   : > { %6433 = vmatmul.mubr.bf16.gmra.mxu1 %v9848_v51  ;;  %v2426_v29 = vshll.u32 %v5695_v19, 16  ;;  %v6859_v13 = vld [vmem:[%s9788_s1 + $0x170] sm:$0xff]   ;;  %v2315_v6 = vsel %vm7013_vm2, %v7837_v28, %v7770_v63  ;;  %v2325_v48 = vsel %vm7013_vm2, %v7842_v47, %v7827_v30  ;;  %v7921_v37 = vrot.slane %v2367_v55, 4 }
  0x9d   : > { %6500 = vmatprep.mubr.bf16.mxu1 %v6853_v52  ;;  %v2291_v52 = vsel %vm7013_vm2, %v7785_v58, %v7729_v60  ;;  %v2415_v60 = vor.u32 %v2414_v18, %v7877_v57  ;;  %v2423_v58 = vshrl.u32 %v5695_v19, 16  ;;  %v7923_v2 = vrot.slane %v2381_v14, 4  ;;  %v5698_v14 = vld [vmem:[%s6982_s26 + $0x90] sm:$0xf]  ;;  %v7954_v59 = vld [vmem:[%s6982_s26 + $0x94] sm:$0xf] }
  0x9e   : > { %v7933_v63 = vrot.slane %v2391_v24, 4  ;;  %v7935_v28 = vrot.slane %v2394_v49, 5  ;;  %v2432_v30 = vshll.u32 %v7900_v3, 16  ;;  %v2436_v47 = vshrl.u32 %v7900_v3, 16  ;;  %9849 = vst [vmem:[#allocation6_spill] sm:$0xff] %v7954_v59 }
  0x9f   : > { %v2349_v55 = vsel %vm7013_vm2, %v7869_v38, %v7845_v5  ;;  %v7948_v9 = vrot.slane %v2405_v20, 4  ;;  %v7950_v51 = vrot.slane %v2418_v40, 5  ;;  %v2428_v18 = vrot.slane %v2426_v29, 5  ;;  %v6863_v5 = vld [vmem:[%s9788_s1 + $0x168] sm:$0xff]  }
  0xa0   : > { %v2450_v38 = vshll.u32 %v5698_v14, 16  ;;  %v2456_v24 = vshll.u32 %v7954_v59, 16  ;;  %v2460_v49 = vshrl.u32 %v7954_v59, 16  ;;  %v5732_v40 = vcombine.low %v2267_v22, %v2277_v43 }
  0xa1   : > { %6549 = vmatmul.mubr.bf16.vlgmr.msra.gmra.mxu0 %v5730_v4  ;;  %v2339_v4 = vsel %vm7013_vm2, %v7859_v33, %v7804_v7  ;;  %v2442_v7 = vshll.u32 %v7926_v17, 16  ;;  %v2447_v33 = vshrl.u32 %v5698_v14, 16  ;;  %v5733_v20 = vcombine.low %v2291_v52, %v2301_v50 }
  0xa2   : > { %6629 = vmatpush3.bf16.msra.mxu0 %v7656_v15  ;;  %6552 = vmatprep.mubr.bf16.mxu0 %v5731_v54  ;;  %v7956_v15 = vrot.slane %v2415_v60, 4  ;;  %v2425_v54 = vrot.slane %v2423_v58, 4  ;;  %v7965_v19 = vrot.slane %v2432_v30, 5  ;;  %v6858_v60 = vld [vmem:[%s6982_s26 + $0x30] sm:$0xff]   ;;  %v6868_v58 = vld [vmem:[%s9788_s1 + $0x1a0] sm:$0xff]   ;;  %v2452_v14 = vrot.slane %v2450_v38, 5 }
  0xa3   : > { %6630 = vmatprep.subr.bf16.mxu0 %v6860_v12  ;;  %v2449_v29 = vrot.slane %v2447_v33, 4  ;;  %v2462_v22 = vrot.slane %v2460_v49, 4  ;;  %v7973_v43 = vcombine.low %v2315_v6, %v2325_v48  ;;  %v7976_v52 = vcombine.low %v2339_v4, %v2349_v55  ;;  %v5701_v30 = vld [vmem:[%s6982_s26 + $0x9c] sm:$0xf]  ;;  %v7998_v4 = vld [vmem:[%s6982_s26 + $0xa4] sm:$0x1] }
  0xa4   : > { %6501 = vmatmul.mubr.bf16.vlgmr.msra.gmra.mxu1 %v6854_v35  ;;  %v2438_v35 = vrot.slane %v2436_v47, 4  ;;  %v2429_v48 = vor.u32 %v2428_v18, %v2425_v54  ;;  %v7995_v47 = vld [vmem:[%s6982_s26 + $0xa0] sm:$0xf]  ;;  %9852 = vst [vmem:[#allocation9_spill] sm:$0xff] %v7998_v4  ;;  %v2471_v55 = vshrl.u32 %v5701_v30, 16  ;;  %v2474_v33 = vshll.u32 %v5701_v30, 16 }
  0xa5   : > { %6581 = vmatpush3.bf16.msra.mxu1 %v7651_v36  ;;  %6504 = vmatprep.mubr.bf16.mxu1 %v6857_v25  ;;  %v7971_v36 = vrot.slane %v2456_v24, 5  ;;  %v2373_v25 = vsel %vm7013_vm2, %v7921_v37, %v7907_v1  ;;  %9851 = vst [vmem:[#allocation8_spill] sm:$0xff] %v7995_v47  ;;  %v6861_v38 = vld [vmem:[%s6982_s26 + $0x3c] sm:$0xff]   ;;  %v2480_v37 = vshll.u32 %v7995_v47, 16  ;;  %v2484_v24 = vshrl.u32 %v7995_v47, 16 }
  0xa6   : > { %6582 = vmatprep.subr.bf16.mxu1 %v6859_v13  ;;  %6631 = vmatpush3.bf16.msra.mxu0 %v6860_v12  ;;  %v7987_v12 = vld [vmem:[%s6982_s26 + $0x98] sm:$0x1]  ;;  %v2439_v1 = vor.u32 %v2438_v35, %v7965_v19  ;;  %v6867_v54 = vld [vmem:[%s9788_s1 + $0x160] sm:$0xff]   ;;  %v2453_v18 = vor.u32 %v2452_v14, %v2449_v29  ;;  %v2473_v30 = vrot.slane %v2471_v55, 4  ;;  %v2476_v49 = vrot.slane %v2474_v33, 5 }
  0xa7   : > { %6632 = vmatprep.subr.bf16.mxu0 %v7931_v11  ;;  %9850 = vst [vmem:[#allocation7_spill] sm:$0xff] %v7987_v12  ;;  %v2466_v35 = vshll.u32 %v7987_v12, 16  ;;  %v2486_v6 = vrot.slane %v2484_v24, 4  ;;  %v2490_v50 = vshll.u32 %v7998_v4, 16  ;;  %v5704_v47 = vld [vmem:[%s6982_s26 + $0xa8] sm:$0xf] }
  0xa8   : > { %v6871_v29 = vld [vmem:[%s9788_s1 + $0x158] sm:$0xff]   ;;  %v8021_v14 = vrot.slane %v2429_v48, 4  ;;  %v2495_v55 = vshrl.u32 %v5704_v47, 16  ;;  %v2498_v33 = vshll.u32 %v5704_v47, 16  ;;  %v8034_v4 = vld [vmem:[%s6982_s26 + $0xb0] sm:$0x1] }
  0xa9   : > { %6553 = vmatmul.mubr.bf16.gmra.mxu0 %v5732_v40  ;;  %6583 = vmatpush3.bf16.msra.mxu1 %v6859_v13  ;;  %v6872_v13 = vld [vmem:[%s9788_s1 + $0x198] sm:$0xff]   ;;  %v2463_v40 = vor.u32 %v2462_v22, %v7971_v36  ;;  %v8023_v22 = vrot.slane %v2442_v7, 5  ;;  %v6862_v48 = vld [vmem:[%s6982_s26 + $0x48] sm:$0xff]   ;;  %v8037_v7 = vrot.slane %v2439_v1, 4  ;;  %v8039_v12 = vrot.slane %v2453_v18, 4 }
  0xaa   : > { %6556 = vmatprep.mubr.bf16.mxu0 %v5733_v20  ;;  %6584 = vmatprep.subr.bf16.mxu1 %v6863_v5  ;;  %v8014_v20 = vrot.slane %v2480_v37, 5  ;;  %v2477_v37 = vor.u32 %v2476_v49, %v2473_v30  ;;  %v8041_v59 = vrot.slane %v2466_v35, 5  ;;  %v6875_v49 = vld [vmem:[%s9788_s1 + $0x150] sm:$0xff]   ;;  %v8058_v18 = vrot.slane %v2498_v33, 5 }
  0xab   : > { %6633 = vmatpush3.bf16.msra.mxu0 %v7931_v11  ;;  %v8026_v11 = vld [vmem:[%s6982_s26 + $0xac] sm:$0xf]  ;;  %v2514_v35 = vshll.u32 %v8034_v4, 16 }
  0xac   : > { %6505 = vmatmul.mubr.bf16.gmra.mxu1 %v6858_v60  ;;  %6634 = vmatprep.subr.bf16.mxu0 %v6868_v58  ;;  %9853 = vst [vmem:[#allocation10_spill] sm:$0xff] %v8026_v11  ;;  %v2397_v60 = vsel %vm7013_vm2, %v7933_v63, %v7935_v28  ;;  %v2487_v24 = vor.u32 %v2486_v6, %v8014_v20  ;;  %v2504_v47 = vshll.u32 %v8026_v11, 16  ;;  %v6865_v63 = vld [vmem:[%s6982_s26 + $0x54] sm:$0xff]   ;;  %v8048_v28 = vrot.slane %v2463_v40, 4 }
  0xad   : > { %6508 = vmatprep.mubr.bf16.mxu1 %v6861_v38  ;;  %6585 = vmatpush3.bf16.msra.mxu1 %v6863_v5  ;;  %v6876_v5 = vld [vmem:[%s9788_s1 + $0x190] sm:$0xff]   ;;  %v8050_v6 = vrot.slane %v2490_v50, 5  ;;  %v8052_v38 = vrot.slane %v2495_v55, 4  ;;  %v2508_v1 = vshrl.u32 %v8026_v11, 16  ;;  %v8067_v40 = vrot.slane %v2477_v37, 4 }
  0xae   : > { %6586 = vmatprep.subr.bf16.mxu1 %v6867_v54  ;;  %v8069_v30 = vrot.slane %v2487_v24, 4  ;;  %v5707_v55 = vld [vmem:[%s6982_s26 + $0xb4] sm:$0xf]  ;;  %v8073_v11 = vld [vmem:[%s6982_s26 + $0xb8] sm:$0xf]  ;;  %v6879_v24 = vld [vmem:[%s9788_s1 + $0x148] sm:$0xff]  }
  0xaf   : > { %6635 = vmatpush3.bf16.msra.mxu0 %v6868_v58  ;;  %v9854_v58 = vsel %vm7013_vm2, %v7871_v46, %v7849_v21  ;;  %9855 = vst [vmem:[#allocation11_spill] sm:$0xff] %v8073_v11  ;;  %v2411_v21 = vsel %vm7013_vm2, %v7948_v9, %v7877_v57  ;;  %v8085_v46 = vrot.slane %v2504_v47, 5  ;;  %v5710_v37 = vld [vmem:[%s6982_s26 + $0xc0] sm:$0xf]  ;;  %v2421_v57 = vsel %vm7013_vm2, %v7956_v15, %v7950_v51  ;;  %v8112_v47 = vld [vmem:[%s6982_s26 + $0xc4] sm:$0xf] }
  0xb0   : > { %6636 = vmatprep.subr.bf16.mxu0 %v6872_v13  ;;  %v5736_v50 = vcombine.low %v9854_v58, %v2373_v25  ;;  %v2519_v25 = vshrl.u32 %v5707_v55, 16  ;;  %v2435_v9 = vsel %vm7013_vm2, %v8021_v14, %v7965_v19  ;;  %9858 = vst [vmem:[#allocation13_spill] sm:$0xff] %v8112_v47  ;;  %v8115_v51 = vld [vmem:[%s6982_s26 + $0xc8] sm:$0x1]  ;;  %v2552_v58 = vshll.u32 %v8112_v47, 16 }
  0xb1   : > { %6557 = vmatmul.mubr.bf16.gmra.mxu0 %v7973_v43  ;;  %6587 = vmatpush3.bf16.msra.mxu1 %v6867_v54  ;;  %v9856_v43 = vsel %vm7013_vm2, %v7923_v2, %v7861_v53  ;;  %v2510_v54 = vrot.slane %v2508_v1, 4  ;;  %v2522_v53 = vshll.u32 %v5707_v55, 16  ;;  %v2528_v2 = vshll.u32 %v8073_v11, 16 }
  0xb2   : > { %6560 = vmatprep.mubr.bf16.mxu0 %v7976_v52  ;;  %v5737_v33 = vcombine.low %v9856_v43, %v2397_v60  ;;  %6588 = vmatprep.subr.bf16.mxu1 %v6871_v29  ;;  %v6880_v52 = vld [vmem:[%s9788_s1 + $0x188] sm:$0xff]   ;;  %v2532_v60 = vshrl.u32 %v8073_v11, 16  ;;  %v2521_v15 = vrot.slane %v2519_v25, 4  ;;  %v9859_v55 = vrot.slane %v7520_v32, 5 }
  0xb3   : > { %6637 = vmatpush3.bf16.msra.mxu0 %v6872_v13  ;;  %v2445_v13 = vsel %vm7013_vm2, %v8037_v7, %v8023_v22  ;;  %v2524_v19 = vrot.slane %v2522_v53, 5  ;;  %v8117_v14 = vrot.slane %v2528_v2, 5  ;;  %v2543_v22 = vshrl.u32 %v5710_v37, 16  ;;  %v6866_v2 = vld [vmem:[%s6982_s26 + $0x60] sm:$0xff]  }
  0xb4   : > { %6509 = vmatmul.mubr.bf16.gmra.mxu1 %v6862_v48  ;;  %6638 = vmatprep.subr.bf16.mxu0 %v6876_v5  ;;  %v8109_v48 = vld [vmem:[%s6982_s26 + $0xbc] sm:$0x1]  ;;  %v2534_v1 = vrot.slane %v2532_v60, 4  ;;  %v2546_v7 = vshll.u32 %v5710_v37, 16  ;;  %v8122_v43 = vrot.slane %v9859_v55, 4  ;;  %v8127_v25 = vrot.slane %v2514_v35, 5 }
  0xb5   : > { %9857 = vst [vmem:[#allocation12_spill] sm:$0xff] %v8109_v48  ;;  %6512 = vmatprep.mubr.bf16.mxu1 %v6865_v63  ;;  %6589 = vmatpush3.bf16.msra.mxu1 %v6871_v29  ;;  %v2501_v63 = vor.u32 %v8058_v18, %v8052_v38  ;;  %v2511_v29 = vor.u32 %v2510_v54, %v8085_v46  ;;  %v2556_v53 = vshrl.u32 %v8112_v47, 16  ;;  %v2538_v60 = vshll.u32 %v8109_v48, 16  ;;  %v6869_v38 = vld [vmem:[%s6982_s26 + $0x6c] sm:$0xff]   ;;  %v8147_v48 = vld [vmem:[%s6982_s26 + $0x18] sm:$0xe] }
  0xb6   : > { %6590 = vmatprep.subr.bf16.mxu1 %v6875_v49  ;;  %v2545_v37 = vrot.slane %v2543_v22, 4  ;;  %v2548_v11 = vrot.slane %v2546_v7, 5  ;;  %v8132_v55 = vrot.slane %v2552_v58, 5  ;;  %v2525_v18 = vor.u32 %v2524_v19, %v2521_v15  ;;  %v6883_v22 = vld [vmem:[%s9788_s1 + $0x140] sm:$0xff]   ;;  %v8144_v58 = vld [vmem:[%s6982_s26 + $0xc] sm:$0xe] }
  0xb7   : > { %6639 = vmatpush3.bf16.msra.mxu0 %v6876_v5  ;;  %v6884_v5 = vld [vmem:[%s9788_s1 + $0x180] sm:$0xff]   ;;  %v2535_v35 = vor.u32 %v2534_v1, %v8117_v14  ;;  %v2558_v54 = vrot.slane %v2556_v53, 4  ;;  %v2562_v47 = vshll.u32 %v8115_v51, 16  ;;  %v5738_v15 = vcombine.low %v2411_v21, %v2421_v57 }
  0xb8   : > { %6640 = vmatprep.subr.bf16.mxu0 %v6880_v52  ;;  %v2549_v7 = vor.u32 %v2548_v11, %v2545_v37  ;;  %v5739_v19 = vcombine.low %v2435_v9, %v2445_v13  ;;  %v8155_v1 = vrot.slane %v2501_v63, 4  ;;  %v8157_v11 = vrot.slane %v2511_v29, 4  ;;  %v6870_v9 = vld [vmem:[%s6982_s26 + $0x78] sm:$0xff]   ;;  %v6873_v37 = vld [vmem:[%s6982_s26 + $0x84] sm:$0xff]  }
  0xb9   : > { %6561 = vmatmul.mubr.bf16.gmra.mxu0 %v5736_v50  ;;  %6591 = vmatpush3.bf16.msra.mxu1 %v6875_v49  ;;  %v8152_v49 = vld [vmem:[%s9788_s1 + $0x238] sm:$0xff]   ;;  %v2559_v50 = vor.u32 %v2558_v54, %v8132_v55  ;;  %v8166_v53 = vrot.slane %v2535_v35, 4  ;;  %v8168_v21 = vrot.slane %v2538_v60, 5  ;;  %v8174_v63 = vrot.slane %v2562_v47, 5  ;;  %v5756_v60 = vld [vmem:[%s6982_s26 + $0x30] sm:$0xe] }
  0xba   : > { %6564 = vmatprep.mubr.bf16.mxu0 %v5737_v33  ;;  %6592 = vmatprep.subr.bf16.mxu1 %v6879_v24  ;;  %v8162_v33 = vld [vmem:[%s9788_s1 + $0x1f8] sm:$0xff]   ;;  %v8172_v13 = vrot.slane %v2549_v7, 4  ;;  %v2957_v29 = vrot.slane %v7594_v42, 5  ;;  %v9860_v35 = vld [vmem:[#allocation2_spill] sm:$0xff]  ;;  %v5772_v47 = vrot.slane %v5756_v60, 9  ;;  %v9863_v60 = vld [vmem:[#allocation3_spill] sm:$0xff] }
  0xbb   : > { %6641 = vmatpush3.bf16.msra.mxu0 %v6880_v52  ;;  %v8164_v52 = vrot.slane %v2525_v18, 4  ;;  %v9861_v7 = vld [vmem:[#allocation5_spill] sm:$0xff]  ;;  %v2978_v18 = vrot.slane %v7677_v0, 5  ;;  %v2493_v0 = vsel %vm7013_vm2, %v8069_v30, %v8050_v6  ;;  %v2992_v30 = vrot.slane %v7768_v41, 5 }
  0xbc   : > { %6513 = vmatmul.mubr.bf16.gmra.mxu1 %v6866_v2  ;;  %6642 = vmatprep.subr.bf16.mxu0 %v6884_v5  ;;  %v2975_v57 = vrot.slane %v9861_v7, 5  ;;  %v9862_v2 = vld [vmem:[#allocation4_spill] sm:$0xff] }
  0xbd   : > { %6516 = vmatprep.mubr.bf16.mxu1 %v6869_v38  ;;  %6593 = vmatpush3.bf16.msra.mxu1 %v6879_v24  ;;  %v8179_v24 = vrot.slane %v2559_v50, 4  ;;  %v2961_v38 = vrot.slane %v7611_v61, 5  ;;  %v2459_v50 = vsel %vm7013_vm2, %v8039_v12, %v7971_v36  ;;  %v2982_v54 = vrot.slane %v9862_v2, 5  ;;  %v5757_v12 = vld [vmem:[%s6982_s26 + $0x3c] sm:$0xe] }
  0xbe   : > { %6594 = vmatprep.subr.bf16.mxu1 %v6883_v22  ;;  %v8201_v7 = vsel %vm7324_vm5, %v5772_v47, %v2975_v57  ;;  %v2977_v36 = vrot.slane %v2975_v57, 4  ;;  %v5773_v2 = vrot.slane %v5757_v12, 9  ;;  %v6874_v47 = vld [vmem:[%s6982_s26 + $0x90] sm:$0xff]   ;;  %v2999_v12 = vrot.slane %v7788_v34, 5 }
  0xbf   : > { %6643 = vmatpush3.bf16.msra.mxu0 %v6884_v5  ;;  %v2469_v5 = vsel %vm7013_vm2, %v8048_v28, %v8041_v59  ;;  %v2483_v59 = vsel %vm7013_vm2, %v8067_v40, %v8014_v20  ;;  %v2984_v28 = vrot.slane %v2982_v54, 4  ;;  %v2989_v20 = vrot.slane %v7727_v39, 5 }
  0xc0   : > { %6724 = vmatprep.subr.bf16.mxu0 %v8152_v49  ;;  %v8215_v57 = vsel %vm7324_vm5, %v2977_v36, %v2978_v18  ;;  %v5741_v18 = vcombine.low %v2483_v59, %v2493_v0  ;;  %v8230_v39 = vsel %vm7324_vm5, %v5773_v2, %v2982_v54  ;;  %v2507_v36 = vsel %vm7013_vm2, %v8155_v1, %v8085_v46  ;;  %v5759_v54 = vld [vmem:[%s6982_s26 + $0x54] sm:$0xe] }
  0xc1   : > { %6565 = vmatmul.mubr.bf16.gmra.mxu0 %v5738_v15  ;;  %6595 = vmatpush3.bf16.msra.mxu1 %v6883_v22  ;;  %v2971_v15 = vrot.slane %v9863_v60, 5  ;;  %v2985_v22 = vrot.slane %v7706_v45, 5  ;;  %v5804_v40 = vcombine.low %v8201_v7, %v8215_v57  ;;  %v5758_v45 = vld [vmem:[%s6982_s26 + $0x48] sm:$0xe]  ;;  %v2517_v46 = vsel %vm7013_vm2, %v8157_v11, %v8127_v25  ;;  %v6894_v7 = vld [vmem:[%s6982_s26 + $0x54] sm:$0xff]  }
  0xc2   : > { %6568 = vmatprep.mubr.bf16.mxu0 %v5739_v19  ;;  %6676 = vmatprep.subr.bf16.mxu1 %v8162_v33  ;;  %v5740_v19 = vcombine.low %v2459_v50, %v2469_v5  ;;  %v2991_v50 = vrot.slane %v2989_v20, 4  ;;  %v6877_v5 = vld [vmem:[%s6982_s26 + $0x9c] sm:$0xff]   ;;  %v3003_v2 = vrot.slane %v7792_v31, 5  ;;  %v2531_v34 = vsel %vm7013_vm2, %v8164_v52, %v8117_v14 }
  0xc3   : > { %v8222_v6 = vsel %vm7324_vm5, %v2984_v28, %v2985_v22  ;;  %v5775_v28 = vrot.slane %v5759_v54, 9  ;;  %v5760_v22 = vld [vmem:[%s6982_s26 + $0x60] sm:$0xe]  ;;  %v3006_v25 = vrot.slane %v7840_v16, 5  ;;  %v2541_v11 = vsel %vm7013_vm2, %v8166_v53, %v8168_v21 }
  0xc4   : > { %6517 = vmatmul.mubr.bf16.gmra.mxu1 %v6870_v9  ;;  %v2996_v9 = vrot.slane %v7762_v10, 5  ;;  %v5805_v41 = vcombine.low %v8230_v39, %v8222_v6  ;;  %v8245_v59 = vsel %vm7324_vm5, %v2991_v50, %v2992_v30  ;;  %v3010_v14 = vrot.slane %v7832_v8, 5  ;;  %v5986_v6 = vld [vmem:[%s6982_s26 + $0x24] sm:$0xe] }
  0xc5   : > { %6520 = vmatprep.mubr.bf16.mxu1 %v6873_v37  ;;  %v5774_v37 = vrot.slane %v5758_v45, 9  ;;  %v3005_v45 = vrot.slane %v3003_v2, 4  ;;  %v5742_v52 = vcombine.low %v2507_v36, %v2517_v46  ;;  %v3013_v8 = vrot.slane %v7853_v62, 5  ;;  %v5762_v36 = vld [vmem:[%s6982_s26 + $0x78] sm:$0xe] }
  0xc6   : > { %v2998_v0 = vrot.slane %v2996_v9, 4  ;;  %v8272_v31 = vsel %vm7324_vm5, %v5775_v28, %v2996_v9  ;;  %v3012_v9 = vrot.slane %v3010_v14, 4  ;;  %v3017_v54 = vrot.slane %v7857_v44, 5 }
  0xc7   : > { %v8241_v10 = vsel %vm7324_vm5, %v5774_v37, %v2989_v20  ;;  %v5776_v20 = vrot.slane %v5760_v22, 9  ;;  %v8284_v53 = vsel %vm7324_vm5, %v3005_v45, %v3006_v25  ;;  %v5743_v37 = vcombine.low %v2531_v34, %v2541_v11 }
  0xc8   : > { %v8300_v46 = vsel %vm7324_vm5, %v3012_v9, %v3013_v8  ;;  %v5778_v62 = vrot.slane %v5762_v36, 9  ;;  %v3024_v28 = vrot.slane %v7900_v3, 5  ;;  %v3019_v44 = vrot.slane %v3017_v54, 4  ;;  %v6885_v8 = vld [vmem:[%s6982_s26 + $0x18] sm:$0xff]   ;;  %v9868_v36 = vld [vmem:[#allocation8_spill] sm:$0xff] }
  0xc9   : > { %6569 = vmatmul.mubr.bf16.gmra.mxu0 %v5740_v19  ;;  %v8263_v19 = vsel %vm7324_vm5, %v2998_v0, %v2999_v12  ;;  %v8279_v16 = vsel %vm7324_vm5, %v5776_v20, %v3003_v2  ;;  %v3020_v0 = vrot.slane %v7864_v26, 5  ;;  %v3027_v26 = vrot.slane %v7926_v17, 5  ;;  %v5763_v20 = vld [vmem:[%s6982_s26 + $0x84] sm:$0xe] }
  0xca   : > { %6572 = vmatprep.mubr.bf16.mxu0 %v5741_v18  ;;  %v5761_v18 = vld [vmem:[%s6982_s26 + $0x6c] sm:$0xe]  ;;  %v2555_v2 = vsel %vm7013_vm2, %v8172_v13, %v8132_v55  ;;  %v8312_v34 = vsel %vm7324_vm5, %v5778_v62, %v3017_v54  ;;  %v2565_v3 = vsel %vm7013_vm2, %v8179_v24, %v8174_v63  ;;  %v5779_v25 = vrot.slane %v5763_v20, 9  ;;  %v9866_v63 = vld [vmem:[#allocation6_spill] sm:$0xff] }
  0xcb   : > { %v5777_v21 = vrot.slane %v5761_v18, 9  ;;  %v8321_v17 = vsel %vm7324_vm5, %v3019_v44, %v3020_v0  ;;  %v3026_v11 = vrot.slane %v3024_v28, 4  ;;  %v9864_v45 = vrot.slane %v7520_v32, 5  ;;  %v5764_v18 = vld [vmem:[%s6982_s26 + $0x90] sm:$0xe]  ;;  %v6897_v62 = vld [vmem:[%s6982_s26 + $0x60] sm:$0xff]  }
  0xcc   : > { %6521 = vmatmul.mubr.bf16.gmra.mxu1 %v6874_v47  ;;  %v6878_v47 = vld [vmem:[%s6982_s26 + $0xa8] sm:$0xff]   ;;  %v9865_v55 = vrot.slane %v8144_v58, 9  ;;  %v3031_v24 = vrot.slane %v9866_v63, 5  ;;  %v8338_v32 = vsel %vm7324_vm5, %v5779_v25, %v3024_v28  ;;  %v3038_v54 = vrot.slane %v9868_v36, 5 }
  0xcd   : > { %6524 = vmatprep.mubr.bf16.mxu1 %v6877_v5  ;;  %v6881_v5 = vld [vmem:[%s6982_s26 + $0xb4] sm:$0xff]   ;;  %v8296_v12 = vsel %vm7324_vm5, %v5777_v21, %v3010_v14  ;;  %v5755_v14 = vld [vmem:[%s6982_s26 + $0x24] sm:$0xe]  ;;  %v9867_v21 = vld [vmem:[#allocation7_spill] sm:$0xff]  ;;  %v8342_v58 = vsel %vm7324_vm5, %v3026_v11, %v3027_v26  ;;  %v5744_v0 = vcombine.low %v2555_v2, %v2565_v3  ;;  %v2958_v28 = vsel %vm7324_vm5, %v8122_v43, %v2957_v29 }
  0xce   : > { %v2955_v13 = vsel %vm7324_vm5, %v9865_v55, %v9864_v45  ;;  %v3034_v9 = vrot.slane %v9867_v21, 5  ;;  %v3033_v44 = vrot.slane %v3031_v24, 4  ;;  %v6882_v45 = vld [vmem:[%s6982_s26 + $0xc0] sm:$0xff]   ;;  %v2963_v26 = vrot.slane %v2961_v38, 4  ;;  %v5765_v2 = vld [vmem:[%s6982_s26 + $0x9c] sm:$0xe] }
  0xcf   : > { %v3040_v3 = vrot.slane %v3038_v54, 4  ;;  %v5781_v11 = vrot.slane %v5765_v2, 9  ;;  %v9870_v55 = vld [vmem:[#allocation10_spill] sm:$0xff]  ;;  %v5766_v63 = vld [vmem:[%s6982_s26 + $0xa8] sm:$0xe]  ;;  %v5801_v21 = vcombine.low %v2955_v13, %v2958_v28  ;;  %v9874_v28 = vrot.slane %v8147_v48, 9 }
  0xd0   : > { %v8363_v25 = vsel %vm7324_vm5, %v3033_v44, %v3034_v9  ;;  %v3045_v42 = vrot.slane %v9870_v55, 5  ;;  %v8486_v43 = vld [vmem:[%s6982_s26 + $0x34] sm:$0xf] }
  0xd1   : > { %6573 = vmatmul.mubr.bf16.gmra.mxu0 %v5742_v52  ;;  %v8376_v9 = vsel %vm7324_vm5, %v5781_v11, %v3038_v54  ;;  %v5767_v54 = vld [vmem:[%s6982_s26 + $0xb4] sm:$0xe]  ;;  %v3879_v39 = vshll.u32 %v8486_v43, 16 }
  0xd2   : > { %6576 = vmatprep.mubr.bf16.mxu0 %v5743_v37  ;;  %v5780_v37 = vrot.slane %v5764_v18, 9  ;;  %v5771_v18 = vrot.slane %v5755_v14, 9  ;;  %v3047_v36 = vrot.slane %v3045_v42, 4  ;;  %v9871_v14 = vrot.slane %v9860_v35, 5 }
  0xd3   : > { %v5783_v55 = vrot.slane %v5767_v54, 9 }
  0xd4   : > { %6525 = vmatmul.mubr.bf16.gmra.mxu1 %v6878_v47  ;;  %v9869_v47 = vld [vmem:[#allocation9_spill] sm:$0xff]  ;;  %v2970_v44 = vrot.slane %v9871_v14, 4  ;;  %v9876_v61 = vmov %v9871_v14  ;;  %v3062_v14 = vrot.slane %v8115_v51, 5  ;;  %v5903_v51 = vld [vmem:[%s6982_s26 + $0x30] sm:$0xf] }
  0xd5   : > { %6528 = vmatprep.mubr.bf16.mxu1 %v6881_v5  ;;  %v3041_v20 = vrot.slane %v9869_v47, 5  ;;  %v8358_v5 = vsel %vm7324_vm5, %v5780_v37, %v3031_v24  ;;  %v3048_v24 = vrot.slane %v8034_v4, 5  ;;  %v5782_v37 = vrot.slane %v5766_v63, 9 }
  0xd6   : > { %v9875_v63 = vrot.slane %v7625_v23, 5  ;;  %v2969_v48 = vsel %vm7324_vm5, %v5771_v18, %v9876_v61  ;;  %v2972_v23 = vsel %vm7324_vm5, %v2970_v44, %v2971_v15  ;;  %v8456_v61 = vld [vmem:[%s6982_s26 + $0x28] sm:$0xf] }
  0xd7   : > { %v8370_v29 = vsel %vm7324_vm5, %v3040_v3, %v3041_v20  ;;  %v9872_v20 = vld [vmem:[#allocation11_spill] sm:$0xff]  ;;  %v8385_v4 = vsel %vm7324_vm5, %v5782_v37, %v3045_v42  ;;  %v8389_v13 = vsel %vm7324_vm5, %v3047_v36, %v3048_v24  ;;  %v2962_v3 = vsel %vm7324_vm5, %v9874_v28, %v2961_v38  ;;  %v5768_v37 = vld [vmem:[%s6982_s26 + $0xc0] sm:$0xe]  ;;  %v9877_v38 = vld [vmem:[#allocation13_spill] sm:$0xff] }
  0xd8   : > { %v3052_v2 = vrot.slane %v9872_v20, 5  ;;  %v2965_v24 = vsel %vm7324_vm5, %v2963_v26, %v9875_v63  ;;  %v3059_v36 = vrot.slane %v9877_v38, 5  ;;  %v5784_v18 = vrot.slane %v5768_v37, 9  ;;  %v6892_v20 = vld [vmem:[%s9788_s1 + $0x230] sm:$0xff]   ;;  %v5900_v63 = vld [vmem:[%s6982_s26 + $0x24] sm:$0xf] }
  0xd9   : > { %6577 = vmatmul.mubr.bf16.gmra.mxu0 %v5744_v0  ;;  %v5802_v15 = vcombine.low %v2962_v3, %v2965_v24  ;;  %v5803_v54 = vcombine.low %v2969_v48, %v2972_v23  ;;  %v6891_v28 = vld [vmem:[%s9788_s1 + $0x1f0] sm:$0xff]   ;;  %v6890_v48 = vld [vmem:[%s6982_s26 + $0x3c] sm:$0xff]   ;;  %v3846_v37 = vshrl.u32 %v5900_v63, 16  ;;  %v6893_v38 = vld [vmem:[%s6982_s26 + $0x48] sm:$0xff]   ;;  %v3855_v23 = vshll.u32 %v8456_v61, 16 }
  0xda   : > { %6644 = vmatprep.mubr.bf16.mxu0 %v6885_v8  ;;  %v9873_v8 = vld [vmem:[#allocation12_spill] sm:$0xff]  ;;  %v3054_v42 = vrot.slane %v3052_v2, 4  ;;  %v8420_v26 = vsel %vm7324_vm5, %v5783_v55, %v3052_v2  ;;  %v3061_v60 = vrot.slane %v3059_v36, 4  ;;  %v8433_v44 = vsel %vm7324_vm5, %v5784_v18, %v3059_v36  ;;  %v5897_v2 = vld [vmem:[%s6982_s26 + $0x18] sm:$0xf]  ;;  %v6896_v55 = vld [vmem:[%s9788_s1 + $0x228] sm:$0xff]  }
  0xdb   : > { %v3055_v0 = vrot.slane %v9873_v8, 5  ;;  %v3825_v24 = vshll.u32 %v5897_v2, 16  ;;  %v6895_v36 = vld [vmem:[%s9788_s1 + $0x1e8] sm:$0xff]   ;;  %v5899_v18 = vld [vmem:[%s6982_s26 + $0x20] sm:$0x1]  ;;  %v3848_v11 = vrot.slane %v3846_v37, 4 }
  0xdc   : > { %6529 = vmatmul.mubr.bf16.gmra.mxu1 %v6882_v45  ;;  %v6886_v45 = vld [vmem:[%s6982_s26 + $0x24] sm:$0xff]   ;;  %v8438_v8 = vsel %vm7324_vm5, %v3061_v60, %v3062_v14  ;;  %v3849_v14 = vshll.u32 %v5900_v63, 16  ;;  %v8476_v63 = vld [vmem:[%s6982_s26 + $0x2c] sm:$0x1]  ;;  %v3870_v37 = vshrl.u32 %v5903_v51, 16 }
  0xdd   : > { %6596 = vmatprep.mubr.bf16.mxu1 %v5801_v21  ;;  %v6889_v21 = vld [vmem:[%s6982_s26 + $0x30] sm:$0xff]   ;;  %v8424_v35 = vsel %vm7324_vm5, %v3054_v42, %v3055_v0  ;;  %v8441_v0 = vld [vmem:[%s6982_s26 + $0x1c] sm:$0xf]  ;;  %v3822_v42 = vshrl.u32 %v5897_v2, 16 }
  0xde   : > { %v4593_v3 = vrot.slane %v8441_v0, 5  ;;  %v3851_v47 = vrot.slane %v3849_v14, 5 }
  0xdf   : > { %v3824_v60 = vrot.slane %v3822_v42, 4  ;;  %v6899_v42 = vld [vmem:[%s9788_s1 + $0x1e0] sm:$0xff]  }
  0xe1   : > { %6645 = vmatmul.mubr.bf16.vlgmr.msra.gmra.mxu0 %v6886_v45  ;;  %v3835_v45 = vshrl.u32 %v8441_v0, 16 }
  0xe2   : > { %6725 = vmatpush3.bf16.msra.mxu0 %v8152_v49  ;;  %6648 = vmatprep.mubr.bf16.mxu0 %v6889_v21  ;;  %v3831_v49 = vshll.u32 %v8441_v0, 16  ;;  %v3859_v21 = vshrl.u32 %v8456_v61, 16 }
  0xe3   : > { %6726 = vmatprep.subr.bf16.mxu0 %v6892_v20 }
  0xe4   : > { %6597 = vmatmul.mubr.bf16.vlgmr.msra.gmra.mxu1 %v5802_v15  ;;  %v5985_v15 = vld [vmem:[%s6982_s26 + $0x18] sm:$0xe]  ;;  %v8471_v2 = vrot.slane %v3831_v49, 5  ;;  %v3841_v49 = vshll.u32 %v5899_v18, 16  ;;  %v3861_v0 = vrot.slane %v3859_v21, 4 }
  0xe5   : > { %6677 = vmatpush3.bf16.msra.mxu1 %v8162_v33  ;;  %6600 = vmatprep.mubr.bf16.mxu1 %v5803_v54  ;;  %v6900_v33 = vld [vmem:[%s9788_s1 + $0x220] sm:$0xff]   ;;  %v3837_v54 = vrot.slane %v3835_v45, 4  ;;  %v8483_v45 = vrot.slane %v3855_v23, 5  ;;  %v6904_v23 = vld [vmem:[%s9788_s1 + $0x218] sm:$0xff]  }
  0xe6   : > { %6678 = vmatprep.subr.bf16.mxu1 %v6891_v28  ;;  %6727 = vmatpush3.bf16.msra.mxu0 %v6892_v20  ;;  %v3827_v20 = vrot.slane %v3825_v24, 5 }
  0xe7   : > { %6728 = vmatprep.subr.bf16.mxu0 %v6896_v55  ;;  %v3838_v21 = vor.u32 %v3837_v54, %v8471_v2  ;;  %v3862_v54 = vor.u32 %v3861_v0, %v8483_v45 }
  0xe9   : > { %6649 = vmatmul.mubr.bf16.gmra.mxu0 %v6890_v48  ;;  %6679 = vmatpush3.bf16.msra.mxu1 %v6891_v28  ;;  %v6001_v48 = vrot.slane %v5985_v15, 9  ;;  %v4596_v28 = vrot.slane %v5899_v18, 5  ;;  %v4595_v18 = vrot.slane %v4593_v3, 4  ;;  %v3865_v15 = vshll.u32 %v8476_v63, 16 }
  0xea   : > { %6652 = vmatprep.mubr.bf16.mxu0 %v6893_v38  ;;  %6680 = vmatprep.subr.bf16.mxu1 %v6895_v36  ;;  %v3873_v38 = vshll.u32 %v5903_v51, 16  ;;  %v4600_v51 = vrot.slane %v8456_v61, 5  ;;  %v3883_v61 = vshrl.u32 %v8486_v43, 16 }
  0xeb   : > { %6729 = vmatpush3.bf16.msra.mxu0 %v6896_v55  ;;  %v3828_v55 = vor.u32 %v3827_v20, %v3824_v60  ;;  %v6903_v60 = vld [vmem:[%s9788_s1 + $0x1d8] sm:$0xff]   ;;  %v8509_v20 = vrot.slane %v3841_v49, 5  ;;  %v6908_v49 = vld [vmem:[%s9788_s1 + $0x210] sm:$0xff]  }
  0xec   : > { %v8481_v24 = vpop.f32.mrf.mxu0  ;;  %6601 = vmatmul.mubr.bf16.gmra.mxu1 %v5804_v40  ;;  %6730 = vmatprep.subr.bf16.mxu0 %v6900_v33  ;;  %v8491_v14 = vpop.f32.mrf.mxu1  ;;  %v3852_v40 = vor.u32 %v3851_v47, %v3848_v11  ;;  %v3872_v47 = vrot.slane %v3870_v37, 4  ;;  %v3875_v11 = vrot.slane %v3873_v38, 5  ;;  %v8536_v37 = vld [vmem:[%s6982_s26 + $0x40] sm:$0xf]  ;;  %v4602_v50 = vrot.slane %v4600_v51, 4 }
  0xed   : > { %9878 = vst [vmem:[#allocation2_spill] sm:$0xff] %v8491_v14  ;;  %6604 = vmatprep.mubr.bf16.mxu1 %v5805_v41  ;;  %6681 = vmatpush3.bf16.msra.mxu1 %v6895_v36  ;;  %v8516_v41 = vsel %vm7324_vm5, %v6001_v48, %v4593_v3  ;;  %v5906_v36 = vld [vmem:[%s6982_s26 + $0x3c] sm:$0xf]  ;;  %v8525_v0 = vrot.slane %v3828_v55, 4  ;;  %v8531_v3 = vsel %vm7324_vm5, %v4595_v18, %v4596_v28  ;;  %v8533_v48 = vrot.slane %v3865_v15, 5  ;;  %v6907_v55 = vld [vmem:[%s9788_s1 + $0x1d0] sm:$0xff]  }
  0xee   : > { %v8502_v57 = vpop.f32.mrf.mxu0  ;;  %6682 = vmatprep.subr.bf16.mxu1 %v6899_v42  ;;  %v8520_v52 = vpop.f32.mrf.mxu1  ;;  %v8543_v22 = vrot.slane %v3852_v40, 4  ;;  %v4603_v28 = vrot.slane %v8476_v63, 5  ;;  %v3863_v18 = vrot.slane %v3862_v54, 4  ;;  %v8547_v15 = vld [vmem:[%s6982_s26 + $0x38] sm:$0x1]  ;;  %v3897_v30 = vshll.u32 %v5906_v36, 16 }
  0xef   : > { %6731 = vmatpush3.bf16.msra.mxu0 %v6900_v33  ;;  %9879 = vst [vmem:[#allocation5_spill] sm:$0xff] %v8520_v52  ;;  %v8527_v33 = vrot.slane %v3838_v21, 4  ;;  %v6002_v21 = vrot.slane %v5986_v6, 9  ;;  %v3876_v1 = vor.u32 %v3875_v11, %v3872_v47  ;;  %v8551_v52 = vrot.slane %v3883_v61, 4  ;;  %v5987_v40 = vld [vmem:[%s6982_s26 + $0x30] sm:$0xe] }
  0xf0   : > { %6732 = vmatprep.subr.bf16.mxu0 %v6904_v23  ;;  %v8538_v38 = vpop.f32.mrf.mxu0  ;;  %v3903_v6 = vshll.u32 %v8536_v37, 16  ;;  %v3907_v63 = vshrl.u32 %v8536_v37, 16  ;;  %v8559_v54 = vpop.f32.mrf.mxu1  ;;  %v9882_v11 = vcombine.low %v8272_v31, %v8263_v19  ;;  %v6898_v61 = vld [vmem:[%s6982_s26 + $0x6c] sm:$0xff]   ;;  %v8592_v19 = vsel %vm7324_vm5, %v4602_v50, %v4603_v28  ;;  %v8610_v28 = vld [vmem:[%s6982_s26 + $0x44] sm:$0x1] }
  0xf1   : > { %6653 = vmatmul.mubr.bf16.gmra.mxu0 %v6894_v7  ;;  %6683 = vmatpush3.bf16.msra.mxu1 %v6899_v42  ;;  %v8549_v7 = vrot.slane %v3879_v39, 5  ;;  %v3894_v42 = vshrl.u32 %v5906_v36, 16  ;;  %9881 = vst [vmem:[#allocation4_spill] sm:$0xff] %v8559_v54  ;;  %v3834_v39 = vsel %vm7013_vm2, %v8525_v0, %v8471_v2  ;;  %v3844_v47 = vsel %vm7013_vm2, %v8527_v33, %v8509_v20  ;;  %v6901_v36 = vld [vmem:[%s6982_s26 + $0x78] sm:$0xff]   ;;  %v8603_v33 = vld [vmem:[%s6982_s26 + $0x4c] sm:$0xf] }
  0xf2   : > { %6656 = vmatprep.mubr.bf16.mxu0 %v6897_v62  ;;  %6684 = vmatprep.subr.bf16.mxu1 %v6903_v60  ;;  %v9880_v62 = vcombine.low %v8241_v10, %v8245_v59  ;;  %v4607_v59 = vrot.slane %v8486_v43, 5  ;;  %v3858_v2 = vsel %vm7013_vm2, %v8543_v22, %v8483_v45  ;;  %v8588_v20 = vsel %vm7324_vm5, %v6002_v21, %v4600_v51  ;;  %v5909_v43 = vld [vmem:[%s6982_s26 + $0x48] sm:$0xf]  ;;  %v8614_v54 = vpop.f32.mrf.mxu1  ;;  %v5988_v14 = vld [vmem:[%s6982_s26 + $0x3c] sm:$0xe] }
  0xf3   : > { %6733 = vmatpush3.bf16.msra.mxu0 %v6904_v23  ;;  %v6912_v23 = vld [vmem:[%s9788_s1 + $0x208] sm:$0xff]   ;;  %v3889_v31 = vshll.u32 %v8547_v15, 16  ;;  %v3868_v22 = vsel %vm7013_vm2, %v3863_v18, %v8533_v48  ;;  %v6003_v45 = vrot.slane %v5987_v40, 9  ;;  %v3896_v0 = vrot.slane %v3894_v42, 4  ;;  %9884 = vst [vmem:[#allocation6_spill] sm:$0xff] %v8614_v54  ;;  %v6915_v42 = vld [vmem:[%s9788_s1 + $0x1c0] sm:$0xff]  }
  0xf4   : > { %6605 = vmatmul.mubr.bf16.gmra.mxu1 %v9880_v62  ;;  %6734 = vmatprep.subr.bf16.mxu0 %v6908_v49  ;;  %v8580_v62 = vpop.f32.mrf.mxu0  ;;  %v3899_v51 = vrot.slane %v3897_v30, 5  ;;  %v8605_v50 = vrot.slane %v3876_v1, 4  ;;  %v3886_v21 = vor.u32 %v8551_v52, %v8549_v7  ;;  %v3909_v10 = vrot.slane %v3907_v63, 4  ;;  %v6916_v30 = vld [vmem:[%s9788_s1 + $0x200] sm:$0xff]  }
  0xf5   : > { %6608 = vmatprep.mubr.bf16.mxu1 %v9882_v11  ;;  %6685 = vmatpush3.bf16.msra.mxu1 %v6903_v60  ;;  %9883 = vst [vmem:[#allocation3_spill] sm:$0xff] %v8580_v62  ;;  %v6911_v60 = vld [vmem:[%s9788_s1 + $0x1c8] sm:$0xff]   ;;  %v8612_v11 = vrot.slane %v3903_v6, 5  ;;  %v4609_v48 = vrot.slane %v4607_v59, 4  ;;  %v3918_v1 = vshrl.u32 %v5909_v43, 16  ;;  %v3921_v18 = vshll.u32 %v5909_v43, 16 }
  0xf6   : > { %6686 = vmatprep.subr.bf16.mxu1 %v6907_v55  ;;  %v8625_v40 = vcombine.low %v3834_v39, %v3844_v47  ;;  %v3931_v63 = vshrl.u32 %v8603_v33, 16  ;;  %v8633_v43 = vrot.slane %v3889_v31, 5  ;;  %v3913_v54 = vshll.u32 %v8610_v28, 16  ;;  %v5912_v39 = vld [vmem:[%s6982_s26 + $0x54] sm:$0xf]  ;;  %v6902_v6 = vld [vmem:[%s6982_s26 + $0x84] sm:$0xff]  }
  0xf7   : > { %6735 = vmatpush3.bf16.msra.mxu0 %v6908_v49  ;;  %v4610_v49 = vrot.slane %v8547_v15, 5  ;;  %v8620_v52 = vpop.f32.mrf.mxu0  ;;  %v3927_v15 = vshll.u32 %v8603_v33, 16  ;;  %v4614_v31 = vrot.slane %v8536_v37, 5  ;;  %v9888_v37 = vcombine.low %v8296_v12, %v8300_v46  ;;  %v6905_v47 = vld [vmem:[%s6982_s26 + $0x90] sm:$0xff]  }
  0xf8   : > { %6736 = vmatprep.subr.bf16.mxu0 %v6912_v23  ;;  %9885 = vst [vmem:[#allocation7_spill] sm:$0xff] %v8620_v52 }
  0xf9   : > { %6657 = vmatmul.mubr.bf16.gmra.mxu0 %v6898_v61  ;;  %6687 = vmatpush3.bf16.msra.mxu1 %v6907_v55  ;;  %v8631_v61 = vcombine.low %v3858_v2, %v3868_v22  ;;  %v3900_v55 = vor.u32 %v3899_v51, %v3896_v0  ;;  %v3910_v2 = vor.u32 %v3909_v10, %v8612_v11  ;;  %v8649_v22 = vld [vmem:[%s6982_s26 + $0x58] sm:$0xf]  ;;  %v8656_v51 = vrot.slane %v3886_v21, 4 }
  0xfa   : > { %6660 = vmatprep.mubr.bf16.mxu0 %v6901_v36  ;;  %6688 = vmatprep.subr.bf16.mxu1 %v6911_v60  ;;  %v8644_v36 = vsel %vm7324_vm5, %v6003_v45, %v4607_v59  ;;  %v9886_v0 = vcombine.low %v8279_v16, %v8284_v53  ;;  %v8660_v59 = vsel %vm7324_vm5, %v4609_v48, %v4610_v49  ;;  %v3920_v45 = vrot.slane %v3918_v1, 4  ;;  %v8667_v16 = vpop.f32.mrf.mxu0  ;;  %v5911_v1 = vld [vmem:[%s6982_s26 + $0x50] sm:$0x1] }
  0xfb   : > { %6737 = vmatpush3.bf16.msra.mxu0 %v6912_v23  ;;  %v8654_v23 = vpop.f32.mrf.mxu1  ;;  %v3923_v10 = vrot.slane %v3921_v18, 5  ;;  %9889 = vst [vmem:[#allocation9_spill] sm:$0xff] %v8667_v16  ;;  %v6004_v53 = vrot.slane %v5988_v14, 9  ;;  %v3933_v21 = vrot.slane %v3931_v63, 4  ;;  %v3901_v48 = vrot.slane %v3900_v55, 4 }
  0xfc   : > { %6609 = vmatmul.mubr.bf16.gmra.mxu1 %v9886_v0  ;;  %9887 = vst [vmem:[#allocation8_spill] sm:$0xff] %v8654_v23  ;;  %6738 = vmatprep.subr.bf16.mxu0 %v6916_v30  ;;  %v8669_v0 = vrot.slane %v3927_v15, 5  ;;  %v3942_v23 = vshrl.u32 %v5912_v39, 16  ;;  %v3915_v49 = vrot.slane %v3913_v54, 5  ;;  %v3945_v18 = vshll.u32 %v5912_v39, 16  ;;  %v8685_v39 = vpop.f32.mrf.mxu0 }
  0xfd   : > { %6612 = vmatprep.mubr.bf16.mxu1 %v9888_v37  ;;  %6689 = vmatpush3.bf16.msra.mxu1 %v6911_v60  ;;  %v3951_v52 = vshll.u32 %v8649_v22, 16  ;;  %v3911_v12 = vrot.slane %v3910_v2, 4  ;;  %v4616_v46 = vrot.slane %v4614_v31, 4  ;;  %v4617_v37 = vrot.slane %v8610_v28, 5  ;;  %v8675_v60 = vpop.f32.mrf.mxu1  ;;  %v5915_v55 = vld [vmem:[%s6982_s26 + $0x60] sm:$0xf] }
  0xfe   : > { %6690 = vmatprep.subr.bf16.mxu1 %v6915_v42  ;;  %v3955_v14 = vshrl.u32 %v8649_v22, 16  ;;  %9890 = vst [vmem:[#allocation10_spill] sm:$0xff] %v8675_v60  ;;  %v3892_v15 = vsel %vm7013_vm2, %v8656_v51, %v8633_v43  ;;  %v3924_v63 = vor.u32 %v3923_v10, %v3920_v45  ;;  %v3934_v28 = vor.u32 %v3933_v21, %v8669_v0  ;;  %v5989_v60 = vld [vmem:[%s6982_s26 + $0x48] sm:$0xe] }
  0xff   : > { %6739 = vmatpush3.bf16.msra.mxu0 %v6916_v30  ;;  %v4621_v30 = vrot.slane %v8603_v33, 5  ;;  %v3937_v2 = vshll.u32 %v5911_v1, 16  ;;  %v3944_v16 = vrot.slane %v3942_v23, 4  ;;  %v3947_v62 = vrot.slane %v3945_v18, 5  ;;  %v8710_v10 = vpop.f32.mrf.mxu1 }
 0x100   : > { %v3906_v43 = vsel %vm7013_vm2, %v3901_v48, %v8612_v11  ;;  %v8694_v33 = vsel %vm7324_vm5, %v6004_v53, %v4614_v31  ;;  %v3916_v51 = vsel %vm7013_vm2, %v3911_v12, %v3915_v49  ;;  %v8702_v23 = vsel %vm7324_vm5, %v4616_v46, %v4617_v37  ;;  %9892 = vst [vmem:[#allocation11_spill] sm:$0xff] %v8710_v10  ;;  %v8713_v49 = vld [vmem:[%s6982_s26 + $0x64] sm:$0xf]  ;;  %v6906_v12 = vld [vmem:[%s6982_s26 + $0x9c] sm:$0xff]   ;;  %v8719_v46 = vpop.f32.mrf.mxu0 }
 0x101   : > { %6661 = vmatmul.mubr.bf16.gmra.mxu0 %v6902_v6  ;;  %6691 = vmatpush3.bf16.msra.mxu1 %v6915_v42  ;;  %v8696_v6 = vrot.slane %v3951_v52, 5  ;;  %v3957_v42 = vrot.slane %v3955_v14, 4  ;;  %v3966_v45 = vshrl.u32 %v5915_v55, 16  ;;  %v3969_v11 = vshll.u32 %v5915_v55, 16  ;;  %v6909_v55 = vld [vmem:[%s6982_s26 + $0xa8] sm:$0xff]  }
 0x102   : > { %6664 = vmatprep.mubr.bf16.mxu0 %v6905_v47  ;;  %v8705_v47 = vld [vmem:[%s6982_s26 + $0x5c] sm:$0x1]  ;;  %v9891_v31 = vcombine.low %v8312_v34, %v8321_v17  ;;  %v3925_v52 = vrot.slane %v3924_v63, 4  ;;  %v6005_v53 = vrot.slane %v5989_v60, 9  ;;  %v4623_v21 = vrot.slane %v4621_v30, 4 }
 0x103   : > { %v4624_v48 = vrot.slane %v5911_v1, 5  ;;  %v9893_v18 = vcombine.low %v8338_v32, %v8342_v58  ;;  %v3935_v37 = vrot.slane %v3934_v28, 4  ;;  %v3939_v14 = vrot.slane %v3937_v2, 5  ;;  %v5990_v63 = vld [vmem:[%s6982_s26 + $0x54] sm:$0xe]  ;;  %v8737_v28 = vpop.f32.mrf.mxu1 }
 0x104   : > { %6613 = vmatmul.mubr.bf16.gmra.mxu1 %v9891_v31  ;;  %v3948_v34 = vor.u32 %v3947_v62, %v3944_v16  ;;  %v4628_v17 = vrot.slane %v8649_v22, 5  ;;  %v3958_v60 = vor.u32 %v3957_v42, %v8696_v6  ;;  %v3961_v1 = vshll.u32 %v8705_v47, 16  ;;  %9895 = vst [vmem:[#allocation12_spill] sm:$0xff] %v8737_v28  ;;  %v5991_v62 = vld [vmem:[%s6982_s26 + $0x60] sm:$0xe] }
 0x105   : > { %6616 = vmatprep.mubr.bf16.mxu1 %v9893_v18  ;;  %v3968_v31 = vrot.slane %v3966_v45, 4  ;;  %v3971_v54 = vrot.slane %v3969_v11, 5  ;;  %v9894_v32 = vsel %vm7013_vm2, %v8605_v50, %v8549_v7  ;;  %v3975_v22 = vshll.u32 %v8713_v49, 16 }
 0x106   : > { %v8731_v58 = vcombine.low %v9894_v32, %v3892_v15  ;;  %v3979_v16 = vshrl.u32 %v8713_v49, 16  ;;  %v8739_v2 = vcombine.low %v3906_v43, %v3916_v51  ;;  %v3930_v42 = vsel %vm7013_vm2, %v3925_v52, %v8669_v0  ;;  %v5918_v15 = vld [vmem:[%s6982_s26 + $0x6c] sm:$0xf]  ;;  %v8757_v32 = vld [vmem:[%s6982_s26 + $0x70] sm:$0xf] }
 0x107   : > { %v8746_v7 = vsel %vm7324_vm5, %v6005_v53, %v4621_v30  ;;  %v8750_v50 = vsel %vm7324_vm5, %v4623_v21, %v4624_v48  ;;  %v8753_v45 = vpop.f32.mrf.mxu0  ;;  %v3949_v43 = vrot.slane %v3948_v34, 4  ;;  %v6006_v51 = vrot.slane %v5990_v63, 9  ;;  %v5917_v53 = vld [vmem:[%s6982_s26 + $0x68] sm:$0x1] }
 0x108   : > { %9896 = vst [vmem:[#allocation13_spill] sm:$0xff] %v8753_v45  ;;  %v4630_v11 = vrot.slane %v4628_v17, 4  ;;  %v4631_v18 = vrot.slane %v8705_v47, 5  ;;  %v3940_v0 = vsel %vm7013_vm2, %v3935_v37, %v3939_v14  ;;  %v3959_v30 = vrot.slane %v3958_v60, 4  ;;  %v5993_v45 = vld [vmem:[%s6982_s26 + $0x78] sm:$0xe] }
 0x109   : > { %6665 = vmatmul.mubr.bf16.gmra.mxu0 %v6906_v12  ;;  %v3963_v52 = vrot.slane %v3961_v1, 5  ;;  %v3972_v21 = vor.u32 %v3971_v54, %v3968_v31  ;;  %v8762_v48 = vrot.slane %v3975_v22, 5  ;;  %v3981_v12 = vrot.slane %v3979_v16, 4  ;;  %v6910_v31 = vld [vmem:[%s6982_s26 + $0xb4] sm:$0xff]  }
 0x10a   : > { %6668 = vmatprep.mubr.bf16.mxu0 %v6909_v55  ;;  %v3990_v34 = vshrl.u32 %v5918_v15, 16  ;;  %v3993_v63 = vshll.u32 %v5918_v15, 16  ;;  %v9897_v47 = vcombine.low %v8358_v5, %v8363_v25  ;;  %v4635_v14 = vrot.slane %v8713_v49, 5  ;;  %v8779_v5 = vpop.f32.mrf.mxu0 }
 0x10b   : > { %v3999_v54 = vshll.u32 %v8757_v32, 16  ;;  %v4003_v60 = vshrl.u32 %v8757_v32, 16  ;;  %v9899_v1 = vcombine.low %v8376_v9, %v8370_v29  ;;  %9900 = vst [vmem:[#allocation15_spill] sm:$0xff] %v8779_v5  ;;  %v8781_v25 = vcombine.low %v3930_v42, %v3940_v0  ;;  %v5921_v29 = vld [vmem:[%s6982_s26 + $0x78] sm:$0xf]  ;;  %v6913_v9 = vld [vmem:[%s6982_s26 + $0xc0] sm:$0xff]  }
 0x10c   : > { %6617 = vmatmul.mubr.bf16.gmra.mxu1 %v9897_v47  ;;  %v8768_v55 = vpop.f32.mrf.mxu1  ;;  %v3954_v22 = vsel %vm7013_vm2, %v3949_v43, %v8696_v6  ;;  %v8788_v49 = vsel %vm7324_vm5, %v6006_v51, %v4628_v17  ;;  %v8792_v16 = vsel %vm7324_vm5, %v4630_v11, %v4631_v18  ;;  %v3964_v15 = vsel %vm7013_vm2, %v3959_v30, %v3963_v52  ;;  %v8805_v43 = vld [vmem:[%s6982_s26 + $0x74] sm:$0x1]  ;;  %v8862_v5 = vld [vmem:[%s6982_s26 + $0x8c] sm:$0x1] }
 0x10d   : > { %9898 = vst [vmem:[#allocation14_spill] sm:$0xff] %v8768_v55  ;;  %6620 = vmatprep.mubr.bf16.mxu1 %v9899_v1  ;;  %v8798_v47 = vrot.slane %v3972_v21, 4  ;;  %v3985_v42 = vshll.u32 %v5917_v53, 16  ;;  %v6007_v0 = vrot.slane %v5991_v62, 9  ;;  %v8801_v1 = vld [vmem:[%s6982_s26 + $0x7c] sm:$0xf]  ;;  %v3982_v6 = vor.u32 %v3981_v12, %v8762_v48  ;;  %v8811_v21 = vpop.f32.mrf.mxu0 }
 0x10e   : > { %v4638_v17 = vrot.slane %v5917_v53, 5  ;;  %v3992_v51 = vrot.slane %v3990_v34, 4  ;;  %v3995_v11 = vrot.slane %v3993_v63, 5  ;;  %v8807_v18 = vpop.f32.mrf.mxu1  ;;  %v4637_v37 = vrot.slane %v4635_v14, 4  ;;  %9902 = vst [vmem:[#allocation17_spill] sm:$0xff] %v8811_v21 }
 0x10f   : > { %9901 = vst [vmem:[#allocation16_spill] sm:$0xff] %v8807_v18  ;;  %v8809_v55 = vrot.slane %v3999_v54, 5  ;;  %v4005_v30 = vrot.slane %v4003_v60, 4  ;;  %v4014_v52 = vshrl.u32 %v5921_v29, 16  ;;  %v5992_v53 = vld [vmem:[%s6982_s26 + $0x6c] sm:$0xe]  ;;  %v8818_v18 = vcombine.low %v3954_v22, %v3964_v15 }
 0x110   : > { %v4017_v12 = vshll.u32 %v5921_v29, 16  ;;  %v4023_v34 = vshll.u32 %v8801_v1, 16  ;;  %v4027_v63 = vshrl.u32 %v8801_v1, 16  ;;  %v8820_v54 = vrot.slane %v3985_v42, 5  ;;  %v5924_v62 = vld [vmem:[%s6982_s26 + $0x84] sm:$0xf]  ;;  %v8841_v42 = vpop.f32.mrf.mxu1 }
 0x111   : > { %6669 = vmatmul.mubr.bf16.gmra.mxu0 %v6910_v31  ;;  %9903 = vst [vmem:[#allocation18_spill] sm:$0xff] %v8818_v18  ;;  %v8824_v60 = vsel %vm7324_vm5, %v6007_v0, %v4635_v14  ;;  %v4009_v31 = vshll.u32 %v8805_v43, 16  ;;  %v8832_v28 = vrot.slane %v3982_v6, 4  ;;  %v4642_v22 = vrot.slane %v8757_v32, 5  ;;  %v8836_v15 = vld [vmem:[%s6982_s26 + $0x88] sm:$0xf] }
 0x112   : > { %6672 = vmatprep.mubr.bf16.mxu0 %v6913_v9  ;;  %v3996_v9 = vor.u32 %v3995_v11, %v3992_v51  ;;  %v9904_v14 = vcombine.low %v8385_v4, %v8389_v13  ;;  %9905 = vst [vmem:[#allocation19_spill] sm:$0xff] %v8841_v42  ;;  %v6914_v0 = vld [vmem:[%s6982_s26 + $0xcc] sm:$0xff]   ;;  %v8846_v10 = vsel %vm7324_vm5, %v4637_v37, %v4638_v17  ;;  %v6008_v6 = vrot.slane %v5992_v53, 9  ;;  %v8849_v11 = vpop.f32.mrf.mxu0  ;;  %v8855_v4 = vld [vmem:[%s6982_s26 + $0x80] sm:$0x1] }
 0x113   : > { %v4006_v29 = vor.u32 %v4005_v30, %v8809_v55  ;;  %v4016_v51 = vrot.slane %v4014_v52, 4  ;;  %9906 = vst [vmem:[#allocation20_spill] sm:$0xff] %v8849_v11  ;;  %v9907_v32 = vcombine.low %v8420_v26, %v8424_v35  ;;  %v4019_v13 = vrot.slane %v4017_v12, 5 }
 0x114   : > { %6621 = vmatmul.mubr.bf16.gmra.mxu1 %v9904_v14  ;;  %v8857_v14 = vrot.slane %v4023_v34, 5  ;;  %v4029_v42 = vrot.slane %v4027_v63, 4  ;;  %v4038_v21 = vshrl.u32 %v5924_v62, 16  ;;  %v4011_v37 = vrot.slane %v4009_v31, 5 }
 0x115   : > { %6624 = vmatprep.mubr.bf16.mxu1 %v9907_v32  ;;  %v4645_v17 = vrot.slane %v8805_v43, 5  ;;  %v4041_v30 = vshll.u32 %v5924_v62, 16  ;;  %v4047_v52 = vshll.u32 %v8836_v15, 16  ;;  %v3997_v53 = vrot.slane %v3996_v9, 4  ;;  %v8865_v32 = vpop.f32.mrf.mxu1 }
 0x116   : > { %v4644_v11 = vrot.slane %v4642_v22, 4  ;;  %v4040_v26 = vrot.slane %v4038_v21, 4  ;;  %v4051_v35 = vshrl.u32 %v8836_v15, 16  ;;  %v4007_v12 = vrot.slane %v4006_v29, 4 }
 0x117   : > { %v4033_v34 = vshll.u32 %v8855_v4, 16  ;;  %v4043_v63 = vrot.slane %v4041_v30, 5  ;;  %v8868_v31 = vrot.slane %v4047_v52, 5  ;;  %v4020_v62 = vor.u32 %v4019_v13, %v4016_v51  ;;  %v5994_v52 = vld [vmem:[%s6982_s26 + $0x84] sm:$0xe] }
 0x118   : > { %v8870_v43 = vpop.f32.mrf.mxu0  ;;  %v4030_v9 = vor.u32 %v4029_v42, %v8857_v14  ;;  %v4649_v21 = vrot.slane %v8801_v1, 5  ;;  %v4053_v18 = vrot.slane %v4051_v35, 4  ;;  %v9908_v29 = vcombine.low %v8516_v41, %v8531_v3 }
 0x119   : > { %6673 = vmatmul.mubr.bf16.gmra.mxu0 %v6914_v0  ;;  %v3988_v30 = vsel %vm7013_vm2, %v8832_v28, %v8820_v54  ;;  %v8886_v51 = vsel %vm7324_vm5, %v6008_v6, %v4642_v22  ;;  %v4057_v42 = vshll.u32 %v8862_v5, 16  ;;  %v4002_v41 = vsel %vm7013_vm2, %v3997_v53, %v8809_v55  ;;  %v5927_v54 = vld [vmem:[%s6982_s26 + $0x90] sm:$0xf] }
 0x11a   : > { %6740 = vmatprep.mubr.bf16.mxu0 %v9908_v29  ;;  %v8889_v1 = vpop.f32.mrf.mxu0  ;;  %v4044_v3 = vor.u32 %v4043_v63, %v4040_v26  ;;  %v4054_v13 = vor.u32 %v4053_v18, %v8868_v31  ;;  %v4656_v28 = vrot.slane %v8836_v15, 5  ;;  %v9910_v22 = vcombine.low %v8433_v44, %v8438_v8 }
 0x11b   : > { %v4012_v6 = vsel %vm7013_vm2, %v4007_v12, %v4011_v37  ;;  %v8907_v55 = vsel %vm7324_vm5, %v4644_v11, %v4645_v17  ;;  %v4035_v53 = vrot.slane %v4033_v34, 5  ;;  %v6009_v18 = vrot.slane %v5993_v45, 9  ;;  %v8916_v12 = vld [vmem:[%s6982_s26 + $0x94] sm:$0xf] }
 0x11c   : > { %v8898_v35 = vpop.f32.mrf.mxu1  ;;  %6625 = vmatmul.mubr.bf16.gmra.mxu1 %v9910_v22  ;;  %v8909_v26 = vpop.f32.mrf.mxu0  ;;  %v4021_v15 = vrot.slane %v4020_v62, 4  ;;  %v4031_v63 = vrot.slane %v4030_v9, 4  ;;  %v4651_v29 = vrot.slane %v4649_v21, 4  ;;  %v4652_v0 = vrot.slane %v8855_v4, 5 }
 0x11d   : > { %9909 = vst [vmem:[#allocation21_spill] sm:$0xff] %v8898_v35  ;;  %6692 = vmatprep.mubr.bf16.mxu1 %v8625_v40  ;;  %v4059_v8 = vrot.slane %v4057_v42, 5  ;;  %v6010_v37 = vrot.slane %v5994_v52, 9  ;;  %v4062_v11 = vshrl.u32 %v5927_v54, 16  ;;  %v4065_v17 = vshll.u32 %v5927_v54, 16 }
 0x11e   : > { %v8913_v44 = vpop.f32.mrf.mxu1  ;;  %v8918_v34 = vpop.f32.mrf.mxu0  ;;  %v4045_v45 = vrot.slane %v4044_v3, 4  ;;  %v4055_v22 = vrot.slane %v4054_v13, 4  ;;  %v4658_v40 = vrot.slane %v4656_v28, 4  ;;  %v4659_v62 = vrot.slane %v8862_v5, 5  ;;  %v8939_v54 = vld [vmem:[%s6982_s26 + $0x98] sm:$0x1] }
 0x11f   : > { %9911 = vst [vmem:[#allocation22_spill] sm:$0xff] %v8913_v44  ;;  %v9913_v4 = vsel %vm7013_vm2, %v8798_v47, %v8762_v48  ;;  %v8930_v52 = vcombine.low %v4002_v41, %v4012_v6  ;;  %v8936_v13 = vsel %vm7324_vm5, %v6009_v18, %v4649_v21  ;;  %v4026_v48 = vsel %vm7013_vm2, %v4021_v15, %v8857_v14  ;;  %v5930_v41 = vld [vmem:[%s6982_s26 + $0x9c] sm:$0xf]  ;;  %v8956_v6 = vld [vmem:[%s6982_s26 + $0xa0] sm:$0xf] }
 0x120   : > { %v8921_v9 = vpop.f32.mrf.mxu1  ;;  %v8928_v42 = vcombine.low %v9913_v4, %v3988_v30  ;;  %v6454_v5 = vpop.f32.mrf.mxu0  ;;  %v4036_v47 = vsel %vm7013_vm2, %v4031_v63, %v4035_v53  ;;  %v8951_v30 = vsel %vm7324_vm5, %v4651_v29, %v4652_v0  ;;  %v4071_v21 = vshll.u32 %v8916_v12, 16  ;;  %v9043_v35 = vld [vmem:[%s6982_s26 + $0xb0] sm:$0x1] }
 0x121   : > { %9912 = vst [vmem:[#allocation23_spill] sm:$0xff] %v8921_v9  ;;  %v9914_v9 = vcombine.low %v8588_v20, %v8592_v19  ;;  %v9916_v20 = vcombine.low %v8644_v36, %v8660_v59  ;;  %v8965_v19 = vsel %vm7324_vm5, %v6010_v37, %v4656_v28  ;;  %v4064_v14 = vrot.slane %v4062_v11, 4  ;;  %v8980_v37 = vld [vmem:[%s6982_s26 + $0x90] sm:$0xe] }
 0x122   : > { %v8958_v18 = vpop.f32.mrf.mxu1  ;;  %v4067_v53 = vrot.slane %v4065_v17, 5  ;;  %v4075_v0 = vshrl.u32 %v8916_v12, 16  ;;  %v1588_v15 = vpop.f32.mrf.mxu0  ;;  %v4050_v63 = vsel %vm7013_vm2, %v4045_v45, %v8868_v31  ;;  %v4060_v29 = vsel %vm7013_vm2, %v4055_v22, %v4059_v8 }
 0x123   : > { %6741 = vmatmul.mubr.bf16.vlgmr.msra.gmra.mxu0 %v9914_v9  ;;  %9915 = vst [vmem:[#allocation24_spill] sm:$0xff] %v8958_v18  ;;  %v8975_v36 = vsel %vm7324_vm5, %v4658_v40, %v4659_v62  ;;  %v4081_v59 = vshll.u32 %v8939_v54, 16  ;;  %v4086_v11 = vshrl.u32 %v5930_v41, 16  ;;  %v4089_v17 = vshll.u32 %v5930_v41, 16 }
 0x124   : > { %6744 = vmatprep.mubr.bf16.mxu0 %v9916_v20  ;;  %v6406_v28 = vpop.f32.mrf.mxu1  ;;  %6693 = vmatmul.mubr.bf16.vlgmr.msra.gmra.mxu1 %v8631_v61  ;;  %v4095_v9 = vshll.u32 %v8956_v6, 16  ;;  %v4099_v31 = vshrl.u32 %v8956_v6, 16  ;;  %v6455_v45 = vpop.f32.mrf.mxu0  ;;  %v8986_v22 = vcombine.low %v4026_v48, %v4036_v47  ;;  %v8990_v40 = vrot.slane %v4071_v21, 5  ;;  %v9004_v61 = vld [vmem:[%s6982_s26 + $0xa4] sm:$0x1] }
 0x125   : > { %v1144_v8 = vadd.f32 %v6406_v28, %v8481_v24  ;;  %6696 = vmatprep.mubr.bf16.mxu1 %v8731_v58  ;;  %v8992_v4 = vcombine.low %v4050_v63, %v4060_v29  ;;  %v4068_v20 = vor.u32 %v4067_v53, %v4064_v14  ;;  %v4077_v24 = vrot.slane %v4075_v0, 4  ;;  %v5933_v28 = vld [vmem:[%s6982_s26 + $0xa8] sm:$0xf]  ;;  %v9009_v14 = vld [vmem:[%s6982_s26 + $0xac] sm:$0xf] }
 0x126   : > { %v1135_v62 = vpop.f32.mrf.mxu1  ;;  %v1591_v48 = vpop.f32.mrf.mxu0  ;;  %v9000_v47 = vrot.slane %v4081_v59, 5  ;;  %v6011_v21 = vrot.slane %v8980_v37, 9  ;;  %v4088_v29 = vrot.slane %v4086_v11, 4  ;;  %v4091_v18 = vrot.slane %v4089_v17, 5 }
 0x127   : > { %v8997_v3 = vadd.f32 %v6454_v5, %v1144_v8  ;;  %v1136_v58 = vadd.f32 %v1135_v62, %v8502_v57  ;;  %v9006_v44 = vrot.slane %v4095_v9, 5  ;;  %v4101_v41 = vrot.slane %v4099_v31, 4  ;;  %v9922_v62 = vld [vmem:[#allocation3_spill] sm:$0xff] }
 0x128   : > { %v6407_v63 = vpop.f32.mrf.mxu1  ;;  %v6458_v5 = vpop.f32.mrf.mxu0  ;;  %v9919_v0 = vcombine.low %v8694_v33, %v8702_v23  ;;  %v4110_v59 = vshrl.u32 %v5933_v28, 16  ;;  %v4113_v37 = vshll.u32 %v5933_v28, 16  ;;  %v9920_v11 = vcombine.low %v8746_v7, %v8750_v50 }
 0x129   : > { %9917 = vst [vmem:[#allocation25_spill] sm:$0xff] %v8997_v3  ;;  %v9011_v53 = vadd.f32 %v1588_v15, %v1136_v58  ;;  %v1147_v57 = vadd.f32 %v6407_v63, %v8538_v38  ;;  %v9020_v17 = vrot.slane %v4068_v20, 4  ;;  %v4078_v15 = vor.u32 %v4077_v24, %v8990_v40  ;;  %v5996_v58 = vld [vmem:[%s6982_s26 + $0x9c] sm:$0xe] }
 0x12a   : > { %v1138_v8 = vpop.f32.mrf.mxu1  ;;  %v4663_v9 = vrot.slane %v8916_v12, 5  ;;  %v4105_v38 = vshll.u32 %v9004_v61, 16  ;;  %v1604_v23 = vpop.f32.mrf.mxu0  ;;  %v4666_v28 = vrot.slane %v8939_v54, 5  ;;  %v4119_v63 = vshll.u32 %v9009_v14, 16 }
 0x12b   : > { %9918 = vst [vmem:[#allocation26_spill] sm:$0xff] %v9011_v53  ;;  %6745 = vmatmul.mubr.bf16.gmra.mxu0 %v9919_v0  ;;  %v9025_v31 = vadd.f32 %v6455_v45, %v1147_v57  ;;  %v1139_v33 = vadd.f32 %v1138_v8, %v9922_v62  ;;  %v4092_v50 = vor.u32 %v4091_v18, %v4088_v29  ;;  %v4670_v12 = vrot.slane %v8956_v6, 5  ;;  %v9923_v57 = vld [vmem:[#allocation7_spill] sm:$0xff]  ;;  %v9924_v6 = vld [vmem:[#allocation9_spill] sm:$0xff] }
 0x12c   : > { %6748 = vmatprep.mubr.bf16.mxu0 %v9920_v11  ;;  %v6410_v7 = vpop.f32.mrf.mxu1  ;;  %6697 = vmatmul.mubr.bf16.gmra.mxu1 %v8739_v2  ;;  %v4102_v20 = vor.u32 %v4101_v41, %v9006_v44  ;;  %v4123_v45 = vshrl.u32 %v9009_v14, 16  ;;  %v6459_v8 = vpop.f32.mrf.mxu0  ;;  %v4112_v54 = vrot.slane %v4110_v59, 4  ;;  %v4115_v11 = vrot.slane %v4113_v37, 5 }
 0x12d   : > { %9921 = vst [vmem:[#allocation27_spill] sm:$0xff] %v9025_v31  ;;  %v9035_v24 = vadd.f32 %v1591_v48, %v1139_v33  ;;  %v1160_v0 = vadd.f32 %v6410_v7, %v9923_v57  ;;  %6700 = vmatprep.mubr.bf16.mxu1 %v8781_v25  ;;  %v4079_v31 = vrot.slane %v4078_v15, 4  ;;  %v4665_v2 = vrot.slane %v4663_v9, 4 }
 0x12e   : > { %v1151_v62 = vpop.f32.mrf.mxu1  ;;  %v4107_v18 = vrot.slane %v4105_v38, 5  ;;  %v6012_v29 = vrot.slane %v5996_v58, 9  ;;  %v1607_v3 = vpop.f32.mrf.mxu0  ;;  %v9045_v48 = vrot.slane %v4119_v63, 5  ;;  %v4125_v33 = vrot.slane %v4123_v45, 4 }
 0x12f   : > { %v9039_v41 = vadd.f32 %v6458_v5, %v1160_v0  ;;  %v1152_v53 = vadd.f32 %v1151_v62, %v9924_v6  ;;  %v4093_v57 = vrot.slane %v4092_v50, 4  ;;  %v4103_v25 = vrot.slane %v4102_v20, 4 }
 0x130   : > { %v6411_v7 = vpop.f32.mrf.mxu1  ;;  %v4672_v59 = vrot.slane %v4670_v12, 4  ;;  %v4673_v37 = vrot.slane %v9004_v61, 5  ;;  %v6462_v38 = vpop.f32.mrf.mxu0  ;;  %v9925_v58 = vcombine.low %v8788_v49, %v8792_v16  ;;  %v9056_v63 = vsel %vm7324_vm5, %v6011_v21, %v4663_v9  ;;  %v5997_v21 = vld [vmem:[%s6982_s26 + $0xa8] sm:$0xe] }
 0x131   : > { %v9048_v15 = vadd.f32 %v1604_v23, %v1152_v53  ;;  %v1163_v5 = vadd.f32 %v6411_v7, %v8685_v39  ;;  %v4116_v50 = vor.u32 %v4115_v11, %v4112_v54  ;;  %v9926_v20 = vcombine.low %v8824_v60, %v8846_v10 }
 0x132   : > { %v1154_v45 = vpop.f32.mrf.mxu1  ;;  %v4074_v39 = vsel %vm7013_vm2, %v9020_v17, %v8990_v40  ;;  %v4084_v49 = vsel %vm7013_vm2, %v4079_v31, %v9000_v47  ;;  %v9070_v16 = vsel %vm7324_vm5, %v4665_v2, %v4666_v28  ;;  %v4129_v61 = vshll.u32 %v9043_v35, 16  ;;  %v1620_v60 = vpop.f32.mrf.mxu0  ;;  %v5936_v17 = vld [vmem:[%s6982_s26 + $0xb4] sm:$0xf]  ;;  %v9927_v47 = vld [vmem:[#allocation18_spill] sm:$0xff]  ;;  %v9099_v2 = vld [vmem:[%s6982_s26 + $0xb8] sm:$0xf] }
 0x133   : > { %6749 = vmatmul.mubr.bf16.gmra.mxu0 %v9925_v58  ;;  %v9074_v53 = vadd.f32 %v6459_v8, %v1163_v5  ;;  %v1155_v10 = vadd.f32 %v1154_v45, %v8719_v46  ;;  %v4126_v9 = vor.u32 %v4125_v33, %v9045_v48  ;;  %v4677_v40 = vrot.slane %v9009_v14, 5  ;;  %v9928_v8 = vld [vmem:[#allocation13_spill] sm:$0xff] }
 0x134   : > { %6752 = vmatprep.mubr.bf16.mxu0 %v9926_v20  ;;  %v6414_v23 = vpop.f32.mrf.mxu1  ;;  %6701 = vmatmul.mubr.bf16.gmra.mxu1 %v9927_v47  ;;  %v4098_v31 = vsel %vm7013_vm2, %v4093_v57, %v9006_v44  ;;  %v4108_v28 = vsel %vm7013_vm2, %v4103_v25, %v4107_v18  ;;  %v9088_v46 = vsel %vm7324_vm5, %v6012_v29, %v4670_v12  ;;  %v6463_v11 = vpop.f32.mrf.mxu0  ;;  %v4117_v62 = vrot.slane %v4116_v50, 4  ;;  %v9929_v57 = vld [vmem:[#allocation15_spill] sm:$0xff]  ;;  %v9933_v47 = vld [vmem:[#allocation20_spill] sm:$0xff] }
 0x135   : > { %v9092_v0 = vsel %vm7324_vm5, %v4672_v59, %v4673_v37  ;;  %v9094_v14 = vadd.f32 %v1607_v3, %v1155_v10  ;;  %v1176_v54 = vadd.f32 %v6414_v23, %v9928_v8  ;;  %6704 = vmatprep.mubr.bf16.mxu1 %v8928_v42  ;;  %v6013_v44 = vrot.slane %v5997_v21, 9 }
 0x136   : > { %v1167_v18 = vpop.f32.mrf.mxu1  ;;  %v4131_v6 = vrot.slane %v4129_v61, 5  ;;  %v4680_v12 = vrot.slane %v9043_v35, 5  ;;  %v4134_v29 = vshrl.u32 %v5936_v17, 16  ;;  %v4137_v33 = vshll.u32 %v5936_v17, 16  ;;  %v1623_v25 = vpop.f32.mrf.mxu0 }
 0x137   : > { %v9102_v7 = vadd.f32 %v6462_v38, %v1176_v54  ;;  %v1168_v3 = vadd.f32 %v1167_v18, %v9929_v57  ;;  %v4127_v59 = vrot.slane %v4126_v9, 4  ;;  %v4679_v37 = vrot.slane %v4677_v40, 4  ;;  %v9930_v38 = vld [vmem:[#allocation17_spill] sm:$0xff] }
 0x138   : > { %v6415_v42 = vpop.f32.mrf.mxu1  ;;  %v9105_v5 = vcombine.low %v4074_v39, %v4084_v49  ;;  %v6043_v58 = vcombine.low %v9056_v63, %v9070_v16  ;;  %v9109_v50 = vcombine.low %v4098_v31, %v4108_v28  ;;  %v4143_v35 = vshll.u32 %v9099_v2, 16  ;;  %v6466_v61 = vpop.f32.mrf.mxu0  ;;  %v5939_v49 = vld [vmem:[%s6982_s26 + $0xc0] sm:$0xf]  ;;  %v9123_v16 = vld [vmem:[%s6982_s26 + $0xc4] sm:$0xf] }
 0x139   : > { %v9112_v45 = vadd.f32 %v1620_v60, %v1168_v3  ;;  %v1179_v20 = vadd.f32 %v6415_v42, %v9930_v38  ;;  %v9931_v21 = vcombine.low %v8886_v51, %v8907_v55  ;;  %v6044_v39 = vcombine.low %v9088_v46, %v9092_v0  ;;  %v9938_v46 = vld [vmem:[#allocation6_spill] sm:$0xff] }
 0x13a   : > { %v4147_v63 = vshrl.u32 %v9099_v2, 16  ;;  %v1170_v10 = vpop.f32.mrf.mxu1  ;;  %v9932_v60 = vcombine.low %v8936_v13, %v8951_v30  ;;  %v4122_v51 = vsel %vm7013_vm2, %v4117_v62, %v9045_v48  ;;  %v9133_v55 = vsel %vm7324_vm5, %v6013_v44, %v4677_v40  ;;  %v1636_v28 = vpop.f32.mrf.mxu0  ;;  %v9145_v30 = vld [vmem:[%s6982_s26 + $0xbc] sm:$0x1]  ;;  %v5998_v48 = vld [vmem:[%s6982_s26 + $0xb4] sm:$0xe] }
 0x13b   : > { %6753 = vmatmul.mubr.bf16.gmra.mxu0 %v9931_v21  ;;  %v4136_v9 = vrot.slane %v4134_v29, 4  ;;  %v4139_v17 = vrot.slane %v4137_v33, 5  ;;  %v9135_v23 = vadd.f32 %v6463_v11, %v1179_v20  ;;  %v1171_v31 = vadd.f32 %v1170_v10, %v9933_v47  ;;  %v9167_v20 = vld [vmem:[%s6982_s26 + $0xc8] sm:$0x1] }
 0x13c   : > { %6756 = vmatprep.mubr.bf16.mxu0 %v9932_v60  ;;  %v4132_v8 = vsel %vm7013_vm2, %v4127_v59, %v4131_v6  ;;  %v9142_v13 = vsel %vm7324_vm5, %v4679_v37, %v4680_v12  ;;  %v6418_v54 = vpop.f32.mrf.mxu1  ;;  %6705 = vmatmul.mubr.bf16.gmra.mxu1 %v8930_v52  ;;  %v9149_v40 = vrot.slane %v4143_v35, 5  ;;  %v4158_v11 = vshrl.u32 %v5939_v49, 16  ;;  %v6467_v29 = vpop.f32.mrf.mxu0 }
 0x13d   : > { %v4161_v62 = vshll.u32 %v5939_v49, 16  ;;  %v4167_v44 = vshll.u32 %v9123_v16, 16  ;;  %v9152_v18 = vadd.f32 %v1623_v25, %v1171_v31  ;;  %v1192_v6 = vadd.f32 %v6418_v54, %v8870_v43  ;;  %6708 = vmatprep.mubr.bf16.mxu1 %v8986_v22 }
 0x13e   : > { %v4149_v12 = vrot.slane %v4147_v63, 4  ;;  %v4171_v33 = vshrl.u32 %v9123_v16, 16  ;;  %v1183_v57 = vpop.f32.mrf.mxu1  ;;  %v4140_v3 = vor.u32 %v4139_v17, %v4136_v9  ;;  %v4153_v52 = vshll.u32 %v9145_v30, 16  ;;  %v1639_v43 = vpop.f32.mrf.mxu0  ;;  %v5942_v9 = vld [vmem:[%s6982_s26 + $0xcc] sm:$0xf] }
 0x13f   : > { %v6014_v59 = vrot.slane %v5998_v48, 9  ;;  %v4684_v37 = vrot.slane %v9099_v2, 5  ;;  %v9159_v42 = vadd.f32 %v6466_v61, %v1192_v6  ;;  %v1184_v25 = vadd.f32 %v1183_v57, %v8889_v1  ;;  %v5999_v48 = vld [vmem:[%s6982_s26 + $0xc0] sm:$0xe] }
 0x140   : > { %v9162_v35 = vcombine.low %v4122_v51, %v4132_v8  ;;  %v6045_v22 = vcombine.low %v9133_v55, %v9142_v13  ;;  %v6419_v38 = vpop.f32.mrf.mxu1  ;;  %v4160_v21 = vrot.slane %v4158_v11, 4  ;;  %v4163_v63 = vrot.slane %v4161_v62, 5  ;;  %v6470_v10 = vpop.f32.mrf.mxu0  ;;  %v9189_v8 = vld [vmem:[%s6982_s26 + $0xd0] sm:$0xf] }
 0x141   : > { %v9169_v49 = vrot.slane %v4167_v44, 5  ;;  %v4173_v2 = vrot.slane %v4171_v33, 4  ;;  %v9171_v61 = vadd.f32 %v1636_v28, %v1184_v25  ;;  %v1195_v1 = vadd.f32 %v6419_v38, %v8909_v26 }
 0x142   : > { %v9934_v60 = vcombine.low %v8965_v19, %v8975_v36  ;;  %v4150_v51 = vor.u32 %v4149_v12, %v9149_v40  ;;  %v4687_v55 = vrot.slane %v9145_v30, 5  ;;  %v1186_v17 = vpop.f32.mrf.mxu1  ;;  %v9180_v47 = vrot.slane %v4140_v3, 4  ;;  %v1652_v13 = vpop.f32.mrf.mxu0 }
 0x143   : > { %v9182_v31 = vrot.slane %v4153_v52, 5  ;;  %v9186_v26 = vsel %vm7324_vm5, %v6014_v59, %v4684_v37  ;;  %v4686_v28 = vrot.slane %v4684_v37, 4  ;;  %v9191_v19 = vadd.f32 %v6467_v29, %v1195_v1  ;;  %v9935_v29 = vld [vmem:[#allocation2_spill] sm:$0xff] }
 0x144   : > { %6757 = vmatmul.mubr.bf16.gmra.mxu0 %v9934_v60  ;;  %v1187_v36 = vadd.f32 %v1186_v17, %v8918_v34  ;;  %v4177_v30 = vshll.u32 %v9167_v20, 16  ;;  %v6422_v54 = vpop.f32.mrf.mxu1  ;;  %6709 = vmatmul.mubr.bf16.gmra.mxu1 %v8992_v4  ;;  %v4164_v11 = vor.u32 %v4163_v63, %v4160_v21  ;;  %v4174_v62 = vor.u32 %v4173_v2, %v9169_v49  ;;  %v6471_v57 = vpop.f32.mrf.mxu0 }
 0x145   : > { %6760 = vmatprep.mubr.bf16.mxu0 %v6043_v58  ;;  %v4691_v58 = vrot.slane %v9123_v16, 5  ;;  %v4182_v44 = vshrl.u32 %v5942_v9, 16  ;;  %v4185_v6 = vshll.u32 %v5942_v9, 16  ;;  %v1208_v33 = vadd.f32 %v6422_v54, %v9935_v29  ;;  %6712 = vmatprep.mubr.bf16.mxu1 %v9105_v5 }
 0x146   : > { %v9199_v12 = vadd.f32 %v1639_v43, %v1187_v36  ;;  %v4191_v34 = vshll.u32 %v9189_v8, 16  ;;  %v4195_v3 = vshrl.u32 %v9189_v8, 16  ;;  %v1199_v16 = vpop.f32.mrf.mxu1  ;;  %v4151_v52 = vrot.slane %v4150_v51, 4  ;;  %v9936_v43 = vld [vmem:[#allocation5_spill] sm:$0xff]  ;;  %v1655_v21 = vpop.f32.mrf.mxu0  ;;  %v9937_v36 = vld [vmem:[#allocation4_spill] sm:$0xff] }
 0x147   : > { %v4688_v4 = vsel %vm7324_vm5, %v4686_v28, %v4687_v55  ;;  %v6015_v59 = vrot.slane %v5999_v48, 9  ;;  %v4694_v37 = vrot.slane %v9167_v20, 5  ;;  %v9208_v25 = vadd.f32 %v6470_v10, %v1208_v33  ;;  %v5944_v20 = vld [vmem:[%s6982_s26 + $0xd4] sm:$0x1] }
 0x148   : > { %v1200_v38 = vadd.f32 %v1199_v16, %v9936_v43  ;;  %v4179_v63 = vrot.slane %v4177_v30, 5  ;;  %v4693_v5 = vrot.slane %v4691_v58, 4  ;;  %v6423_v2 = vpop.f32.mrf.mxu1  ;;  %v4165_v1 = vrot.slane %v4164_v11, 4 }
 0x149   : > { %v4175_v60 = vrot.slane %v4174_v62, 4  ;;  %v4184_v9 = vrot.slane %v4182_v44, 4  ;;  %v4187_v17 = vrot.slane %v4185_v6, 5  ;;  %v1211_v55 = vadd.f32 %v6423_v2, %v9937_v36  ;;  %v6474_v28 = vpop.f32.mrf.mxu0  ;;  %v6000_v6 = vld [vmem:[%s6982_s26 + $0xcc] sm:$0xe]  ;;  %s6091_s26 = sshll.u32 %s10024_s16, 7 }
 0x14a   : > { %v9211_v51 = vadd.f32 %v1652_v13, %v1200_v38  ;;  %v9218_v10 = vrot.slane %v4191_v34, 5  ;;  %v4197_v30 = vrot.slane %v4195_v3, 4  ;;  %v1202_v48 = vpop.f32.mrf.mxu1  ;;  %v4146_v13 = vsel %vm7013_vm2, %v9180_v47, %v9149_v40  ;;  %s9564_s29 = scalar_lea.vmem %s9789_s2, %s6091_s26 }
 0x14b   : > { %v4156_v54 = vsel %vm7013_vm2, %v4151_v52, %v9182_v31  ;;  %v4698_v11 = vrot.slane %v9189_v8, 5  ;;  %v9228_v62 = vadd.f32 %v6471_v57, %v1211_v55  ;;  %v1203_v0 = vadd.f32 %v1202_v48, %v9938_v46  ;;  %v9939_v57 = vld [vmem:[#allocation8_spill] sm:$0xff] }
 0x14c   : > { %6761 = vmatmul.mubr.bf16.gmra.mxu0 %v6044_v39  ;;  %v1668_v39 = vpop.f32.mrf.mxu0  ;;  %v4692_v44 = vsel %vm7324_vm5, %v6015_v59, %v4691_v58  ;;  %v6426_v29 = vpop.f32.mrf.mxu1  ;;  %6713 = vmatmul.mubr.bf16.gmra.mxu1 %v9109_v50  ;;  %v6046_v40 = vcombine.low %v9186_v26, %v4688_v4  ;;  %v4170_v47 = vsel %vm7013_vm2, %v4165_v1, %v9169_v49  ;;  %v4201_v8 = vshll.u32 %v5944_v20, 16  ;;  %v9942_v48 = vld [vmem:[#allocation12_spill] sm:$0xff] }
 0x14d   : > { %6764 = vmatprep.mubr.bf16.mxu0 %v6045_v22  ;;  %v4695_v22 = vsel %vm7324_vm5, %v4693_v5, %v4694_v37  ;;  %v4188_v31 = vor.u32 %v4187_v17, %v4184_v9  ;;  %v9241_v33 = vadd.f32 %v1655_v21, %v1203_v0  ;;  %v1224_v34 = vadd.f32 %v6426_v29, %v9939_v57  ;;  %v9940_v37 = vld [vmem:[#allocation10_spill] sm:$0xff]  ;;  %v9941_v9 = vld [vmem:[#allocation11_spill] sm:$0xff] }
 0x14e   : > { %v6475_v58 = vpop.f32.mrf.mxu0  ;;  %6716 = vmatprep.mubr.bf16.mxu1 %v9162_v35  ;;  %v4180_v3 = vsel %vm7013_vm2, %v4175_v60, %v4179_v63  ;;  %v4198_v50 = vor.u32 %v4197_v30, %v9218_v10  ;;  %v1215_v16 = vpop.f32.mrf.mxu1  ;;  %v6047_v26 = vcombine.low %v4692_v44, %v4695_v22  ;;  %v6016_v52 = vrot.slane %v6000_v6, 9  ;;  %v9943_v44 = vld [vmem:[#allocation14_spill] sm:$0xff] }
 0x14f   : > { %v4700_v4 = vrot.slane %v4698_v11, 4  ;;  %v4701_v59 = vrot.slane %v5944_v20, 5  ;;  %v9248_v49 = vadd.f32 %v6474_v28, %v1224_v34  ;;  %v1216_v43 = vadd.f32 %v1215_v16, %v9940_v37  ;;  %v9946_v37 = vld [vmem:[#allocation21_spill] sm:$0xff] }
 0x150   : > { %v1671_v38 = vpop.f32.mrf.mxu0  ;;  %v6427_v21 = vpop.f32.mrf.mxu1  ;;  %v5974_v5 = vcombine.low %v4146_v13, %v4156_v54  ;;  %v5975_v2 = vcombine.low %v4170_v47, %v4180_v3  ;;  %v4189_v1 = vrot.slane %v4188_v31, 4  ;;  %v4199_v17 = vrot.slane %v4198_v50, 4  ;;  %v9944_v47 = vld [vmem:[#allocation16_spill] sm:$0xff] }
 0x151   : > { %v9251_v35 = vadd.f32 %v1668_v39, %v1216_v43  ;;  %v1227_v63 = vadd.f32 %v6427_v21, %v9941_v9  ;;  %v4203_v36 = vrot.slane %v4201_v8, 5  ;;  %v4699_v28 = vsel %vm7324_vm5, %v6016_v52, %v4698_v11 }
 0x152   : > { %v6478_v60 = vpop.f32.mrf.mxu0  ;;  %v1218_v55 = vpop.f32.mrf.mxu1  ;;  %v4702_v20 = vsel %vm7324_vm5, %v4700_v4, %v4701_v59  ;;  %v4194_v0 = vsel %vm7013_vm2, %v4189_v1, %v9218_v10  ;;  %v9945_v10 = vld [vmem:[#allocation19_spill] sm:$0xff] }
 0x153   : > { %v9258_v30 = vadd.f32 %v6475_v58, %v1227_v63  ;;  %v1219_v13 = vadd.f32 %v1218_v55, %v9942_v48  ;;  %v4204_v56 = vsel %vm7013_vm2, %v4199_v17, %v4203_v36  ;;  %v6048_v11 = vcombine.low %v4699_v28, %v4702_v20  ;;  %v9948_v17 = vld [vmem:[#allocation23_spill] sm:$0xff]  ;;  %v9949_v20 = vld [vmem:[#allocation24_spill] sm:$0xff] }
 0x154   : > { %6765 = vmatmul.mubr.bf16.gmra.mxu0 %v6046_v40  ;;  %v1684_v54 = vpop.f32.mrf.mxu0  ;;  %v6430_v46 = vpop.f32.mrf.mxu1  ;;  %6717 = vmatmul.mubr.bf16.gmra.mxu1 %v5974_v5  ;;  %v5976_v34 = vcombine.low %v4194_v0, %v4204_v56  ;;  %v9950_v0 = vld [vmem:[#allocation25_spill] sm:$0xff] }
 0x155   : > { %6768 = vmatprep.mubr.bf16.mxu0 %v6047_v26  ;;  %v9264_v39 = vadd.f32 %v1671_v38, %v1219_v13  ;;  %v1240_v22 = vadd.f32 %v6430_v46, %v9943_v44  ;;  %6720 = vmatprep.mubr.bf16.mxu1 %v5975_v2  ;;  %v9947_v2 = vld [vmem:[#allocation22_spill] sm:$0xff] }
 0x156   : > { %v6479_v6 = vpop.f32.mrf.mxu0  ;;  %v1231_v29 = vpop.f32.mrf.mxu1 }
 0x157   : > { %v9269_v40 = vadd.f32 %v6478_v60, %v1240_v22  ;;  %v1232_v31 = vadd.f32 %v1231_v29, %v9944_v47 }
 0x158   : > { %v1687_v8 = vpop.f32.mrf.mxu0  ;;  %v6431_v57 = vpop.f32.mrf.mxu1 }
 0x159   : > { %v9272_v58 = vadd.f32 %v1684_v54, %v1232_v31  ;;  %v1243_v3 = vadd.f32 %v6431_v57, %v9945_v10  ;;  %v9952_v57 = vld [vmem:[#allocation27_spill] sm:$0xff] }
 0x15a   : > { %v6482_v50 = vpop.f32.mrf.mxu0  ;;  %v1234_v16 = vpop.f32.mrf.mxu1 }
 0x15b   : > { %v9275_v26 = vadd.f32 %v6479_v6, %v1243_v3  ;;  %v1235_v27 = vadd.f32 %v1234_v16, %v8865_v32 }
 0x15c   : > { %6769 = vmatmul.mubr.bf16.gmra.mxu0 %v6048_v11  ;;  %v1700_v52 = vpop.f32.mrf.mxu0  ;;  %v6434_v4 = vpop.f32.mrf.mxu1  ;;  %6721 = vmatmul.mubr.bf16.gmra.mxu1 %v5976_v34  ;;  %v9951_v11 = vld [vmem:[#allocation26_spill] sm:$0xff] }
 0x15d   : > { %v9278_v59 = vadd.f32 %v1687_v8, %v1235_v27  ;;  %v1256_v43 = vadd.f32 %v6434_v4, %v9946_v37 }
 0x15e   : > { %v6483_v38 = vpop.f32.mrf.mxu0  ;;  %v1247_v21 = vpop.f32.mrf.mxu1 }
 0x15f   : > { %v9281_v5 = vadd.f32 %v6482_v50, %v1256_v43  ;;  %v1248_v1 = vadd.f32 %v1247_v21, %v9947_v2 }
 0x160   : > { %v1703_v9 = vpop.f32.mrf.mxu0  ;;  %v6435_v63 = vpop.f32.mrf.mxu1 }
 0x161   : > { %v9284_v60 = vadd.f32 %v1700_v52, %v1248_v1  ;;  %v1259_v36 = vadd.f32 %v6435_v63, %v9948_v17 }
 0x162   : > { %v6550_v32 = vpop.f32.mrf.mxu0  ;;  %v1250_v55 = vpop.f32.mrf.mxu1 }
 0x163   : > { %v9287_v28 = vadd.f32 %v6483_v38, %v1259_v36  ;;  %v1251_v48 = vadd.f32 %v1250_v55, %v9949_v20 }
 0x164   : > { %v2729_v13 = vpop.f32.mrf.mxu0  ;;  %v6502_v54 = vpop.f32.mrf.mxu1 }
 0x165   : > { %v9290_v46 = vadd.f32 %v1703_v9, %v1251_v48  ;;  %v2104_v44 = vadd.f32 %v6502_v54, %v9950_v0 }
 0x166   : > { %v6551_v22 = vpop.f32.mrf.mxu0  ;;  %v1975_v6 = vpop.f32.mrf.mxu1 }
 0x167   : > { %v9293_v56 = vadd.f32 %v6550_v32, %v2104_v44  ;;  %v2102_v29 = vadd.f32 %v1975_v6, %v9951_v11 }
 0x168   : > { %v2732_v47 = vpop.f32.mrf.mxu0  ;;  %v6503_v31 = vpop.f32.mrf.mxu1 }
 0x169   : > { %v9296_v8 = vadd.f32 %v2729_v13, %v2102_v29  ;;  %v2105_v34 = vadd.f32 %v6503_v31, %v9952_v57 }
 0x16a   : > { %v6554_v10 = vpop.f32.mrf.mxu0  ;;  %v1978_v3 = vpop.f32.mrf.mxu1 }
 0x16b   : > { %v9299_v50 = vadd.f32 %v6551_v22, %v2105_v34  ;;  %v2103_v16 = vadd.f32 %v1978_v3, %v9035_v24 }
 0x16c   : > { %v2745_v27 = vpop.f32.mrf.mxu0  ;;  %v6506_v52 = vpop.f32.mrf.mxu1 }
 0x16d   : > { %v9302_v4 = vadd.f32 %v2732_v47, %v2103_v16  ;;  %v2108_v37 = vadd.f32 %v6506_v52, %v9039_v41 }
 0x16e   : > { %v6555_v43 = vpop.f32.mrf.mxu0  ;;  %v1991_v38 = vpop.f32.mrf.mxu1 }
 0x16f   : > { %v9305_v21 = vadd.f32 %v6554_v10, %v2108_v37  ;;  %v2106_v2 = vadd.f32 %v1991_v38, %v9048_v15 }
 0x170   : > { %v2748_v1 = vpop.f32.mrf.mxu0  ;;  %v6507_v9 = vpop.f32.mrf.mxu1 }
 0x171   : > { %v9308_v63 = vadd.f32 %v2745_v27, %v2106_v2  ;;  %v2109_v17 = vadd.f32 %v6507_v9, %v9074_v53 }
 0x172   : > { %v6558_v36 = vpop.f32.mrf.mxu0  ;;  %v1994_v24 = vpop.f32.mrf.mxu1 }
 0x173   : > { %v9311_v32 = vadd.f32 %v6555_v43, %v2109_v17  ;;  %v2107_v55 = vadd.f32 %v1994_v24, %v9094_v14 }
 0x174   : > { %v2761_v20 = vpop.f32.mrf.mxu0  ;;  %v6510_v41 = vpop.f32.mrf.mxu1 }
 0x175   : > { %v9314_v48 = vadd.f32 %v2748_v1, %v2107_v55  ;;  %v2112_v13 = vadd.f32 %v6510_v41, %v9102_v7 }
 0x176   : > { %v6559_v54 = vpop.f32.mrf.mxu0  ;;  %v2007_v15 = vpop.f32.mrf.mxu1 }
 0x177   : > { %v9317_v0 = vadd.f32 %v6558_v36, %v2112_v13  ;;  %v2110_v44 = vadd.f32 %v2007_v15, %v9112_v45 }
 0x178   : > { %v2764_v22 = vpop.f32.mrf.mxu0  ;;  %v6511_v53 = vpop.f32.mrf.mxu1 }
 0x179   : > { %v9320_v6 = vadd.f32 %v2761_v20, %v2110_v44  ;;  %v2113_v11 = vadd.f32 %v6511_v53, %v9135_v23 }
 0x17a   : > { %v6562_v29 = vpop.f32.mrf.mxu0  ;;  %v2010_v14 = vpop.f32.mrf.mxu1 }
 0x17b   : > { %v9323_v47 = vadd.f32 %v6559_v54, %v2113_v11  ;;  %v2111_v31 = vadd.f32 %v2010_v14, %v9152_v18 }
 0x17c   : > { %v2777_v57 = vpop.f32.mrf.mxu0  ;;  %v6514_v7 = vpop.f32.mrf.mxu1 }
 0x17d   : > { %v9326_v34 = vadd.f32 %v2764_v22, %v2111_v31  ;;  %v2116_v10 = vadd.f32 %v6514_v7, %v9159_v42 }
 0x17e   : > { %v6563_v3 = vpop.f32.mrf.mxu0  ;;  %v2023_v45 = vpop.f32.mrf.mxu1 }
 0x17f   : > { %v9329_v16 = vadd.f32 %v6562_v29, %v2116_v10  ;;  %v2114_v27 = vadd.f32 %v2023_v45, %v9171_v61 }
 0x180   : > { %v2780_v52 = vpop.f32.mrf.mxu0  ;;  %v6515_v23 = vpop.f32.mrf.mxu1 }
 0x181   : > { %v9332_v37 = vadd.f32 %v2777_v57, %v2114_v27  ;;  %v2117_v43 = vadd.f32 %v6515_v23, %v9191_v19 }
 0x182   : > { %v6566_v38 = vpop.f32.mrf.mxu0  ;;  %v2026_v18 = vpop.f32.mrf.mxu1 }
 0x183   : > { %v9335_v2 = vadd.f32 %v6563_v3, %v2117_v43  ;;  %v2115_v1 = vadd.f32 %v2026_v18, %v9199_v12 }
 0x184   : > { %v2793_v9 = vpop.f32.mrf.mxu0  ;;  %v6518_v42 = vpop.f32.mrf.mxu1 }
 0x185   : > { %v9338_v17 = vadd.f32 %v2780_v52, %v2115_v1  ;;  %v2120_v36 = vadd.f32 %v6518_v42, %v9208_v25 }
 0x186   : > { %v6567_v24 = vpop.f32.mrf.mxu0  ;;  %v2039_v61 = vpop.f32.mrf.mxu1 }
 0x187   : > { %v9341_v55 = vadd.f32 %v6566_v38, %v2120_v36  ;;  %v2118_v20 = vadd.f32 %v2039_v61, %v9211_v51 }
 0x188   : > { %v2796_v41 = vpop.f32.mrf.mxu0  ;;  %v6519_v19 = vpop.f32.mrf.mxu1 }
 0x189   : > { %v9344_v13 = vadd.f32 %v2793_v9, %v2118_v20  ;;  %v2121_v54 = vadd.f32 %v6519_v19, %v9228_v62 }
 0x18a   : > { %v6570_v15 = vpop.f32.mrf.mxu0  ;;  %v2042_v12 = vpop.f32.mrf.mxu1 }
 0x18b   : > { %v9347_v44 = vadd.f32 %v6567_v24, %v2121_v54  ;;  %v2119_v22 = vadd.f32 %v2042_v12, %v9241_v33 }
 0x18c   : > { %v2809_v53 = vpop.f32.mrf.mxu0  ;;  %v6522_v25 = vpop.f32.mrf.mxu1 }
 0x18d   : > { %v9350_v11 = vadd.f32 %v2796_v41, %v2119_v22  ;;  %v2124_v29 = vadd.f32 %v6522_v25, %v9248_v49 }
 0x18e   : > { %v6571_v14 = vpop.f32.mrf.mxu0  ;;  %v2055_v51 = vpop.f32.mrf.mxu1 }
 0x18f   : > { %9953 = vst [vmem:[#allocation3_spill] sm:$0xff] %v9350_v11  ;;  %v9353_v31 = vadd.f32 %v6570_v15, %v2124_v29  ;;  %v2122_v57 = vadd.f32 %v2055_v51, %v9251_v35 }
 0x190   : > { %v2812_v7 = vpop.f32.mrf.mxu0  ;;  %v6523_v62 = vpop.f32.mrf.mxu1 }
 0x191   : > { %9954 = vst [vmem:[#allocation7_spill] sm:$0xff] %v9353_v31  ;;  %v9356_v10 = vadd.f32 %v2809_v53, %v2122_v57  ;;  %v2125_v3 = vadd.f32 %v6523_v62, %v9258_v30 }
 0x192   : > { %v6574_v45 = vpop.f32.mrf.mxu0  ;;  %v2058_v33 = vpop.f32.mrf.mxu1 }
 0x193   : > { %9955 = vst [vmem:[#allocation9_spill] sm:$0xff] %v9356_v10  ;;  %v9359_v27 = vadd.f32 %v6571_v14, %v2125_v3  ;;  %v2123_v52 = vadd.f32 %v2058_v33, %v9264_v39 }
 0x194   : > { %v2825_v23 = vpop.f32.mrf.mxu0  ;;  %v6526_v49 = vpop.f32.mrf.mxu1 }
 0x195   : > { %9956 = vst [vmem:[#allocation18_spill] sm:$0xff] %v9359_v27  ;;  %v9362_v43 = vadd.f32 %v2812_v7, %v2123_v52  ;;  %v2128_v38 = vadd.f32 %v6526_v49, %v9269_v40 }
 0x196   : > { %v6575_v18 = vpop.f32.mrf.mxu0  ;;  %v2071_v35 = vpop.f32.mrf.mxu1 }
 0x197   : > { %9957 = vst [vmem:[#allocation13_spill] sm:$0xff] %v9362_v43  ;;  %v9365_v1 = vadd.f32 %v6574_v45, %v2128_v38  ;;  %v2126_v9 = vadd.f32 %v2071_v35, %v9272_v58 }
 0x198   : > { %v2828_v42 = vpop.f32.mrf.mxu0  ;;  %v6527_v30 = vpop.f32.mrf.mxu1 }
 0x199   : > { %9958 = vst [vmem:[#allocation15_spill] sm:$0xff] %v9365_v1  ;;  %v9368_v36 = vadd.f32 %v2825_v23, %v2126_v9  ;;  %v2129_v24 = vadd.f32 %v6527_v30, %v9275_v26 }
 0x19a   : > { %v6578_v61 = vpop.f32.mrf.mxu0  ;;  %v2074_v39 = vpop.f32.mrf.mxu1 }
 0x19b   : > { %9959 = vst [vmem:[#allocation17_spill] sm:$0xff] %v9368_v36  ;;  %v9371_v20 = vadd.f32 %v6575_v18, %v2129_v24  ;;  %v2127_v41 = vadd.f32 %v2074_v39, %v9278_v59 }
 0x19c   : > { %v2841_v19 = vpop.f32.mrf.mxu0  ;;  %v6530_v40 = vpop.f32.mrf.mxu1 }
 0x19d   : > { %9960 = vst [vmem:[#allocation20_spill] sm:$0xff] %v9371_v20  ;;  %v9374_v54 = vadd.f32 %v2828_v42, %v2127_v41  ;;  %v2132_v15 = vadd.f32 %v6530_v40, %v9281_v5 }
 0x19e   : > { %v6579_v12 = vpop.f32.mrf.mxu0  ;;  %v2087_v58 = vpop.f32.mrf.mxu1 }
 0x19f   : > { %9961 = vst [vmem:[#allocation2_spill] sm:$0xff] %v9374_v54  ;;  %v9377_v22 = vadd.f32 %v6578_v61, %v2132_v15  ;;  %v2130_v53 = vadd.f32 %v2087_v58, %v9284_v60 }
 0x1a0   : > { %v2844_v25 = vpop.f32.mrf.mxu0  ;;  %v6531_v26 = vpop.f32.mrf.mxu1 }
 0x1a1   : > { %9962 = vst [vmem:[#allocation5_spill] sm:$0xff] %v9377_v22  ;;  %v9380_v29 = vadd.f32 %v2841_v19, %v2130_v53  ;;  %v2133_v14 = vadd.f32 %v6531_v26, %v9287_v28 }
 0x1a2   : > { %v9383_v51 = vpop.f32.mrf.mxu0  ;;  %v2090_v59 = vpop.f32.mrf.mxu1 }
 0x1a3   : > { %9963 = vst [vmem:[#allocation4_spill] sm:$0xff] %v9380_v29  ;;  %v9385_v57 = vadd.f32 %v6579_v12, %v2133_v14  ;;  %v2131_v7 = vadd.f32 %v2090_v59, %v9290_v46 }
 0x1a4   : > { %v9388_v5 = vpop.f32.mrf.mxu0  ;;  %v6598_v62 = vpop.f32.mrf.mxu1 }
 0x1a5   : > { %9964 = vst [vmem:[#allocation6_spill] sm:$0xff] %v9385_v57  ;;  %v9390_v3 = vadd.f32 %v2844_v25, %v2131_v7 }
 0x1a6   : > { %v9392_v45 = vpop.f32.mrf.mxu0  ;;  %v3227_v60 = vpop.f32.mrf.mxu1 }
 0x1a7   : > { %9965 = vst [vmem:[#allocation8_spill] sm:$0xff] %v9390_v3 }
 0x1a8   : > { %v9394_v33 = vpop.f32.mrf.mxu0  ;;  %v6599_v52 = vpop.f32.mrf.mxu1 }
 0x1aa   : > { %v9396_v23 = vpop.f32.mrf.mxu0  ;;  %v3230_v28 = vpop.f32.mrf.mxu1 }
 0x1ac   : > { %v9398_v49 = vpop.f32.mrf.mxu0  ;;  %v6602_v38 = vpop.f32.mrf.mxu1 }
 0x1ae   : > { %v9400_v18 = vpop.f32.mrf.mxu0  ;;  %v3243_v46 = vpop.f32.mrf.mxu1 }
 0x1b0   : > { %v9402_v35 = vpop.f32.mrf.mxu0  ;;  %v6603_v9 = vpop.f32.mrf.mxu1 }
 0x1b2   : > { %v9404_v42 = vpop.f32.mrf.mxu0  ;;  %v3246_v30 = vpop.f32.mrf.mxu1 }
 0x1b4   : > { %v9406_v24 = vpop.f32.mrf.mxu0  ;;  %v6606_v61 = vpop.f32.mrf.mxu1 }
 0x1b6   : > { %v9408_v39 = vpop.f32.mrf.mxu0  ;;  %v3259_v41 = vpop.f32.mrf.mxu1 }
 0x1b8   : > { %v9410_v19 = vpop.f32.mrf.mxu0  ;;  %v6607_v40 = vpop.f32.mrf.mxu1 }
 0x1ba   : > { %v9412_v15 = vpop.f32.mrf.mxu0  ;;  %v3262_v12 = vpop.f32.mrf.mxu1 }
 0x1bc   : > { %v9414_v58 = vpop.f32.mrf.mxu0  ;;  %v6610_v53 = vpop.f32.mrf.mxu1 }
 0x1be   : > { %v9416_v25 = vpop.f32.mrf.mxu0  ;;  %v3275_v26 = vpop.f32.mrf.mxu1 }
 0x1c0   : > { %v9418_v14 = vpop.f32.mrf.mxu0  ;;  %v6611_v59 = vpop.f32.mrf.mxu1 }
 0x1c1   : > { %9966 = vst [vmem:[#allocation10_spill] sm:$0xff] %v9418_v14 }
 0x1c2   : > { %v9420_v7 = vpop.f32.mrf.mxu0  ;;  %v3278_v3 = vpop.f32.mrf.mxu1 }
 0x1c3   : > { %9967 = vst [vmem:[#allocation11_spill] sm:$0xff] %v9420_v7 }
 0x1c4   : > { %v9422_v57 = vpop.f32.mrf.mxu0  ;;  %v6614_v29 = vpop.f32.mrf.mxu1 }
 0x1c5   : > { %9968 = vst [vmem:[#allocation12_spill] sm:$0xff] %v9422_v57 }
 0x1c6   : > { %v9424_v22 = vpop.f32.mrf.mxu0  ;;  %v3291_v54 = vpop.f32.mrf.mxu1 }
 0x1c7   : > { %9969 = vst [vmem:[#allocation14_spill] sm:$0xff] %v9424_v22 }
 0x1c8   : > { %v9426_v20 = vpop.f32.mrf.mxu0  ;;  %v6615_v36 = vpop.f32.mrf.mxu1 }
 0x1c9   : > { %9970 = vst [vmem:[#allocation16_spill] sm:$0xff] %v9426_v20 }
 0x1ca   : > { %v9428_v1 = vpop.f32.mrf.mxu0  ;;  %v9430_v43 = vpop.f32.mrf.mxu1 }
 0x1cb   : > { %9971 = vst [vmem:[#allocation19_spill] sm:$0xff] %v9428_v1  ;;  %9972 = vst [vmem:[#allocation21_spill] sm:$0xff] %v9430_v43 }
 0x1cc   : > { %v9432_v27 = vpop.f32.mrf.mxu0  ;;  %v9434_v10 = vpop.f32.mrf.mxu1 }
 0x1cd   : > { %9973 = vst [vmem:[#allocation22_spill] sm:$0xff] %v9432_v27  ;;  %9974 = vst [vmem:[#allocation23_spill] sm:$0xff] %v9434_v10 }
 0x1ce   : > { %v9436_v31 = vpop.f32.mrf.mxu0  ;;  %v9438_v11 = vpop.f32.mrf.mxu1 }
 0x1cf   : > { %9975 = vst [vmem:[#allocation24_spill] sm:$0xff] %v9436_v31  ;;  %9976 = vst [vmem:[#allocation25_spill] sm:$0xff] %v9438_v11 }
 0x1d0   : > { %v9440_v57 = vpop.f32.mrf.mxu0  ;;  %v9442_v7 = vpop.f32.mrf.mxu1 }
 0x1d1   : > { %9977 = vst [vmem:[#allocation26_spill] sm:$0xff] %v9440_v57  ;;  %9978 = vst [vmem:[#allocation27_spill] sm:$0xff] %v9442_v7  ;;  %v3356_v57 = vadd.f32 %v6598_v62, %v9293_v56  ;;  %v3358_v56 = vadd.f32 %v3243_v46, %v9308_v63  ;;  %v3361_v62 = vadd.f32 %v6603_v9, %v9311_v32 }
 0x1d2   : > { %v9444_v22 = vpop.f32.mrf.mxu0  ;;  %v9446_v20 = vpop.f32.mrf.mxu1  ;;  %v3363_v63 = vadd.f32 %v3262_v12, %v9326_v34  ;;  %v3368_v32 = vadd.f32 %v6610_v53, %v9329_v16  ;;  %v3372_v16 = vadd.f32 %v6614_v29, %v9341_v55  ;;  %v3370_v29 = vadd.f32 %v3291_v54, %v9344_v13  ;;  %v9991_v13 = vld [vmem:[#allocation21_spill] sm:$0xff] }
 0x1d3   : > { %9979 = vst [vmem:[#allocation28_spill] sm:$0xff] %v9444_v22  ;;  %9980 = vst [vmem:[#allocation29_spill] sm:$0xff] %v9446_v20  ;;  %v9503_v34 = vadd.f32 %v9400_v18, %v3361_v62  ;;  %v9988_v18 = vld [vmem:[#allocation10_spill] sm:$0xff] }
 0x1d4   : > { %v9448_v14 = vpop.f32.mrf.mxu0  ;;  %v9450_v1 = vpop.f32.mrf.mxu1  ;;  %v9524_v55 = vadd.f32 %v9412_v15, %v3368_v32  ;;  %v9996_v15 = vld [vmem:[#allocation18_spill] sm:$0xff]  ;;  %v10004_v32 = vld [vmem:[#allocation17_spill] sm:$0xff] }
 0x1d5   : > { %9981 = vst [vmem:[#allocation30_spill] sm:$0xff] %v9448_v14  ;;  %9982 = vst [vmem:[#allocation31_spill] sm:$0xff] %v9450_v1  ;;  %v3354_v14 = vadd.f32 %v3227_v60, %v9296_v8  ;;  %v3357_v1 = vadd.f32 %v6599_v52, %v9299_v50  ;;  %v3359_v8 = vadd.f32 %v3246_v30, %v9314_v48 }
 0x1d6   : > { %v9452_v43 = vpop.f32.mrf.mxu0  ;;  %v9454_v27 = vpop.f32.mrf.mxu1  ;;  %v3364_v50 = vadd.f32 %v6606_v61, %v9317_v0  ;;  %v3362_v60 = vadd.f32 %v3259_v41, %v9320_v6  ;;  %v3366_v0 = vadd.f32 %v3275_v26, %v9332_v37  ;;  %v3369_v6 = vadd.f32 %v6611_v59, %v9335_v2  ;;  %v9995_v41 = vld [vmem:[#allocation25_spill] sm:$0xff] }
 0x1d7   : > { %9983 = vst [vmem:[#allocation32_spill] sm:$0xff] %v9452_v43  ;;  %9984 = vst [vmem:[#allocation33_spill] sm:$0xff] %v9454_v27  ;;  %v3355_v43 = vadd.f32 %v3230_v28, %v9302_v4  ;;  %v3365_v4 = vadd.f32 %v6607_v40, %v9323_v47  ;;  %v3367_v47 = vadd.f32 %v3278_v3, %v9338_v17 }
 0x1d8   : > { %v9456_v10 = vpop.f32.mrf.mxu0  ;;  %v9458_v31 = vpop.f32.mrf.mxu1  ;;  %v9509_v37 = vadd.f32 %v9402_v35, %v3359_v8  ;;  %v9512_v2 = vadd.f32 %v9404_v42, %v3364_v50  ;;  %v9515_v17 = vadd.f32 %v9406_v24, %v3362_v60  ;;  %v9989_v42 = vld [vmem:[#allocation11_spill] sm:$0xff]  ;;  %v10001_v8 = vld [vmem:[#allocation14_spill] sm:$0xff] }
 0x1d9   : > { %9985 = vst [vmem:[#allocation34_spill] sm:$0xff] %v9456_v10  ;;  %v3743_v10 = vadd.f32 %v9383_v51, %v3356_v57  ;;  %v3741_v51 = vadd.f32 %v9388_v5, %v3354_v14  ;;  %v3742_v48 = vadd.f32 %v9394_v33, %v3355_v43  ;;  %v3373_v33 = vadd.f32 %v6615_v36, %v9347_v44  ;;  %v9990_v24 = vld [vmem:[#allocation3_spill] sm:$0xff] }
 0x1da   : > { %v9460_v11 = vpop.f32.mrf.mxu0  ;;  %v9463_v7 = vpop.f32.mrf.mxu1  ;;  %v9535_v46 = vadd.f32 %v9988_v18, %v3367_v47  ;;  %v9539_v30 = vadd.f32 %v9989_v42, %v3372_v16  ;;  %v3371_v54 = vadd.f32 %v9991_v13, %v9990_v24  ;;  %v9992_v44 = vld [vmem:[#allocation7_spill] sm:$0xff]  ;;  %v9999_v53 = vld [vmem:[#allocation29_spill] sm:$0xff]  ;;  %v10006_v47 = vld [vmem:[#allocation20_spill] sm:$0xff] }
 0x1db   : > { %9986 = vst [vmem:[#allocation35_spill] sm:$0xff] %v9460_v11  ;;  %9987 = vst [vmem:[#allocation36_spill] sm:$0xff] %v9463_v7  ;;  %v3360_v11 = vadd.f32 %v6602_v38, %v9305_v21  ;;  %v3744_v21 = vadd.f32 %v9392_v45, %v3357_v1  ;;  %v9500_v1 = vadd.f32 %v9398_v49, %v3358_v56  ;;  %v9993_v36 = vld [vmem:[#allocation23_spill] sm:$0xff]  ;;  %v10000_v56 = vld [vmem:[#allocation12_spill] sm:$0xff] }
 0x1dc   : > { %v9465_v22 = vpop.f32.mrf.mxu0  ;;  %v9469_v20 = vpop.f32.mrf.mxu1  ;;  %v9521_v45 = vadd.f32 %v9410_v19, %v3363_v63  ;;  %v9529_v49 = vadd.f32 %v9414_v58, %v3366_v0  ;;  %v9532_v38 = vadd.f32 %v9416_v25, %v3369_v6  ;;  %v3376_v61 = vadd.f32 %v9993_v36, %v9992_v44  ;;  %v9997_v12 = vld [vmem:[#allocation27_spill] sm:$0xff]  ;;  %v10007_v16 = vld [vmem:[#allocation2_spill] sm:$0xff]  ;;  %v10009_v42 = vld [vmem:[#allocation16_spill] sm:$0xff] }
 0x1dd   : > { %v9497_v5 = vadd.f32 %v9396_v23, %v3360_v11  ;;  %v9518_v11 = vadd.f32 %v9408_v39, %v3365_v4  ;;  %v9994_v39 = vld [vmem:[#allocation9_spill] sm:$0xff]  ;;  %v3377_v58 = vadd.f32 %v9997_v12, %v9996_v15  ;;  %v9552_v62 = vadd.f32 %v10000_v56, %v3370_v29  ;;  %v10002_v60 = vld [vmem:[#allocation15_spill] sm:$0xff]  ;;  %v10012_v15 = vld [vmem:[#allocation22_spill] sm:$0xff] }
 0x1de   : > { %v9472_v27 = vpop.f32.mrf.mxu0  ;;  %v9478_v7 = vpop.f32.mrf.mxu1  ;;  %v3374_v19 = vadd.f32 %v9995_v41, %v9994_v39  ;;  %v9555_v50 = vadd.f32 %v10001_v8, %v3373_v33  ;;  %v10003_v4 = vld [vmem:[#allocation31_spill] sm:$0xff]  ;;  %v10005_v0 = vld [vmem:[#allocation33_spill] sm:$0xff]  ;;  %v9571_v24 = vadd.f32 %v10009_v42, %v3371_v54  ;;  %v10013_v12 = vld [vmem:[#allocation24_spill] sm:$0xff] }
 0x1df   : > { %v3380_v63 = vadd.f32 %v10003_v4, %v10002_v60  ;;  %v3378_v6 = vadd.f32 %v10005_v0, %v10004_v32  ;;  %v10010_v13 = vld [vmem:[#allocation19_spill] sm:$0xff]  ;;  %v10011_v36 = vld [vmem:[#allocation5_spill] sm:$0xff]  ;;  %v10017_v4 = vld [vmem:[#allocation32_spill] sm:$0xff] }
 0x1e0   : > { %v9484_v52 = vpop.f32.mrf.mxu0  ;;  %v9490_v57 = vpop.f32.mrf.mxu1  ;;  %v9574_v44 = vadd.f32 %v10010_v13, %v3376_v61  ;;  %v3384_v39 = vadd.f32 %v9469_v20, %v10011_v36  ;;  %v10016_v20 = vld [vmem:[#allocation30_spill] sm:$0xff] }
 0x1e1   : > { %v9593_v8 = vadd.f32 %v10016_v20, %v3378_v6  ;;  %v10020_v6 = vld [vmem:[#allocation4_spill] sm:$0xff] }
 0x1e2   : > { %v9506_v43 = vpop.f32.mrf.mxu1  ;;  %v10008_v29 = vld [vmem:[#allocation36_spill] sm:$0xff] }
 0x1e3   : > { %v6742_v28 = vpop.f32.mrf.mxu0  ;;  %v3379_v33 = vadd.f32 %v10008_v29, %v10007_v16 }
 0x1e4   : > { %v6694_v23 = vpop.f32.mrf.mxu1 }
 0x1e5   : > { %v4866_v3 = vpop.f32.mrf.mxu0  ;;  %v4497_v35 = vadd.f32 %v6694_v23, %v3743_v10  ;;  %v9998_v10 = vld [vmem:[#allocation13_spill] sm:$0xff] }
 0x1e6   : > { %v4368_v40 = vpop.f32.mrf.mxu1  ;;  %v3375_v25 = vadd.f32 %v9999_v53, %v9998_v10  ;;  %v9582_v10 = vadd.f32 %v10013_v12, %v3377_v58  ;;  %v10018_v58 = vld [vmem:[#allocation34_spill] sm:$0xff] }
 0x1e7   : > { %v6743_v9 = vpop.f32.mrf.mxu0  ;;  %v4995_v26 = vadd.f32 %v6742_v28, %v4497_v35  ;;  %v4495_v14 = vadd.f32 %v4368_v40, %v3741_v51  ;;  %v3381_v28 = vadd.f32 %v9458_v31, %v10006_v47  ;;  %v9579_v31 = vadd.f32 %v10012_v15, %v3374_v19  ;;  %v10019_v47 = vld [vmem:[#allocation35_spill] sm:$0xff] }
 0x1e8   : > { %v6695_v51 = vpop.f32.mrf.mxu1  ;;  %v9599_v0 = vadd.f32 %v10018_v58, %v3379_v33  ;;  %v9605_v16 = vadd.f32 %v10019_v47, %v3384_v39 }
 0x1e9   : > { %v4869_v59 = vpop.f32.mrf.mxu0  ;;  %v6094_v23 = vpack.c.bf16 %v4995_v26, %v4995_v26  ;;  %v4993_v18 = vadd.f32 %v4866_v3, %v4495_v14  ;;  %v4498_v41 = vadd.f32 %v6695_v51, %v3744_v21  ;;  %v10014_v3 = vld [vmem:[#allocation26_spill] sm:$0xff]  ;;  %v10015_v14 = vld [vmem:[#allocation28_spill] sm:$0xff]  ;;  %v9596_v32 = vadd.f32 %v10017_v4, %v3381_v28 }
 0x1ea   : > { %v4371_v40 = vpop.f32.mrf.mxu1  ;;  %v9585_v53 = vadd.f32 %v10014_v3, %v3375_v25  ;;  %v9590_v56 = vadd.f32 %v10015_v14, %v3380_v63  ;;  %v5260_v42 = vmul.f32 %v4995_v26, %v4995_v26  ;;  %v5190_v15 = vsel %vm5186_vm7, %v4995_v26, 0.0 }
 0x1eb   : > { %v6746_v35 = vpop.f32.mrf.mxu0  ;;  %5156 = vst.msk [vmem:[%s9564_s29 + $0x8] sm:$0xf] %vm5153_vm6, %v6094_v23  ;;  %v6092_v54 = vpack.c.bf16 %v4993_v18, %v4993_v18  ;;  %v4996_v21 = vadd.f32 %v6743_v9, %v4498_v41  ;;  %v4496_v60 = vadd.f32 %v4371_v40, %v3742_v48  ;;  %v5258_v25 = vmul.f32 %v4993_v18, %v4993_v18  ;;  %v10021_v23 = vld [vmem:[#allocation6_spill] sm:$0xff] }
 0x1ec   : > { %v6698_v19 = vpop.f32.mrf.mxu1  ;;  %v3382_v48 = vadd.f32 %v9478_v7, %v10020_v6  ;;  %v9611_v33 = vadd.f32 %v9490_v57, %v10021_v23  ;;  %v5187_v41 = vsel %vm5186_vm7, %v4993_v18, 0.0 }
 0x1ed   : > { %v4882_v61 = vpop.f32.mrf.mxu0  ;;  %5154 = vst.msk [vmem:[%s9564_s29] sm:$0xf] %vm5153_vm6, %v6092_v54  ;;  %v4501_v51 = vadd.f32 %v6698_v19, %v9497_v5  ;;  %v6095_v9 = vpack.c.bf16 %v4996_v21, %v4996_v21  ;;  %v4994_v29 = vadd.f32 %v4869_v59, %v4496_v60  ;;  %v5290_v57 = vsel %vm5186_vm7, %v5258_v25, 0.0 }
 0x1ee   : > { %v4384_v28 = vpop.f32.mrf.mxu1  ;;  %v5261_v54 = vmul.f32 %v4996_v21, %v4996_v21  ;;  %v5293_v60 = vsel %vm5186_vm7, %v5260_v42, 0.0  ;;  %v5192_v25 = vsel %vm5186_vm7, %v4996_v21, 0.0 }
 0x1ef   : > { %v6747_v63 = vpop.f32.mrf.mxu0  ;;  %v4999_v13 = vadd.f32 %v6746_v35, %v4501_v51  ;;  %v4499_v36 = vadd.f32 %v4384_v28, %v9500_v1  ;;  %5157 = vst.msk [vmem:[%s9564_s29 + $0xc] sm:$0xf] %vm5153_vm6, %v6095_v9  ;;  %v6093_v39 = vpack.c.bf16 %v4994_v29, %v4994_v29  ;;  %v5188_v7 = vsel %vm5186_vm7, %v4994_v29, 0.0 }
 0x1f0   : > { %v5259_v40 = vmul.f32 %v4994_v29, %v4994_v29  ;;  %v6699_v59 = vpop.f32.mrf.mxu1  ;;  %v5189_v12 = vadd.f32 %v5188_v7, %v5187_v41  ;;  %v5295_v42 = vsel %vm5186_vm7, %v5261_v54, 0.0 }
 0x1f1   : > { %v4885_v5 = vpop.f32.mrf.mxu0  ;;  %v6098_v3 = vpack.c.bf16 %v4999_v13, %v4999_v13  ;;  %5155 = vst.msk [vmem:[%s9564_s29 + $0x4] sm:$0xf] %vm5153_vm6, %v6093_v39  ;;  %v4997_v18 = vadd.f32 %v4882_v61, %v4499_v36  ;;  %v4502_v14 = vadd.f32 %v6699_v59, %v9503_v34  ;;  %v5264_v36 = vmul.f32 %v4999_v13, %v4999_v13 }
 0x1f2   : > { %v5291_v1 = vsel %vm5186_vm7, %v5259_v40, 0.0  ;;  %v4387_v20 = vpop.f32.mrf.mxu1  ;;  %v5191_v19 = vadd.f32 %v5190_v15, %v5189_v12 }
 0x1f3   : > { %v6750_v35 = vpop.f32.mrf.mxu0  ;;  %v5292_v4 = vadd.f32 %v5291_v1, %v5290_v57  ;;  %5160 = vst.msk [vmem:[%s9564_s29 + $0x18] sm:$0xf] %vm5153_vm6, %v6098_v3  ;;  %v4500_v26 = vadd.f32 %v4387_v20, %v9509_v37  ;;  %v6096_v51 = vpack.c.bf16 %v4997_v18, %v4997_v18  ;;  %v5262_v47 = vmul.f32 %v4997_v18, %v4997_v18 }
 0x1f4   : > { %v5000_v6 = vadd.f32 %v6747_v63, %v4502_v14  ;;  %v6702_v9 = vpop.f32.mrf.mxu1  ;;  %v5193_v29 = vadd.f32 %v5192_v25, %v5191_v19  ;;  %v5194_v37 = vsel %vm5186_vm7, %v4997_v18, 0.0  ;;  %v9640_v3 = vadd.f32 %v9465_v22, %v3382_v48 }
 0x1f5   : > { %v4898_v58 = vpop.f32.mrf.mxu0  ;;  %v5294_v61 = vadd.f32 %v5293_v60, %v5292_v4  ;;  %v4998_v34 = vadd.f32 %v4885_v5, %v4500_v26  ;;  %v4505_v28 = vadd.f32 %v6702_v9, %v9512_v2  ;;  %5158 = vst.msk [vmem:[%s9564_s29 + $0x10] sm:$0xf] %vm5153_vm6, %v6096_v51  ;;  %v5297_v5 = vsel %vm5186_vm7, %v5262_v47, 0.0 }
 0x1f6   : > { %v6099_v21 = vpack.c.bf16 %v5000_v6, %v5000_v6  ;;  %v4400_v41 = vpop.f32.mrf.mxu1  ;;  %v5195_v39 = vadd.f32 %v5194_v37, %v5193_v29  ;;  %v5198_v20 = vsel %vm5186_vm7, %v4999_v13, 0.0  ;;  %v5265_v60 = vmul.f32 %v5000_v6, %v5000_v6 }
 0x1f7   : > { %v6751_v23 = vpop.f32.mrf.mxu0  ;;  %v5296_v63 = vadd.f32 %v5295_v42, %v5294_v61  ;;  %v6097_v7 = vpack.c.bf16 %v4998_v34, %v4998_v34  ;;  %v5196_v40 = vsel %vm5186_vm7, %v4998_v34, 0.0  ;;  %v5263_v2 = vmul.f32 %v4998_v34, %v4998_v34  ;;  %v10022_v61 = vld [vmem:[#allocation8_spill] sm:$0xff] }
 0x1f8   : > { %5161 = vst.msk [vmem:[%s9564_s29 + $0x1c] sm:$0xf] %vm5153_vm6, %v6099_v21  ;;  %v5003_v15 = vadd.f32 %v6750_v35, %v4505_v28  ;;  %v4503_v57 = vadd.f32 %v4400_v41, %v9515_v17  ;;  %v6703_v12 = vpop.f32.mrf.mxu1  ;;  %v5197_v1 = vadd.f32 %v5196_v40, %v5195_v39  ;;  %v9649_v51 = vadd.f32 %v9472_v27, %v9611_v33 }
 0x1f9   : > { %v4901_v59 = vpop.f32.mrf.mxu0  ;;  %v5298_v54 = vadd.f32 %v5297_v5, %v5296_v63  ;;  %5159 = vst.msk [vmem:[%s9564_s29 + $0x14] sm:$0xf] %vm5153_vm6, %v6097_v7  ;;  %v4506_v18 = vadd.f32 %v6703_v12, %v9518_v11  ;;  %v5299_v19 = vsel %vm5186_vm7, %v5263_v2, 0.0  ;;  %v5301_v11 = vsel %vm5186_vm7, %v5264_v36, 0.0 }
 0x1fa   : > { %v6102_v35 = vpack.c.bf16 %v5003_v15, %v5003_v15  ;;  %v4403_v4 = vpop.f32.mrf.mxu1  ;;  %v5199_v17 = vadd.f32 %v5198_v20, %v5197_v1  ;;  %v5001_v25 = vadd.f32 %v4898_v58, %v4503_v57  ;;  %v5200_v47 = vsel %vm5186_vm7, %v5000_v6, 0.0 }
 0x1fb   : > { %v6754_v14 = vpop.f32.mrf.mxu0  ;;  %v5300_v26 = vadd.f32 %v5299_v19, %v5298_v54  ;;  %v5004_v22 = vadd.f32 %v6751_v23, %v4506_v18  ;;  %v4504_v13 = vadd.f32 %v4403_v4, %v9521_v45  ;;  %v3383_v29 = vadd.f32 %v9506_v43, %v10022_v61 }
 0x1fc   : > { %5164 = vst.msk [vmem:[%s9564_s29 + $0x28] sm:$0xf] %vm5153_vm6, %v6102_v35  ;;  %v6706_v9 = vpop.f32.mrf.mxu1  ;;  %v6100_v34 = vpack.c.bf16 %v5001_v25, %v5001_v25  ;;  %v5201_v28 = vadd.f32 %v5200_v47, %v5199_v17  ;;  %v5303_v27 = vsel %vm5186_vm7, %v5265_v60, 0.0  ;;  %v5202_v33 = vsel %vm5186_vm7, %v5001_v25, 0.0 }
 0x1fd   : > { %v4914_v48 = vpop.f32.mrf.mxu0  ;;  %v5302_v58 = vadd.f32 %v5301_v11, %v5300_v26  ;;  %v5266_v42 = vmul.f32 %v5001_v25, %v5001_v25  ;;  %v6103_v36 = vpack.c.bf16 %v5004_v22, %v5004_v22  ;;  %v5002_v21 = vadd.f32 %v4901_v59, %v4504_v13 }
 0x1fe   : > { %v4416_v6 = vpop.f32.mrf.mxu1  ;;  %5162 = vst.msk [vmem:[%s9564_s29 + $0x20] sm:$0xf] %vm5153_vm6, %v6100_v34  ;;  %v5203_v37 = vadd.f32 %v5202_v33, %v5201_v28  ;;  %v4509_v41 = vadd.f32 %v6706_v9, %v9524_v55  ;;  %v5268_v39 = vmul.f32 %v5003_v15, %v5003_v15  ;;  %v5269_v7 = vmul.f32 %v5004_v22, %v5004_v22 }
 0x1ff   : > { %v6755_v23 = vpop.f32.mrf.mxu0  ;;  %v5304_v45 = vadd.f32 %v5303_v27, %v5302_v58  ;;  %v5305_v63 = vsel %vm5186_vm7, %v5266_v42, 0.0  ;;  %5165 = vst.msk [vmem:[%s9564_s29 + $0x2c] sm:$0xf] %vm5153_vm6, %v6103_v36  ;;  %v4507_v40 = vadd.f32 %v4416_v6, %v9529_v49  ;;  %v6101_v57 = vpack.c.bf16 %v5002_v21, %v5002_v21 }
 0x200   : > { %v6707_v5 = vpop.f32.mrf.mxu1  ;;  %v5204_v12 = vsel %vm5186_vm7, %v5002_v21, 0.0  ;;  %v5267_v54 = vmul.f32 %v5002_v21, %v5002_v21  ;;  %v5007_v18 = vadd.f32 %v6754_v14, %v4509_v41  ;;  %v9670_v19 = vadd.f32 %v9484_v52, %v3383_v29 }
 0x201   : > { %v4917_v43 = vpop.f32.mrf.mxu0  ;;  %v5306_v2 = vadd.f32 %v5305_v63, %v5304_v45  ;;  %v5205_v59 = vadd.f32 %v5204_v12, %v5203_v37  ;;  %v5005_v55 = vadd.f32 %v4914_v48, %v4507_v40  ;;  %v4510_v20 = vadd.f32 %v6707_v5, %v9532_v38  ;;  %5163 = vst.msk [vmem:[%s9564_s29 + $0x24] sm:$0xf] %vm5153_vm6, %v6101_v57 }
 0x202   : > { %v4419_v60 = vpop.f32.mrf.mxu1  ;;  %v5206_v35 = vsel %vm5186_vm7, %v5003_v15, 0.0  ;;  %v5307_v49 = vsel %vm5186_vm7, %v5267_v54, 0.0  ;;  %v5309_v26 = vsel %vm5186_vm7, %v5268_v39, 0.0  ;;  %v6106_v38 = vpack.c.bf16 %v5007_v18, %v5007_v18 }
 0x203   : > { %v4508_v4 = vadd.f32 %v4419_v60, %v9535_v46  ;;  %v5207_v14 = vadd.f32 %v5206_v35, %v5205_v59  ;;  %v5308_v25 = vadd.f32 %v5307_v49, %v5306_v2  ;;  %v5208_v52 = vsel %vm5186_vm7, %v5004_v22, 0.0 }
 0x204   : > { %v6758_v1 = vpop.f32.mrf.mxu0  ;;  %v6710_v48 = vpop.f32.mrf.mxu1  ;;  %v5311_v11 = vsel %vm5186_vm7, %v5269_v7, 0.0  ;;  %v6104_v15 = vpack.c.bf16 %v5005_v55, %v5005_v55  ;;  %v5270_v47 = vmul.f32 %v5005_v55, %v5005_v55  ;;  %5168 = vst.msk [vmem:[%s9564_s29 + $0x38] sm:$0xf] %vm5153_vm6, %v6106_v38  ;;  %v5008_v46 = vadd.f32 %v6755_v23, %v4510_v20 }
 0x205   : > { %v5310_v9 = vadd.f32 %v5309_v26, %v5308_v25  ;;  %v5209_v61 = vadd.f32 %v5208_v52, %v5207_v14  ;;  %v5006_v29 = vadd.f32 %v4917_v43, %v4508_v4  ;;  %v5272_v34 = vmul.f32 %v5007_v18, %v5007_v18 }
 0x206   : > { %v4930_v17 = vpop.f32.mrf.mxu0  ;;  %v4432_v58 = vpop.f32.mrf.mxu1  ;;  %5166 = vst.msk [vmem:[%s9564_s29 + $0x30] sm:$0xf] %vm5153_vm6, %v6104_v15  ;;  %v5210_v28 = vsel %vm5186_vm7, %v5005_v55, 0.0  ;;  %v4513_v22 = vadd.f32 %v6710_v48, %v9539_v30  ;;  %v5313_v6 = vsel %vm5186_vm7, %v5270_v47, 0.0  ;;  %v6107_v37 = vpack.c.bf16 %v5008_v46, %v5008_v46 }
 0x207   : > { %v4511_v27 = vadd.f32 %v4432_v58, %v9552_v62  ;;  %v5211_v42 = vadd.f32 %v5210_v28, %v5209_v61  ;;  %v5312_v36 = vadd.f32 %v5311_v11, %v5310_v9  ;;  %v5273_v45 = vmul.f32 %v5008_v46, %v5008_v46 }
 0x208   : > { %v6759_v13 = vpop.f32.mrf.mxu0  ;;  %v6711_v23 = vpop.f32.mrf.mxu1  ;;  %v6105_v21 = vpack.c.bf16 %v5006_v29, %v5006_v29  ;;  %v5212_v41 = vsel %vm5186_vm7, %v5006_v29, 0.0  ;;  %v5271_v43 = vmul.f32 %v5006_v29, %v5006_v29  ;;  %5169 = vst.msk [vmem:[%s9564_s29 + $0x3c] sm:$0xf] %vm5153_vm6, %v6107_v37  ;;  %v5011_v7 = vadd.f32 %v6758_v1, %v4513_v22 }
 0x209   : > { %v5314_v63 = vadd.f32 %v5313_v6, %v5312_v36  ;;  %v5213_v30 = vadd.f32 %v5212_v41, %v5211_v42  ;;  %v5009_v62 = vadd.f32 %v4930_v17, %v4511_v27  ;;  %v5214_v5 = vsel %vm5186_vm7, %v5007_v18, 0.0 }
 0x20a   : > { %v4933_v33 = vpop.f32.mrf.mxu0  ;;  %v4435_v40 = vpop.f32.mrf.mxu1  ;;  %5167 = vst.msk [vmem:[%s9564_s29 + $0x34] sm:$0xf] %vm5153_vm6, %v6105_v21  ;;  %v5315_v2 = vsel %vm5186_vm7, %v5271_v43, 0.0  ;;  %v4514_v57 = vadd.f32 %v6711_v23, %v9555_v50  ;;  %v5317_v59 = vsel %vm5186_vm7, %v5272_v34, 0.0  ;;  %v6110_v1 = vpack.c.bf16 %v5011_v7, %v5011_v7 }
 0x20b   : > { %v4512_v12 = vadd.f32 %v4435_v40, %v9571_v24  ;;  %v5215_v55 = vadd.f32 %v5214_v5, %v5213_v30  ;;  %v5316_v20 = vadd.f32 %v5315_v2, %v5314_v63  ;;  %v5216_v35 = vsel %vm5186_vm7, %v5008_v46, 0.0 }
 0x20c   : > { %v6762_v39 = vpop.f32.mrf.mxu0  ;;  %v6714_v60 = vpop.f32.mrf.mxu1  ;;  %v5319_v18 = vsel %vm5186_vm7, %v5273_v45, 0.0  ;;  %v6108_v49 = vpack.c.bf16 %v5009_v62, %v5009_v62  ;;  %v5274_v4 = vmul.f32 %v5009_v62, %v5009_v62  ;;  %5172 = vst.msk [vmem:[%s9564_s29 + $0x48] sm:$0xf] %vm5153_vm6, %v6110_v1  ;;  %v5012_v24 = vadd.f32 %v6759_v13, %v4514_v57 }
 0x20d   : > { %v5318_v26 = vadd.f32 %v5317_v59, %v5316_v20  ;;  %v5217_v50 = vadd.f32 %v5216_v35, %v5215_v55  ;;  %v5010_v14 = vadd.f32 %v4933_v33, %v4512_v12  ;;  %v5276_v38 = vmul.f32 %v5011_v7, %v5011_v7 }
 0x20e   : > { %v4946_v54 = vpop.f32.mrf.mxu0  ;;  %v4448_v25 = vpop.f32.mrf.mxu1  ;;  %5170 = vst.msk [vmem:[%s9564_s29 + $0x40] sm:$0xf] %vm5153_vm6, %v6108_v49  ;;  %v5218_v48 = vsel %vm5186_vm7, %v5009_v62, 0.0  ;;  %v4517_v52 = vadd.f32 %v6714_v60, %v9574_v44  ;;  %v5321_v61 = vsel %vm5186_vm7, %v5274_v4, 0.0  ;;  %v6111_v46 = vpack.c.bf16 %v5012_v24, %v5012_v24 }
 0x20f   : > { %v4515_v11 = vadd.f32 %v4448_v25, %v9579_v31  ;;  %v5219_v47 = vadd.f32 %v5218_v48, %v5217_v50  ;;  %v5320_v9 = vadd.f32 %v5319_v18, %v5318_v26  ;;  %v5277_v29 = vmul.f32 %v5012_v24, %v5012_v24 }
 0x210   : > { %v6763_v17 = vpop.f32.mrf.mxu0  ;;  %v6715_v13 = vpop.f32.mrf.mxu1  ;;  %v6109_v58 = vpack.c.bf16 %v5010_v14, %v5010_v14  ;;  %v5220_v34 = vsel %vm5186_vm7, %v5010_v14, 0.0  ;;  %v5275_v28 = vmul.f32 %v5010_v14, %v5010_v14  ;;  %5173 = vst.msk [vmem:[%s9564_s29 + $0x4c] sm:$0xf] %vm5153_vm6, %v6111_v46  ;;  %v5015_v33 = vadd.f32 %v6762_v39, %v4517_v52 }
 0x211   : > { %v5322_v27 = vadd.f32 %v5321_v61, %v5320_v9  ;;  %v5221_v44 = vadd.f32 %v5220_v34, %v5219_v47  ;;  %v5013_v31 = vadd.f32 %v4946_v54, %v4515_v11  ;;  %v5222_v36 = vsel %vm5186_vm7, %v5011_v7, 0.0 }
 0x212   : > { %v4949_v15 = vpop.f32.mrf.mxu0  ;;  %v4451_v42 = vpop.f32.mrf.mxu1  ;;  %5171 = vst.msk [vmem:[%s9564_s29 + $0x44] sm:$0xf] %vm5153_vm6, %v6109_v58  ;;  %v5323_v6 = vsel %vm5186_vm7, %v5275_v28, 0.0  ;;  %v4518_v37 = vadd.f32 %v6715_v13, %v9582_v10  ;;  %v5325_v21 = vsel %vm5186_vm7, %v5276_v38, 0.0  ;;  %v6114_v39 = vpack.c.bf16 %v5015_v33, %v5015_v33 }
 0x213   : > { %v4516_v23 = vadd.f32 %v4451_v42, %v9585_v53  ;;  %v5223_v41 = vadd.f32 %v5222_v36, %v5221_v44  ;;  %v5324_v43 = vadd.f32 %v5323_v6, %v5322_v27  ;;  %v5224_v30 = vsel %vm5186_vm7, %v5012_v24, 0.0 }
 0x214   : > { %v6766_v22 = vpop.f32.mrf.mxu0  ;;  %v6718_v63 = vpop.f32.mrf.mxu1  ;;  %v5327_v7 = vsel %vm5186_vm7, %v5277_v29, 0.0  ;;  %v6112_v62 = vpack.c.bf16 %v5013_v31, %v5013_v31  ;;  %v5278_v40 = vmul.f32 %v5013_v31, %v5013_v31  ;;  %5176 = vst.msk [vmem:[%s9564_s29 + $0x58] sm:$0xf] %vm5153_vm6, %v6114_v39  ;;  %v5016_v53 = vadd.f32 %v6763_v17, %v4518_v37 }
 0x215   : > { %v5326_v2 = vadd.f32 %v5325_v21, %v5324_v43  ;;  %v5225_v10 = vadd.f32 %v5224_v30, %v5223_v41  ;;  %v5014_v57 = vadd.f32 %v4949_v15, %v4516_v23  ;;  %v5280_v54 = vmul.f32 %v5015_v33, %v5015_v33 }
 0x216   : > { %v4962_v45 = vpop.f32.mrf.mxu0  ;;  %v4464_v12 = vpop.f32.mrf.mxu1  ;;  %5174 = vst.msk [vmem:[%s9564_s29 + $0x50] sm:$0xf] %vm5153_vm6, %v6112_v62  ;;  %v5226_v59 = vsel %vm5186_vm7, %v5013_v31, 0.0  ;;  %v4521_v55 = vadd.f32 %v6718_v63, %v9590_v56  ;;  %v5329_v18 = vsel %vm5186_vm7, %v5278_v40, 0.0  ;;  %v6115_v49 = vpack.c.bf16 %v5016_v53, %v5016_v53 }
 0x217   : > { %v4519_v20 = vadd.f32 %v4464_v12, %v9593_v8  ;;  %v5227_v60 = vadd.f32 %v5226_v59, %v5225_v10  ;;  %v5328_v35 = vadd.f32 %v5327_v7, %v5326_v2  ;;  %v5281_v17 = vmul.f32 %v5016_v53, %v5016_v53 }
 0x218   : > { %v6767_v5 = vpop.f32.mrf.mxu0  ;;  %v6719_v4 = vpop.f32.mrf.mxu1  ;;  %v6113_v26 = vpack.c.bf16 %v5014_v57, %v5014_v57  ;;  %v5228_v50 = vsel %vm5186_vm7, %v5014_v57, 0.0  ;;  %v5279_v24 = vmul.f32 %v5014_v57, %v5014_v57  ;;  %5177 = vst.msk [vmem:[%s9564_s29 + $0x5c] sm:$0xf] %vm5153_vm6, %v6115_v49  ;;  %v5019_v38 = vadd.f32 %v6766_v22, %v4521_v55 }
 0x219   : > { %v5330_v25 = vadd.f32 %v5329_v18, %v5328_v35  ;;  %v5229_v56 = vadd.f32 %v5228_v50, %v5227_v60  ;;  %v5017_v8 = vadd.f32 %v4962_v45, %v4519_v20  ;;  %v5230_v52 = vsel %vm5186_vm7, %v5015_v33, 0.0 }
 0x21a   : > { %v4965_v1 = vpop.f32.mrf.mxu0  ;;  %v4467_v48 = vpop.f32.mrf.mxu1  ;;  %5175 = vst.msk [vmem:[%s9564_s29 + $0x54] sm:$0xf] %vm5153_vm6, %v6113_v26  ;;  %v5331_v11 = vsel %vm5186_vm7, %v5279_v24, 0.0  ;;  %v4522_v15 = vadd.f32 %v6719_v4, %v9596_v32  ;;  %v5333_v9 = vsel %vm5186_vm7, %v5280_v54, 0.0  ;;  %v6118_v13 = vpack.c.bf16 %v5019_v38, %v5019_v38 }
 0x21b   : > { %v4520_v47 = vadd.f32 %v4467_v48, %v9599_v0  ;;  %v5231_v61 = vadd.f32 %v5230_v52, %v5229_v56  ;;  %v5332_v46 = vadd.f32 %v5331_v11, %v5330_v25  ;;  %v5232_v58 = vsel %vm5186_vm7, %v5016_v53, 0.0 }
 0x21c   : > { %v6770_v14 = vpop.f32.mrf.mxu0  ;;  %v6722_v29 = vpop.f32.mrf.mxu1  ;;  %v5335_v34 = vsel %vm5186_vm7, %v5281_v17, 0.0  ;;  %v6116_v28 = vpack.c.bf16 %v5017_v8, %v5017_v8  ;;  %v5282_v22 = vmul.f32 %v5017_v8, %v5017_v8  ;;  %5180 = vst.msk [vmem:[%s9564_s29 + $0x68] sm:$0xf] %vm5153_vm6, %v6118_v13  ;;  %v5020_v33 = vadd.f32 %v6767_v5, %v4522_v15 }
 0x21d   : > { %v5334_v44 = vadd.f32 %v5333_v9, %v5332_v46  ;;  %v5233_v32 = vadd.f32 %v5232_v58, %v5231_v61  ;;  %v5018_v0 = vadd.f32 %v4965_v1, %v4520_v47  ;;  %v5238_v42 = vsel %vm5186_vm7, %v5019_v38, 0.0 }
 0x21e   : > { %v4978_v27 = vpop.f32.mrf.mxu0  ;;  %v4480_v31 = vpop.f32.mrf.mxu1  ;;  %5178 = vst.msk [vmem:[%s9564_s29 + $0x60] sm:$0xf] %vm5153_vm6, %v6116_v28  ;;  %v5234_v36 = vsel %vm5186_vm7, %v5017_v8, 0.0  ;;  %v4525_v6 = vadd.f32 %v6722_v29, %v9605_v16  ;;  %v5284_v23 = vmul.f32 %v5019_v38, %v5019_v38  ;;  %v6119_v41 = vpack.c.bf16 %v5020_v33, %v5020_v33 }
 0x21f   : > { %v4523_v37 = vadd.f32 %v4480_v31, %v9640_v3  ;;  %v5235_v45 = vadd.f32 %v5234_v36, %v5233_v32  ;;  %v5336_v21 = vadd.f32 %v5335_v34, %v5334_v44  ;;  %v5337_v39 = vsel %vm5186_vm7, %v5282_v22, 0.0 }
 0x220   : > { %v6723_v43 = vpop.f32.mrf.mxu1  ;;  %v6117_v63 = vpack.c.bf16 %v5018_v0, %v5018_v0  ;;  %v5236_v30 = vsel %vm5186_vm7, %v5018_v0, 0.0  ;;  %v5283_v7 = vmul.f32 %v5018_v0, %v5018_v0  ;;  %v6771_v62 = vpop.f32.mrf.mxu0  ;;  %5181 = vst.msk [vmem:[%s9564_s29 + $0x6c] sm:$0xf] %vm5153_vm6, %v6119_v41  ;;  %v5023_v16 = vadd.f32 %v6770_v14, %v4525_v6 }
 0x221   : > { %v5338_v40 = vadd.f32 %v5337_v39, %v5336_v21  ;;  %v5237_v5 = vadd.f32 %v5236_v30, %v5235_v45  ;;  %v5021_v2 = vadd.f32 %v4978_v27, %v4523_v37  ;;  %v5285_v10 = vmul.f32 %v5020_v33, %v5020_v33 }
 0x222   : > { %v4483_v3 = vpop.f32.mrf.mxu1  ;;  %5179 = vst.msk [vmem:[%s9564_s29 + $0x64] sm:$0xf] %vm5153_vm6, %v6117_v63  ;;  %v5339_v53 = vsel %vm5186_vm7, %v5283_v7, 0.0  ;;  %v4526_v57 = vadd.f32 %v6723_v43, %v9649_v51  ;;  %v6122_v55 = vpack.c.bf16 %v5023_v16, %v5023_v16  ;;  %v5341_v20 = vsel %vm5186_vm7, %v5284_v23, 0.0  ;;  %v4981_v18 = vpop.f32.mrf.mxu0 }
 0x223   : > { %v4524_v12 = vadd.f32 %v4483_v3, %v9670_v19  ;;  %v5239_v54 = vadd.f32 %v5238_v42, %v5237_v5  ;;  %v5340_v59 = vadd.f32 %v5339_v53, %v5338_v40  ;;  %v5240_v1 = vsel %vm5186_vm7, %v5020_v33, 0.0 }
 0x224   : > { %v6120_v60 = vpack.c.bf16 %v5021_v2, %v5021_v2  ;;  %v5286_v35 = vmul.f32 %v5021_v2, %v5021_v2  ;;  %5184 = vst.msk [vmem:[%s9564_s29 + $0x78] sm:$0xf] %vm5153_vm6, %v6122_v55  ;;  %v5024_v17 = vadd.f32 %v6771_v62, %v4526_v57  ;;  %v5343_v26 = vsel %vm5186_vm7, %v5285_v10, 0.0 }
 0x225   : > { %v5342_v49 = vadd.f32 %v5341_v20, %v5340_v59  ;;  %v5241_v4 = vadd.f32 %v5240_v1, %v5239_v54  ;;  %v5022_v51 = vadd.f32 %v4981_v18, %v4524_v12  ;;  %v5242_v19 = vsel %vm5186_vm7, %v5021_v2, 0.0 }
 0x226   : > { %5182 = vst.msk [vmem:[%s9564_s29 + $0x70] sm:$0xf] %vm5153_vm6, %v6120_v60  ;;  %v5288_v50 = vmul.f32 %v5023_v16, %v5023_v16  ;;  %v6123_v25 = vpack.c.bf16 %v5024_v17, %v5024_v17  ;;  %v5345_v56 = vsel %vm5186_vm7, %v5286_v35, 0.0  ;;  %v5246_v15 = vsel %vm5186_vm7, %v5023_v16, 0.0 }
 0x227   : > { %v5243_v24 = vadd.f32 %v5242_v19, %v5241_v4  ;;  %v5344_v14 = vadd.f32 %v5343_v26, %v5342_v49  ;;  %v6121_v38 = vpack.c.bf16 %v5022_v51, %v5022_v51  ;;  %v5244_v8 = vsel %vm5186_vm7, %v5022_v51, 0.0 }
 0x228   : > { %v5287_v48 = vmul.f32 %v5022_v51, %v5022_v51  ;;  %5185 = vst.msk [vmem:[%s9564_s29 + $0x7c] sm:$0xf] %vm5153_vm6, %v6123_v25  ;;  %v5289_v47 = vmul.f32 %v5024_v17, %v5024_v17  ;;  %v5349_v13 = vsel %vm5186_vm7, %v5288_v50, 0.0  ;;  %v5248_v29 = vsel %vm5186_vm7, %v5024_v17, 0.0 }
 0x229   : > { %v5346_v52 = vadd.f32 %v5345_v56, %v5344_v14  ;;  %v5245_v11 = vadd.f32 %v5244_v8, %v5243_v24  ;;  %5183 = vst.msk [vmem:[%s9564_s29 + $0x74] sm:$0xf] %vm5153_vm6, %v6121_v38 }
 0x22a   : > { %v5347_v9 = vsel %vm5186_vm7, %v5287_v48, 0.0  ;;  %v5351_v28 = vsel %vm5186_vm7, %v5289_v47, 0.0 }
 0x22b   : > { %v5247_v61 = vadd.f32 %v5246_v15, %v5245_v11  ;;  %v5348_v46 = vadd.f32 %v5347_v9, %v5346_v52 }
 0x22d   : > { %v5249_v58 = vadd.f32 %v5248_v29, %v5247_v61  ;;  %v5350_v34 = vadd.f32 %v5349_v13, %v5348_v46 }
 0x22f   : > { %v5250_v22 = vrot.slane %v5249_v58, 4  ;;  %v5352_v27 = vadd.f32 %v5351_v28, %v5350_v34 }
 0x231   : > { %v5251_v44 = vadd.f32 %v5250_v22, %v5249_v58  ;;  %v5353_v32 = vrot.slane %v5352_v27, 4 }
 0x233   : > { %v5252_v33 = vrot.slane %v5251_v44, 2  ;;  %v5354_v0 = vadd.f32 %v5353_v32, %v5352_v27 }
 0x235   : > { %v5253_v31 = vadd.f32 %v5252_v33, %v5251_v44  ;;  %v5355_v42 = vrot.slane %v5354_v0, 2 }
 0x237   : > { %v5254_v36 = vrot.slane %v5253_v31, 1  ;;  %v5356_v6 = vadd.f32 %v5355_v42, %v5354_v0 }
 0x239   : > { %v5255_v37 = vadd.f32 %v5254_v36, %v5253_v31  ;;  %v5357_v23 = vrot.slane %v5356_v6, 1 }
 0x23b   : > { %5257 = vst.msk [vmem:[%s211_s6] sm:$0x1] %vm5256_vm8, %v5255_v37  ;;  %v5358_v45 = vadd.f32 %v5357_v23, %v5356_v6 }
 0x23d   : > { %5359 = vst.msk [vmem:[%s214_s9] sm:$0x1] %vm5256_vm8, %v5358_v45 }
 0x23e PF: > { %s15_s15 = sadd.s32 1, %s6932_s15  }
 0x23f   : > { %p12_p4 = scmp.ge.s32.totalorder %s15_s15, 4  }
 0x241   :  { %14 = sbr.rel (!%p12_p4) target bundleno = 1 (0x1), region = 92 }

// kernel: upconv_forward.6
= control target key start
LH: loop header
LB: loop body
LE: loop exit
PB: predicated region body
PF: predicated region fallthrough
CT: control target
= control target key end

     0   :  { %s7534_s21 = smov 0   ;;  %s10430_s0 = inlined_call_operand.vmem [shape: bf16[2,18,18,64], index: 0, kind: input, shape index: {}]   ;;  %s10431_s1 = inlined_call_operand.vmem [shape: bf16[9,64,64], index: 1, kind: input, shape index: {}]   ;;  %s10432_s2 = inlined_call_operand.vmem [shape: f32[1,64], index: 2, kind: input, shape index: {}]   ;;  %s10433_s3 = inlined_call_operand.vmem [shape: f32[1,64], index: 3, kind: input, shape index: {}]   ;;  %s10434_s4 = inlined_call_operand.vmem [shape: bf16[2,256,64], index: 4, kind: output, shape index: {0}]   ;;  %s10435_s5 = inlined_call_operand.vmem [shape: f32[2,1,64], index: 5, kind: output, shape index: {1}]   ;;  %s10436_s6 = inlined_call_operand.vmem [shape: f32[2,1,64], index: 6, kind: output, shape index: {2}]  }
   0x1 LB: > { %s6176_s22 = sadd.s32 4294967295, %s7496_s21   ;;  %p6180_p0 = scmp.ge.s32.totalorder %s7496_s21, 1  ;;  %s7496_s21 = sphi %s7534_s21, %s17_s21  }
   0x2   : > { %p217_p1 = scmp.lt.s32.totalorder %s7496_s21, 3 }
   0x4   : > { %p218_p2 = pnand %p6180_p0, %p217_p1 }
   0x6   : > { %221 = sbr.rel (%p218_p2) target bundleno = 650 (0x28a), region = 36 }
   0xb   : > { %v7389_v0 = vld [vmem:[%s10431_s1 + $0x38] sm:$0xff]   ;;  %v7390_v1 = vld [vmem:[%s10431_s1 + $0x30] sm:$0xff]   ;;  %v7498_v2 = vmov 0.0|0.0   ;;  %vm873_vm0 = vcmask 519168   ;;  %v554_v5 = vlaneseq  ;;  %vm876_vm1 = vcmask 516096   ;;  %v7391_v6 = vld [vmem:[%s10431_s1 + $0x28] sm:$0xff]  }
   0xc   : > { %v6186_v3 = vcombine.low %v7498_v2, %v7498_v2  ;;  %v6187_v4 = vcombine.high %v7498_v2, %v7498_v2  ;;  %7011 = vmatprep.subr.bf16.mxu0 %v7389_v0  ;;  %7371 = vmatprep.subr.bf16.mxu1 %v7389_v0  ;;  %p253_p3 = scmp.lt.s32.totalorder %s6176_s22, 1  ;;  %v7392_v8 = vld [vmem:[%s10431_s1 + $0x20] sm:$0xff]   ;;  %vm985_vm2 = vsmask.f32 3328  ;;  %vm986_vm3 = vsmask.f32 7440 }
   0xd   : > { %7012 = vmatpush3.bf16.msra.mxu0 %v7389_v0  ;;  %7375 = vmatpush3.bf16.msra.mxu1 %v7389_v0  ;;  %v7559_v7 = vshrl.u32 %v554_v5, 7  ;;  %v7575_v10 = vld [vmem:[%s10432_s2] ss:$0 sm:$0xff]  ;;  %vm1453_vm5 = vcmask 523264   ;;  %v7594_v20 = vld [vmem:[%s10431_s1 + $0x18] sm:$0xff]   ;;  %vm7610_vm7 = vmor %vm985_vm2, %vm986_vm3  ;;  %vm2024_vm8 = vcmask 1042432  }
   0xe   : > { %874 = vst.msk [vmem:[#allocation2] sm:$0xf] %vm873_vm0, %v6186_v3  ;;  %875 = vst.msk [vmem:[#allocation2 + $0x4] sm:$0xf] %vm873_vm0, %v6187_v4  ;;  %7013 = vmatprep.subr.bf16.mxu0 %v7390_v1  ;;  %7372 = vmatprep.subr.bf16.mxu1 %v7390_v1  ;;  %s10656_s22 = smov (!%p253_p3, %s6176_s22), 1  ;;  %v7603_v26 = vld [vmem:[%s10431_s1 + $0x58] sm:$0xff]  }
   0xf   : > { %877 = vst.msk [vmem:[#allocation2 + $0x8] sm:$0x1] %vm876_vm1, %v6186_v3  ;;  %928 = vst.msk [vmem:[#allocation2 + $0xd4] sm:$0x1] %vm876_vm1, %v6186_v3  ;;  %s7379_s7 = smul.u32 216, %s10656_s22  ;;  %v7570_v9 = vadd.s32 16, %v7559_v7  ;;  %s265_s10 = scalar_lea.vmem %s10435_s5, %s10656_s22 }
  0x10   : > { %926 = vst.msk [vmem:[#allocation2 + $0xcc] sm:$0xf] %vm873_vm0, %v6186_v3  ;;  %927 = vst.msk [vmem:[#allocation2 + $0xd0] sm:$0xf] %vm873_vm0, %v6187_v4  ;;  %vm558_vm4 = vcmp.gt.s32.totalorder %v7559_v7, 0  ;;  %vm2025_vm9 = vcmask 1046532   ;;  %s268_s14 = scalar_lea.vmem %s10436_s6, %s10656_s22 }
  0x11   : > { %7014 = vmatpush3.bf16.msra.mxu0 %v7390_v1  ;;  %7376 = vmatpush3.bf16.msra.mxu1 %v7390_v1  ;;  %10443 = vst [vmem:[#allocation3_spill] sm:$0xff] %v7570_v9  ;;  %s7583_s12 = scalar_lea.vmem %s10430_s0, %s7379_s7  ;;  %v7589_v19 = vld [vmem:[%s10433_s3] ss:$0 sm:$0xff]  ;;  %vm563_vm6 = vcmp.lt.s32.totalorder %v7570_v9, 17  ;;  %vm8036_vm10 = vmor %vm2024_vm8, %vm2025_vm9  ;;  %s6710_s29 = sshll.u32 %s10656_s22, 7 }
  0x12   : > { %7015 = vmatprep.subr.bf16.mxu0 %v7391_v6  ;;  %7373 = vmatprep.subr.bf16.mxu1 %v7391_v6  ;;  %v273_v18 = vld [vmem:[%s7583_s12 + $0xc] sm:$0xff]   ;;  %v275_v22 = vld [vmem:[%s7583_s12 + $0x14] sm:$0x1]  ;;  %v6826_v25 = vld [vmem:[%s7583_s12 + $0x60] sm:$0xff]   ;;  %s10139_s7 = scalar_lea.vmem %s10434_s4, %s6710_s29 }
  0x13   : > { %v327_v23 = vunpack.c.l.bf16 %v273_v18  ;;  %v328_v24 = vunpack.c.h.bf16 %v273_v18  ;;  %v296_v31 = vld [vmem:[%s7583_s12 + $0x68] sm:$0x1]  ;;  %v329_v33 = vunpack.c.l.bf16 %v275_v22  ;;  %v6805_v38 = vunpack.c.l.bf16 %v6826_v25  ;;  %v297_v53 = vld [vmem:[%s7583_s12 + $0x6c] sm:$0xff]   ;;  %v299_v58 = vld [vmem:[%s7583_s12 + $0x74] sm:$0x1] }
  0x14   : > { %v6806_v39 = vunpack.c.h.bf16 %v6826_v25  ;;  %v350_v44 = vunpack.c.l.bf16 %v296_v31  ;;  %v351_v4 = vunpack.c.l.bf16 %v297_v53  ;;  %v352_v5 = vunpack.c.h.bf16 %v297_v53 }
  0x15   : > { %v929_v11 = vld [vmem:[#allocation2] sm:$0xf]  ;;  %v930_v12 = vld [vmem:[#allocation2 + $0x4] sm:$0xf]  ;;  %7016 = vmatpush3.bf16.msra.mxu0 %v7391_v6  ;;  %7377 = vmatpush3.bf16.msra.mxu1 %v7391_v6  ;;  %v389_v34 = vmul.f32 %v7575_v10, %v327_v23  ;;  %v390_v35 = vmul.f32 %v7575_v10, %v328_v24  ;;  %v391_v41 = vmul.f32 %v7575_v10, %v329_v33  ;;  %v353_v6 = vunpack.c.l.bf16 %v299_v58 }
  0x16   : > { %v7578_v13 = vld [vmem:[#allocation2 + $0x8] sm:$0x1]  ;;  %v989_v14 = vshrl.u32 %v929_v11, 16  ;;  %v992_v15 = vshll.u32 %v929_v11, 16  ;;  %v998_v16 = vshll.u32 %v930_v12, 16  ;;  %v1002_v17 = vshrl.u32 %v930_v12, 16  ;;  %7017 = vmatprep.subr.bf16.mxu0 %v7392_v8  ;;  %7374 = vmatprep.subr.bf16.mxu1 %v7392_v8 }
  0x17   : > { %v1008_v21 = vshll.u32 %v7578_v13, 16  ;;  %v449_v42 = vadd.f32 %v7589_v19, %v389_v34  ;;  %v450_v43 = vadd.f32 %v7589_v19, %v390_v35  ;;  %v410_v47 = vmul.f32 %v6805_v38, %v7575_v10  ;;  %v278_v11 = vld [vmem:[%s7583_s12 + $0x20] sm:$0x1] }
  0x18   : > { %v991_v27 = vrot.slane %v989_v14, 4  ;;  %v994_v28 = vrot.slane %v992_v15, 5  ;;  %v1000_v29 = vrot.slane %v998_v16, 5  ;;  %v1004_v30 = vrot.slane %v1002_v17, 4 }
  0x19   : > { %v1010_v32 = vrot.slane %v1008_v21, 5  ;;  %7018 = vmatpush3.bf16.msra.mxu0 %v7392_v8  ;;  %7378 = vmatpush3.bf16.msra.mxu1 %v7392_v8  ;;  %v411_v48 = vmul.f32 %v6806_v39, %v7575_v10  ;;  %v451_v49 = vadd.f32 %v7589_v19, %v391_v41  ;;  %v503_v50 = vmax.f32 %v449_v42, 0.0  ;;  %v6823_v8 = vld [vmem:[%s7583_s12 + $0x18] sm:$0xff]  }
  0x1a   : > { %v995_v36 = vor.u32 %v994_v28, %v991_v27  ;;  %v1005_v37 = vor.u32 %v1004_v30, %v1000_v29  ;;  %7051 = vmatprep.subr.bf16.mxu1 %v7594_v20  ;;  %7091 = vmatprep.subr.bf16.mxu0 %v7603_v26  ;;  %v504_v51 = vmax.f32 %v450_v43, 0.0  ;;  %v412_v52 = vmul.f32 %v7575_v10, %v350_v44  ;;  %v7651_v28 = vld [vmem:[%s7583_s12 + $0x24] sm:$0xff]  }
  0x1b   : > { %v470_v56 = vadd.f32 %v7589_v19, %v410_v47  ;;  %v471_v57 = vadd.f32 %v7589_v19, %v411_v48  ;;  %v505_v60 = vmax.f32 %v451_v49, 0.0  ;;  %v588_v61 = vsel %vm558_vm4, %v503_v50, 0.0 }
  0x1c   : > { %v996_v45 = vrot.slane %v995_v36, 4  ;;  %v1006_v46 = vrot.slane %v1005_v37, 4  ;;  %v6712_v62 = vpack.c.bf16 %v504_v51, %v504_v51  ;;  %v6711_v63 = vpack.c.bf16 %v588_v61, %v588_v61 }
  0x1d   : > { %v472_v0 = vadd.f32 %v7589_v19, %v412_v52  ;;  %v524_v1 = vmax.f32 %v470_v56, 0.0  ;;  %v525_v2 = vmax.f32 %v471_v57, 0.0  ;;  %v590_v3 = vsel %vm563_vm6, %v505_v60, 0.0 }
  0x1e   : > { %v1001_v54 = vsel %vm7610_vm7, %v996_v45, %v1000_v29  ;;  %v1011_v55 = vsel %vm7610_vm7, %v1006_v46, %v1010_v32  ;;  %879 = vst.msk [vmem:[#allocation2 + $0x10] sm:$0xf] %vm873_vm0, %v6712_v62  ;;  %v6713_v12 = vpack.c.bf16 %v590_v3, %v590_v3  ;;  %878 = vst.msk [vmem:[#allocation2 + $0xc] sm:$0xf] %vm873_vm0, %v6711_v63  ;;  %v6793_v24 = vunpack.c.l.bf16 %v6823_v8 }
  0x1f   : > { %v6248_v59 = vcombine.low %v1001_v54, %v1011_v55  ;;  %v526_v14 = vmax.f32 %v472_v0, 0.0  ;;  %v609_v15 = vsel %vm558_vm4, %v524_v1, 0.0  ;;  %v6733_v16 = vpack.c.bf16 %v525_v2, %v525_v2 }
  0x20   : > { %v6732_v17 = vpack.c.bf16 %v609_v15, %v609_v15  ;;  %v413_v18 = vmul.f32 %v7575_v10, %v351_v4  ;;  %v414_v21 = vmul.f32 %v7575_v10, %v352_v5  ;;  %v415_v22 = vmul.f32 %v7575_v10, %v353_v6  ;;  %880 = vst.msk [vmem:[#allocation2 + $0x14] sm:$0x1] %vm876_vm1, %v6713_v12  ;;  %v281_v5 = vld [vmem:[%s7583_s12 + $0x2c] sm:$0x1] }
  0x21   : > { %7019 = vmatprep.mubr.msk.bf16.mxu0 %vm1453_vm5, %v6248_v59  ;;  %v611_v23 = vsel %vm563_vm6, %v526_v14, 0.0  ;;  %900 = vst.msk [vmem:[#allocation2 + $0x64] sm:$0xf] %vm873_vm0, %v6733_v16  ;;  %v6794_v25 = vunpack.c.h.bf16 %v6823_v8  ;;  %v332_v27 = vunpack.c.l.bf16 %v278_v11  ;;  %v392_v33 = vmul.f32 %v6793_v24, %v7575_v10 }
  0x22   : > { %v6734_v29 = vpack.c.bf16 %v611_v23, %v611_v23  ;;  %899 = vst.msk [vmem:[#allocation2 + $0x60] sm:$0xf] %vm873_vm0, %v6732_v17  ;;  %v473_v30 = vadd.f32 %v7589_v19, %v413_v18  ;;  %v474_v31 = vadd.f32 %v7589_v19, %v414_v21  ;;  %v475_v32 = vadd.f32 %v7589_v19, %v415_v22 }
  0x23   : > { %v393_v34 = vmul.f32 %v6794_v25, %v7575_v10  ;;  %v394_v41 = vmul.f32 %v7575_v10, %v332_v27  ;;  %v452_v42 = vadd.f32 %v7589_v19, %v392_v33  ;;  %v333_v43 = vunpack.c.l.bf16 %v7651_v28 }
  0x24   : > { %901 = vst.msk [vmem:[#allocation2 + $0x68] sm:$0x1] %vm876_vm1, %v6734_v29  ;;  %v527_v36 = vmax.f32 %v473_v30, 0.0  ;;  %v528_v37 = vmax.f32 %v474_v31, 0.0  ;;  %v529_v38 = vmax.f32 %v475_v32, 0.0  ;;  %v334_v44 = vunpack.c.h.bf16 %v7651_v28  ;;  %v7396_v31 = vld [vmem:[%s10431_s1 + $0x50] sm:$0xff]  }
  0x25   : > { %v932_v39 = vld [vmem:[#allocation2 + $0x10] sm:$0xf]  ;;  %v931_v45 = vld [vmem:[#allocation2 + $0xc] sm:$0xf]  ;;  %v453_v49 = vadd.f32 %v7589_v19, %v393_v34  ;;  %v454_v0 = vadd.f32 %v7589_v19, %v394_v41  ;;  %v506_v14 = vmax.f32 %v452_v42, 0.0  ;;  %v335_v24 = vunpack.c.l.bf16 %v281_v5  ;;  %v7400_v28 = vld [vmem:[%s10431_s1 + $0x40] sm:$0xff]  }
  0x26   : > { %v1022_v46 = vshll.u32 %v932_v39, 16  ;;  %v1026_v47 = vshrl.u32 %v932_v39, 16  ;;  %v612_v48 = vsel %vm558_vm4, %v527_v36, 0.0  ;;  %v1013_v50 = vshrl.u32 %v931_v45, 16 }
  0x27   : > { %v1016_v51 = vshll.u32 %v931_v45, 16  ;;  %v614_v52 = vsel %vm563_vm6, %v529_v38, 0.0  ;;  %v6735_v53 = vpack.c.bf16 %v612_v48, %v612_v48  ;;  %v970_v54 = vld [vmem:[#allocation2 + $0x14] sm:$0x1]  ;;  %v6736_v58 = vpack.c.bf16 %v528_v37, %v528_v37 }
  0x28   : > { %v1024_v55 = vrot.slane %v1022_v46, 5  ;;  %v1028_v56 = vrot.slane %v1026_v47, 4  ;;  %v946_v57 = vld [vmem:[#allocation2 + $0x64] sm:$0xf]  ;;  %v6737_v59 = vpack.c.bf16 %v614_v52, %v614_v52  ;;  %v1015_v60 = vrot.slane %v1013_v50, 4 }
  0x29   : > { %v1018_v61 = vrot.slane %v1016_v51, 5  ;;  %v1032_v62 = vshll.u32 %v970_v54, 16  ;;  %v945_v63 = vld [vmem:[#allocation2 + $0x60] sm:$0xf]  ;;  %902 = vst.msk [vmem:[#allocation2 + $0x6c] sm:$0xf] %vm873_vm0, %v6735_v53 }
  0x2a   : > { %v1029_v1 = vor.u32 %v1028_v56, %v1024_v55  ;;  %v1181_v2 = vshrl.u32 %v945_v63, 16  ;;  %v1184_v3 = vshll.u32 %v945_v63, 16  ;;  %v1190_v4 = vshll.u32 %v946_v57, 16  ;;  %903 = vst.msk [vmem:[#allocation2 + $0x70] sm:$0xf] %vm873_vm0, %v6736_v58 }
  0x2b   : > { %904 = vst.msk [vmem:[#allocation2 + $0x74] sm:$0x1] %vm876_vm1, %v6737_v59  ;;  %v1019_v6 = vor.u32 %v1018_v61, %v1015_v60  ;;  %v1034_v8 = vrot.slane %v1032_v62, 5  ;;  %v977_v11 = vld [vmem:[#allocation2 + $0x68] sm:$0x1]  ;;  %v1194_v12 = vshrl.u32 %v946_v57, 16  ;;  %v395_v60 = vmul.f32 %v7575_v10, %v333_v43 }
  0x2c   : > { %v1030_v15 = vrot.slane %v1029_v1, 4  ;;  %v1183_v16 = vrot.slane %v1181_v2, 4  ;;  %v1186_v17 = vrot.slane %v1184_v3, 5  ;;  %v1192_v18 = vrot.slane %v1190_v4, 5  ;;  %v302_v56 = vld [vmem:[%s7583_s12 + $0x80] sm:$0x1] }
  0x2d   : > { %v1020_v21 = vrot.slane %v1019_v6, 4  ;;  %v1196_v22 = vrot.slane %v1194_v12, 4  ;;  %v1200_v23 = vshll.u32 %v977_v11, 16  ;;  %v507_v29 = vmax.f32 %v453_v49, 0.0  ;;  %v7398_v1 = vld [vmem:[%s10431_s1 + $0x48] sm:$0xff]  }
  0x2e   : > { %v1035_v25 = vsel %vm7610_vm7, %v1030_v15, %v1034_v8  ;;  %v1187_v27 = vor.u32 %v1186_v17, %v1183_v16  ;;  %v508_v30 = vmax.f32 %v454_v0, 0.0  ;;  %v591_v36 = vsel %vm558_vm4, %v506_v14, 0.0 }
  0x2f   : > { %v1025_v32 = vsel %vm7610_vm7, %v1020_v21, %v1024_v55  ;;  %v1197_v33 = vor.u32 %v1196_v22, %v1192_v18  ;;  %v1202_v34 = vrot.slane %v1200_v23, 5  ;;  %v6714_v42 = vpack.c.bf16 %v591_v36, %v591_v36  ;;  %v6827_v55 = vld [vmem:[%s7583_s12 + $0x78] sm:$0xff]  }
  0x30   : > { %v6249_v37 = vcombine.low %v1025_v32, %v1035_v25  ;;  %v1188_v38 = vrot.slane %v1187_v27, 4  ;;  %v947_v39 = vld [vmem:[#allocation2 + $0x6c] sm:$0xf]  ;;  %v593_v41 = vsel %vm563_vm6, %v508_v30, 0.0  ;;  %v6715_v49 = vpack.c.bf16 %v507_v29, %v507_v29  ;;  %v7395_v27 = vld [vmem:[%s10431_s1 + $0x10] sm:$0xff]  }
  0x31   : > { %v1198_v45 = vrot.slane %v1197_v33, 4  ;;  %v948_v46 = vld [vmem:[#allocation2 + $0x70] sm:$0xf]  ;;  %v1205_v48 = vshrl.u32 %v947_v39, 16  ;;  %v6716_v50 = vpack.c.bf16 %v593_v41, %v593_v41  ;;  %v1208_v52 = vshll.u32 %v947_v39, 16  ;;  %v303_v41 = vld [vmem:[%s7583_s12 + $0x84] sm:$0xff]  }
  0x32   : > { %v978_v47 = vld [vmem:[#allocation2 + $0x74] sm:$0x1]  ;;  %7020 = vmatmul.mubr.msk.bf16.vlgmr.msra.gmra.mxu0 %vm1453_vm5, %v6249_v37  ;;  %v1193_v51 = vsel %vm7610_vm7, %v1188_v38, %v1192_v18  ;;  %v1214_v53 = vshll.u32 %v948_v46, 16  ;;  %v1218_v54 = vshrl.u32 %v948_v46, 16  ;;  %881 = vst.msk [vmem:[#allocation2 + $0x18] sm:$0xf] %vm873_vm0, %v6714_v42  ;;  %v397_v3 = vmul.f32 %v7575_v10, %v335_v24 }
  0x33   : > { %v1203_v57 = vsel %vm7610_vm7, %v1198_v45, %v1202_v34  ;;  %v1207_v58 = vrot.slane %v1205_v48, 4  ;;  %v1224_v59 = vshll.u32 %v978_v47, 16  ;;  %7092 = vmatpush3.bf16.msra.mxu0 %v7603_v26  ;;  %882 = vst.msk [vmem:[#allocation2 + $0x1c] sm:$0xf] %vm873_vm0, %v6715_v49  ;;  %v1210_v62 = vrot.slane %v1208_v52, 5  ;;  %v7402_v49 = vld [vmem:[%s10431_s1 + $0x98] sm:$0xff]  }
  0x34   : > { %883 = vst.msk [vmem:[#allocation2 + $0x20] sm:$0x1] %vm876_vm1, %v6716_v50  ;;  %v6256_v61 = vcombine.low %v1193_v51, %v1203_v57  ;;  %v1216_v63 = vrot.slane %v1214_v53, 5  ;;  %v1220_v0 = vrot.slane %v1218_v54, 4  ;;  %7093 = vmatprep.subr.bf16.mxu0 %v7396_v31  ;;  %v396_v26 = vmul.f32 %v7575_v10, %v334_v44  ;;  %v305_v42 = vld [vmem:[%s7583_s12 + $0x8c] sm:$0x1] }
  0x35   : > { %v1226_v2 = vrot.slane %v1224_v59, 5  ;;  %v455_v4 = vadd.f32 %v7589_v19, %v395_v60  ;;  %v1211_v43 = vor.u32 %v1210_v62, %v1207_v58  ;;  %v6809_v6 = vunpack.c.l.bf16 %v6827_v55  ;;  %v7397_v54 = vld [vmem:[%s10431_s1 + $0x8] sm:$0xff]  }
  0x36   : > { %7035 = vmatprep.mubr.msk.bf16.mxu1 %vm1453_vm5, %v6256_v61  ;;  %v1221_v5 = vor.u32 %v1220_v0, %v1216_v63  ;;  %v6810_v8 = vunpack.c.h.bf16 %v6827_v55  ;;  %v456_v11 = vadd.f32 %v7589_v19, %v396_v26  ;;  %v457_v12 = vadd.f32 %v7589_v19, %v397_v3 }
  0x37   : > { %v509_v14 = vmax.f32 %v455_v4, 0.0  ;;  %v356_v15 = vunpack.c.l.bf16 %v302_v56  ;;  %7094 = vmatpush3.bf16.msra.mxu0 %v7396_v31  ;;  %v1212_v44 = vrot.slane %v1211_v43, 4  ;;  %v416_v17 = vmul.f32 %v6809_v6, %v7575_v10 }
  0x38   : > { %v1222_v16 = vrot.slane %v1221_v5, 4  ;;  %v417_v18 = vmul.f32 %v6810_v8, %v7575_v10  ;;  %7095 = vmatprep.subr.bf16.mxu0 %v7398_v1  ;;  %v510_v22 = vmax.f32 %v456_v11, 0.0  ;;  %v511_v23 = vmax.f32 %v457_v12, 0.0  ;;  %v6824_v12 = vld [vmem:[%s7583_s12 + $0x30] sm:$0xff]  }
  0x39   : > { %v933_v21 = vld [vmem:[#allocation2 + $0x18] sm:$0xf]  ;;  %v594_v24 = vsel %vm558_vm4, %v509_v14, 0.0  ;;  %v418_v25 = vmul.f32 %v7575_v10, %v356_v15  ;;  %v1217_v29 = vsel %vm7610_vm7, %v1212_v44, %v1216_v63  ;;  %v476_v57 = vadd.f32 %v7589_v19, %v416_v17 }
  0x3a   : > { %v1227_v30 = vsel %vm7610_vm7, %v1222_v16, %v1226_v2  ;;  %v934_v31 = vld [vmem:[#allocation2 + $0x1c] sm:$0xf]  ;;  %v1037_v33 = vshrl.u32 %v933_v21, 16  ;;  %v1040_v34 = vshll.u32 %v933_v21, 16  ;;  %v596_v47 = vsel %vm563_vm6, %v511_v23, 0.0  ;;  %v7399_v16 = vld [vmem:[%s10431_s1] sm:$0xff]  }
  0x3b   : > { %v971_v32 = vld [vmem:[#allocation2 + $0x20] sm:$0x1]  ;;  %v6257_v36 = vcombine.low %v1217_v29, %v1227_v30  ;;  %v1046_v37 = vshll.u32 %v934_v31, 16  ;;  %v1050_v38 = vshrl.u32 %v934_v31, 16  ;;  %7096 = vmatpush3.bf16.msra.mxu0 %v7398_v1  ;;  %v6717_v48 = vpack.c.bf16 %v594_v24, %v594_v24  ;;  %v7745_v2 = vld [vmem:[%s7583_s12 + $0x38] sm:$0x1] }
  0x3c   : > { %v1056_v39 = vshll.u32 %v971_v32, 16  ;;  %v1039_v45 = vrot.slane %v1037_v33, 4  ;;  %v1042_v46 = vrot.slane %v1040_v34, 5  ;;  %7097 = vmatprep.subr.bf16.mxu0 %v7400_v28  ;;  %v6718_v53 = vpack.c.bf16 %v510_v22, %v510_v22 }
  0x3d   : > { %7036 = vmatmul.mubr.msk.bf16.vlgmr.msra.gmra.mxu1 %vm1453_vm5, %v6257_v36  ;;  %v1048_v50 = vrot.slane %v1046_v37, 5  ;;  %v1052_v51 = vrot.slane %v1050_v38, 4  ;;  %v6719_v56 = vpack.c.bf16 %v596_v47, %v596_v47  ;;  %884 = vst.msk [vmem:[#allocation2 + $0x24] sm:$0xf] %vm873_vm0, %v6717_v48  ;;  %v477_v58 = vadd.f32 %v7589_v19, %v417_v18 }
  0x3e   : > { %v1058_v52 = vrot.slane %v1056_v39, 5  ;;  %7052 = vmatpush3.bf16.msra.mxu1 %v7594_v20  ;;  %v1043_v55 = vor.u32 %v1042_v46, %v1039_v45  ;;  %885 = vst.msk [vmem:[#allocation2 + $0x28] sm:$0xf] %vm873_vm0, %v6718_v53  ;;  %v478_v60 = vadd.f32 %v7589_v19, %v418_v25  ;;  %v357_v61 = vunpack.c.l.bf16 %v303_v41 }
  0x3f   : > { %v1053_v59 = vor.u32 %v1052_v51, %v1048_v50  ;;  %7053 = vmatprep.subr.bf16.mxu1 %v7395_v27  ;;  %v358_v62 = vunpack.c.h.bf16 %v303_v41  ;;  %7098 = vmatpush3.bf16.msra.mxu0 %v7400_v28  ;;  %886 = vst.msk [vmem:[#allocation2 + $0x2c] sm:$0x1] %vm876_vm1, %v6719_v56  ;;  %v530_v20 = vmax.f32 %v476_v57, 0.0  ;;  %v531_v0 = vmax.f32 %v477_v58, 0.0 }
  0x40   : > { %v1044_v63 = vrot.slane %v1043_v55, 4  ;;  %v359_v1 = vunpack.c.l.bf16 %v305_v42  ;;  %7171 = vmatprep.subr.bf16.mxu0 %v7402_v49  ;;  %v532_v3 = vmax.f32 %v478_v60, 0.0  ;;  %v419_v4 = vmul.f32 %v7575_v10, %v357_v61  ;;  %v7401_v42 = vld [vmem:[%s10431_s1 + $0x78] sm:$0xff]  }
  0x41   : > { %v1054_v26 = vrot.slane %v1053_v59, 4  ;;  %v420_v43 = vmul.f32 %v7575_v10, %v358_v62  ;;  %v615_v6 = vsel %vm558_vm4, %v530_v20, 0.0  ;;  %v6739_v8 = vpack.c.bf16 %v531_v0, %v531_v0  ;;  %v7786_v49 = vld [vmem:[%s7583_s12 + $0x3c] sm:$0xff]  }
  0x42   : > { %v1049_v5 = vsel %vm7610_vm7, %v1044_v63, %v1048_v50  ;;  %v421_v11 = vmul.f32 %v7575_v10, %v359_v1  ;;  %7054 = vmatpush3.bf16.msra.mxu1 %v7395_v27  ;;  %v617_v15 = vsel %vm563_vm6, %v532_v3, 0.0  ;;  %v6738_v28 = vpack.c.bf16 %v615_v6, %v615_v6  ;;  %v287_v6 = vld [vmem:[%s7583_s12 + $0x44] sm:$0x1] }
  0x43   : > { %v1059_v14 = vsel %vm7610_vm7, %v1054_v26, %v1058_v52  ;;  %v479_v44 = vadd.f32 %v7589_v19, %v419_v4  ;;  %7055 = vmatprep.subr.bf16.mxu1 %v7397_v54  ;;  %v6740_v18 = vpack.c.bf16 %v617_v15, %v617_v15  ;;  %906 = vst.msk [vmem:[#allocation2 + $0x7c] sm:$0xf] %vm873_vm0, %v6739_v8  ;;  %v6797_v25 = vunpack.c.l.bf16 %v6824_v12 }
  0x44   : > { %v6250_v17 = vcombine.low %v1049_v5, %v1059_v14  ;;  %v480_v21 = vadd.f32 %v7589_v19, %v420_v43  ;;  %v481_v22 = vadd.f32 %v7589_v19, %v421_v11  ;;  %v935_v23 = vld [vmem:[#allocation2 + $0x24] sm:$0xf]  ;;  %905 = vst.msk [vmem:[#allocation2 + $0x78] sm:$0xf] %vm873_vm0, %v6738_v28  ;;  %v6798_v27 = vunpack.c.h.bf16 %v6824_v12 }
  0x45   : > { %v533_v24 = vmax.f32 %v479_v44, 0.0  ;;  %v338_v29 = vunpack.c.l.bf16 %v7745_v2  ;;  %v7769_v30 = vld [vmem:[#allocation2 + $0x28] sm:$0xf]  ;;  %v1061_v31 = vshrl.u32 %v935_v23, 16  ;;  %v1064_v32 = vshll.u32 %v935_v23, 16 }
  0x46   : > { %7023 = vmatprep.mubr.msk.bf16.mxu0 %vm1453_vm5, %v6250_v17  ;;  %907 = vst.msk [vmem:[#allocation2 + $0x80] sm:$0x1] %vm876_vm1, %v6740_v18  ;;  %v534_v33 = vmax.f32 %v480_v21, 0.0  ;;  %v535_v34 = vmax.f32 %v481_v22, 0.0  ;;  %7056 = vmatpush3.bf16.msra.mxu1 %v7397_v54  ;;  %v7772_v36 = vld [vmem:[#allocation2 + $0x2c] sm:$0x1]  ;;  %v398_v41 = vmul.f32 %v6797_v25, %v7575_v10  ;;  %v399_v57 = vmul.f32 %v6798_v27, %v7575_v10 }
  0x47   : > { %v1070_v37 = vshll.u32 %v7769_v30, 16  ;;  %v1074_v38 = vshrl.u32 %v7769_v30, 16  ;;  %v618_v39 = vsel %vm558_vm4, %v533_v24, 0.0  ;;  %7057 = vmatprep.subr.bf16.mxu1 %v7399_v16  ;;  %v1063_v45 = vrot.slane %v1061_v31, 4 }
  0x48   : > { %v1066_v46 = vrot.slane %v1064_v32, 5  ;;  %v1080_v47 = vshll.u32 %v7772_v36, 16  ;;  %v620_v48 = vsel %vm563_vm6, %v535_v34, 0.0  ;;  %v6741_v52 = vpack.c.bf16 %v618_v39, %v618_v39 }
  0x49   : > { %v1072_v50 = vrot.slane %v1070_v37, 5  ;;  %v1076_v51 = vrot.slane %v1074_v38, 4  ;;  %v6742_v53 = vpack.c.bf16 %v534_v33, %v534_v33  ;;  %v6743_v56 = vpack.c.bf16 %v620_v48, %v620_v48 }
  0x4a   : > { %v1067_v54 = vor.u32 %v1066_v46, %v1063_v45  ;;  %v1082_v55 = vrot.slane %v1080_v47, 5  ;;  %7058 = vmatpush3.bf16.msra.mxu1 %v7399_v16  ;;  %v950_v59 = vld [vmem:[#allocation2 + $0x7c] sm:$0xf]  ;;  %908 = vst.msk [vmem:[#allocation2 + $0x84] sm:$0xf] %vm873_vm0, %v6741_v52  ;;  %v400_v60 = vmul.f32 %v7575_v10, %v338_v29  ;;  %v458_v61 = vadd.f32 %v7589_v19, %v398_v41 }
  0x4b   : > { %v1077_v58 = vor.u32 %v1076_v51, %v1072_v50  ;;  %909 = vst.msk [vmem:[#allocation2 + $0x88] sm:$0xf] %vm873_vm0, %v6742_v53  ;;  %v339_v62 = vunpack.c.l.bf16 %v7786_v49  ;;  %7131 = vmatprep.subr.bf16.mxu1 %v7401_v42  ;;  %v949_v20 = vld [vmem:[#allocation2 + $0x78] sm:$0xf]  ;;  %v1238_v0 = vshll.u32 %v950_v59, 16  ;;  %v1242_v1 = vshrl.u32 %v950_v59, 16 }
  0x4c   : > { %v1068_v63 = vrot.slane %v1067_v54, 4  ;;  %910 = vst.msk [vmem:[#allocation2 + $0x8c] sm:$0x1] %vm876_vm1, %v6743_v56  ;;  %v459_v2 = vadd.f32 %v7589_v19, %v399_v57  ;;  %v1229_v4 = vshrl.u32 %v949_v20, 16  ;;  %v1232_v43 = vshll.u32 %v949_v20, 16 }
  0x4d   : > { %v1078_v26 = vrot.slane %v1077_v58, 4  ;;  %v979_v3 = vld [vmem:[#allocation2 + $0x80] sm:$0x1]  ;;  %v460_v5 = vadd.f32 %v7589_v19, %v400_v60  ;;  %v1240_v11 = vrot.slane %v1238_v0, 5  ;;  %v1244_v12 = vrot.slane %v1242_v1, 4 }
  0x4e   : > { %v1073_v8 = vsel %vm7610_vm7, %v1068_v63, %v1072_v50  ;;  %v1248_v14 = vshll.u32 %v979_v3, 16  ;;  %v1231_v28 = vrot.slane %v1229_v4, 4  ;;  %v1234_v44 = vrot.slane %v1232_v43, 5  ;;  %v308_v50 = vld [vmem:[%s7583_s12 + $0x98] sm:$0x1]  ;;  %v7821_v60 = vld [vmem:[%s7583_s12 + $0x9c] sm:$0xff]  }
  0x4f   : > { %v1083_v15 = vsel %vm7610_vm7, %v1078_v26, %v1082_v55  ;;  %v512_v16 = vmax.f32 %v458_v61, 0.0  ;;  %v1245_v18 = vor.u32 %v1244_v12, %v1240_v11  ;;  %v513_v22 = vmax.f32 %v459_v2, 0.0  ;;  %v6828_v55 = vld [vmem:[%s7583_s12 + $0x90] sm:$0xff]  }
  0x50   : > { %v6251_v17 = vcombine.low %v1073_v8, %v1083_v15  ;;  %v1250_v21 = vrot.slane %v1248_v14, 5  ;;  %v1235_v23 = vor.u32 %v1234_v44, %v1231_v28  ;;  %v514_v24 = vmax.f32 %v460_v5, 0.0 }
  0x51   : > { %v597_v25 = vsel %vm558_vm4, %v512_v16, 0.0  ;;  %v340_v27 = vunpack.c.h.bf16 %v7786_v49  ;;  %v1246_v29 = vrot.slane %v1245_v18, 4  ;;  %v951_v31 = vld [vmem:[#allocation2 + $0x84] sm:$0xf]  ;;  %v6721_v34 = vpack.c.bf16 %v513_v22, %v513_v22 }
  0x52   : > { %7024 = vmatmul.mubr.msk.bf16.gmra.mxu0 %vm1453_vm5, %v6251_v17  ;;  %v7806_v32 = vld [vmem:[#allocation2 + $0x88] sm:$0xf]  ;;  %v6720_v33 = vpack.c.bf16 %v597_v25, %v597_v25  ;;  %v341_v37 = vunpack.c.l.bf16 %v287_v6  ;;  %v1236_v38 = vrot.slane %v1235_v23, 4  ;;  %v1253_v41 = vshrl.u32 %v951_v31, 16 }
  0x53   : > { %v980_v39 = vld [vmem:[#allocation2 + $0x8c] sm:$0x1]  ;;  %v1256_v42 = vshll.u32 %v951_v31, 16  ;;  %v1262_v45 = vshll.u32 %v7806_v32, 16  ;;  %v1251_v46 = vsel %vm7610_vm7, %v1246_v29, %v1250_v21  ;;  %v1266_v47 = vshrl.u32 %v7806_v32, 16 }
  0x54   : > { %v1272_v48 = vshll.u32 %v980_v39, 16  ;;  %v599_v49 = vsel %vm563_vm6, %v514_v24, 0.0  ;;  %887 = vst.msk [vmem:[#allocation2 + $0x30] sm:$0xf] %vm873_vm0, %v6720_v33  ;;  %888 = vst.msk [vmem:[#allocation2 + $0x34] sm:$0xf] %vm873_vm0, %v6721_v34  ;;  %v1241_v51 = vsel %vm7610_vm7, %v1236_v38, %v1240_v11  ;;  %v401_v63 = vmul.f32 %v7575_v10, %v339_v62 }
  0x55   : > { %v1255_v52 = vrot.slane %v1253_v41, 4  ;;  %v1258_v53 = vrot.slane %v1256_v42, 5  ;;  %v1264_v54 = vrot.slane %v1262_v45, 5  ;;  %v6258_v56 = vcombine.low %v1241_v51, %v1251_v46  ;;  %v311_v29 = vld [vmem:[%s7583_s12 + $0xa4] sm:$0x1] }
  0x56   : > { %v1268_v57 = vrot.slane %v1266_v47, 4  ;;  %v1274_v58 = vrot.slane %v1272_v48, 5  ;;  %v6722_v59 = vpack.c.bf16 %v599_v49, %v599_v49  ;;  %v402_v20 = vmul.f32 %v7575_v10, %v340_v27 }
  0x57   : > { %v1259_v61 = vor.u32 %v1258_v53, %v1255_v52  ;;  %v403_v0 = vmul.f32 %v7575_v10, %v341_v37  ;;  %7039 = vmatprep.mubr.msk.bf16.mxu1 %vm1453_vm5, %v6258_v56  ;;  %v6813_v2 = vunpack.c.l.bf16 %v6828_v55  ;;  %v6814_v26 = vunpack.c.h.bf16 %v6828_v55 }
  0x58   : > { %v1269_v1 = vor.u32 %v1268_v57, %v1264_v54  ;;  %889 = vst.msk [vmem:[#allocation2 + $0x38] sm:$0x1] %vm876_vm1, %v6722_v59  ;;  %v362_v3 = vunpack.c.l.bf16 %v308_v50  ;;  %v461_v43 = vadd.f32 %v7589_v19, %v401_v63  ;;  %v462_v5 = vadd.f32 %v7589_v19, %v402_v20  ;;  %v7868_v63 = vld [vmem:[%s10432_s2] ss:$0 sm:$0xff] }
  0x59   : > { %v1260_v4 = vrot.slane %v1259_v61, 4  ;;  %v463_v6 = vadd.f32 %v7589_v19, %v403_v0  ;;  %v422_v8 = vmul.f32 %v6813_v2, %v7575_v10  ;;  %v423_v11 = vmul.f32 %v6814_v26, %v7575_v10  ;;  %v290_v26 = vld [vmem:[%s7583_s12 + $0x50] sm:$0x1] }
  0x5a   : > { %v1270_v62 = vrot.slane %v1269_v1, 4  ;;  %v424_v12 = vmul.f32 %v7575_v10, %v362_v3  ;;  %v515_v44 = vmax.f32 %v461_v43, 0.0  ;;  %v516_v16 = vmax.f32 %v462_v5, 0.0  ;;  %v7884_v5 = vld [vmem:[%s10433_s3] ss:$0 sm:$0xff] }
  0x5b   : > { %v1265_v14 = vsel %vm7610_vm7, %v1260_v4, %v1264_v54  ;;  %v7836_v15 = vld [vmem:[#allocation2 + $0x30] sm:$0xf]  ;;  %v7838_v28 = vld [vmem:[#allocation2 + $0x34] sm:$0xf]  ;;  %v363_v17 = vunpack.c.l.bf16 %v7821_v60  ;;  %v517_v25 = vmax.f32 %v463_v6, 0.0  ;;  %v482_v45 = vadd.f32 %v7589_v19, %v422_v8 }
  0x5c   : > { %v1275_v18 = vsel %vm7610_vm7, %v1270_v62, %v1274_v58  ;;  %v1085_v21 = vshrl.u32 %v7836_v15, 16  ;;  %v1088_v22 = vshll.u32 %v7836_v15, 16  ;;  %v1094_v10 = vshll.u32 %v7838_v28, 16 }
  0x5d   : > { %v6259_v23 = vcombine.low %v1265_v14, %v1275_v18  ;;  %v1098_v24 = vshrl.u32 %v7838_v28, 16  ;;  %v600_v27 = vsel %vm558_vm4, %v515_v44, 0.0  ;;  %v602_v41 = vsel %vm563_vm6, %v517_v25, 0.0 }
  0x5e   : > { %v1087_v31 = vrot.slane %v1085_v21, 4  ;;  %v1090_v33 = vrot.slane %v1088_v22, 5  ;;  %v1096_v34 = vrot.slane %v1094_v10, 5  ;;  %v6723_v37 = vpack.c.bf16 %v600_v27, %v600_v27 }
  0x5f   : > { %7040 = vmatmul.mubr.msk.bf16.gmra.mxu1 %vm1453_vm5, %v6259_v23  ;;  %v7851_v38 = vld [vmem:[#allocation2 + $0x38] sm:$0x1]  ;;  %v1100_v39 = vrot.slane %v1098_v24, 4  ;;  %v6724_v42 = vpack.c.bf16 %v516_v16, %v516_v16  ;;  %v6725_v48 = vpack.c.bf16 %v602_v41, %v602_v41  ;;  %v483_v49 = vadd.f32 %v7589_v19, %v423_v11 }
  0x60   : > { %v1091_v46 = vor.u32 %v1090_v33, %v1087_v31  ;;  %v1104_v47 = vshll.u32 %v7851_v38, 16  ;;  %890 = vst.msk [vmem:[#allocation2 + $0x3c] sm:$0xf] %vm873_vm0, %v6723_v37  ;;  %v484_v51 = vadd.f32 %v7589_v19, %v424_v12  ;;  %v536_v52 = vmax.f32 %v482_v45, 0.0 }
  0x61   : > { %v1101_v50 = vor.u32 %v1100_v39, %v1096_v34  ;;  %891 = vst.msk [vmem:[#allocation2 + $0x40] sm:$0xf] %vm873_vm0, %v6724_v42  ;;  %v364_v53 = vunpack.c.h.bf16 %v7821_v60  ;;  %v537_v56 = vmax.f32 %v483_v49, 0.0  ;;  %v365_v57 = vunpack.c.l.bf16 %v311_v29  ;;  %v6825_v60 = vld [vmem:[%s7583_s12 + $0x48] sm:$0xff]   ;;  %v7908_v42 = vld [vmem:[%s7583_s12 + $0x54] sm:$0xff]  }
  0x62   : > { %v1092_v54 = vrot.slane %v1091_v46, 4  ;;  %v1106_v55 = vrot.slane %v1104_v47, 5  ;;  %892 = vst.msk [vmem:[#allocation2 + $0x44] sm:$0x1] %vm876_vm1, %v6725_v48  ;;  %v538_v59 = vmax.f32 %v484_v51, 0.0  ;;  %v621_v61 = vsel %vm558_vm4, %v536_v52, 0.0 }
  0x63   : > { %v1102_v58 = vrot.slane %v1101_v50, 4  ;;  %v425_v19 = vmul.f32 %v7868_v63, %v363_v17  ;;  %v6744_v0 = vpack.c.bf16 %v621_v61, %v621_v61  ;;  %v6745_v1 = vpack.c.bf16 %v537_v56, %v537_v56 }
  0x64   : > { %v1097_v20 = vsel %vm7610_vm7, %v1092_v54, %v1096_v34  ;;  %v426_v2 = vmul.f32 %v7868_v63, %v364_v53  ;;  %v623_v4 = vsel %vm563_vm6, %v538_v59, 0.0  ;;  %v427_v43 = vmul.f32 %v7868_v63, %v365_v57 }
  0x65   : > { %v1107_v3 = vsel %vm7610_vm7, %v1102_v58, %v1106_v55  ;;  %v485_v6 = vadd.f32 %v7884_v5, %v425_v19  ;;  %v6746_v8 = vpack.c.bf16 %v623_v4, %v623_v4  ;;  %911 = vst.msk [vmem:[#allocation2 + $0x90] sm:$0xf] %vm873_vm0, %v6744_v0  ;;  %912 = vst.msk [vmem:[#allocation2 + $0x94] sm:$0xf] %vm873_vm0, %v6745_v1  ;;  %v6801_v12 = vunpack.c.l.bf16 %v6825_v60 }
  0x66   : > { %v6252_v62 = vcombine.low %v1097_v20, %v1107_v3  ;;  %v486_v11 = vadd.f32 %v7884_v5, %v426_v2  ;;  %v487_v44 = vadd.f32 %v7884_v5, %v427_v43  ;;  %v6802_v17 = vunpack.c.h.bf16 %v6825_v60 }
  0x67   : > { %v7890_v14 = vld [vmem:[#allocation2 + $0x3c] sm:$0xf]  ;;  %v539_v16 = vmax.f32 %v485_v6, 0.0  ;;  %v344_v18 = vunpack.c.l.bf16 %v290_v26  ;;  %913 = vst.msk [vmem:[#allocation2 + $0x98] sm:$0x1] %vm876_vm1, %v6746_v8  ;;  %v404_v24 = vmul.f32 %v7868_v63, %v6801_v12  ;;  %v345_v58 = vunpack.c.l.bf16 %v7908_v42 }
  0x68   : > { %7027 = vmatprep.mubr.msk.bf16.mxu0 %vm1453_vm5, %v6252_v62  ;;  %v7894_v21 = vld [vmem:[#allocation2 + $0x40] sm:$0xf]  ;;  %v1109_v22 = vshrl.u32 %v7890_v14, 16  ;;  %v1112_v10 = vshll.u32 %v7890_v14, 16  ;;  %v540_v23 = vmax.f32 %v486_v11, 0.0  ;;  %v541_v31 = vmax.f32 %v487_v44, 0.0 }
  0x69   : > { %v7900_v25 = vld [vmem:[#allocation2 + $0x44] sm:$0x1]  ;;  %v1118_v27 = vshll.u32 %v7894_v21, 16  ;;  %v1122_v29 = vshrl.u32 %v7894_v21, 16  ;;  %v624_v33 = vsel %vm558_vm4, %v539_v16, 0.0  ;;  %v405_v52 = vmul.f32 %v7868_v63, %v6802_v17 }
  0x6a   : > { %v1111_v34 = vrot.slane %v1109_v22, 4  ;;  %v1114_v37 = vrot.slane %v1112_v10, 5  ;;  %v1128_v39 = vshll.u32 %v7900_v25, 16  ;;  %v6747_v41 = vpack.c.bf16 %v624_v33, %v624_v33  ;;  %v8397_v9 = vld [vmem:[#allocation2 + $0x40] sm:$0xf] }
  0x6b   : > { %v1120_v45 = vrot.slane %v1118_v27, 5  ;;  %v1124_v46 = vrot.slane %v1122_v29, 4  ;;  %v626_v47 = vsel %vm563_vm6, %v541_v31, 0.0  ;;  %v6748_v48 = vpack.c.bf16 %v540_v23, %v540_v23  ;;  %10456 = vst [vmem:[#allocation6_spill] sm:$0xff] %v8397_v9 }
  0x6c   : > { %v1115_v49 = vor.u32 %v1114_v37, %v1111_v34  ;;  %v1130_v50 = vrot.slane %v1128_v39, 5  ;;  %v6749_v51 = vpack.c.bf16 %v626_v47, %v626_v47  ;;  %914 = vst.msk [vmem:[#allocation2 + $0x9c] sm:$0xf] %vm873_vm0, %v6747_v41  ;;  %v7914_v54 = vld [vmem:[#allocation2 + $0x90] sm:$0xf]  ;;  %v406_v56 = vmul.f32 %v7868_v63, %v344_v18 }
  0x6d   : > { %v1125_v53 = vor.u32 %v1124_v46, %v1120_v45  ;;  %v7916_v55 = vld [vmem:[#allocation2 + $0x94] sm:$0xf]  ;;  %915 = vst.msk [vmem:[#allocation2 + $0xa0] sm:$0xf] %vm873_vm0, %v6748_v48  ;;  %v464_v57 = vadd.f32 %v7884_v5, %v404_v24  ;;  %v1277_v61 = vshrl.u32 %v7914_v54, 16  ;;  %v1280_v19 = vshll.u32 %v7914_v54, 16 }
  0x6e   : > { %v1116_v59 = vrot.slane %v1115_v49, 4  ;;  %v1286_v60 = vshll.u32 %v7916_v55, 16  ;;  %916 = vst.msk [vmem:[#allocation2 + $0xa4] sm:$0x1] %vm876_vm1, %v6749_v51  ;;  %v7926_v0 = vld [vmem:[#allocation2 + $0x98] sm:$0x1]  ;;  %v465_v2 = vadd.f32 %v7884_v5, %v405_v52  ;;  %v466_v26 = vadd.f32 %v7884_v5, %v406_v56 }
  0x6f   : > { %v1126_v20 = vrot.slane %v1125_v53, 4  ;;  %v1290_v1 = vshrl.u32 %v7916_v55, 16  ;;  %v1279_v4 = vrot.slane %v1277_v61, 4  ;;  %v1282_v43 = vrot.slane %v1280_v19, 5  ;;  %v293_v39 = vld [vmem:[%s7583_s12 + $0x5c] sm:$0x1] }
  0x70   : > { %v1121_v3 = vsel %vm7610_vm7, %v1116_v59, %v1120_v45  ;;  %v1288_v6 = vrot.slane %v1286_v60, 5  ;;  %v1296_v11 = vshll.u32 %v7926_v0, 16  ;;  %v518_v12 = vmax.f32 %v464_v57, 0.0  ;;  %v6829_v52 = vld [vmem:[%s7583_s12 + $0xa8] sm:$0xff]   ;;  %v314_v53 = vld [vmem:[%s7583_s12 + $0xb0] sm:$0x1] }
  0x71   : > { %v1131_v62 = vsel %vm7610_vm7, %v1126_v20, %v1130_v50  ;;  %v1292_v8 = vrot.slane %v1290_v1, 4  ;;  %v1283_v16 = vor.u32 %v1282_v43, %v1279_v4  ;;  %v519_v17 = vmax.f32 %v465_v2, 0.0 }
  0x72   : > { %v6253_v44 = vcombine.low %v1121_v3, %v1131_v62  ;;  %v520_v18 = vmax.f32 %v466_v26, 0.0  ;;  %v1298_v10 = vrot.slane %v1296_v11, 5  ;;  %v603_v24 = vsel %vm558_vm4, %v518_v12, 0.0 }
  0x73   : > { %v1293_v22 = vor.u32 %v1292_v8, %v1288_v6  ;;  %v7936_v23 = vld [vmem:[#allocation2 + $0x9c] sm:$0xf]  ;;  %v346_v27 = vunpack.c.h.bf16 %v7908_v42  ;;  %v1284_v29 = vrot.slane %v1283_v16, 4  ;;  %v6726_v47 = vpack.c.bf16 %v603_v24, %v603_v24 }
  0x74   : > { %7028 = vmatmul.mubr.msk.bf16.gmra.mxu0 %vm1453_vm5, %v6253_v44  ;;  %v7942_v31 = vld [vmem:[#allocation2 + $0xa0] sm:$0xf]  ;;  %v1301_v33 = vshrl.u32 %v7936_v23, 16  ;;  %v1304_v34 = vshll.u32 %v7936_v23, 16  ;;  %v605_v37 = vsel %vm563_vm6, %v520_v18, 0.0  ;;  %v6727_v61 = vpack.c.bf16 %v519_v17, %v519_v17 }
  0x75   : > { %v1294_v41 = vrot.slane %v1293_v22, 4  ;;  %v7949_v45 = vld [vmem:[#allocation2 + $0xa4] sm:$0x1]  ;;  %v1310_v42 = vshll.u32 %v7942_v31, 16  ;;  %v1314_v46 = vshrl.u32 %v7942_v31, 16  ;;  %v1289_v48 = vsel %vm7610_vm7, %v1284_v29, %v1288_v6 }
  0x76   : > { %v1303_v49 = vrot.slane %v1301_v33, 4  ;;  %v1306_v50 = vrot.slane %v1304_v34, 5  ;;  %v1320_v51 = vshll.u32 %v7949_v45, 16  ;;  %893 = vst.msk [vmem:[#allocation2 + $0x48] sm:$0xf] %vm873_vm0, %v6726_v47  ;;  %v6728_v1 = vpack.c.bf16 %v605_v37, %v605_v37 }
  0x77   : > { %v1299_v56 = vsel %vm7610_vm7, %v1294_v41, %v1298_v10  ;;  %v1312_v57 = vrot.slane %v1310_v42, 5  ;;  %v1316_v59 = vrot.slane %v1314_v46, 4  ;;  %894 = vst.msk [vmem:[#allocation2 + $0x4c] sm:$0xf] %vm873_vm0, %v6727_v61  ;;  %v347_v26 = vunpack.c.l.bf16 %v293_v39 }
  0x78   : > { %v6260_v19 = vcombine.low %v1289_v48, %v1299_v56  ;;  %v1307_v60 = vor.u32 %v1306_v50, %v1303_v49  ;;  %v1322_v20 = vrot.slane %v1320_v51, 5  ;;  %v407_v3 = vmul.f32 %v7868_v63, %v345_v58  ;;  %895 = vst.msk [vmem:[#allocation2 + $0x50] sm:$0x1] %vm876_vm1, %v6728_v1 }
  0x79   : > { %v1317_v2 = vor.u32 %v1316_v59, %v1312_v57  ;;  %v408_v4 = vmul.f32 %v7868_v63, %v346_v27  ;;  %v6817_v6 = vunpack.c.l.bf16 %v6829_v52  ;;  %v6818_v62 = vunpack.c.h.bf16 %v6829_v52 }
  0x7a   : > { %7043 = vmatprep.mubr.msk.bf16.mxu1 %vm1453_vm5, %v6260_v19  ;;  %v1308_v43 = vrot.slane %v1307_v60, 4  ;;  %v368_v8 = vunpack.c.l.bf16 %v314_v53  ;;  %v409_v12 = vmul.f32 %v7868_v63, %v347_v26  ;;  %v467_v44 = vadd.f32 %v7884_v5, %v407_v3  ;;  %v315_v26 = vld [vmem:[%s7583_s12 + $0xb4] sm:$0xff]  }
  0x7b   : > { %v1318_v11 = vrot.slane %v1317_v2, 4  ;;  %v468_v16 = vadd.f32 %v7884_v5, %v408_v4  ;;  %v428_v17 = vmul.f32 %v7868_v63, %v6817_v6  ;;  %v429_v18 = vmul.f32 %v7868_v63, %v6818_v62  ;;  %v317_v62 = vld [vmem:[%s7583_s12 + $0xbc] sm:$0x1] }
  0x7c   : > { %v1313_v58 = vsel %vm7610_vm7, %v1308_v43, %v1312_v57  ;;  %v430_v22 = vmul.f32 %v7868_v63, %v368_v8  ;;  %v469_v24 = vadd.f32 %v7884_v5, %v409_v12  ;;  %v521_v27 = vmax.f32 %v467_v44, 0.0 }
  0x7d   : > { %v1323_v10 = vsel %vm7610_vm7, %v1318_v11, %v1322_v20  ;;  %v522_v29 = vmax.f32 %v468_v16, 0.0  ;;  %v7977_v34 = vld [vmem:[#allocation2 + $0x48] sm:$0xf]  ;;  %v488_v37 = vadd.f32 %v7884_v5, %v428_v17  ;;  %v489_v39 = vadd.f32 %v7884_v5, %v429_v18 }
  0x7e   : > { %v6261_v33 = vcombine.low %v1313_v58, %v1323_v10  ;;  %v490_v41 = vadd.f32 %v7884_v5, %v430_v22  ;;  %v1133_v42 = vshrl.u32 %v7977_v34, 16  ;;  %v1136_v46 = vshll.u32 %v7977_v34, 16  ;;  %v7987_v49 = vld [vmem:[#allocation2 + $0x4c] sm:$0xf]  ;;  %v1976_v22 = vld [vmem:[#allocation2] sm:$0xe] }
  0x7f   : > { %v523_v47 = vmax.f32 %v469_v24, 0.0  ;;  %v606_v48 = vsel %vm558_vm4, %v521_v27, 0.0  ;;  %v6730_v51 = vpack.c.bf16 %v522_v29, %v522_v29  ;;  %v542_v52 = vmax.f32 %v488_v37, 0.0  ;;  %v7989_v56 = vld [vmem:[#allocation2 + $0x50] sm:$0x1] }
  0x80   : > { %7044 = vmatmul.mubr.msk.bf16.gmra.mxu1 %vm1453_vm5, %v6261_v33  ;;  %v6729_v50 = vpack.c.bf16 %v606_v48, %v606_v48  ;;  %v543_v53 = vmax.f32 %v489_v39, 0.0  ;;  %v1135_v57 = vrot.slane %v1133_v42, 4  ;;  %v1138_v59 = vrot.slane %v1136_v46, 5  ;;  %v8005_v10 = vld [vmem:[#allocation2 + $0x10] sm:$0xf] }
  0x81   : > { %v1142_v61 = vshll.u32 %v7987_v49, 16  ;;  %v1146_v19 = vshrl.u32 %v7987_v49, 16  ;;  %v1152_v60 = vshll.u32 %v7989_v56, 16  ;;  %v608_v20 = vsel %vm563_vm6, %v523_v47, 0.0  ;;  %897 = vst.msk [vmem:[#allocation2 + $0x58] sm:$0xf] %vm873_vm0, %v6730_v51 }
  0x82   : > { %896 = vst.msk [vmem:[#allocation2 + $0x54] sm:$0xf] %vm873_vm0, %v6729_v50  ;;  %v544_v1 = vmax.f32 %v490_v41, 0.0  ;;  %v627_v2 = vsel %vm558_vm4, %v542_v52, 0.0  ;;  %v1139_v3 = vor.u32 %v1138_v59, %v1135_v57  ;;  %v6731_v6 = vpack.c.bf16 %v608_v20, %v608_v20  ;;  %v8014_v41 = vld [vmem:[#allocation2 + $0x14] sm:$0x1] }
  0x83   : > { %v1144_v4 = vrot.slane %v1142_v61, 5  ;;  %v1148_v43 = vrot.slane %v1146_v19, 4  ;;  %v1154_v8 = vrot.slane %v1152_v60, 5  ;;  %v6750_v12 = vpack.c.bf16 %v627_v2, %v627_v2  ;;  %v8018_v48 = vld [vmem:[#allocation2 + $0xc] sm:$0xe] }
  0x84   : > { %v629_v11 = vsel %vm563_vm6, %v544_v1, 0.0  ;;  %v6751_v44 = vpack.c.bf16 %v543_v53, %v543_v53  ;;  %v1140_v16 = vrot.slane %v1139_v3, 4  ;;  %898 = vst.msk [vmem:[#allocation2 + $0x5c] sm:$0x1] %vm876_vm1, %v6731_v6  ;;  %v369_v18 = vunpack.c.l.bf16 %v315_v26  ;;  %v8028_v59 = vld [vmem:[#allocation2 + $0x4] sm:$0xf] }
  0x85   : > { %v1149_v58 = vor.u32 %v1148_v43, %v1144_v4  ;;  %v6752_v17 = vpack.c.bf16 %v629_v11, %v629_v11  ;;  %v2036_v24 = vrot.slane %v8005_v10, 5  ;;  %917 = vst.msk [vmem:[#allocation2 + $0xa8] sm:$0xf] %vm873_vm0, %v6750_v12  ;;  %v370_v27 = vunpack.c.h.bf16 %v315_v26 }
  0x86   : > { %918 = vst.msk [vmem:[#allocation2 + $0xac] sm:$0xf] %vm873_vm0, %v6751_v44  ;;  %v371_v29 = vunpack.c.l.bf16 %v317_v62  ;;  %v1145_v33 = vsel %vm7610_vm7, %v1140_v16, %v1144_v4  ;;  %v431_v39 = vmul.f32 %v7868_v63, %v369_v18  ;;  %v2039_v42 = vrot.slane %v8014_v41, 5  ;;  %v1980_v41 = vld [vmem:[#allocation2 + $0x30] sm:$0xe] }
  0x87   : > { %v1150_v37 = vrot.slane %v1149_v58, 4  ;;  %919 = vst.msk [vmem:[#allocation2 + $0xb0] sm:$0x1] %vm876_vm1, %v6752_v17  ;;  %v432_v46 = vmul.f32 %v7868_v63, %v370_v27  ;;  %v6320_v47 = vrot.slane %v1976_v22, 9  ;;  %v2029_v61 = vrot.slane %v8028_v59, 5 }
  0x88   : > { %v8024_v52 = vld [vmem:[#allocation2 + $0x58] sm:$0xf]  ;;  %v433_v53 = vmul.f32 %v7868_v63, %v371_v29  ;;  %v491_v57 = vadd.f32 %v7884_v5, %v431_v39  ;;  %v10446_v2 = vmov 0  ;;  %v6321_v3 = vrot.slane %v8018_v48, 9 }
  0x89   : > { %v1155_v50 = vsel %vm7610_vm7, %v1150_v37, %v1154_v8  ;;  %v8022_v51 = vld [vmem:[#allocation2 + $0x54] sm:$0xf]  ;;  %v1166_v1 = vshll.u32 %v8024_v52, 16  ;;  %v10447_v2 = vsel %vm8036_vm10, 4294967295, %v10446_v2  ;;  %v1170_v63 = vshrl.u32 %v8024_v52, 16 }
  0x8a   : > { %v6254_v19 = vcombine.low %v1145_v33, %v1155_v50  ;;  %v1157_v60 = vshrl.u32 %v8022_v51, 16  ;;  %v1160_v20 = vshll.u32 %v8022_v51, 16  ;;  %10448 = vst [vmem:[#allocation4_spill] sm:$0xff] %v10447_v2  ;;  %v492_v26 = vadd.f32 %v7884_v5, %v432_v46 }
  0x8b   : > { %v2038_v4 = vrot.slane %v2036_v24, 4  ;;  %v8046_v43 = vld [vmem:[#allocation2 + $0x5c] sm:$0x1]  ;;  %v1168_v8 = vrot.slane %v1166_v1, 5  ;;  %v545_v11 = vmax.f32 %v491_v57, 0.0  ;;  %v1172_v12 = vrot.slane %v1170_v63, 4 }
  0x8c   : > { %7031 = vmatprep.mubr.msk.bf16.mxu0 %vm1453_vm5, %v6254_v19  ;;  %v1159_v6 = vrot.slane %v1157_v60, 4  ;;  %v1162_v62 = vrot.slane %v1160_v20, 5  ;;  %v1176_v44 = vshll.u32 %v8046_v43, 16  ;;  %v8049_v16 = vld [vmem:[#allocation2 + $0xa8] sm:$0xf]  ;;  %v493_v17 = vadd.f32 %v7884_v5, %v433_v53 }
  0x8d   : > { %v8051_v58 = vld [vmem:[#allocation2 + $0xac] sm:$0xf]  ;;  %v2030_v18 = vsel %vm8036_vm10, %v6320_v47, %v2029_v61  ;;  %v1325_v29 = vshrl.u32 %v8049_v16, 16  ;;  %v1328_v33 = vshll.u32 %v8049_v16, 16  ;;  %v1173_v39 = vor.u32 %v1172_v12, %v1168_v8 }
  0x8e   : > { %v1163_v22 = vor.u32 %v1162_v62, %v1159_v6  ;;  %v8056_v27 = vld [vmem:[#allocation2 + $0xb0] sm:$0x1]  ;;  %v1334_v37 = vshll.u32 %v8051_v58, 16  ;;  %v1178_v46 = vrot.slane %v1176_v44, 5  ;;  %v1338_v48 = vshrl.u32 %v8051_v58, 16 }
  0x8f   : > { %v1344_v50 = vshll.u32 %v8056_v27, 16  ;;  %v1327_v5 = vrot.slane %v1325_v29, 4  ;;  %v1330_v53 = vrot.slane %v1328_v33, 5  ;;  %v1174_v47 = vrot.slane %v1173_v39, 4  ;;  %v1978_v33 = vld [vmem:[#allocation2 + $0x18] sm:$0xe] }
  0x90   : > { %v1164_v57 = vrot.slane %v1163_v22, 4  ;;  %v1336_v19 = vrot.slane %v1334_v37, 5  ;;  %v1340_v60 = vrot.slane %v1338_v48, 4  ;;  %v546_v1 = vmax.f32 %v492_v26, 0.0 }
  0x91   : > { %v1346_v20 = vrot.slane %v1344_v50, 5  ;;  %v1331_v6 = vor.u32 %v1330_v53, %v1327_v5  ;;  %v547_v62 = vmax.f32 %v493_v17, 0.0  ;;  %v630_v12 = vsel %vm558_vm4, %v545_v11, 0.0  ;;  %v8088_v5 = vld [vmem:[#allocation2 + $0x1c] sm:$0xf] }
  0x92   : > { %v1169_v63 = vsel %vm7610_vm7, %v1164_v57, %v1168_v8  ;;  %v1179_v44 = vsel %vm7610_vm7, %v1174_v47, %v1178_v46  ;;  %v1341_v35 = vor.u32 %v1340_v60, %v1336_v19  ;;  %v6753_v22 = vpack.c.bf16 %v630_v12, %v630_v12  ;;  %v7464_v53 = vld [vmem:[#allocation2 + $0x20] sm:$0x1] }
  0x93   : > { %v6754_v29 = vpack.c.bf16 %v546_v1, %v546_v1  ;;  %v6255_v37 = vcombine.low %v1169_v63, %v1179_v44  ;;  %v1332_v39 = vrot.slane %v1331_v6, 4  ;;  %v632_v26 = vsel %vm563_vm6, %v547_v62, 0.0 }
  0x94   : > { %v2031_v48 = vrot.slane %v2029_v61, 4  ;;  %v1342_v50 = vrot.slane %v1341_v35, 4  ;;  %v6755_v8 = vpack.c.bf16 %v632_v26, %v632_v26  ;;  %920 = vst.msk [vmem:[#allocation2 + $0xb4] sm:$0xf] %vm873_vm0, %v6753_v22  ;;  %v2037_v11 = vsel %vm8036_vm10, %v6321_v3, %v2036_v24  ;;  %v1979_v3 = vld [vmem:[#allocation2 + $0x24] sm:$0xe] }
  0x95   : > { %921 = vst.msk [vmem:[#allocation2 + $0xb8] sm:$0xf] %vm873_vm0, %v6754_v29  ;;  %v2040_v17 = vsel %vm8036_vm10, %v2038_v4, %v2039_v42  ;;  %7032 = vmatmul.mubr.msk.bf16.gmra.mxu0 %vm1453_vm5, %v6255_v37  ;;  %v1337_v35 = vsel %vm7610_vm7, %v1332_v39, %v1336_v19  ;;  %v10449_v61 = vrot.slane %v7578_v13, 5  ;;  %v6322_v57 = vrot.slane %v1978_v33, 9 }
  0x96   : > { %v2043_v24 = vrot.slane %v8088_v5, 5  ;;  %v1347_v42 = vsel %vm7610_vm7, %v1342_v50, %v1346_v20  ;;  %922 = vst.msk [vmem:[#allocation2 + $0xbc] sm:$0x1] %vm876_vm1, %v6755_v8  ;;  %v2046_v19 = vrot.slane %v7464_v53, 5  ;;  %v6345_v13 = vcombine.low %v2037_v11, %v2040_v17  ;;  %v7465_v53 = vld [vmem:[%s10431_s1 + $0x98] sm:$0xff]  }
  0x97   : > { %v2033_v46 = vsel %vm8036_vm10, %v2031_v48, %v10449_v61  ;;  %v6262_v47 = vcombine.low %v1337_v35, %v1347_v42  ;;  %v6323_v63 = vrot.slane %v1979_v3, 9  ;;  %v2050_v6 = vrot.slane %v7769_v30, 5  ;;  %v7404_v30 = vld [vmem:[%s10431_s1 + $0x90] sm:$0xff]   ;;  %v1981_v35 = vld [vmem:[#allocation2 + $0x3c] sm:$0xe] }
  0x98   : > { %v6344_v4 = vcombine.low %v2030_v18, %v2033_v46  ;;  %v2044_v60 = vsel %vm8036_vm10, %v6322_v57, %v2043_v24  ;;  %v2045_v1 = vrot.slane %v2043_v24, 4  ;;  %v2053_v62 = vrot.slane %v7772_v36, 5 }
  0x99   : > { %v6324_v12 = vrot.slane %v1980_v41, 9  ;;  %7047 = vmatprep.mubr.msk.bf16.mxu1 %vm1453_vm5, %v6262_v47  ;;  %v2057_v20 = vrot.slane %v7838_v28, 5  ;;  %v2060_v44 = vrot.slane %v7851_v38, 5  ;;  %v2052_v33 = vrot.slane %v2050_v6, 4 }
  0x9a   : > { %7099 = vmatprep.mubr.msk.bf16.mxu0 %vm1453_vm5, %v6344_v4  ;;  %v2047_v18 = vsel %vm8036_vm10, %v2045_v1, %v2046_v19  ;;  %v2064_v48 = vrot.slane %v7894_v21, 5  ;;  %v2051_v46 = vsel %vm8036_vm10, %v6323_v63, %v2050_v6  ;;  %v1982_v19 = vld [vmem:[#allocation2 + $0x48] sm:$0xe] }
  0x9b   : > { %v6346_v29 = vcombine.low %v2044_v60, %v2047_v18  ;;  %v8109_v36 = vld [vmem:[#allocation2 + $0xb4] sm:$0xf]  ;;  %v2058_v39 = vsel %vm8036_vm10, %v6324_v12, %v2057_v20  ;;  %v2059_v26 = vrot.slane %v2057_v20, 4  ;;  %v2054_v57 = vsel %vm8036_vm10, %v2052_v33, %v2053_v62  ;;  %v7406_v63 = vld [vmem:[%s10431_s1 + $0x88] sm:$0xff]  }
  0x9c   : > { %v8111_v37 = vld [vmem:[#allocation2 + $0xb8] sm:$0xf]  ;;  %v1349_v50 = vshrl.u32 %v8109_v36, 16  ;;  %v1352_v8 = vshll.u32 %v8109_v36, 16  ;;  %v6325_v60 = vrot.slane %v1981_v35, 9  ;;  %v2066_v1 = vrot.slane %v2064_v48, 4 }
  0x9d   : > { %v1358_v11 = vshll.u32 %v8111_v37, 16  ;;  %v1362_v17 = vshrl.u32 %v8111_v37, 16  ;;  %v8122_v61 = vld [vmem:[#allocation2 + $0xbc] sm:$0x1]  ;;  %7100 = vmatmul.mubr.msk.bf16.vlgmr.msra.gmra.mxu0 %vm1453_vm5, %v6345_v13  ;;  %v2061_v24 = vsel %vm8036_vm10, %v2059_v26, %v2060_v44  ;;  %v2067_v12 = vrot.slane %v7900_v25, 5 }
  0x9e   : > { %v1351_v3 = vrot.slane %v1349_v50, 4  ;;  %v1354_v41 = vrot.slane %v1352_v8, 5  ;;  %7172 = vmatpush3.bf16.msra.mxu0 %v7465_v53  ;;  %7103 = vmatprep.mubr.msk.bf16.mxu0 %vm1453_vm5, %v6346_v29  ;;  %v1368_v47 = vshll.u32 %v8122_v61, 16  ;;  %v6348_v13 = vcombine.low %v2058_v39, %v2061_v24  ;;  %v1983_v33 = vld [vmem:[#allocation2 + $0x54] sm:$0xe] }
  0x9f   : > { %v1360_v42 = vrot.slane %v1358_v11, 5  ;;  %v1364_v4 = vrot.slane %v1362_v17, 4  ;;  %7173 = vmatprep.subr.bf16.mxu0 %v7404_v30  ;;  %v2071_v18 = vrot.slane %v7987_v49, 5  ;;  %v6347_v44 = vcombine.low %v2051_v46, %v2054_v57  ;;  %v7408_v17 = vld [vmem:[%s10431_s1 + $0x80] sm:$0xff]   ;;  %v7466_v25 = vld [vmem:[#allocation2 + $0x68] sm:$0x1] }
  0xa0   : > { %v1355_v6 = vor.u32 %v1354_v41, %v1351_v3  ;;  %v1370_v20 = vrot.slane %v1368_v47, 5  ;;  %v6326_v29 = vrot.slane %v1982_v19, 9  ;;  %v2074_v8 = vrot.slane %v7989_v56, 5  ;;  %v7467_v24 = vld [vmem:[#allocation2] sm:$0xf] }
  0xa1   : > { %v1365_v62 = vor.u32 %v1364_v4, %v1360_v42  ;;  %v2073_v39 = vrot.slane %v2071_v18, 4  ;;  %v2078_v11 = vrot.slane %v8024_v52, 5  ;;  %v2088_v35 = vrot.slane %v7466_v25, 5  ;;  %v8151_v56 = vld [vmem:[#allocation2 + $0xc] sm:$0xf] }
  0xa2   : > { %v1356_v26 = vrot.slane %v1355_v6, 4  ;;  %7174 = vmatpush3.bf16.msra.mxu0 %v7404_v30  ;;  %v6284_v30 = vcombine.low %v7467_v24, %v8028_v59  ;;  %v6285_v41 = vcombine.low %v8151_v56, %v8005_v10  ;;  %v8155_v4 = vld [vmem:[#allocation2 + $0x18] sm:$0xf]  ;;  %v1984_v19 = vld [vmem:[#allocation2 + $0x60] sm:$0xe]  ;;  %v2068_v59 = vsel %vm8036_vm10, %v2066_v1, %v2067_v12 }
  0xa3   : > { %v1366_v50 = vrot.slane %v1365_v62, 4  ;;  %7175 = vmatprep.subr.bf16.mxu0 %v7406_v63  ;;  %v6286_v53 = vcombine.low %v8155_v4, %v8088_v5  ;;  %v1985_v47 = vld [vmem:[#allocation2 + $0x6c] sm:$0xe]  ;;  %v2072_v6 = vsel %vm8036_vm10, %v6326_v29, %v2071_v18  ;;  %v6327_v62 = vrot.slane %v1983_v33, 9  ;;  %v8180_v12 = vld [vmem:[%s10431_s1 + $0xd8] sm:$0xff]  }
  0xa4   : > { %v1361_v46 = vsel %vm7610_vm7, %v1356_v26, %v1360_v42  ;;  %v2065_v42 = vsel %vm8036_vm10, %v6325_v60, %v2064_v48  ;;  %v2075_v48 = vsel %vm8036_vm10, %v2073_v39, %v2074_v8  ;;  %v2080_v60 = vrot.slane %v2078_v11, 4  ;;  %v8185_v18 = vld [vmem:[#allocation2 + $0x28] sm:$0xf]  ;;  %v1986_v39 = vld [vmem:[#allocation2 + $0x78] sm:$0xe] }
  0xa5   : > { %v1371_v57 = vsel %vm7610_vm7, %v1366_v50, %v1370_v20  ;;  %7104 = vmatmul.mubr.msk.bf16.gmra.mxu0 %vm1453_vm5, %v6347_v44  ;;  %v8167_v20 = vld [vmem:[#allocation2 + $0x64] sm:$0xf]  ;;  %v8174_v44 = vld [vmem:[#allocation2 + $0x70] sm:$0xf]  ;;  %v6329_v50 = vrot.slane %v1985_v47, 9  ;;  %v6349_v8 = vcombine.low %v2065_v42, %v2068_v59  ;;  %v8199_v42 = vsel %vm8036_vm10, %v6327_v62, %v2078_v11 }
  0xa6   : > { %v6263_v3 = vcombine.low %v1361_v46, %v1371_v57  ;;  %7107 = vmatprep.mubr.msk.bf16.mxu0 %vm1453_vm5, %v6348_v13  ;;  %v2085_v26 = vrot.slane %v8167_v20, 5  ;;  %7176 = vmatpush3.bf16.msra.mxu0 %v7406_v63  ;;  %v2081_v13 = vrot.slane %v8046_v43, 5  ;;  %v2092_v1 = vrot.slane %v8174_v44, 5  ;;  %v8183_v63 = vld [vmem:[#allocation2 + $0x24] sm:$0xf] }
  0xa7   : > { %7177 = vmatprep.subr.bf16.mxu0 %v7408_v17  ;;  %v6328_v43 = vrot.slane %v1984_v19, 9  ;;  %v7474_v46 = vld [vmem:[#allocation2 + $0x74] sm:$0x1]  ;;  %v8189_v24 = vld [vmem:[#allocation2 + $0x7c] sm:$0xf]  ;;  %v2106_v19 = vrot.slane %v7806_v32, 5  ;;  %v10450_v38 = vcombine.low %v8183_v63, %v8185_v18 }
  0xa8   : > { %7048 = vmatmul.mubr.msk.bf16.gmra.mxu1 %vm1453_vm5, %v6263_v3  ;;  %v2087_v33 = vrot.slane %v2085_v26, 4  ;;  %v2094_v25 = vrot.slane %v2092_v1, 4  ;;  %v2095_v57 = vrot.slane %v7474_v46, 5  ;;  %v2099_v3 = vrot.slane %v8189_v24, 5  ;;  %v1987_v29 = vld [vmem:[#allocation2 + $0x84] sm:$0xe] }
  0xa9   : > { %7059 = vmatprep.mubr.msk.bf16.mxu1 %vm1453_vm5, %v6284_v30  ;;  %v6350_v30 = vcombine.low %v2072_v6, %v2075_v48  ;;  %v2082_v47 = vsel %vm8036_vm10, %v2080_v60, %v2081_v13  ;;  %v8203_v59 = vld [vmem:[#allocation2 + $0x60] sm:$0xf]  ;;  %v6330_v48 = vrot.slane %v1986_v39, 9  ;;  %v8210_v46 = vsel %vm8036_vm10, %v6328_v43, %v2085_v26  ;;  %v1989_v60 = vld [vmem:[#allocation2 + $0x9c] sm:$0xe]  ;;  %v7403_v26 = vld [vmem:[%s10431_s1 + $0x70] sm:$0xff]  }
  0xaa   : > { %7178 = vmatpush3.bf16.msra.mxu0 %v7408_v17  ;;  %v8214_v32 = vsel %vm8036_vm10, %v2087_v33, %v2088_v35  ;;  %v8218_v11 = vsel %vm8036_vm10, %v6329_v50, %v2092_v1  ;;  %v8220_v17 = vld [vmem:[#allocation2 + $0x6c] sm:$0xf]  ;;  %v8230_v35 = vsel %vm8036_vm10, %v2094_v25, %v2095_v57  ;;  %v2101_v13 = vrot.slane %v2099_v3, 4  ;;  %v7478_v43 = vld [vmem:[#allocation2 + $0x80] sm:$0x1] }
  0xab   : > { %7251 = vmatprep.subr.bf16.mxu0 %v8180_v12  ;;  %v2102_v1 = vrot.slane %v7478_v43, 5  ;;  %v6331_v33 = vrot.slane %v1987_v29, 9  ;;  %v6351_v50 = vcombine.low %v8199_v42, %v2082_v47  ;;  %v8234_v39 = vld [vmem:[#allocation2 + $0x78] sm:$0xf]  ;;  %v2108_v62 = vrot.slane %v2106_v19, 4 }
  0xac   : > { %v7480_v6 = vld [vmem:[#allocation2 + $0x8c] sm:$0x1]  ;;  %v6352_v29 = vcombine.low %v8210_v46, %v8214_v32  ;;  %v8246_v25 = vsel %vm8036_vm10, %v6330_v48, %v2099_v3  ;;  %v1988_v57 = vld [vmem:[#allocation2 + $0x90] sm:$0xe]  ;;  %v6333_v42 = vrot.slane %v1989_v60, 9  ;;  %v7481_v47 = vld [vmem:[%s10431_s1 + $0x78] sm:$0xff]  }
  0xad   : > { %7108 = vmatmul.mubr.msk.bf16.gmra.mxu0 %vm1453_vm5, %v6349_v8  ;;  %v2109_v22 = vrot.slane %v7480_v6, 5  ;;  %v2120_v56 = vrot.slane %v7942_v31, 5  ;;  %v1990_v6 = vld [vmem:[#allocation2 + $0xa8] sm:$0xe]  ;;  %v8267_v5 = vsel %vm8036_vm10, %v2101_v13, %v2102_v1  ;;  %v8271_v4 = vsel %vm8036_vm10, %v6331_v33, %v2106_v19  ;;  %v2848_v46 = vld [vmem:[#allocation2 + $0xc] sm:$0xf] }
  0xae   : > { %7111 = vmatprep.mubr.msk.bf16.mxu0 %vm1453_vm5, %v6350_v30  ;;  %v2113_v30 = vrot.slane %v7916_v55, 5  ;;  %v7405_v48 = vld [vmem:[%s10431_s1 + $0x68] sm:$0xff]   ;;  %v6332_v60 = vrot.slane %v1988_v57, 9  ;;  %v1991_v1 = vld [vmem:[#allocation2 + $0xb4] sm:$0xe]  ;;  %v2116_v19 = vrot.slane %v7926_v0, 5  ;;  %v6354_v0 = vcombine.low %v8246_v25, %v8267_v5 }
  0xaf   : > { %v8278_v32 = vsel %vm8036_vm10, %v2108_v62, %v2109_v22  ;;  %v8282_v43 = vsel %vm8036_vm10, %v6333_v42, %v2120_v56  ;;  %v2122_v13 = vrot.slane %v2120_v56, 4  ;;  %v6334_v33 = vrot.slane %v1990_v6, 9  ;;  %v2849_v62 = vld [vmem:[#allocation2 + $0x10] sm:$0xf]  ;;  %v8307_v10 = vld [vmem:[#allocation2 + $0x84] sm:$0xf] }
  0xb0   : > { %7060 = vmatmul.mubr.msk.bf16.vlgmr.msra.gmra.mxu1 %vm1453_vm5, %v6285_v41  ;;  %v2123_v41 = vrot.slane %v7949_v45, 5  ;;  %v2134_v3 = vrot.slane %v8111_v37, 5  ;;  %v2897_v57 = vshrl.u32 %v2848_v46, 16  ;;  %v2900_v42 = vshll.u32 %v2848_v46, 16  ;;  %v2850_v18 = vld [vmem:[#allocation2 + $0x14] sm:$0x1] }
  0xb1   : > { %7132 = vmatpush3.bf16.msra.mxu1 %v7481_v47  ;;  %7063 = vmatprep.mubr.msk.bf16.mxu1 %vm1453_vm5, %v6286_v53  ;;  %v2127_v53 = vrot.slane %v8051_v58, 5  ;;  %v2115_v47 = vrot.slane %v2113_v30, 4  ;;  %v6335_v6 = vrot.slane %v1991_v1, 9  ;;  %v2137_v22 = vrot.slane %v8122_v61, 5  ;;  %v2852_v5 = vld [vmem:[#allocation2 + $0x1c] sm:$0xf] }
  0xb2   : > { %7133 = vmatprep.subr.bf16.mxu1 %v7403_v26  ;;  %v8288_v45 = vsel %vm8036_vm10, %v2122_v13, %v2123_v41  ;;  %v2130_v41 = vrot.slane %v8056_v27, 5  ;;  %v2136_v13 = vrot.slane %v2134_v3, 4  ;;  %v2899_v46 = vrot.slane %v2897_v57, 4  ;;  %v8309_v27 = vld [vmem:[#allocation2 + $0x88] sm:$0xf] }
  0xb3   : > { %v2129_v56 = vrot.slane %v2127_v53, 4  ;;  %v2902_v8 = vrot.slane %v2900_v42, 5  ;;  %v2906_v1 = vshll.u32 %v2849_v62, 16  ;;  %v2910_v61 = vshrl.u32 %v2849_v62, 16  ;;  %v2853_v63 = vld [vmem:[#allocation2 + $0x20] sm:$0x1] }
  0xb4   : > { %v10451_v57 = vcombine.low %v7836_v15, %v7838_v28  ;;  %v8323_v42 = vsel %vm8036_vm10, %v6332_v60, %v2113_v30  ;;  %v8327_v62 = vsel %vm8036_vm10, %v2115_v47, %v2116_v19  ;;  %v8344_v60 = vsel %vm8036_vm10, %v6335_v6, %v2134_v3  ;;  %v8350_v19 = vld [vmem:[#allocation2 + $0x28] sm:$0xf]  ;;  %v2857_v3 = vld [vmem:[#allocation2 + $0x30] sm:$0xf] }
  0xb5   : > { %7134 = vmatpush3.bf16.msra.mxu1 %v7403_v26  ;;  %7112 = vmatmul.mubr.msk.bf16.gmra.mxu0 %vm1453_vm5, %v6351_v50  ;;  %v7407_v26 = vld [vmem:[%s10431_s1 + $0x60] sm:$0xff]   ;;  %v2851_v50 = vld [vmem:[#allocation2 + $0x18] sm:$0xf]  ;;  %v2903_v25 = vor.u32 %v2902_v8, %v2899_v46  ;;  %v8336_v8 = vsel %vm8036_vm10, %v6334_v33, %v2127_v53  ;;  %v8340_v30 = vsel %vm8036_vm10, %v2129_v56, %v2130_v41  ;;  %v8352_v46 = vrot.slane %v2906_v1, 5 }
  0xb6   : > { %7135 = vmatprep.subr.bf16.mxu1 %v7405_v48  ;;  %7115 = vmatprep.mubr.msk.bf16.mxu0 %vm1453_vm5, %v6352_v29  ;;  %v2921_v15 = vshrl.u32 %v2851_v50, 16  ;;  %v2924_v28 = vshll.u32 %v2851_v50, 16  ;;  %v8348_v47 = vsel %vm8036_vm10, %v2136_v13, %v2137_v22  ;;  %v2912_v50 = vrot.slane %v2910_v61, 4  ;;  %v2860_v61 = vld [vmem:[#allocation2 + $0x3c] sm:$0xf] }
  0xb7   : > { %v2930_v53 = vshll.u32 %v2852_v5, 16  ;;  %v2934_v33 = vshrl.u32 %v2852_v5, 16  ;;  %v8354_v29 = vrot.slane %v2903_v25, 4  ;;  %v2916_v56 = vshll.u32 %v2850_v18, 16 }
  0xb8   : > { %7064 = vmatmul.mubr.msk.bf16.gmra.mxu1 %vm1453_vm5, %v10450_v38  ;;  %v10452_v6 = vcombine.low %v8218_v11, %v8230_v35  ;;  %v6356_v22 = vcombine.low %v8323_v42, %v8327_v62  ;;  %v2923_v13 = vrot.slane %v2921_v15, 4  ;;  %v2926_v1 = vrot.slane %v2924_v28, 5  ;;  %v8369_v35 = vld [vmem:[#allocation2 + $0x2c] sm:$0x1]  ;;  %v8379_v15 = vld [vmem:[#allocation2 + $0x34] sm:$0xf] }
  0xb9   : > { %7067 = vmatprep.mubr.msk.bf16.mxu1 %vm1453_vm5, %v10451_v57  ;;  %7136 = vmatpush3.bf16.msra.mxu1 %v7405_v48  ;;  %v8332_v48 = vld [vmem:[%s10431_s1 + $0xb8] sm:$0xff]   ;;  %v2854_v57 = vld [vmem:[#allocation2 + $0x24] sm:$0xf]  ;;  %v2940_v11 = vshll.u32 %v2853_v63, 16  ;;  %v2958_v25 = vshrl.u32 %v8350_v19, 16  ;;  %v10453_v5 = vcombine.low %v7890_v14, %v7894_v21  ;;  %v2913_v42 = vor.u32 %v2912_v50, %v8352_v46 }
  0xba   : > { %7137 = vmatprep.subr.bf16.mxu1 %v7407_v26  ;;  %v2945_v41 = vshrl.u32 %v2854_v57, 16  ;;  %v2948_v38 = vshll.u32 %v2854_v57, 16  ;;  %v8377_v62 = vrot.slane %v2930_v53, 5  ;;  %v2969_v28 = vshrl.u32 %v2857_v3, 16  ;;  %v8389_v50 = vld [vmem:[#allocation2 + $0x38] sm:$0x1] }
  0xbb   : > { %v10454_v63 = vcombine.low %v7977_v34, %v7987_v49  ;;  %v2909_v14 = vsel %vm7610_vm7, %v8354_v29, %v8352_v46  ;;  %v2918_v21 = vrot.slane %v2916_v56, 5  ;;  %10455 = vst [vmem:[#allocation5_spill] sm:$0xff] %v8389_v50  ;;  %v2927_v53 = vor.u32 %v2926_v1, %v2923_v13 }
  0xbc   : > { %v2947_v57 = vrot.slane %v2945_v41, 4  ;;  %v2972_v18 = vshll.u32 %v2857_v3, 16  ;;  %v8393_v2 = vrot.slane %v2940_v11, 5  ;;  %v2971_v34 = vrot.slane %v2969_v28, 4  ;;  %v2863_v28 = vld [vmem:[#allocation2 + $0x48] sm:$0xf] }
  0xbd   : > { %7138 = vmatpush3.bf16.msra.mxu1 %v7407_v26  ;;  %7116 = vmatmul.mubr.msk.bf16.gmra.mxu0 %vm1453_vm5, %v10452_v6  ;;  %v2954_v26 = vshll.u32 %v8350_v19, 16  ;;  %v2950_v6 = vrot.slane %v2948_v38, 5  ;;  %v2978_v49 = vshll.u32 %v8379_v15, 16  ;;  %v2914_v29 = vrot.slane %v2913_v42, 4 }
  0xbe   : > { %7211 = vmatprep.subr.bf16.mxu1 %v8332_v48  ;;  %7119 = vmatprep.mubr.msk.bf16.mxu0 %vm1453_vm5, %v6354_v0  ;;  %v2936_v0 = vrot.slane %v2934_v33, 4  ;;  %v2964_v46 = vshll.u32 %v8369_v35, 16  ;;  %v2974_v56 = vrot.slane %v2972_v18, 5  ;;  %v2993_v1 = vshrl.u32 %v2860_v61, 16 }
  0xbf   : > { %v8391_v33 = vrot.slane %v2954_v26, 5  ;;  %v2951_v41 = vor.u32 %v2950_v6, %v2947_v57  ;;  %v8401_v13 = vrot.slane %v2978_v49, 5  ;;  %v10457_v26 = vcombine.low %v8271_v4, %v8278_v32 }
  0xc0   : > { %7068 = vmatmul.mubr.msk.bf16.gmra.mxu1 %vm1453_vm5, %v10453_v5  ;;  %v2960_v5 = vrot.slane %v2958_v25, 4  ;;  %v2937_v38 = vor.u32 %v2936_v0, %v8377_v62  ;;  %v2988_v25 = vshll.u32 %v8389_v50, 16  ;;  %v2996_v42 = vshll.u32 %v2860_v61, 16 }
  0xc1   : > { %7071 = vmatprep.mubr.msk.bf16.mxu1 %vm1453_vm5, %v10454_v63  ;;  %v2982_v63 = vshrl.u32 %v8379_v15, 16  ;;  %v3002_v0 = vshll.u32 %v8397_v9, 16  ;;  %v2975_v18 = vor.u32 %v2974_v56, %v2971_v34  ;;  %v2995_v6 = vrot.slane %v2993_v1, 4 }
  0xc2   : > { %v2961_v11 = vor.u32 %v2960_v5, %v8391_v33  ;;  %v3006_v49 = vshrl.u32 %v8397_v9, 16  ;;  %v10458_v4 = vcombine.low %v8022_v51, %v8024_v52  ;;  %v2919_v32 = vsel %vm7610_vm7, %v2914_v29, %v2918_v21  ;;  %v8419_v5 = vld [vmem:[#allocation2 + $0x44] sm:$0x1]  ;;  %v8427_v51 = vld [vmem:[#allocation2 + $0x4c] sm:$0xf] }
  0xc3   : > { %v2984_v3 = vrot.slane %v2982_v63, 4  ;;  %v2928_v61 = vrot.slane %v2927_v53, 4  ;;  %v2998_v63 = vrot.slane %v2996_v42, 5  ;;  %v2938_v34 = vrot.slane %v2937_v38, 4  ;;  %v2866_v29 = vld [vmem:[#allocation2 + $0x54] sm:$0xf] }
  0xc4   : > { %v2952_v56 = vrot.slane %v2951_v41, 4  ;;  %v3017_v52 = vshrl.u32 %v2863_v28, 16  ;;  %v2962_v1 = vrot.slane %v2961_v11, 4  ;;  %v2990_v21 = vrot.slane %v2988_v25, 5  ;;  %v8432_v41 = vld [vmem:[#allocation2 + $0x58] sm:$0xf] }
  0xc5   : > { %7120 = vmatmul.mubr.msk.bf16.gmra.mxu0 %vm1453_vm5, %v10457_v26  ;;  %v2985_v57 = vor.u32 %v2984_v3, %v8401_v13  ;;  %v8421_v26 = vrot.slane %v3002_v0, 5  ;;  %v3008_v3 = vrot.slane %v3006_v49, 4  ;;  %v3020_v53 = vshll.u32 %v2863_v28, 16 }
  0xc6   : > { %7123 = vmatprep.mubr.msk.bf16.mxu0 %vm1453_vm5, %v6356_v22  ;;  %v10459_v22 = vcombine.low %v8203_v59, %v8167_v20  ;;  %v2976_v9 = vrot.slane %v2975_v18, 4  ;;  %v2999_v0 = vor.u32 %v2998_v63, %v2995_v6  ;;  %v3012_v50 = vshll.u32 %v8419_v5, 16 }
  0xc7   : > { %v2986_v42 = vrot.slane %v2985_v57, 4  ;;  %v3009_v20 = vor.u32 %v3008_v3, %v8421_v26  ;;  %v3019_v59 = vrot.slane %v3017_v52, 4  ;;  %v3026_v38 = vshll.u32 %v8427_v51, 16 }
  0xc8   : > { %7072 = vmatmul.mubr.msk.bf16.gmra.mxu1 %vm1453_vm5, %v10458_v4  ;;  %v2966_v4 = vrot.slane %v2964_v46, 5  ;;  %v6432_v49 = vcombine.low %v2909_v14, %v2919_v32  ;;  %v2933_v46 = vsel %vm7610_vm7, %v2928_v61, %v8377_v62  ;;  %v3030_v11 = vshrl.u32 %v8427_v51, 16  ;;  %v2869_v32 = vld [vmem:[#allocation2 + $0x60] sm:$0xf]  ;;  %v8462_v61 = vld [vmem:[#allocation2 + $0x64] sm:$0xf] }
  0xc9   : > { %7075 = vmatprep.mubr.msk.bf16.mxu1 %vm1453_vm5, %v10459_v22  ;;  %v3022_v22 = vrot.slane %v3020_v53, 5  ;;  %v3041_v25 = vshrl.u32 %v2866_v29, 16  ;;  %v10460_v28 = vcombine.low %v8282_v43, %v8288_v45  ;;  %v2943_v18 = vsel %vm7610_vm7, %v2938_v34, %v8393_v2  ;;  %v8478_v34 = vld [vmem:[#allocation2 + $0x50] sm:$0x1]  ;;  %v2872_v53 = vld [vmem:[#allocation2 + $0x6c] sm:$0xf] }
  0xca   : > { %v2957_v14 = vsel %vm7610_vm7, %v2952_v56, %v8391_v33  ;;  %v2967_v57 = vsel %vm7610_vm7, %v2962_v1, %v2966_v4  ;;  %v3044_v62 = vshll.u32 %v2866_v29, 16  ;;  %v10461_v6 = vcombine.low %v8336_v8, %v8340_v30 }
  0xcb   : > { %v2981_v45 = vsel %vm7610_vm7, %v2976_v9, %v8401_v13  ;;  %v2991_v2 = vsel %vm7610_vm7, %v2986_v42, %v2990_v21  ;;  %v8459_v43 = vrot.slane %v3012_v50, 5  ;;  %v3050_v33 = vshll.u32 %v8432_v41, 16 }
  0xcc   : > { %v10462_v63 = vcombine.low %v8220_v17, %v8174_v44  ;;  %v8468_v8 = vrot.slane %v2999_v0, 4  ;;  %v8470_v30 = vrot.slane %v3009_v20, 4  ;;  %v3023_v9 = vor.u32 %v3022_v22, %v3019_v59 }
  0xcd   : > { %7124 = vmatmul.mubr.msk.bf16.gmra.mxu0 %vm1453_vm5, %v10460_v28  ;;  %v8472_v13 = vrot.slane %v3026_v38, 5  ;;  %v10463_v50 = vcombine.low %v8234_v39, %v8189_v24  ;;  %v3032_v56 = vrot.slane %v3030_v11, 4  ;;  %v3043_v3 = vrot.slane %v3041_v25, 4  ;;  %v8486_v24 = vld [vmem:[#allocation2 + $0x5c] sm:$0x1] }
  0xce   : > { %7127 = vmatprep.mubr.msk.bf16.mxu0 %vm1453_vm5, %v10461_v6  ;;  %v3046_v52 = vrot.slane %v3044_v62, 5  ;;  %v3054_v44 = vshrl.u32 %v8432_v41, 16  ;;  %v6433_v17 = vcombine.low %v2933_v46, %v2943_v18  ;;  %v3065_v1 = vshrl.u32 %v2869_v32, 16  ;;  %v8503_v28 = vld [vmem:[#allocation2 + $0x70] sm:$0xf] }
  0xcf   : > { %v3068_v4 = vshll.u32 %v2869_v32, 16  ;;  %v3074_v21 = vshll.u32 %v8462_v61, 16  ;;  %v8482_v29 = vcombine.low %v2957_v14, %v2967_v57  ;;  %v8484_v42 = vcombine.low %v2981_v45, %v2991_v2  ;;  %v8510_v62 = vld [vmem:[#allocation2 + $0x68] sm:$0x1] }
  0xd0   : > { %7076 = vmatmul.mubr.msk.bf16.gmra.mxu1 %vm1453_vm5, %v10462_v63  ;;  %v8488_v39 = vrot.slane %v3050_v33, 5  ;;  %v3056_v0 = vrot.slane %v3054_v44, 4  ;;  %v3005_v20 = vsel %vm7610_vm7, %v8468_v8, %v8421_v26  ;;  %v8494_v59 = vrot.slane %v3023_v9, 4 }
  0xd1   : > { %7079 = vmatprep.mubr.msk.bf16.mxu1 %vm1453_vm5, %v10463_v50  ;;  %v3036_v22 = vshll.u32 %v8478_v34, 16  ;;  %v3078_v38 = vshrl.u32 %v8462_v61, 16  ;;  %v3015_v46 = vsel %vm7610_vm7, %v8470_v30, %v8459_v43  ;;  %v3033_v11 = vor.u32 %v3032_v56, %v8472_v13  ;;  %v2875_v30 = vld [vmem:[#allocation2 + $0x78] sm:$0xf]  ;;  %v8524_v50 = vld [vmem:[#allocation2 + $0x74] sm:$0x1] }
  0xd2   : > { %v3047_v25 = vor.u32 %v3046_v52, %v3043_v3  ;;  %v3089_v18 = vshrl.u32 %v2872_v53, 16  ;;  %v10464_v14 = vcombine.low %v8344_v60, %v8348_v47  ;;  %v3060_v57 = vshll.u32 %v8486_v24, 16 }
  0xd3   : > { %v3067_v6 = vrot.slane %v3065_v1, 4  ;;  %v3070_v45 = vrot.slane %v3068_v4, 5  ;;  %v8512_v2 = vrot.slane %v3074_v21, 5  ;;  %v3057_v43 = vor.u32 %v3056_v0, %v8488_v39  ;;  %v8533_v1 = vld [vmem:[#allocation2 + $0x7c] sm:$0xf] }
  0xd4   : > { %v3080_v33 = vrot.slane %v3078_v38, 4  ;;  %v3091_v32 = vrot.slane %v3089_v18, 4  ;;  %v3092_v63 = vshll.u32 %v2872_v53, 16  ;;  %v10465_v60 = vcombine.low %v8307_v10, %v8309_v27 }
  0xd5   : > { %7128 = vmatmul.mubr.msk.bf16.gmra.mxu0 %vm1453_vm5, %v10464_v14  ;;  %v3029_v47 = vsel %vm7610_vm7, %v8494_v59, %v8472_v13  ;;  %v3038_v9 = vrot.slane %v3036_v22, 5  ;;  %v3102_v56 = vshrl.u32 %v8503_v28, 16  ;;  %v10466_v3 = vcombine.low %v7914_v54, %v7916_v55  ;;  %v7419_v54 = vld [vmem:[%s10431_s1 + $0xd0] sm:$0xff]  }
  0xd6   : > { %7179 = vmatprep.mubr.msk.bf16.mxu0 %vm1453_vm5, %v6432_v49  ;;  %v3098_v49 = vshll.u32 %v8503_v28, 16  ;;  %v3034_v10 = vrot.slane %v3033_v11, 4  ;;  %v3048_v27 = vrot.slane %v3047_v25, 4  ;;  %v3084_v52 = vshll.u32 %v8510_v62, 16 }
  0xd7   : > { %v3094_v44 = vrot.slane %v3092_v63, 5  ;;  %v3062_v13 = vrot.slane %v3060_v57, 5  ;;  %v3071_v4 = vor.u32 %v3070_v45, %v3067_v6  ;;  %v3113_v53 = vshrl.u32 %v2875_v30, 16 }
  0xd8   : > { %7080 = vmatmul.mubr.msk.bf16.gmra.mxu1 %vm1453_vm5, %v10465_v60  ;;  %v8535_v21 = vrot.slane %v3098_v49, 5  ;;  %v3058_v0 = vrot.slane %v3057_v43, 4  ;;  %v3081_v59 = vor.u32 %v3080_v33, %v8512_v2  ;;  %v3104_v38 = vrot.slane %v3102_v56, 4  ;;  %v8552_v43 = vld [vmem:[#allocation2 + $0x80] sm:$0x1] }
  0xd9   : > { %7083 = vmatprep.mubr.msk.bf16.mxu1 %vm1453_vm5, %v10466_v3  ;;  %v3095_v22 = vor.u32 %v3094_v44, %v3091_v32  ;;  %v3108_v55 = vshll.u32 %v8524_v50, 16  ;;  %v3116_v11 = vshll.u32 %v2875_v30, 16  ;;  %v3122_v25 = vshll.u32 %v8533_v1, 16  ;;  %v2878_v33 = vld [vmem:[#allocation2 + $0x84] sm:$0xf] }
  0xda   : > { %v3126_v18 = vshrl.u32 %v8533_v1, 16  ;;  %v3039_v14 = vsel %vm7610_vm7, %v3034_v10, %v3038_v9  ;;  %v3053_v57 = vsel %vm7610_vm7, %v3048_v27, %v8488_v39  ;;  %v8549_v6 = vrot.slane %v3084_v52, 5  ;;  %v8557_v49 = vld [vmem:[#allocation2 + $0x88] sm:$0xf]  ;;  %v2881_v44 = vld [vmem:[#allocation2 + $0x90] sm:$0xf] }
  0xdb   : > { %v3105_v45 = vor.u32 %v3104_v38, %v8535_v21  ;;  %v3115_v32 = vrot.slane %v3113_v53, 4  ;;  %v3118_v63 = vrot.slane %v3116_v11, 5  ;;  %v8555_v30 = vrot.slane %v3122_v25, 5  ;;  %v7425_v10 = vld [vmem:[%s10431_s1 + $0xc8] sm:$0xff]   ;;  %v2884_v38 = vld [vmem:[#allocation2 + $0x9c] sm:$0xf] }
  0xdc   : > { %v3128_v60 = vrot.slane %v3126_v18, 4  ;;  %v3063_v39 = vsel %vm7610_vm7, %v3058_v0, %v3062_v13  ;;  %v8564_v9 = vrot.slane %v3071_v4, 4  ;;  %v8566_v56 = vrot.slane %v3081_v59, 4  ;;  %v8608_v59 = vld [vmem:[#allocation2 + $0x8c] sm:$0x1]  ;;  %v7431_v25 = vld [vmem:[%s10431_s1 + $0xc0] sm:$0xff]  }
  0xdd   : > { %7180 = vmatmul.mubr.msk.bf16.vlgmr.msra.gmra.mxu0 %vm1453_vm5, %v6433_v17  ;;  %v8568_v17 = vrot.slane %v3095_v22, 4  ;;  %v10467_v3 = vcombine.low %v7936_v23, %v7942_v31  ;;  %v3137_v27 = vshrl.u32 %v2878_v33, 16  ;;  %v3140_v52 = vshll.u32 %v2878_v33, 16  ;;  %v7410_v18 = vld [vmem:[#allocation2 + $0xc] sm:$0xff]  }
  0xde   : > { %7252 = vmatpush3.bf16.msra.mxu0 %v8180_v12  ;;  %7183 = vmatprep.mubr.msk.bf16.mxu0 %vm1453_vm5, %v8482_v29  ;;  %v6436_v12 = vcombine.low %v3005_v20, %v3015_v46  ;;  %v3110_v29 = vrot.slane %v3108_v55, 5  ;;  %v10468_v23 = vcombine.low %v8049_v16, %v8051_v58  ;;  %v3106_v31 = vrot.slane %v3105_v45, 4  ;;  %v8589_v20 = vld [vmem:[#allocation2 + $0x94] sm:$0xf]  ;;  %v8620_v45 = vld [vmem:[#allocation2 + $0xa0] sm:$0xf] }
  0xdf   : > { %7253 = vmatprep.subr.bf16.mxu0 %v7419_v54  ;;  %v3132_v13 = vshll.u32 %v8552_v43, 16  ;;  %v3146_v26 = vshll.u32 %v8557_v49, 16  ;;  %v3150_v8 = vshrl.u32 %v8557_v49, 16  ;;  %v8591_v46 = vcombine.low %v3029_v47, %v3039_v14 }
  0xe0   : > { %7084 = vmatmul.mubr.msk.bf16.gmra.mxu1 %vm1453_vm5, %v10467_v3  ;;  %v8593_v4 = vcombine.low %v3053_v57, %v3063_v39  ;;  %v3119_v53 = vor.u32 %v3118_v63, %v3115_v32  ;;  %v3129_v0 = vor.u32 %v3128_v60, %v8555_v30  ;;  %v3077_v16 = vsel %vm7610_vm7, %v8564_v9, %v8512_v2  ;;  %v8631_v39 = vld [vmem:[#allocation2 + $0x98] sm:$0x1] }
  0xe1   : > { %7087 = vmatprep.mubr.msk.bf16.mxu1 %vm1453_vm5, %v10468_v23  ;;  %v3087_v58 = vsel %vm7610_vm7, %v8566_v56, %v8549_v6  ;;  %v3101_v47 = vsel %vm7610_vm7, %v8568_v17, %v8535_v21  ;;  %v3161_v22 = vshrl.u32 %v2881_v44, 16  ;;  %v3142_v55 = vrot.slane %v3140_v52, 5  ;;  %v2887_v23 = vld [vmem:[#allocation2 + $0xa8] sm:$0xf] }
  0xe2   : > { %7254 = vmatpush3.bf16.msra.mxu0 %v7419_v54  ;;  %v3139_v54 = vrot.slane %v3137_v27, 4  ;;  %v3164_v11 = vshll.u32 %v2881_v44, 16  ;;  %v3170_v2 = vshll.u32 %v8589_v20, 16  ;;  %v3111_v14 = vsel %vm7610_vm7, %v3106_v31, %v3110_v29 }
  0xe3   : > { %7255 = vmatprep.subr.bf16.mxu0 %v7425_v10  ;;  %v8616_v57 = vrot.slane %v3132_v13, 5  ;;  %v8618_v21 = vrot.slane %v3146_v26, 5  ;;  %v3152_v6 = vrot.slane %v3150_v8, 4  ;;  %v8624_v33 = vrot.slane %v3119_v53, 4  ;;  %v8648_v13 = vld [vmem:[#allocation2 + $0xac] sm:$0xf] }
  0xe4   : > { %v8626_v32 = vrot.slane %v3129_v0, 4  ;;  %v3156_v63 = vshll.u32 %v8608_v59, 16  ;;  %v3174_v60 = vshrl.u32 %v8589_v20, 16  ;;  %v3163_v9 = vrot.slane %v3161_v22, 4 }
  0xe5   : > { %7184 = vmatmul.mubr.msk.bf16.gmra.mxu0 %vm1453_vm5, %v8484_v42  ;;  %v3166_v56 = vrot.slane %v3164_v11, 5  ;;  %v3185_v17 = vshrl.u32 %v2884_v38, 16  ;;  %v3188_v3 = vshll.u32 %v2884_v38, 16  ;;  %v10469_v42 = vcombine.low %v8109_v36, %v8111_v37 }
  0xe6   : > { %7187 = vmatprep.mubr.msk.bf16.mxu0 %vm1453_vm5, %v6436_v12  ;;  %7256 = vmatpush3.bf16.msra.mxu0 %v7425_v10  ;;  %v3143_v29 = vor.u32 %v3142_v55, %v3139_v54  ;;  %v8637_v27 = vrot.slane %v3170_v2, 5  ;;  %v3176_v52 = vrot.slane %v3174_v60, 4  ;;  %v3194_v44 = vshll.u32 %v8620_v45, 16  ;;  %v8643_v12 = vld [vmem:[%s10431_s1 + $0x118] sm:$0xff]   ;;  %v8659_v54 = vld [vmem:[#allocation2 + $0xa4] sm:$0x1] }
  0xe7   : > { %7257 = vmatprep.subr.bf16.mxu0 %v7431_v25  ;;  %10470 = vst [vmem:[#allocation7_spill] sm:$0xff] %v8643_v12  ;;  %v3153_v10 = vor.u32 %v3152_v6, %v8618_v21  ;;  %v3187_v36 = vrot.slane %v3185_v17, 4  ;;  %v3190_v37 = vrot.slane %v3188_v3, 5  ;;  %v3198_v31 = vshrl.u32 %v8620_v45, 16  ;;  %v7412_v2 = vld [vmem:[#allocation2 + $0x18] sm:$0xff]   ;;  %v7415_v6 = vld [vmem:[#allocation2 + $0x30] sm:$0xff]  }
  0xe8   : > { %7088 = vmatmul.mubr.msk.bf16.gmra.mxu1 %vm1453_vm5, %v10469_v42  ;;  %v8650_v26 = vcombine.low %v3077_v16, %v3087_v58  ;;  %v8652_v8 = vcombine.low %v3101_v47, %v3111_v14  ;;  %v3180_v53 = vshll.u32 %v8631_v39, 16  ;;  %v8655_v0 = vrot.slane %v3194_v44, 5  ;;  %v7414_v14 = vld [vmem:[#allocation2 + $0x24] sm:$0xff]  }
  0xe9   : > { %7139 = vmatprep.mubr.msk.bf16.mxu1 %vm1453_vm5, %v7410_v18  ;;  %v8657_v22 = vrot.slane %v3156_v63, 5  ;;  %v3167_v38 = vor.u32 %v3166_v56, %v3163_v9  ;;  %v3200_v55 = vrot.slane %v3198_v31, 4  ;;  %v3209_v11 = vshrl.u32 %v2887_v23, 16  ;;  %v2890_v9 = vld [vmem:[#allocation2 + $0xb4] sm:$0xf] }
  0xea   : > { %7258 = vmatpush3.bf16.msra.mxu0 %v7431_v25  ;;  %v3177_v58 = vor.u32 %v3176_v52, %v8637_v27  ;;  %v3212_v47 = vshll.u32 %v2887_v23, 16  ;;  %v3218_v18 = vshll.u32 %v8648_v13, 16  ;;  %v8672_v25 = vrot.slane %v3143_v29, 4  ;;  %v7417_v56 = vld [vmem:[%s10431_s1 + $0xb0] sm:$0xff]   ;;  %v8686_v52 = vld [vmem:[#allocation2 + $0xb8] sm:$0xf] }
  0xeb   : > { %7331 = vmatprep.subr.bf16.mxu0 %v8643_v12  ;;  %v8674_v63 = vrot.slane %v3153_v10, 4  ;;  %v3191_v60 = vor.u32 %v3190_v37, %v3187_v36  ;;  %v8681_v17 = vrot.slane %v3180_v53, 5  ;;  %v3201_v3 = vor.u32 %v3200_v55, %v8655_v0 }
  0xec   : > { %v3204_v42 = vshll.u32 %v8659_v54, 16  ;;  %v3222_v29 = vshrl.u32 %v8648_v13, 16  ;;  %v8690_v44 = vrot.slane %v3167_v38, 4  ;;  %v3211_v23 = vrot.slane %v3209_v11, 4 }
  0xed   : > { %7188 = vmatmul.mubr.msk.bf16.gmra.mxu0 %vm1453_vm5, %v8591_v46  ;;  %v8692_v46 = vld [vmem:[#allocation2 + $0xb0] sm:$0x1]  ;;  %v3214_v10 = vrot.slane %v3212_v47, 5  ;;  %v8694_v36 = vrot.slane %v3218_v18, 5  ;;  %v3178_v37 = vrot.slane %v3177_v58, 4  ;;  %v3233_v53 = vshrl.u32 %v2890_v9, 16 }
  0xee   : > { %7191 = vmatprep.mubr.msk.bf16.mxu0 %vm1453_vm5, %v8593_v4  ;;  %v3224_v31 = vrot.slane %v3222_v29, 4  ;;  %v3236_v55 = vshll.u32 %v2890_v9, 16  ;;  %v3149_v4 = vsel %vm7610_vm7, %v8672_v25, %v8618_v21  ;;  %v3192_v38 = vrot.slane %v3191_v60, 4  ;;  %v7423_v58 = vld [vmem:[%s10431_s1 + $0xa8] sm:$0xff]  }
  0xef   : > { %v3242_v11 = vshll.u32 %v8686_v52, 16  ;;  %v3246_v47 = vshrl.u32 %v8686_v52, 16  ;;  %v3202_v18 = vrot.slane %v3201_v3, 4  ;;  %v3228_v21 = vshll.u32 %v8692_v46, 16  ;;  %v320_v25 = vld [vmem:[%s7583_s12 + $0xc8] sm:$0x1] }
  0xf0   : > { %7140 = vmatmul.mubr.msk.bf16.vlgmr.msra.gmra.mxu1 %vm1453_vm5, %v7412_v2  ;;  %v6830_v2 = vld [vmem:[%s7583_s12 + $0xc0] sm:$0xff]   ;;  %v3215_v60 = vor.u32 %v3214_v10, %v3211_v23  ;;  %v3225_v9 = vor.u32 %v3224_v31, %v8694_v36  ;;  %v3235_v29 = vrot.slane %v3233_v53, 4  ;;  %v3238_v16 = vrot.slane %v3236_v55, 5 }
  0xf1   : > { %7212 = vmatpush3.bf16.msra.mxu1 %v8332_v48  ;;  %7143 = vmatprep.mubr.msk.bf16.mxu1 %vm1453_vm5, %v7414_v14  ;;  %v3159_v48 = vsel %vm7610_vm7, %v8674_v63, %v8657_v22  ;;  %v3206_v14 = vrot.slane %v3204_v42, 5  ;;  %v3173_v12 = vsel %vm7610_vm7, %v8690_v44, %v8637_v27  ;;  %v3183_v22 = vsel %vm7610_vm7, %v3178_v37, %v8681_v17  ;;  %v7416_v42 = vld [vmem:[#allocation2 + $0x3c] sm:$0xff]  }
  0xf2   : > { %7213 = vmatprep.subr.bf16.mxu1 %v7417_v56  ;;  %v6821_v63 = vunpack.c.l.bf16 %v6830_v2  ;;  %v6822_v3 = vunpack.c.h.bf16 %v6830_v2  ;;  %v3197_v23 = vsel %vm7610_vm7, %v3192_v38, %v8655_v0  ;;  %v8726_v10 = vrot.slane %v3242_v11, 5  ;;  %v8735_v44 = vld [vmem:[#allocation2 + $0xbc] sm:$0x1]  ;;  %v7484_v0 = vld [vmem:[%s10432_s2] ss:$0 sm:$0xff] }
  0xf3   : > { %v3248_v31 = vrot.slane %v3246_v47, 4  ;;  %v374_v53 = vunpack.c.l.bf16 %v320_v25  ;;  %v3207_v27 = vsel %vm7610_vm7, %v3202_v18, %v3206_v14  ;;  %v3230_v17 = vrot.slane %v3228_v21, 5 }
  0xf4   : > { %v434_v37 = vmul.f32 %v7484_v0, %v6821_v63  ;;  %v435_v55 = vmul.f32 %v7484_v0, %v6822_v3  ;;  %v3226_v38 = vrot.slane %v3225_v9, 4  ;;  %v3239_v11 = vor.u32 %v3238_v16, %v3235_v29  ;;  %v8766_v63 = vld [vmem:[%s10431_s1 + $0xf8] sm:$0xff]  }
  0xf5   : > { %7214 = vmatpush3.bf16.msra.mxu1 %v7417_v56  ;;  %7192 = vmatmul.mubr.msk.bf16.gmra.mxu0 %vm1453_vm5, %v8650_v26  ;;  %v7429_v56 = vld [vmem:[%s10431_s1 + $0xa0] sm:$0xff]   ;;  %v3216_v26 = vrot.slane %v3215_v60, 4  ;;  %v436_v47 = vmul.f32 %v7484_v0, %v374_v53  ;;  %v10471_v2 = vsel %vm7610_vm7, %v8626_v32, %v8616_v57  ;;  %v10472_v18 = vsel %vm7610_vm7, %v8624_v33, %v8555_v30  ;;  %v3605_v53 = vld [vmem:[#allocation2 + $0x30] sm:$0xe] }
  0xf6   : > { %7215 = vmatprep.subr.bf16.mxu1 %v7423_v58  ;;  %7195 = vmatprep.mubr.msk.bf16.mxu0 %vm1453_vm5, %v8652_v8  ;;  %v6441_v14 = vcombine.low %v10472_v18, %v10471_v2  ;;  %v7485_v8 = vld [vmem:[%s10433_s3] ss:$0 sm:$0xff]  ;;  %v3249_v25 = vor.u32 %v3248_v31, %v8726_v10  ;;  %v3252_v57 = vshll.u32 %v8735_v44, 16  ;;  %v3604_v60 = vld [vmem:[#allocation2 + $0x24] sm:$0xe]  ;;  %v8759_v9 = vcombine.low %v3173_v12, %v3183_v22  ;;  %v7418_v22 = vld [vmem:[#allocation2 + $0x48] sm:$0xff]  }
  0xf7   : > { %v494_v21 = vadd.f32 %v7485_v8, %v434_v37  ;;  %v495_v16 = vadd.f32 %v7485_v8, %v435_v55  ;;  %v496_v32 = vadd.f32 %v7485_v8, %v436_v47  ;;  %v8761_v30 = vcombine.low %v3197_v23, %v3207_v27  ;;  %v7420_v27 = vld [vmem:[#allocation2 + $0x54] sm:$0xff]   ;;  %v10475_v8 = vld [vmem:[#allocation5_spill] sm:$0xff] }
  0xf8   : > { %7144 = vmatmul.mubr.msk.bf16.gmra.mxu1 %vm1453_vm5, %v7415_v6  ;;  %v6442_v6 = vcombine.low %v3149_v4, %v3159_v48  ;;  %v3221_v4 = vsel %vm7610_vm7, %v3216_v26, %v8694_v36  ;;  %v3240_v48 = vrot.slane %v3239_v11, 4  ;;  %v6470_v23 = vrot.slane %v3604_v60, 9  ;;  %v3608_v60 = vld [vmem:[#allocation2 + $0x54] sm:$0xe] }
  0xf9   : > { %7147 = vmatprep.mubr.msk.bf16.mxu1 %vm1453_vm5, %v7416_v42  ;;  %7216 = vmatpush3.bf16.msra.mxu1 %v7423_v58  ;;  %v548_v33 = vmax.f32 %v494_v21, 0.0  ;;  %v549_v29 = vmax.f32 %v495_v16, 0.0  ;;  %v3231_v58 = vsel %vm7610_vm7, %v3226_v38, %v3230_v17  ;;  %v550_v12 = vmax.f32 %v496_v32, 0.0  ;;  %v3606_v17 = vld [vmem:[#allocation2 + $0x3c] sm:$0xe] }
  0xfa   : > { %7217 = vmatprep.subr.bf16.mxu1 %v7429_v56  ;;  %v3682_v31 = vrot.slane %v8350_v19, 5  ;;  %v3250_v0 = vrot.slane %v3249_v25, 4  ;;  %v3254_v37 = vrot.slane %v3252_v57, 5  ;;  %v8779_v38 = vcombine.low %v3221_v4, %v3231_v58  ;;  %v3607_v57 = vld [vmem:[#allocation2 + $0x48] sm:$0xe] }
  0xfb   : > { %v633_v3 = vsel %vm558_vm4, %v548_v33, 0.0  ;;  %v6757_v42 = vpack.c.bf16 %v549_v29, %v549_v29  ;;  %v635_v36 = vsel %vm563_vm6, %v550_v12, 0.0  ;;  %v3685_v47 = vrot.slane %v8369_v35, 5 }
  0xfc   : > { %v6756_v26 = vpack.c.bf16 %v633_v3, %v633_v3  ;;  %v6758_v7 = vpack.c.bf16 %v635_v36, %v635_v36  ;;  %v8785_v11 = vsel %vm8036_vm10, %v6470_v23, %v3682_v31  ;;  %v6471_v2 = vrot.slane %v3605_v53, 9  ;;  %v7422_v23 = vld [vmem:[#allocation2 + $0x6c] sm:$0xff]  }
  0xfd   : > { %7218 = vmatpush3.bf16.msra.mxu1 %v7429_v56  ;;  %7196 = vmatmul.mubr.msk.bf16.gmra.mxu0 %vm1453_vm5, %v6441_v14  ;;  %924 = vst.msk [vmem:[#allocation2 + $0xc4] sm:$0xf] %vm873_vm0, %v6757_v42  ;;  %v3684_v56 = vrot.slane %v3682_v31, 4  ;;  %v3689_v18 = vrot.slane %v8379_v15, 5  ;;  %v3245_v14 = vsel %vm7610_vm7, %v3240_v48, %v8726_v10  ;;  %v3692_v21 = vrot.slane %v10475_v8, 5  ;;  %v7421_v42 = vld [vmem:[#allocation2 + $0x60] sm:$0xff]  }
  0xfe   : > { %7291 = vmatprep.subr.bf16.mxu1 %v8766_v63  ;;  %7199 = vmatprep.mubr.msk.bf16.mxu0 %vm1453_vm5, %v6442_v6  ;;  %923 = vst.msk [vmem:[#allocation2 + $0xc0] sm:$0xf] %vm873_vm0, %v6756_v26  ;;  %v6472_v16 = vrot.slane %v3606_v17, 9  ;;  %v10476_v6 = vld [vmem:[#allocation6_spill] sm:$0xff]  ;;  %v3255_v35 = vsel %vm7610_vm7, %v3250_v0, %v3254_v37  ;;  %v3699_v58 = vrot.slane %v8419_v5, 5  ;;  %v6473_v12 = vrot.slane %v3607_v57, 9 }
  0xff   : > { %925 = vst.msk [vmem:[#allocation2 + $0xc8] sm:$0x1] %vm876_vm1, %v6758_v7  ;;  %v3696_v25 = vrot.slane %v10476_v6, 5  ;;  %v8803_v15 = vsel %vm8036_vm10, %v3684_v56, %v3685_v47  ;;  %v8807_v10 = vsel %vm8036_vm10, %v6471_v2, %v3689_v18  ;;  %v3691_v32 = vrot.slane %v3689_v18, 4  ;;  %v3609_v0 = vld [vmem:[#allocation2 + $0x60] sm:$0xe] }
 0x100   : > { %7148 = vmatmul.mubr.msk.bf16.gmra.mxu1 %vm1453_vm5, %v7418_v22  ;;  %v6494_v33 = vcombine.low %v8785_v11, %v8803_v15  ;;  %v3703_v22 = vrot.slane %v8427_v51, 5  ;;  %v3706_v3 = vrot.slane %v8478_v34, 5  ;;  %v3710_v5 = vrot.slane %v8432_v41, 5  ;;  %v3610_v47 = vld [vmem:[#allocation2 + $0x6c] sm:$0xe] }
 0x101   : > { %7151 = vmatprep.mubr.msk.bf16.mxu1 %vm1453_vm5, %v7420_v27  ;;  %v8813_v29 = vsel %vm8036_vm10, %v6472_v16, %v3696_v25  ;;  %v3698_v4 = vrot.slane %v3696_v25, 4  ;;  %v8818_v48 = vsel %vm8036_vm10, %v3691_v32, %v3692_v21  ;;  %v6474_v27 = vrot.slane %v3608_v60, 9 }
 0x102   : > { %v8835_v34 = vsel %vm8036_vm10, %v6473_v12, %v3703_v22  ;;  %v3705_v55 = vrot.slane %v3703_v22, 4  ;;  %v3713_v36 = vrot.slane %v8486_v24, 5  ;;  %v6446_v26 = vcombine.low %v3245_v14, %v3255_v35  ;;  %v3611_v12 = vld [vmem:[#allocation2 + $0x78] sm:$0xe] }
 0x103   : > { %v8826_v53 = vsel %vm8036_vm10, %v3698_v4, %v3699_v58  ;;  %v8844_v56 = vsel %vm8036_vm10, %v6474_v27, %v3710_v5  ;;  %v3712_v14 = vrot.slane %v3710_v5, 4  ;;  %v6475_v35 = vrot.slane %v3609_v0, 9  ;;  %v7424_v27 = vld [vmem:[#allocation2 + $0x78] sm:$0xff]  }
 0x104   : > { %v8829_v37 = vld [vmem:[#allocation2 + $0xc4] sm:$0xf]  ;;  %v3717_v58 = vrot.slane %v8462_v61, 5 }
 0x105   : > { %7200 = vmatmul.mubr.msk.bf16.gmra.mxu0 %vm1453_vm5, %v8759_v9  ;;  %v2893_v17 = vld [vmem:[#allocation2 + $0xc0] sm:$0xf]  ;;  %v3266_v41 = vshll.u32 %v8829_v37, 16  ;;  %v3270_v7 = vshrl.u32 %v8829_v37, 16  ;;  %v8852_v9 = vsel %vm8036_vm10, %v3705_v55, %v3706_v3  ;;  %v8861_v57 = vsel %vm8036_vm10, %v3712_v14, %v3713_v36  ;;  %v3613_v14 = vld [vmem:[#allocation2 + $0x90] sm:$0xe] }
 0x106   : > { %7203 = vmatprep.mubr.msk.bf16.mxu0 %vm1453_vm5, %v8761_v30  ;;  %v8848_v2 = vld [vmem:[#allocation2 + $0xc8] sm:$0x1]  ;;  %v3257_v24 = vshrl.u32 %v2893_v17, 16  ;;  %v3260_v18 = vshll.u32 %v2893_v17, 16  ;;  %v3720_v3 = vrot.slane %v8510_v62, 5  ;;  %v8870_v55 = vsel %vm8036_vm10, %v6475_v35, %v3717_v58 }
 0x107   : > { %v3268_v8 = vrot.slane %v3266_v41, 5  ;;  %v3272_v21 = vrot.slane %v3270_v7, 4  ;;  %v3276_v16 = vshll.u32 %v8848_v2, 16  ;;  %v3719_v0 = vrot.slane %v3717_v58, 4  ;;  %v3612_v17 = vld [vmem:[#allocation2 + $0x84] sm:$0xe] }
 0x108   : > { %7152 = vmatmul.mubr.msk.bf16.gmra.mxu1 %vm1453_vm5, %v7421_v42  ;;  %v3259_v30 = vrot.slane %v3257_v24, 4  ;;  %v3262_v25 = vrot.slane %v3260_v18, 5  ;;  %v6476_v42 = vrot.slane %v3610_v47, 9  ;;  %v3727_v36 = vrot.slane %v8524_v50, 5  ;;  %v7426_v41 = vld [vmem:[#allocation2 + $0x84] sm:$0xff]  }
 0x109   : > { %7155 = vmatprep.mubr.msk.bf16.mxu1 %vm1453_vm5, %v7422_v23  ;;  %v3273_v32 = vor.u32 %v3272_v21, %v3268_v8  ;;  %v3278_v60 = vrot.slane %v3276_v16, 5  ;;  %v3724_v23 = vrot.slane %v8503_v28, 5  ;;  %v6477_v47 = vrot.slane %v3611_v12, 9 }
 0x10a   : > { %v3263_v22 = vor.u32 %v3262_v25, %v3259_v30  ;;  %v8883_v24 = vsel %vm8036_vm10, %v3719_v0, %v3720_v3  ;;  %v3731_v50 = vrot.slane %v8533_v1, 5  ;;  %v3734_v18 = vrot.slane %v8552_v43, 5  ;;  %v3614_v25 = vld [vmem:[#allocation2 + $0x9c] sm:$0xe]  ;;  %v3616_v0 = vld [vmem:[#allocation2 + $0xb4] sm:$0xe] }
 0x10b   : > { %v3274_v5 = vrot.slane %v3273_v32, 4  ;;  %v8875_v61 = vsel %vm8036_vm10, %v6476_v42, %v3724_v23  ;;  %v3726_v62 = vrot.slane %v3724_v23, 4  ;;  %v6478_v30 = vrot.slane %v3612_v17, 9  ;;  %v3615_v23 = vld [vmem:[#allocation2 + $0xa8] sm:$0xe] }
 0x10c   : > { %v3264_v7 = vrot.slane %v3263_v22, 4  ;;  %v3738_v35 = vrot.slane %v8557_v49, 5  ;;  %v3741_v32 = vrot.slane %v8608_v59, 5  ;;  %v3745_v58 = vrot.slane %v8589_v20, 5 }
 0x10d   : > { %7204 = vmatmul.mubr.msk.bf16.gmra.mxu0 %vm1453_vm5, %v8779_v38  ;;  %v3279_v28 = vsel %vm7610_vm7, %v3274_v5, %v3278_v60  ;;  %v8894_v16 = vsel %vm8036_vm10, %v3726_v62, %v3727_v36  ;;  %v6479_v60 = vrot.slane %v3613_v14, 9  ;;  %v3748_v22 = vrot.slane %v8631_v39, 5  ;;  %v7427_v36 = vld [vmem:[#allocation2 + $0x90] sm:$0xff]  }
 0x10e   : > { %7207 = vmatprep.mubr.msk.bf16.mxu0 %vm1453_vm5, %v6446_v26  ;;  %v3269_v21 = vsel %vm7610_vm7, %v3264_v7, %v3268_v8  ;;  %v8901_v26 = vsel %vm8036_vm10, %v6477_v47, %v3731_v50  ;;  %v3733_v8 = vrot.slane %v3731_v50, 4  ;;  %v6480_v3 = vrot.slane %v3614_v25, 9  ;;  %v7428_v7 = vld [vmem:[#allocation2 + $0x9c] sm:$0xff]  }
 0x10f   : > { %v6447_v1 = vcombine.low %v3269_v21, %v3279_v28  ;;  %v3752_v42 = vrot.slane %v8620_v45, 5  ;;  %v8917_v49 = vsel %vm8036_vm10, %v6478_v30, %v3738_v35  ;;  %v3740_v59 = vrot.slane %v3738_v35, 4 }
 0x110   : > { %7156 = vmatmul.mubr.msk.bf16.gmra.mxu1 %vm1453_vm5, %v7424_v27  ;;  %v8909_v12 = vsel %vm8036_vm10, %v3733_v8, %v3734_v18  ;;  %v7434_v27 = vld [vmem:[#allocation2 + $0x18] sm:$0xff]   ;;  %v8921_v20 = vsel %vm8036_vm10, %v6479_v60, %v3745_v58  ;;  %v3747_v39 = vrot.slane %v3745_v58, 4  ;;  %v6481_v47 = vrot.slane %v3615_v23, 9  ;;  %v3617_v18 = vld [vmem:[#allocation2 + $0xc0] sm:$0xe]  ;;  %v7435_v23 = vld [vmem:[#allocation2 + $0x24] sm:$0xff]  }
 0x111   : > { %7159 = vmatprep.mubr.msk.bf16.mxu1 %vm1453_vm5, %v7426_v41  ;;  %v8925_v45 = vsel %vm8036_vm10, %v6480_v3, %v3752_v42  ;;  %v3754_v17 = vrot.slane %v3752_v42, 4  ;;  %v3755_v41 = vrot.slane %v8659_v54, 5  ;;  %v8930_v62 = vsel %vm8036_vm10, %v3740_v59, %v3741_v32  ;;  %v7486_v3 = vld [vmem:[#allocation2 + $0x10] sm:$0xf] }
 0x112   : > { %v3759_v28 = vrot.slane %v8648_v13, 5  ;;  %v3762_v50 = vrot.slane %v8692_v46, 5  ;;  %v8939_v21 = vsel %vm8036_vm10, %v3747_v39, %v3748_v22  ;;  %v6482_v30 = vrot.slane %v3616_v0, 9  ;;  %v7438_v59 = vld [vmem:[#allocation2 + $0x30] sm:$0xff]   ;;  %v7430_v39 = vld [vmem:[#allocation2 + $0xa8] sm:$0xff]  }
 0x113   : > { %v8943_v54 = vsel %vm8036_vm10, %v3754_v17, %v3755_v41  ;;  %v3766_v8 = vrot.slane %v8686_v52, 5  ;;  %v3769_v35 = vrot.slane %v8735_v44, 5  ;;  %v6483_v32 = vrot.slane %v3617_v18, 9  ;;  %v7432_v41 = vld [vmem:[#allocation2 + $0xb4] sm:$0xff]   ;;  %v4493_v13 = vld [vmem:[#allocation2 + $0x30] sm:$0xf] }
 0x114   : > { %v8952_v25 = vsel %vm8036_vm10, %v6481_v47, %v3759_v28  ;;  %v3773_v60 = vrot.slane %v8829_v37, 5  ;;  %v3776_v22 = vrot.slane %v8848_v2, 5  ;;  %v3668_v42 = vrot.slane %v7486_v3, 5  ;;  %v3602_v37 = vld [vmem:[#allocation2 + $0xc] sm:$0xe]  ;;  %v7443_v2 = vld [vmem:[%s10431_s1 + $0x110] sm:$0xff]  }
 0x115   : > { %7208 = vmatmul.mubr.msk.bf16.gmra.mxu0 %vm1453_vm5, %v6447_v1  ;;  %v3761_v1 = vrot.slane %v3759_v28, 4  ;;  %v8968_v52 = vsel %vm8036_vm10, %v6482_v30, %v3766_v8  ;;  %v3768_v44 = vrot.slane %v3766_v8, 4  ;;  %v6468_v28 = vrot.slane %v3602_v37, 9  ;;  %v7487_v18 = vld [vmem:[#allocation2 + $0x14] sm:$0x1]  ;;  %v10477_v8 = vld [vmem:[#allocation7_spill] sm:$0xff] }
 0x116   : > { %7259 = vmatprep.mubr.msk.bf16.mxu0 %vm1453_vm5, %v7434_v27  ;;  %v8972_v0 = vsel %vm8036_vm10, %v6483_v32, %v3773_v60  ;;  %v3671_v30 = vrot.slane %v7487_v18, 5  ;;  %v7488_v32 = vld [vmem:[#allocation2 + $0x1c] sm:$0xf]  ;;  %v7440_v37 = vld [vmem:[#allocation2 + $0x48] sm:$0xff]   ;;  %v4584_v51 = vshrl.u32 %v4493_v13, 16  ;;  %v4587_v31 = vshll.u32 %v4493_v13, 16 }
 0x117   : > { %v8961_v58 = vsel %vm8036_vm10, %v3761_v1, %v3762_v50  ;;  %v8979_v17 = vsel %vm8036_vm10, %v3768_v44, %v3769_v35  ;;  %v3670_v50 = vrot.slane %v3668_v42, 4  ;;  %v7449_v35 = vld [vmem:[%s10431_s1 + $0x108] sm:$0xff]   ;;  %v7439_v44 = vld [vmem:[#allocation2 + $0x3c] sm:$0xff]  }
 0x118   : > { %7160 = vmatmul.mubr.msk.bf16.gmra.mxu1 %vm1453_vm5, %v7427_v36  ;;  %v3775_v36 = vrot.slane %v3773_v60, 4  ;;  %v3675_v60 = vrot.slane %v7488_v32, 5 }
 0x119   : > { %7163 = vmatprep.mubr.msk.bf16.mxu1 %vm1453_vm5, %v7428_v7  ;;  %v3672_v3 = vsel %vm8036_vm10, %v3670_v50, %v3671_v30  ;;  %v7441_v50 = vld [vmem:[#allocation2 + $0x54] sm:$0xff]  }
 0x11a   : > { %v8985_v47 = vsel %vm8036_vm10, %v3775_v36, %v3776_v22  ;;  %v3669_v22 = vsel %vm8036_vm10, %v6468_v28, %v3668_v42  ;;  %v7455_v36 = vld [vmem:[%s10431_s1 + $0x100] sm:$0xff]   ;;  %v3677_v18 = vrot.slane %v3675_v60, 4  ;;  %v9005_v42 = vpop.f32.mrf.mxu0 }
 0x11c   : > { %v9014_v30 = vpop.f32.mrf.mxu0 }
 0x11d   : > { %7260 = vmatmul.mubr.msk.bf16.vlgmr.msra.gmra.mxu0 %vm1453_vm5, %v7435_v23  ;;  %v3603_v23 = vld [vmem:[#allocation2 + $0x18] sm:$0xe]  ;;  %10478 = vst [vmem:[#allocation3_spill] sm:$0xff] %v9014_v30  ;;  %v9085_v30 = vld [vmem:[#allocation2 + $0x40] sm:$0xf] }
 0x11e   : > { %7332 = vmatpush3.bf16.msra.mxu0 %v10477_v8  ;;  %7263 = vmatprep.mubr.msk.bf16.mxu0 %vm1453_vm5, %v7438_v59  ;;  %v7433_v59 = vld [vmem:[#allocation2 + $0xc0] sm:$0xff]  }
 0x11f   : > { %7333 = vmatprep.subr.bf16.mxu0 %v7443_v2  ;;  %v7489_v8 = vld [vmem:[#allocation2 + $0x20] sm:$0x1] }
 0x120   : > { %7164 = vmatmul.mubr.msk.bf16.gmra.mxu1 %vm1453_vm5, %v7430_v39  ;;  %v6492_v39 = vcombine.low %v3669_v22, %v3672_v3  ;;  %v3678_v32 = vrot.slane %v7489_v8, 5  ;;  %v7444_v22 = vld [vmem:[#allocation2 + $0x60] sm:$0xff]   ;;  %v4487_v3 = vld [vmem:[#allocation2 + $0x18] sm:$0xf] }
 0x121   : > { %7167 = vmatprep.mubr.msk.bf16.mxu1 %vm1453_vm5, %v7432_v41  ;;  %v6469_v41 = vrot.slane %v3603_v23, 9 }
 0x122   : > { %7334 = vmatpush3.bf16.msra.mxu0 %v7443_v2  ;;  %v3679_v28 = vsel %vm8036_vm10, %v3677_v18, %v3678_v32  ;;  %v5241_v18 = vld [vmem:[#allocation2 + $0x18] sm:$0xe] }
 0x123   : > { %7335 = vmatprep.subr.bf16.mxu0 %v7449_v35  ;;  %v3676_v2 = vsel %vm8036_vm10, %v6469_v41, %v3675_v60  ;;  %v7442_v60 = vld [vmem:[%s10431_s1 + $0xf0] sm:$0xff]   ;;  %v4539_v41 = vshll.u32 %v4487_v3, 16 }
 0x124   : > { %v6493_v23 = vcombine.low %v3676_v2, %v3679_v28  ;;  %v4489_v2 = vld [vmem:[#allocation2 + $0x20] sm:$0x1] }
 0x125   : > { %7264 = vmatmul.mubr.msk.bf16.gmra.mxu0 %vm1453_vm5, %v7439_v44  ;;  %v4488_v44 = vld [vmem:[#allocation2 + $0x1c] sm:$0xf]  ;;  %v4541_v46 = vrot.slane %v4539_v41, 5  ;;  %v5310_v5 = vrot.slane %v4489_v2, 5 }
 0x126   : > { %7267 = vmatprep.mubr.msk.bf16.mxu0 %vm1453_vm5, %v7440_v37  ;;  %7336 = vmatpush3.bf16.msra.mxu0 %v7449_v35  ;;  %v9016_v35 = vld [vmem:[#allocation2 + $0x28] sm:$0xf]  ;;  %v4490_v37 = vld [vmem:[#allocation2 + $0x24] sm:$0xf]  ;;  %v4545_v8 = vshll.u32 %v4488_v44, 16  ;;  %v4549_v32 = vshrl.u32 %v4488_v44, 16 }
 0x127   : > { %7337 = vmatprep.subr.bf16.mxu0 %v7455_v36  ;;  %v4560_v28 = vshrl.u32 %v4490_v37, 16  ;;  %v4563_v1 = vshll.u32 %v4490_v37, 16  ;;  %v4573_v7 = vshrl.u32 %v9016_v35, 16  ;;  %v6616_v37 = vrot.slane %v5241_v18, 9 }
 0x128   : > { %7168 = vmatmul.mubr.msk.bf16.gmra.mxu1 %vm1453_vm5, %v7433_v59  ;;  %v9022_v59 = vpop.f32.mrf.mxu0  ;;  %v9040_v11 = vrot.slane %v4545_v8, 5  ;;  %v4551_v15 = vrot.slane %v4549_v32, 4  ;;  %v7454_v8 = vld [vmem:[%s10431_s1 + $0xe0] sm:$0xff]   ;;  %v4555_v32 = vshll.u32 %v4489_v2, 16 }
 0x129   : > { %7219 = vmatprep.mubr.msk.bf16.mxu1 %vm1453_vm5, %v6492_v39  ;;  %10479 = vst [vmem:[#allocation4_spill] sm:$0xff] %v9022_v59  ;;  %v4536_v39 = vshrl.u32 %v4487_v3, 16  ;;  %v9033_v3 = vld [vmem:[#allocation2 + $0x34] sm:$0xf]  ;;  %v4562_v43 = vrot.slane %v4560_v28, 4  ;;  %v4565_v38 = vrot.slane %v4563_v1, 5 }
 0x12a   : > { %7338 = vmatpush3.bf16.msra.mxu0 %v7455_v36  ;;  %v5307_v36 = vrot.slane %v4488_v44, 5  ;;  %v9038_v44 = vpop.f32.mrf.mxu0  ;;  %v4575_v6 = vrot.slane %v4573_v7, 4  ;;  %v4597_v41 = vshrl.u32 %v9033_v3, 16  ;;  %v4552_v7 = vor.u32 %v4551_v15, %v9040_v11 }
 0x12b   : > { %10480 = vst [vmem:[#allocation5_spill] sm:$0xff] %v9038_v44  ;;  %v4538_v27 = vrot.slane %v4536_v39, 4  ;;  %v4593_v39 = vshll.u32 %v9033_v3, 16  ;;  %v5314_v28 = vrot.slane %v9016_v35, 5  ;;  %v4589_v15 = vrot.slane %v4587_v31, 5 }
 0x12c   : > { %v5309_v14 = vrot.slane %v5307_v36, 4  ;;  %v9049_v18 = vpop.f32.mrf.mxu0  ;;  %v9057_v13 = vsel %vm8036_vm10, %v6616_v37, %v5307_v36  ;;  %v4566_v36 = vor.u32 %v4565_v38, %v4562_v43  ;;  %v5243_v37 = vld [vmem:[#allocation2 + $0x30] sm:$0xe]  ;;  %v4557_v43 = vrot.slane %v4555_v32, 5  ;;  %v4496_v44 = vld [vmem:[#allocation2 + $0x3c] sm:$0xf] }
 0x12d   : > { %7268 = vmatmul.mubr.msk.bf16.gmra.mxu0 %vm1453_vm5, %v7441_v50  ;;  %v4569_v50 = vshll.u32 %v9016_v35, 16  ;;  %10481 = vst [vmem:[#allocation6_spill] sm:$0xff] %v9049_v18  ;;  %v4542_v1 = vor.u32 %v4541_v46, %v4538_v27  ;;  %v9066_v46 = vpop.f32.mrf.mxu1  ;;  %v10484_v35 = vcombine.low %v8813_v29, %v8826_v53  ;;  %v4553_v29 = vrot.slane %v4552_v7, 4 }
 0x12e   : > { %7271 = vmatprep.mubr.msk.bf16.mxu0 %vm1453_vm5, %v7444_v22  ;;  %v7445_v22 = vld [vmem:[#allocation2 + $0x6c] sm:$0xff]   ;;  %10483 = vst [vmem:[#allocation7_spill] sm:$0xff] %v9066_v46  ;;  %v9070_v27 = vsel %vm8036_vm10, %v5309_v14, %v5310_v5  ;;  %v4599_v46 = vrot.slane %v4597_v41, 4  ;;  %v7447_v5 = vld [vmem:[#allocation2 + $0x84] sm:$0xff]   ;;  %v9080_v38 = vpop.f32.mrf.mxu0  ;;  %v5316_v53 = vrot.slane %v5314_v28, 4  ;;  %v4567_v31 = vrot.slane %v4566_v36, 4 }
 0x12f   : > { %v9044_v4 = vrot.slane %v4569_v50, 5  ;;  %v7450_v14 = vld [vmem:[#allocation2 + $0x90] sm:$0xff]  }
 0x130   : > { %7220 = vmatmul.mubr.msk.bf16.vlgmr.msra.gmra.mxu1 %vm1453_vm5, %v6493_v23  ;;  %v7448_v23 = vld [vmem:[%s10431_s1 + $0xe8] sm:$0xff]  }
 0x131   : > { %7292 = vmatpush3.bf16.msra.mxu1 %v8766_v63  ;;  %7223 = vmatprep.mubr.msk.bf16.mxu1 %vm1453_vm5, %v6494_v33  ;;  %v7446_v63 = vld [vmem:[#allocation2 + $0x78] sm:$0xff]   ;;  %v9042_v33 = vld [vmem:[#allocation2 + $0x2c] sm:$0x1]  ;;  %v4576_v2 = vor.u32 %v4575_v6, %v9044_v4  ;;  %v4543_v6 = vrot.slane %v4542_v1, 4 }
 0x132   : > { %7293 = vmatprep.subr.bf16.mxu1 %v7442_v60  ;;  %v4579_v50 = vshll.u32 %v9042_v33, 16  ;;  %v5317_v18 = vrot.slane %v9042_v33, 5 }
 0x135   : > { %7294 = vmatpush3.bf16.msra.mxu1 %v7442_v60  ;;  %7272 = vmatmul.mubr.msk.bf16.gmra.mxu0 %vm1453_vm5, %v7445_v22  ;;  %v5242_v60 = vld [vmem:[#allocation2 + $0x24] sm:$0xe]  ;;  %v10482_v22 = vcombine.low %v8807_v10, %v8818_v48  ;;  %v4495_v10 = vld [vmem:[#allocation2 + $0x38] sm:$0x1]  ;;  %v4586_v48 = vrot.slane %v4584_v51, 4  ;;  %v9083_v51 = vpop.f32.mrf.mxu1 }
 0x136   : > { %7295 = vmatprep.subr.bf16.mxu1 %v7448_v23  ;;  %7275 = vmatprep.mubr.msk.bf16.mxu0 %vm1453_vm5, %v7446_v63  ;;  %v5321_v63 = vrot.slane %v9033_v3, 5  ;;  %v6617_v3 = vrot.slane %v5242_v60, 9  ;;  %10485 = vst [vmem:[#allocation8_spill] sm:$0xff] %v9083_v51  ;;  %v5324_v59 = vrot.slane %v4495_v10, 5  ;;  %v4603_v7 = vshll.u32 %v4495_v10, 16  ;;  %v9091_v60 = vpop.f32.mrf.mxu0 }
 0x137   : > { %v4590_v32 = vor.u32 %v4589_v15, %v4586_v48  ;;  %10486 = vst [vmem:[#allocation9_spill] sm:$0xff] %v9091_v60  ;;  %v4617_v10 = vshll.u32 %v9085_v30, 16  ;;  %v4621_v48 = vshrl.u32 %v9085_v30, 16 }
 0x138   : > { %7224 = vmatmul.mubr.msk.bf16.gmra.mxu1 %vm1453_vm5, %v10482_v22  ;;  %v9078_v22 = vrot.slane %v4593_v39, 5  ;;  %v4577_v39 = vrot.slane %v4576_v2, 4  ;;  %v5323_v41 = vrot.slane %v5321_v63, 4  ;;  %v9098_v36 = vsel %vm8036_vm10, %v6617_v3, %v5314_v28  ;;  %v9113_v28 = vpop.f32.mrf.mxu1 }
 0x139   : > { %7227 = vmatprep.mubr.msk.bf16.mxu1 %vm1453_vm5, %v10484_v35  ;;  %7296 = vmatpush3.bf16.msra.mxu1 %v7448_v23  ;;  %v4581_v35 = vrot.slane %v4579_v50, 5  ;;  %v6618_v23 = vrot.slane %v5243_v37, 9  ;;  %v4548_v50 = vsel %vm7610_vm7, %v4543_v6, %v9040_v11  ;;  %v4611_v2 = vshll.u32 %v4496_v44, 16  ;;  %10488 = vst [vmem:[#allocation10_spill] sm:$0xff] %v9113_v28 }
 0x13a   : > { %7297 = vmatprep.subr.bf16.mxu1 %v7454_v8  ;;  %v4600_v33 = vor.u32 %v4599_v46, %v9078_v22  ;;  %v4558_v46 = vsel %vm7610_vm7, %v4553_v29, %v4557_v43  ;;  %v9105_v37 = vsel %vm8036_vm10, %v5316_v53, %v5317_v18  ;;  %v10487_v11 = vcombine.low %v8835_v34, %v8852_v9  ;;  %v4498_v34 = vld [vmem:[#allocation2 + $0x44] sm:$0x1]  ;;  %v5244_v9 = vld [vmem:[#allocation2 + $0x3c] sm:$0xe]  ;;  %v4499_v29 = vld [vmem:[#allocation2 + $0x48] sm:$0xf] }
 0x13b   : > { %v4582_v15 = vsel %vm7610_vm7, %v4577_v39, %v4581_v35  ;;  %v9122_v18 = vsel %vm8036_vm10, %v6618_v23, %v5321_v63  ;;  %v4591_v6 = vrot.slane %v4590_v32, 4  ;;  %v4605_v43 = vrot.slane %v4603_v7, 5  ;;  %v7451_v53 = vld [vmem:[#allocation2 + $0x9c] sm:$0xff]   ;;  %v9133_v63 = vpop.f32.mrf.mxu0  ;;  %v4500_v39 = vld [vmem:[#allocation2 + $0x4c] sm:$0xf]  ;;  %v9143_v7 = vpop.f32.mrf.mxu1 }
 0x13c   : > { %v5328_v3 = vrot.slane %v9085_v30, 5  ;;  %10490 = vst [vmem:[#allocation11_spill] sm:$0xff] %v9133_v63  ;;  %v9135_v35 = vcombine.low %v4548_v50, %v4558_v46  ;;  %v9141_v32 = vrot.slane %v4617_v10, 5  ;;  %v4623_v30 = vrot.slane %v4621_v48, 4  ;;  %10491 = vst [vmem:[#allocation12_spill] sm:$0xff] %v9143_v7 }
 0x13d   : > { %7298 = vmatpush3.bf16.msra.mxu1 %v7454_v8  ;;  %7276 = vmatmul.mubr.msk.bf16.gmra.mxu0 %vm1453_vm5, %v7447_v5  ;;  %v4608_v8 = vshrl.u32 %v4496_v44, 16  ;;  %v4572_v44 = vsel %vm7610_vm7, %v4567_v31, %v9044_v4  ;;  %v9126_v5 = vsel %vm8036_vm10, %v5323_v41, %v5324_v59  ;;  %v4601_v4 = vrot.slane %v4600_v33, 4  ;;  %v5245_v33 = vld [vmem:[#allocation2 + $0x48] sm:$0xe]  ;;  %v4502_v59 = vld [vmem:[#allocation2 + $0x54] sm:$0xf]  ;;  %v9155_v48 = vpop.f32.mrf.mxu0 }
 0x13e   : > { %7279 = vmatprep.mubr.msk.bf16.mxu0 %vm1453_vm5, %v7450_v14  ;;  %v10489_v14 = vcombine.low %v8844_v56, %v8861_v57  ;;  %v4613_v31 = vrot.slane %v4611_v2, 5  ;;  %v7452_v56 = vld [vmem:[#allocation2 + $0xa8] sm:$0xff]   ;;  %v6619_v41 = vrot.slane %v5244_v9, 9  ;;  %v5331_v50 = vrot.slane %v4498_v34, 5  ;;  %v9152_v57 = vld [vmem:[#allocation2 + $0x58] sm:$0xf] }
 0x13f   : > { %v4610_v23 = vrot.slane %v4608_v8, 4  ;;  %v4632_v46 = vshrl.u32 %v4499_v29, 16  ;;  %v4596_v8 = vsel %vm7610_vm7, %v4591_v6, %v9078_v22  ;;  %v4606_v2 = vsel %vm7610_vm7, %v4601_v4, %v4605_v43  ;;  %10492 = vst [vmem:[#allocation13_spill] sm:$0xff] %v9155_v48  ;;  %v9159_v22 = vld [vmem:[#allocation2 + $0x50] sm:$0x1] }
 0x140   : > { %7228 = vmatmul.mubr.msk.bf16.gmra.mxu1 %vm1453_vm5, %v10487_v11  ;;  %v9145_v11 = vcombine.low %v4572_v44, %v4582_v15  ;;  %v5330_v9 = vrot.slane %v5328_v3, 4  ;;  %v4627_v10 = vshll.u32 %v4498_v34, 16  ;;  %v6620_v15 = vrot.slane %v5245_v33, 9 }
 0x141   : > { %7231 = vmatprep.mubr.msk.bf16.mxu1 %vm1453_vm5, %v10489_v14  ;;  %v4635_v14 = vshll.u32 %v4499_v29, 16  ;;  %v4614_v44 = vor.u32 %v4613_v31, %v4610_v23  ;;  %v4641_v1 = vshll.u32 %v4500_v39, 16  ;;  %v4645_v29 = vshrl.u32 %v4500_v39, 16 }
 0x142   : > { %v4624_v7 = vor.u32 %v4623_v30, %v9141_v32  ;;  %v5335_v6 = vrot.slane %v4500_v39, 5  ;;  %v4656_v4 = vshrl.u32 %v4502_v59, 16  ;;  %v4659_v43 = vshll.u32 %v4502_v59, 16  ;;  %v7453_v39 = vld [vmem:[#allocation2 + $0xb4] sm:$0xff]  }
 0x143   : > { %v10493_v34 = vcombine.low %v8870_v55, %v8883_v24  ;;  %v4634_v23 = vrot.slane %v4632_v46, 4  ;;  %v4637_v31 = vrot.slane %v4635_v14, 5  ;;  %v4665_v33 = vshll.u32 %v9152_v57, 16  ;;  %v9185_v14 = vld [vmem:[#allocation2 + $0x64] sm:$0xf] }
 0x144   : > { %v10495_v30 = vcombine.low %v8875_v61, %v8894_v16  ;;  %v9173_v59 = vcombine.low %v4596_v8, %v4606_v2  ;;  %v9177_v55 = vsel %vm8036_vm10, %v6619_v41, %v5328_v3  ;;  %v9181_v24 = vsel %vm8036_vm10, %v5330_v9, %v5331_v50  ;;  %v7456_v3 = vld [vmem:[#allocation2 + $0xc0] sm:$0xff]   ;;  %v9198_v9 = vld [vmem:[#allocation2 + $0x5c] sm:$0x1] }
 0x145   : > { %7280 = vmatmul.mubr.msk.bf16.gmra.mxu0 %vm1453_vm5, %v7451_v53  ;;  %v9165_v53 = vpop.f32.mrf.mxu1  ;;  %v9183_v46 = vrot.slane %v4627_v10, 5  ;;  %v9189_v61 = vrot.slane %v4614_v44, 4  ;;  %v5338_v16 = vrot.slane %v9159_v22, 5  ;;  %v9192_v8 = vrot.slane %v4641_v1, 5 }
 0x146   : > { %7283 = vmatprep.mubr.msk.bf16.mxu0 %vm1453_vm5, %v7452_v56  ;;  %10494 = vst [vmem:[#allocation14_spill] sm:$0xff] %v9165_v53  ;;  %v4669_v56 = vshrl.u32 %v9152_v57, 16  ;;  %v4647_v2 = vrot.slane %v4645_v29, 4  ;;  %v9196_v41 = vsel %vm8036_vm10, %v6620_v15, %v5335_v6  ;;  %v5337_v50 = vrot.slane %v5335_v6, 4 }
 0x147   : > { %v4658_v10 = vrot.slane %v4656_v4, 4  ;;  %v4661_v53 = vrot.slane %v4659_v43, 5  ;;  %v9200_v28 = vpop.f32.mrf.mxu1  ;;  %v9202_v44 = vrot.slane %v4624_v7, 4  ;;  %v4638_v51 = vor.u32 %v4637_v31, %v4634_v23 }
 0x148   : > { %7232 = vmatmul.mubr.msk.bf16.gmra.mxu1 %vm1453_vm5, %v10493_v34  ;;  %v9187_v34 = vpop.f32.mrf.mxu0  ;;  %10497 = vst [vmem:[#allocation16_spill] sm:$0xff] %v9200_v28  ;;  %v9204_v1 = vrot.slane %v4665_v33, 5  ;;  %v4671_v29 = vrot.slane %v4669_v56, 4  ;;  %v4689_v60 = vshll.u32 %v9185_v14, 16  ;;  %v4693_v15 = vshrl.u32 %v9185_v14, 16 }
 0x149   : > { %7235 = vmatprep.mubr.msk.bf16.mxu1 %vm1453_vm5, %v10495_v30  ;;  %10496 = vst [vmem:[#allocation15_spill] sm:$0xff] %v9187_v34  ;;  %v4505_v30 = vld [vmem:[#allocation2 + $0x60] sm:$0xf]  ;;  %v5246_v34 = vld [vmem:[#allocation2 + $0x54] sm:$0xe]  ;;  %v4648_v4 = vor.u32 %v4647_v2, %v9192_v8  ;;  %v4651_v43 = vshll.u32 %v9159_v22, 16  ;;  %v9221_v31 = vsel %vm8036_vm10, %v5337_v50, %v5338_v16  ;;  %v4662_v56 = vor.u32 %v4661_v53, %v4658_v10  ;;  %v9228_v2 = vpop.f32.mrf.mxu1 }
 0x14a   : > { %v4680_v48 = vshrl.u32 %v4505_v30, 16  ;;  %v4683_v63 = vshll.u32 %v4505_v30, 16  ;;  %v9209_v6 = vpop.f32.mrf.mxu0  ;;  %v5342_v23 = vrot.slane %v9152_v57, 5  ;;  %v6621_v33 = vrot.slane %v5246_v34, 9  ;;  %10500 = vst [vmem:[#allocation18_spill] sm:$0xff] %v9228_v2 }
 0x14b   : > { %10498 = vst [vmem:[#allocation17_spill] sm:$0xff] %v9209_v6  ;;  %v10499_v30 = vcombine.low %v8901_v26, %v8909_v12  ;;  %v4630_v57 = vsel %vm7610_vm7, %v9202_v44, %v9183_v46  ;;  %v9234_v22 = vrot.slane %v4638_v51, 4  ;;  %v4672_v16 = vor.u32 %v4671_v29, %v9204_v1  ;;  %v5247_v34 = vld [vmem:[#allocation2 + $0x60] sm:$0xe]  ;;  %v4507_v26 = vld [vmem:[#allocation2 + $0x68] sm:$0x1] }
 0x14c   : > { %v5349_v53 = vrot.slane %v9185_v14, 5  ;;  %v4682_v12 = vrot.slane %v4680_v48, 4  ;;  %v4685_v50 = vrot.slane %v4683_v63, 5  ;;  %v9242_v10 = vrot.slane %v4689_v60, 5  ;;  %v9244_v7 = vpop.f32.mrf.mxu0  ;;  %v7457_v51 = vld [vmem:[#allocation2 + $0xcc] sm:$0xff]   ;;  %v9251_v63 = vpop.f32.mrf.mxu1 }
 0x14d   : > { %7284 = vmatmul.mubr.msk.bf16.gmra.mxu0 %vm1453_vm5, %v7453_v39  ;;  %v4675_v39 = vshll.u32 %v9198_v9, 16  ;;  %10502 = vst [vmem:[#allocation19_spill] sm:$0xff] %v9244_v7  ;;  %v4649_v46 = vrot.slane %v4648_v4, 4  ;;  %v4653_v44 = vrot.slane %v4651_v43, 5  ;;  %v5344_v29 = vrot.slane %v5342_v23, 4  ;;  %10503 = vst [vmem:[#allocation20_spill] sm:$0xff] %v9251_v63 }
 0x14e   : > { %7287 = vmatprep.mubr.msk.bf16.mxu0 %vm1453_vm5, %v7456_v3  ;;  %v10501_v3 = vcombine.low %v8917_v49, %v8930_v62  ;;  %v5345_v2 = vrot.slane %v9198_v9, 5  ;;  %v9249_v14 = vsel %vm8036_vm10, %v6621_v33, %v5342_v23  ;;  %v4663_v49 = vrot.slane %v4662_v56, 4  ;;  %v4508_v48 = vld [vmem:[#allocation2 + $0x6c] sm:$0xf]  ;;  %v4509_v6 = vld [vmem:[#allocation2 + $0x70] sm:$0xf] }
 0x14f   : > { %v4677_v62 = vrot.slane %v4675_v39, 5  ;;  %v4673_v60 = vrot.slane %v4672_v16, 4  ;;  %v5352_v28 = vrot.slane %v4507_v26, 5  ;;  %v4699_v7 = vshll.u32 %v4507_v26, 16  ;;  %v5248_v23 = vld [vmem:[#allocation2 + $0x6c] sm:$0xe] }
 0x150   : > { %7236 = vmatmul.mubr.msk.bf16.gmra.mxu1 %vm1453_vm5, %v10499_v30  ;;  %v4695_v30 = vrot.slane %v4693_v15, 4  ;;  %v5351_v15 = vrot.slane %v5349_v53, 4  ;;  %v4644_v9 = vsel %vm7610_vm7, %v9234_v22, %v9192_v8  ;;  %v4686_v4 = vor.u32 %v4685_v50, %v4682_v12 }
 0x151   : > { %7239 = vmatprep.mubr.msk.bf16.mxu1 %vm1453_vm5, %v10501_v3  ;;  %v6622_v3 = vrot.slane %v5247_v34, 9  ;;  %v5356_v33 = vrot.slane %v4509_v6, 5  ;;  %v4654_v39 = vsel %vm7610_vm7, %v4649_v46, %v4653_v44  ;;  %v9265_v16 = vsel %vm8036_vm10, %v5344_v29, %v5345_v2  ;;  %v9267_v34 = vld [vmem:[#allocation2 + $0x74] sm:$0x1]  ;;  %v9284_v46 = vpop.f32.mrf.mxu1 }
 0x152   : > { %v4696_v43 = vor.u32 %v4695_v30, %v9242_v10  ;;  %v4704_v26 = vshrl.u32 %v4508_v48, 16  ;;  %v4707_v8 = vshll.u32 %v4508_v48, 16  ;;  %v10505_v22 = vcombine.low %v9057_v13, %v9070_v27  ;;  %10507 = vst [vmem:[#allocation22_spill] sm:$0xff] %v9284_v46 }
 0x153   : > { %v4668_v12 = vsel %vm7610_vm7, %v4663_v49, %v9204_v1  ;;  %v9278_v50 = vsel %vm8036_vm10, %v6622_v3, %v5349_v53  ;;  %v4713_v30 = vshll.u32 %v4509_v6, 16  ;;  %v4717_v2 = vshrl.u32 %v4509_v6, 16 }
 0x154   : > { %v4678_v27 = vsel %vm7610_vm7, %v4673_v60, %v4677_v62  ;;  %v9292_v1 = vsel %vm8036_vm10, %v5351_v15, %v5352_v28  ;;  %v4701_v53 = vrot.slane %v4699_v7, 5  ;;  %v6623_v44 = vrot.slane %v5248_v23, 9  ;;  %v9316_v23 = vpop.f32.mrf.mxu1 }
 0x155   : > { %v9258_v56 = vpop.f32.mrf.mxu0  ;;  %7288 = vmatmul.mubr.msk.bf16.gmra.mxu0 %vm1453_vm5, %v7457_v51  ;;  %v10506_v51 = vcombine.low %v8921_v20, %v8939_v21  ;;  %v10509_v6 = vcombine.low %v8925_v45, %v8943_v54  ;;  %v4687_v20 = vrot.slane %v4686_v4, 4  ;;  %v4697_v21 = vrot.slane %v4696_v43, 4  ;;  %v4511_v43 = vld [vmem:[#allocation2 + $0x78] sm:$0xf]  ;;  %10512 = vst [vmem:[#allocation25_spill] sm:$0xff] %v9316_v23 }
 0x156   : > { %10504 = vst [vmem:[#allocation21_spill] sm:$0xff] %v9258_v56  ;;  %7339 = vmatprep.mubr.msk.bf16.mxu0 %vm1453_vm5, %v10505_v22  ;;  %v5358_v29 = vrot.slane %v5356_v33, 4  ;;  %v5359_v49 = vrot.slane %v9267_v34, 5  ;;  %v4706_v7 = vrot.slane %v4704_v26, 4  ;;  %v4709_v48 = vrot.slane %v4707_v8, 5 }
 0x157   : > { %v9286_v13 = vpop.f32.mrf.mxu0  ;;  %v10511_v45 = vsel %vm7610_vm7, %v9189_v61, %v9141_v32  ;;  %v9312_v60 = vcombine.low %v4644_v9, %v4654_v39  ;;  %v9314_v15 = vrot.slane %v4713_v30, 5  ;;  %v4719_v4 = vrot.slane %v4717_v2, 4  ;;  %v5249_v9 = vld [vmem:[#allocation2 + $0x78] sm:$0xe] }
 0x158   : > { %7240 = vmatmul.mubr.msk.bf16.gmra.mxu1 %vm1453_vm5, %v10506_v51  ;;  %10508 = vst [vmem:[#allocation23_spill] sm:$0xff] %v9286_v13  ;;  %v9310_v54 = vcombine.low %v10511_v45, %v4630_v57  ;;  %v9322_v8 = vcombine.low %v4668_v12, %v4678_v27  ;;  %v9328_v61 = vsel %vm8036_vm10, %v6623_v44, %v5356_v33  ;;  %v4512_v57 = vld [vmem:[#allocation2 + $0x7c] sm:$0xf]  ;;  %v4723_v2 = vshll.u32 %v9267_v34, 16  ;;  %v9340_v51 = vld [vmem:[#allocation2 + $0x88] sm:$0xf] }
 0x159   : > { %7243 = vmatprep.mubr.msk.bf16.mxu1 %vm1453_vm5, %v10509_v6  ;;  %v9299_v3 = vpop.f32.mrf.mxu0  ;;  %v4692_v39 = vsel %vm7610_vm7, %v4687_v20, %v9242_v10  ;;  %v4702_v30 = vsel %vm7610_vm7, %v4697_v21, %v4701_v53  ;;  %v9337_v12 = vsel %vm8036_vm10, %v5358_v29, %v5359_v49  ;;  %v4514_v27 = vld [vmem:[#allocation2 + $0x84] sm:$0xf]  ;;  %v10514_v44 = vcombine.low %v9098_v36, %v9105_v37  ;;  %v9348_v6 = vld [vmem:[#allocation2 + $0x80] sm:$0x1]  ;;  %v9359_v37 = vpop.f32.mrf.mxu1  ;;  %v5252_v13 = vld [vmem:[#allocation2 + $0x9c] sm:$0xe] }
 0x15a   : > { %10510 = vst [vmem:[#allocation24_spill] sm:$0xff] %v9299_v3  ;;  %v4710_v10 = vor.u32 %v4709_v48, %v4706_v7  ;;  %v5363_v53 = vrot.slane %v4512_v57, 5  ;;  %v4728_v20 = vshrl.u32 %v4511_v43, 16  ;;  %v4731_v21 = vshll.u32 %v4511_v43, 16  ;;  %10517 = vst [vmem:[#allocation27_spill] sm:$0xff] %v9359_v37 }
 0x15b   : > { %v9318_v22 = vpop.f32.mrf.mxu0  ;;  %v10515_v29 = vcombine.low %v9122_v18, %v9126_v5  ;;  %v4720_v34 = vor.u32 %v4719_v4, %v9314_v15  ;;  %v6624_v49 = vrot.slane %v5249_v9, 9  ;;  %v4737_v45 = vshll.u32 %v4512_v57, 16  ;;  %v9392_v28 = vpop.f32.mrf.mxu1 }
 0x15c   : > { %10513 = vst [vmem:[#allocation26_spill] sm:$0xff] %v9318_v22  ;;  %v4741_v32 = vshrl.u32 %v4512_v57, 16  ;;  %v10516_v36 = vcombine.low %v8952_v25, %v8961_v58  ;;  %v4752_v48 = vshrl.u32 %v4514_v27, 16  ;;  %v4755_v43 = vshll.u32 %v4514_v27, 16  ;;  %v9390_v25 = vld [vmem:[#allocation2 + $0x8c] sm:$0x1] }
 0x15d   : > { %v9342_v33 = vpop.f32.mrf.mxu0  ;;  %7340 = vmatmul.mubr.msk.bf16.vlgmr.msra.gmra.mxu0 %vm1453_vm5, %v10514_v44  ;;  %v4761_v18 = vshll.u32 %v9340_v51, 16  ;;  %v4765_v5 = vshrl.u32 %v9340_v51, 16  ;;  %v10518_v4 = vcombine.low %v8968_v52, %v8979_v17  ;;  %v9369_v57 = vcombine.low %v4692_v39, %v4702_v30  ;;  %v9376_v44 = vld [vmem:[#allocation2 + $0x94] sm:$0xf]  ;;  %v4517_v17 = vld [vmem:[#allocation2 + $0x90] sm:$0xf] }
 0x15e   : > { %7343 = vmatprep.mubr.msk.bf16.mxu0 %vm1453_vm5, %v10515_v29  ;;  %v9373_v58 = vrot.slane %v4723_v2, 5  ;;  %v5366_v9 = vrot.slane %v9348_v6, 5  ;;  %v9380_v29 = vrot.slane %v4710_v10, 4  ;;  %v4730_v26 = vrot.slane %v4728_v20, 4  ;;  %10519 = vst [vmem:[#allocation28_spill] sm:$0xff] %v9392_v28 }
 0x15f   : > { %v9361_v7 = vpop.f32.mrf.mxu0  ;;  %v4733_v52 = vrot.slane %v4731_v21, 5  ;;  %v9386_v39 = vsel %vm8036_vm10, %v6624_v49, %v5363_v53  ;;  %v9388_v30 = vrot.slane %v4737_v45, 5  ;;  %v4743_v2 = vrot.slane %v4741_v32, 4  ;;  %v5250_v10 = vld [vmem:[#allocation2 + $0x84] sm:$0xe] }
 0x160   : > { %7244 = vmatmul.mubr.msk.bf16.gmra.mxu1 %vm1453_vm5, %v10516_v36  ;;  %v5365_v36 = vrot.slane %v5363_v53, 4  ;;  %v4754_v37 = vrot.slane %v4752_v48, 4  ;;  %v4757_v20 = vrot.slane %v4755_v43, 5  ;;  %v9396_v21 = vrot.slane %v4761_v18, 5 }
 0x161   : > { %7247 = vmatprep.mubr.msk.bf16.mxu1 %vm1453_vm5, %v10518_v4  ;;  %v9378_v27 = vpop.f32.mrf.mxu0  ;;  %v9382_v4 = vrot.slane %v4720_v34, 4  ;;  %v4767_v34 = vrot.slane %v4765_v5, 4  ;;  %v4776_v23 = vshrl.u32 %v4517_v17, 16  ;;  %v4779_v46 = vshll.u32 %v4517_v17, 16 }
 0x162   : > { %v4785_v53 = vshll.u32 %v9376_v44, 16  ;;  %v4789_v49 = vshrl.u32 %v9376_v44, 16  ;;  %v10520_v32 = vcombine.low %v9177_v55, %v9181_v24  ;;  %v9412_v43 = vsel %vm8036_vm10, %v5365_v36, %v5366_v9 }
 0x163   : > { %v9394_v62 = vpop.f32.mrf.mxu0  ;;  %v4734_v18 = vor.u32 %v4733_v52, %v4730_v26  ;;  %v4747_v5 = vshll.u32 %v9348_v6, 16  ;;  %v10521_v17 = vcombine.low %v9196_v41, %v9221_v31  ;;  %v4744_v55 = vor.u32 %v4743_v2, %v9388_v30  ;;  %v5251_v52 = vld [vmem:[#allocation2 + $0x90] sm:$0xe]  ;;  %v4521_v41 = vld [vmem:[#allocation2 + $0xa0] sm:$0xf] }
 0x164   : > { %v6625_v24 = vrot.slane %v5250_v10, 9  ;;  %v4771_v28 = vshll.u32 %v9390_v25, 16  ;;  %v10523_v9 = vcombine.low %v8972_v0, %v8985_v47  ;;  %v4758_v31 = vor.u32 %v4757_v20, %v4754_v37 }
 0x165   : > { %v9400_v45 = vpop.f32.mrf.mxu0  ;;  %7344 = vmatmul.mubr.msk.bf16.gmra.mxu0 %vm1453_vm5, %v10520_v32  ;;  %v5370_v32 = vrot.slane %v9340_v51, 5  ;;  %v4768_v6 = vor.u32 %v4767_v34, %v9396_v21  ;;  %v4519_v51 = vld [vmem:[#allocation2 + $0x98] sm:$0x1]  ;;  %v5377_v36 = vrot.slane %v9376_v44, 5  ;;  %v4778_v0 = vrot.slane %v4776_v23, 4 }
 0x166   : > { %7347 = vmatprep.mubr.msk.bf16.mxu0 %vm1453_vm5, %v10521_v17  ;;  %v4781_v47 = vrot.slane %v4779_v46, 5  ;;  %v9438_v2 = vrot.slane %v4785_v53, 5  ;;  %v4791_v10 = vrot.slane %v4789_v49, 4  ;;  %v4735_v20 = vrot.slane %v4734_v18, 4  ;;  %v4520_v53 = vld [vmem:[#allocation2 + $0x9c] sm:$0xf] }
 0x167   : > { %v9428_v26 = vpop.f32.mrf.mxu0  ;;  %v4749_v34 = vrot.slane %v4747_v5, 5  ;;  %v5373_v44 = vrot.slane %v9390_v25, 5  ;;  %v5372_v46 = vrot.slane %v5370_v32, 4  ;;  %v4773_v23 = vrot.slane %v4771_v28, 5 }
 0x168   : > { %v9422_v48 = vpop.f32.mrf.mxu1  ;;  %7248 = vmatmul.mubr.msk.bf16.gmra.mxu1 %vm1453_vm5, %v10523_v9  ;;  %v4759_v63 = vrot.slane %v4758_v31, 4  ;;  %v6626_v22 = vrot.slane %v5251_v52, 9  ;;  %v5379_v37 = vrot.slane %v5377_v36, 4  ;;  %v5380_v18 = vrot.slane %v4519_v51, 5 }
 0x169   : > { %10522 = vst [vmem:[#allocation29_spill] sm:$0xff] %v9422_v48  ;;  %7299 = vmatprep.mubr.msk.bf16.mxu1 %vm1453_vm5, %v9135_v35  ;;  %v9442_v9 = vpop.f32.mrf.mxu0  ;;  %v4745_v48 = vrot.slane %v4744_v55, 4  ;;  %v9449_v35 = vsel %vm8036_vm10, %v6625_v24, %v5370_v32  ;;  %v4769_v5 = vrot.slane %v4768_v6, 4  ;;  %v4782_v3 = vor.u32 %v4781_v47, %v4778_v0 }
 0x16a   : > { %v9440_v17 = vpop.f32.mrf.mxu1  ;;  %v4792_v25 = vor.u32 %v4791_v10, %v9438_v2  ;;  %v4795_v55 = vshll.u32 %v4519_v51, 16  ;;  %v10526_v28 = vcombine.low %v9249_v14, %v9265_v16  ;;  %v4800_v32 = vshrl.u32 %v4520_v53, 16 }
 0x16b   : > { %10524 = vst [vmem:[#allocation30_spill] sm:$0xff] %v9440_v17  ;;  %v9453_v17 = vpop.f32.mrf.mxu0  ;;  %v4803_v31 = vshll.u32 %v4520_v53, 16  ;;  %v4809_v52 = vshll.u32 %v4521_v41, 16  ;;  %v10527_v6 = vcombine.low %v9278_v50, %v9292_v1  ;;  %v4740_v51 = vsel %vm7610_vm7, %v4735_v20, %v9388_v30 }
 0x16c   : > { %v9451_v49 = vpop.f32.mrf.mxu1  ;;  %v4750_v0 = vsel %vm7610_vm7, %v4745_v48, %v4749_v34  ;;  %v9475_v14 = vsel %vm8036_vm10, %v5372_v46, %v5373_v44  ;;  %v5384_v16 = vrot.slane %v4521_v41, 5  ;;  %v4764_v50 = vsel %vm7610_vm7, %v4759_v63, %v9396_v21  ;;  %v4522_v48 = vld [vmem:[#allocation2 + $0xa4] sm:$0x1] }
 0x16d   : > { %10525 = vst [vmem:[#allocation31_spill] sm:$0xff] %v9451_v49  ;;  %v9458_v24 = vpop.f32.mrf.mxu0  ;;  %7348 = vmatmul.mubr.msk.bf16.gmra.mxu0 %vm1453_vm5, %v10526_v28  ;;  %v4813_v49 = vshrl.u32 %v4521_v41, 16  ;;  %v9486_v1 = vsel %vm8036_vm10, %v6626_v22, %v5377_v36  ;;  %v9490_v30 = vsel %vm8036_vm10, %v5379_v37, %v5380_v18  ;;  %v6627_v41 = vrot.slane %v5252_v13, 9 }
 0x16e   : > { %v9456_v56 = vpop.f32.mrf.mxu1  ;;  %7351 = vmatprep.mubr.msk.bf16.mxu0 %vm1453_vm5, %v10527_v6  ;;  %v9496_v20 = vrot.slane %v4782_v3, 4  ;;  %v9498_v34 = vrot.slane %v4792_v25, 4  ;;  %v9500_v63 = vrot.slane %v4795_v55, 5  ;;  %v4802_v36 = vrot.slane %v4800_v32, 4  ;;  %v4523_v25 = vld [vmem:[#allocation2 + $0xa8] sm:$0xf] }
 0x16f   : > { %v9479_v10 = vpop.f32.mrf.mxu0  ;;  %v4805_v37 = vrot.slane %v4803_v31, 5  ;;  %v9504_v44 = vrot.slane %v4809_v52, 5  ;;  %v4815_v13 = vrot.slane %v4813_v49, 4  ;;  %v10529_v3 = vsel %vm7610_vm7, %v9380_v29, %v9314_v15  ;;  %v4524_v29 = vld [vmem:[#allocation2 + $0xac] sm:$0xf] }
 0x170   : > { %v7061_v47 = vpop.f32.mrf.mxu1  ;;  %7300 = vmatmul.mubr.msk.bf16.vlgmr.msra.gmra.mxu1 %vm1453_vm5, %v9145_v11  ;;  %v4774_v11 = vsel %vm7610_vm7, %v4769_v5, %v4773_v23  ;;  %v9518_v23 = vcombine.low %v4740_v51, %v4750_v0  ;;  %v5386_v53 = vrot.slane %v5384_v16, 4  ;;  %v5387_v18 = vrot.slane %v4522_v48, 5  ;;  %v5253_v5 = vld [vmem:[#allocation2 + $0xa8] sm:$0xe] }
 0x171   : > { %7303 = vmatprep.mubr.msk.bf16.mxu1 %vm1453_vm5, %v9173_v59  ;;  %v9502_v21 = vpop.f32.mrf.mxu0  ;;  %v10528_v59 = vsel %vm7610_vm7, %v9382_v4, %v9373_v58  ;;  %v6649_v28 = vcombine.low %v9449_v35, %v9475_v14  ;;  %v9524_v58 = vcombine.low %v4764_v50, %v4774_v11  ;;  %v6650_v4 = vcombine.low %v9486_v1, %v9490_v30  ;;  %v9547_v50 = vld [vmem:[#allocation2 + $0xb0] sm:$0x1] }
 0x172   : > { %v1849_v22 = vpop.f32.mrf.mxu1  ;;  %v9516_v46 = vcombine.low %v10529_v3, %v10528_v59  ;;  %v9530_v15 = vsel %vm8036_vm10, %v6627_v41, %v5384_v16  ;;  %v4788_v32 = vsel %vm7610_vm7, %v9496_v20, %v9438_v2  ;;  %v4798_v35 = vsel %vm7610_vm7, %v9498_v34, %v9500_v63  ;;  %v10531_v20 = vld [vmem:[#allocation3_spill] sm:$0xff]  ;;  %v10532_v34 = vld [vmem:[#allocation4_spill] sm:$0xff]  ;;  %v10535_v3 = vld [vmem:[#allocation6_spill] sm:$0xff] }
 0x173   : > { %v9520_v49 = vpop.f32.mrf.mxu0  ;;  %v4819_v31 = vshll.u32 %v4522_v48, 16  ;;  %v5391_v52 = vrot.slane %v4524_v29, 5  ;;  %v10530_v0 = vcombine.low %v9328_v61, %v9337_v12  ;;  %v4806_v14 = vor.u32 %v4805_v37, %v4802_v36  ;;  %v10534_v12 = vld [vmem:[#allocation5_spill] sm:$0xff] }
 0x174   : > { %v7062_v55 = vpop.f32.mrf.mxu1  ;;  %v4816_v16 = vor.u32 %v4815_v13, %v9504_v44  ;;  %v6628_v2 = vrot.slane %v5253_v5, 9  ;;  %v4824_v41 = vshrl.u32 %v4523_v25, 16  ;;  %v1858_v11 = vadd.f32 %v7061_v47, %v9005_v42 }
 0x175   : > { %v9540_v51 = vpop.f32.mrf.mxu0  ;;  %7352 = vmatmul.mubr.msk.bf16.gmra.mxu0 %vm1453_vm5, %v10530_v0  ;;  %v1850_v48 = vadd.f32 %v1849_v22, %v10531_v20  ;;  %v1861_v63 = vadd.f32 %v7062_v55, %v10532_v34  ;;  %v10533_v59 = vcombine.low %v9386_v39, %v9412_v43  ;;  %v9558_v61 = vsel %vm8036_vm10, %v5386_v53, %v5387_v18 }
 0x176   : > { %v1852_v6 = vpop.f32.mrf.mxu1  ;;  %v4827_v47 = vshll.u32 %v4523_v25, 16  ;;  %v4833_v22 = vshll.u32 %v4524_v29, 16  ;;  %v4837_v13 = vshrl.u32 %v4524_v29, 16  ;;  %v4821_v39 = vrot.slane %v4819_v31, 5 }
 0x177   : > { %7355 = vmatprep.mubr.msk.bf16.mxu0 %vm1453_vm5, %v10533_v59  ;;  %v1853_v36 = vadd.f32 %v1852_v6, %v10534_v12  ;;  %v9563_v42 = vpop.f32.mrf.mxu0  ;;  %v5393_v43 = vrot.slane %v5391_v52, 4  ;;  %v5394_v53 = vrot.slane %v9547_v50, 5  ;;  %v4807_v6 = vrot.slane %v4806_v14, 4 }
 0x178   : > { %v7065_v37 = vpop.f32.mrf.mxu1  ;;  %7304 = vmatmul.mubr.msk.bf16.gmra.mxu1 %vm1453_vm5, %v9310_v54  ;;  %v4817_v0 = vrot.slane %v4816_v16, 4  ;;  %v9573_v54 = vsel %vm8036_vm10, %v6628_v2, %v5391_v52  ;;  %v4826_v25 = vrot.slane %v4824_v41, 4  ;;  %v9577_v20 = vadd.f32 %v9342_v33, %v1858_v11 }
 0x179   : > { %v1874_v5 = vadd.f32 %v7065_v37, %v10535_v3  ;;  %7307 = vmatprep.mubr.msk.bf16.mxu1 %vm1453_vm5, %v9312_v60  ;;  %v9569_v55 = vpop.f32.mrf.mxu0  ;;  %v9580_v60 = vadd.f32 %v9361_v7, %v1850_v48  ;;  %v9583_v31 = vadd.f32 %v9378_v27, %v1861_v63  ;;  %v4829_v14 = vrot.slane %v4827_v47, 5  ;;  %v9597_v7 = vld [vmem:[#allocation2 + $0xb8] sm:$0xf]  ;;  %v9599_v27 = vld [vmem:[#allocation2 + $0xb4] sm:$0xf] }
 0x17a   : > { %v1865_v18 = vpop.f32.mrf.mxu1  ;;  %v9587_v16 = vrot.slane %v4833_v22, 5  ;;  %v4839_v52 = vrot.slane %v4837_v13, 4  ;;  %v9590_v2 = vadd.f32 %v9394_v62, %v1853_v36  ;;  %v9595_v33 = vsel %vm8036_vm10, %v5393_v43, %v5394_v53  ;;  %v5254_v47 = vld [vmem:[#allocation2 + $0xb4] sm:$0xe]  ;;  %v9618_v22 = vld [vmem:[#allocation2 + $0xc4] sm:$0xf] }
 0x17b   : > { %v1866_v29 = vadd.f32 %v1865_v18, %v9080_v38  ;;  %v9585_v59 = vpop.f32.mrf.mxu0  ;;  %v10536_v38 = vld [vmem:[#allocation9_spill] sm:$0xff]  ;;  %v9602_v11 = vadd.f32 %v9400_v45, %v1874_v5  ;;  %v9610_v62 = vcombine.low %v4788_v32, %v4798_v35  ;;  %v4812_v36 = vsel %vm7610_vm7, %v4807_v6, %v9504_v44  ;;  %v9627_v32 = vld [vmem:[#allocation2 + $0xbc] sm:$0x1]  ;;  %v5255_v44 = vld [vmem:[#allocation2 + $0xc0] sm:$0xe] }
 0x17c   : > { %v7066_v34 = vpop.f32.mrf.mxu1  ;;  %v4822_v37 = vsel %vm7610_vm7, %v4817_v0, %v4821_v39  ;;  %v5398_v45 = vrot.slane %v9597_v7, 5  ;;  %v5405_v35 = vrot.slane %v9618_v22, 5  ;;  %v6652_v1 = vcombine.low %v9573_v54, %v9595_v33  ;;  %v10538_v43 = vld [vmem:[#allocation13_spill] sm:$0xff] }
 0x17d   : > { %v1877_v41 = vadd.f32 %v7066_v34, %v10536_v38  ;;  %v9605_v48 = vadd.f32 %v9428_v26, %v1866_v29  ;;  %v9607_v12 = vpop.f32.mrf.mxu0  ;;  %7356 = vmatmul.mubr.msk.bf16.gmra.mxu0 %vm1453_vm5, %v6649_v28  ;;  %v10537_v26 = vld [vmem:[#allocation11_spill] sm:$0xff]  ;;  %v6651_v28 = vcombine.low %v9530_v15, %v9558_v61  ;;  %v4830_v30 = vor.u32 %v4829_v14, %v4826_v25  ;;  %v9641_v61 = vld [vmem:[#allocation2 + $0xc8] sm:$0x1] }
 0x17e   : > { %v1868_v63 = vpop.f32.mrf.mxu1  ;;  %7359 = vmatprep.mubr.msk.bf16.mxu0 %vm1453_vm5, %v6650_v4  ;;  %v4840_v4 = vor.u32 %v4839_v52, %v9587_v16  ;;  %v4843_v15 = vshll.u32 %v9547_v50, 16  ;;  %v5400_v54 = vrot.slane %v5398_v45, 4  ;;  %v5401_v25 = vrot.slane %v9627_v32, 5  ;;  %v10539_v34 = vld [vmem:[#allocation15_spill] sm:$0xff] }
 0x17f   : > { %v1869_v13 = vadd.f32 %v1868_v63, %v10537_v26  ;;  %v9631_v3 = vadd.f32 %v9442_v9, %v1877_v41  ;;  %v9635_v39 = vpop.f32.mrf.mxu0  ;;  %v9646_v9 = vcombine.low %v4812_v36, %v4822_v37  ;;  %v4848_v50 = vshrl.u32 %v9599_v27, 16 }
 0x180   : > { %v7069_v5 = vpop.f32.mrf.mxu1  ;;  %7308 = vmatmul.mubr.msk.bf16.gmra.mxu1 %vm1453_vm5, %v9322_v8  ;;  %v6629_v8 = vrot.slane %v5254_v47, 9  ;;  %v6630_v29 = vrot.slane %v5255_v44, 9  ;;  %v5407_v52 = vrot.slane %v5405_v35, 4  ;;  %v9662_v33 = vrot.slane %v4830_v30, 4  ;;  %v10541_v47 = vld [vmem:[#allocation17_spill] sm:$0xff] }
 0x181   : > { %v1890_v53 = vadd.f32 %v7069_v5, %v10538_v43  ;;  %7311 = vmatprep.mubr.msk.bf16.mxu1 %vm1453_vm5, %v9369_v57  ;;  %v9649_v18 = vadd.f32 %v9453_v17, %v1869_v13  ;;  %v9651_v0 = vpop.f32.mrf.mxu0  ;;  %v5408_v57 = vrot.slane %v9641_v61, 5  ;;  %v9664_v63 = vrot.slane %v4840_v4, 4 }
 0x182   : > { %v1881_v6 = vpop.f32.mrf.mxu1  ;;  %v9666_v36 = vrot.slane %v4843_v15, 5  ;;  %v4851_v37 = vshll.u32 %v9599_v27, 16  ;;  %v5399_v13 = vsel %vm8036_vm10, %v6629_v8, %v5398_v45  ;;  %v4857_v44 = vshll.u32 %v9597_v7, 16  ;;  %v10543_v8 = vld [vmem:[#allocation19_spill] sm:$0xff] }
 0x183   : > { %v1882_v14 = vadd.f32 %v1881_v6, %v10539_v34  ;;  %v9658_v38 = vadd.f32 %v9458_v24, %v1890_v53  ;;  %v9660_v17 = vpop.f32.mrf.mxu0  ;;  %v4529_v24 = vld [vmem:[#allocation2 + $0xc0] sm:$0xf]  ;;  %v5402_v4 = vsel %vm8036_vm10, %v5400_v54, %v5401_v25  ;;  %v9681_v27 = vrot.slane %v4848_v50, 4  ;;  %v9686_v53 = vld [vmem:[#allocation2 + $0xd0] sm:$0xf] }
 0x184   : > { %v7070_v41 = vpop.f32.mrf.mxu1  ;;  %v4861_v15 = vshrl.u32 %v9597_v7, 16  ;;  %v5406_v45 = vsel %vm8036_vm10, %v6630_v29, %v5405_v35  ;;  %v5409_v6 = vsel %vm8036_vm10, %v5407_v52, %v5408_v57  ;;  %v5412_v34 = vrot.slane %v9686_v53, 5  ;;  %v10545_v52 = vld [vmem:[#allocation21_spill] sm:$0xff] }
 0x185   : > { %10540 = vst [vmem:[#allocation3_spill] sm:$0xff] %v9658_v38  ;;  %v1893_v26 = vadd.f32 %v7070_v41, %v10541_v47  ;;  %v9674_v5 = vadd.f32 %v9479_v10, %v1882_v14  ;;  %v9676_v30 = vpop.f32.mrf.mxu0  ;;  %7360 = vmatmul.mubr.msk.bf16.gmra.mxu0 %vm1453_vm5, %v6651_v28  ;;  %v5256_v28 = vld [vmem:[#allocation2 + $0xcc] sm:$0xe]  ;;  %v4872_v35 = vshrl.u32 %v4529_v24, 16  ;;  %v4875_v50 = vshll.u32 %v4529_v24, 16 }
 0x186   : > { %v1884_v43 = vpop.f32.mrf.mxu1  ;;  %7363 = vmatprep.mubr.msk.bf16.mxu0 %vm1453_vm5, %v6652_v1  ;;  %v4881_v29 = vshll.u32 %v9618_v22, 16  ;;  %v4885_v1 = vshrl.u32 %v9618_v22, 16  ;;  %v9702_v14 = vld [vmem:[#allocation2 + $0xd4] sm:$0x1]  ;;  %v9707_v41 = vrot.slane %v4857_v44, 5  ;;  %v6653_v24 = vcombine.low %v5399_v13, %v5402_v4  ;;  %v10548_v13 = vld [vmem:[#allocation24_spill] sm:$0xff] }
 0x187   : > { %10542 = vst [vmem:[#allocation4_spill] sm:$0xff] %v9674_v5  ;;  %v1885_v10 = vadd.f32 %v1884_v43, %v10543_v8  ;;  %v9694_v54 = vadd.f32 %v9502_v21, %v1893_v26  ;;  %v9698_v7 = vpop.f32.mrf.mxu0  ;;  %v4853_v21 = vrot.slane %v4851_v37, 5  ;;  %v4863_v43 = vrot.slane %v4861_v15, 4 }
 0x188   : > { %v7073_v25 = vpop.f32.mrf.mxu1  ;;  %7312 = vmatmul.mubr.msk.bf16.gmra.mxu1 %vm1453_vm5, %v9516_v46  ;;  %v6654_v8 = vcombine.low %v5406_v45, %v5409_v6  ;;  %v6631_v22 = vrot.slane %v5256_v28, 9  ;;  %v5414_v38 = vrot.slane %v5412_v34, 4  ;;  %v4836_v15 = vsel %vm7610_vm7, %v9662_v33, %v9587_v16  ;;  %v4532_v45 = vld [vmem:[#allocation2 + $0xcc] sm:$0xf] }
 0x189   : > { %10544 = vst [vmem:[#allocation5_spill] sm:$0xff] %v9694_v54  ;;  %v1906_v57 = vadd.f32 %v7073_v25, %v10545_v52  ;;  %7315 = vmatprep.mubr.msk.bf16.mxu1 %vm1453_vm5, %v9518_v23  ;;  %v9710_v46 = vadd.f32 %v9520_v49, %v1885_v10  ;;  %v9712_v26 = vpop.f32.mrf.mxu0  ;;  %v10547_v54 = vld [vmem:[#allocation23_spill] sm:$0xff]  ;;  %v5415_v25 = vrot.slane %v9702_v14, 5  ;;  %v4874_v49 = vrot.slane %v4872_v35, 4 }
 0x18a   : > { %v1897_v47 = vpop.f32.mrf.mxu1  ;;  %v4877_v10 = vrot.slane %v4875_v50, 5  ;;  %v9721_v52 = vrot.slane %v4881_v29, 5  ;;  %v4854_v35 = vor.u32 %v4853_v21, %v9681_v27  ;;  %v4864_v50 = vor.u32 %v4863_v43, %v9707_v41  ;;  %v10549_v29 = vld [vmem:[#allocation26_spill] sm:$0xff] }
 0x18b   : > { %10546 = vst [vmem:[#allocation6_spill] sm:$0xff] %v9710_v46  ;;  %v1898_v5 = vadd.f32 %v1897_v47, %v10547_v54  ;;  %v9717_v23 = vadd.f32 %v9540_v51, %v1906_v57  ;;  %v9719_v44 = vpop.f32.mrf.mxu0  ;;  %v4887_v46 = vrot.slane %v4885_v1, 4  ;;  %v4846_v51 = vsel %vm7610_vm7, %v9664_v63, %v9666_v36  ;;  %v10550_v47 = vld [vmem:[#allocation7_spill] sm:$0xff] }
 0x18c   : > { %v7074_v37 = vpop.f32.mrf.mxu1  ;;  %v4867_v16 = vshll.u32 %v9627_v32, 16  ;;  %v4891_v33 = vshll.u32 %v9641_v61, 16  ;;  %v5416_v63 = vsel %vm8036_vm10, %v5414_v38, %v5415_v25  ;;  %v4878_v61 = vor.u32 %v4877_v10, %v4874_v49  ;;  %v10551_v25 = vld [vmem:[#allocation8_spill] sm:$0xff] }
 0x18d   : > { %v1909_v4 = vadd.f32 %v7074_v37, %v10548_v13  ;;  %v9733_v6 = vadd.f32 %v9563_v42, %v1898_v5  ;;  %v9735_v54 = vpop.f32.mrf.mxu0  ;;  %7364 = vmatmul.mubr.msk.bf16.gmra.mxu0 %vm1453_vm5, %v6653_v24  ;;  %v5413_v42 = vsel %vm8036_vm10, %v6631_v22, %v5412_v34  ;;  %v4888_v27 = vor.u32 %v4887_v46, %v9721_v52 }
 0x18e   : > { %v1900_v28 = vpop.f32.mrf.mxu1  ;;  %7367 = vmatprep.mubr.msk.bf16.mxu0 %vm1453_vm5, %v6654_v8  ;;  %v4896_v57 = vshrl.u32 %v4532_v45, 16  ;;  %v4899_v21 = vshll.u32 %v4532_v45, 16  ;;  %v4905_v19 = vshll.u32 %v9686_v53, 16  ;;  %v6592_v34 = vcombine.low %v4836_v15, %v4846_v51  ;;  %v10552_v15 = vld [vmem:[#allocation10_spill] sm:$0xff] }
 0x18f   : > { %v1901_v1 = vadd.f32 %v1900_v28, %v10549_v29  ;;  %v9749_v36 = vadd.f32 %v9569_v55, %v1909_v4  ;;  %v9753_v32 = vpop.f32.mrf.mxu0  ;;  %v4909_v55 = vshrl.u32 %v9686_v53, 16  ;;  %v4855_v43 = vrot.slane %v4854_v35, 4 }
 0x190   : > { %v7077_v5 = vpop.f32.mrf.mxu1  ;;  %7316 = vmatmul.mubr.msk.bf16.gmra.mxu1 %vm1453_vm5, %v9524_v58  ;;  %v4869_v8 = vrot.slane %v4867_v16, 5  ;;  %v6655_v46 = vcombine.low %v5413_v42, %v5416_v63  ;;  %v4865_v49 = vrot.slane %v4864_v50, 4  ;;  %v4893_v10 = vrot.slane %v4891_v33, 5 }
 0x191   : > { %v1922_v24 = vadd.f32 %v7077_v5, %v10550_v47  ;;  %7319 = vmatprep.mubr.msk.bf16.mxu1 %vm1453_vm5, %v9610_v62  ;;  %v9762_v38 = vadd.f32 %v9585_v59, %v1901_v1  ;;  %v9764_v22 = vpop.f32.mrf.mxu0  ;;  %v4879_v53 = vrot.slane %v4878_v61, 4  ;;  %v4889_v59 = vrot.slane %v4888_v27, 4 }
 0x192   : > { %v1913_v58 = vpop.f32.mrf.mxu1  ;;  %v4898_v45 = vrot.slane %v4896_v57, 4  ;;  %v4901_v28 = vrot.slane %v4899_v21, 5  ;;  %v4907_v35 = vrot.slane %v4905_v19, 5  ;;  %v4911_v16 = vrot.slane %v4909_v55, 4 }
 0x193   : > { %v1914_v37 = vadd.f32 %v1913_v58, %v10551_v25  ;;  %v9768_v62 = vadd.f32 %v9607_v12, %v1922_v24  ;;  %v9770_v4 = vpop.f32.mrf.mxu0  ;;  %v10553_v12 = vld [vmem:[#allocation12_spill] sm:$0xff]  ;;  %v4860_v42 = vsel %vm7610_vm7, %v4855_v43, %v9707_v41  ;;  %v4884_v61 = vsel %vm7610_vm7, %v4879_v53, %v9721_v52  ;;  %v10554_v41 = vld [vmem:[#allocation14_spill] sm:$0xff] }
 0x194   : > { %v7078_v13 = vpop.f32.mrf.mxu1  ;;  %v4894_v27 = vsel %vm7610_vm7, %v4889_v59, %v4893_v10  ;;  %v4902_v57 = vor.u32 %v4901_v28, %v4898_v45  ;;  %v4915_v24 = vshll.u32 %v9702_v14, 16  ;;  %v10555_v58 = vld [vmem:[#allocation16_spill] sm:$0xff]  ;;  %v10556_v10 = vld [vmem:[#allocation18_spill] sm:$0xff] }
 0x195   : > { %v1925_v51 = vadd.f32 %v7078_v13, %v10552_v15  ;;  %v9774_v29 = vadd.f32 %v9635_v39, %v1914_v37  ;;  %v9776_v50 = vpop.f32.mrf.mxu0  ;;  %7368 = vmatmul.mubr.msk.bf16.gmra.mxu0 %vm1453_vm5, %v6655_v46  ;;  %v4870_v39 = vsel %vm7610_vm7, %v4865_v49, %v4869_v8  ;;  %v6594_v25 = vcombine.low %v4884_v61, %v4894_v27  ;;  %v10557_v45 = vld [vmem:[#allocation20_spill] sm:$0xff] }
 0x196   : > { %v1916_v1 = vpop.f32.mrf.mxu1  ;;  %v6593_v46 = vcombine.low %v4860_v42, %v4870_v39  ;;  %v4903_v37 = vrot.slane %v4902_v57, 4  ;;  %v4917_v53 = vrot.slane %v4915_v24, 5 }
 0x197   : > { %v1917_v33 = vadd.f32 %v1916_v1, %v10553_v12  ;;  %v9784_v63 = vadd.f32 %v9651_v0, %v1925_v51  ;;  %v2414_v21 = vpop.f32.mrf.mxu0  ;;  %v4912_v0 = vor.u32 %v4911_v16, %v4907_v35  ;;  %v10558_v16 = vld [vmem:[#allocation22_spill] sm:$0xff] }
 0x198   : > { %v7081_v5 = vpop.f32.mrf.mxu1  ;;  %7320 = vmatmul.mubr.msk.bf16.gmra.mxu1 %vm1453_vm5, %v9646_v9  ;;  %v4908_v12 = vsel %vm7610_vm7, %v4903_v37, %v4907_v35 }
 0x199   : > { %v1938_v47 = vadd.f32 %v7081_v5, %v10554_v41  ;;  %7323 = vmatprep.mubr.msk.bf16.mxu1 %vm1453_vm5, %v6592_v34  ;;  %v9799_v9 = vadd.f32 %v9660_v17, %v1917_v33  ;;  %v7130_v55 = vpop.f32.mrf.mxu0  ;;  %v4913_v13 = vrot.slane %v4912_v0, 4  ;;  %v10559_v5 = vld [vmem:[#allocation25_spill] sm:$0xff] }
 0x19a   : > { %v1929_v19 = vpop.f32.mrf.mxu1 }
 0x19b   : > { %v1930_v43 = vadd.f32 %v1929_v19, %v10555_v58  ;;  %v9803_v52 = vadd.f32 %v9676_v30, %v1938_v47  ;;  %v2417_v49 = vpop.f32.mrf.mxu0  ;;  %v10560_v47 = vld [vmem:[#allocation27_spill] sm:$0xff]  ;;  %v10561_v19 = vld [vmem:[#allocation28_spill] sm:$0xff] }
 0x19c   : > { %v7082_v8 = vpop.f32.mrf.mxu1 }
 0x19d   : > { %v1941_v34 = vadd.f32 %v7082_v8, %v10556_v10  ;;  %v9807_v14 = vadd.f32 %v9698_v7, %v1930_v43  ;;  %v7181_v59 = vpop.f32.mrf.mxu0  ;;  %v4918_v7 = vsel %vm7610_vm7, %v4913_v13, %v4917_v53  ;;  %v10562_v8 = vld [vmem:[#allocation29_spill] sm:$0xff] }
 0x19e   : > { %v1932_v17 = vpop.f32.mrf.mxu1  ;;  %v6595_v57 = vcombine.low %v4908_v12, %v4918_v7 }
 0x19f   : > { %v1933_v28 = vadd.f32 %v1932_v17, %v10557_v45  ;;  %v9811_v15 = vadd.f32 %v9712_v26, %v1941_v34  ;;  %v3443_v51 = vpop.f32.mrf.mxu0 }
 0x1a0   : > { %v7085_v30 = vpop.f32.mrf.mxu1  ;;  %7324 = vmatmul.mubr.msk.bf16.gmra.mxu1 %vm1453_vm5, %v6593_v46 }
 0x1a1   : > { %v1954_v1 = vadd.f32 %v7085_v30, %v10558_v16  ;;  %7327 = vmatprep.mubr.msk.bf16.mxu1 %vm1453_vm5, %v6594_v25  ;;  %v9821_v33 = vadd.f32 %v9719_v44, %v1933_v28  ;;  %v7182_v26 = vpop.f32.mrf.mxu0 }
 0x1a2   : > { %v1945_v42 = vpop.f32.mrf.mxu1 }
 0x1a3   : > { %v1946_v39 = vadd.f32 %v1945_v42, %v10559_v5  ;;  %v9825_v61 = vadd.f32 %v9735_v54, %v1954_v1  ;;  %v3446_v41 = vpop.f32.mrf.mxu0 }
 0x1a4   : > { %v7086_v27 = vpop.f32.mrf.mxu1 }
 0x1a5   : > { %v1957_v0 = vadd.f32 %v7086_v27, %v10560_v47  ;;  %v9829_v35 = vadd.f32 %v9753_v32, %v1946_v39  ;;  %v7185_v24 = vpop.f32.mrf.mxu0  ;;  %v10563_v32 = vld [vmem:[#allocation30_spill] sm:$0xff] }
 0x1a6   : > { %v1948_v40 = vpop.f32.mrf.mxu1 }
 0x1a7   : > { %v1949_v44 = vadd.f32 %v1948_v40, %v10561_v19  ;;  %v9833_v58 = vadd.f32 %v9764_v22, %v1957_v0  ;;  %v3459_v54 = vpop.f32.mrf.mxu0  ;;  %v10564_v22 = vld [vmem:[#allocation31_spill] sm:$0xff] }
 0x1a8   : > { %v7089_v43 = vpop.f32.mrf.mxu1  ;;  %7328 = vmatmul.mubr.msk.bf16.gmra.mxu1 %vm1453_vm5, %v6595_v57 }
 0x1a9   : > { %v1970_v46 = vadd.f32 %v7089_v43, %v10562_v8  ;;  %v9838_v25 = vadd.f32 %v9770_v4, %v1949_v44  ;;  %v7186_v10 = vpop.f32.mrf.mxu0 }
 0x1aa   : > { %v1961_v37 = vpop.f32.mrf.mxu1 }
 0x1ab   : > { %v1962_v34 = vadd.f32 %v1961_v37, %v10563_v32  ;;  %v9842_v13 = vadd.f32 %v9776_v50, %v1970_v46  ;;  %v3462_v17 = vpop.f32.mrf.mxu0 }
 0x1ac   : > { %v7090_v53 = vpop.f32.mrf.mxu1 }
 0x1ad   : > { %v1973_v45 = vadd.f32 %v7090_v53, %v10564_v22  ;;  %v9845_v28 = vadd.f32 %v2414_v21, %v1962_v34  ;;  %v7189_v16 = vpop.f32.mrf.mxu0 }
 0x1ae   : > { %v1964_v30 = vpop.f32.mrf.mxu1 }
 0x1af   : > { %v1965_v1 = vadd.f32 %v1964_v30, %v9456_v56  ;;  %v9848_v12 = vadd.f32 %v7130_v55, %v1973_v45  ;;  %v3475_v7 = vpop.f32.mrf.mxu0  ;;  %v10565_v45 = vld [vmem:[#allocation3_spill] sm:$0xff] }
 0x1b0   : > { %v7141_v4 = vpop.f32.mrf.mxu1 }
 0x1b1   : > { %v2818_v42 = vadd.f32 %v7141_v4, %v9577_v20  ;;  %v9851_v5 = vadd.f32 %v2417_v49, %v1965_v1  ;;  %v7190_v39 = vpop.f32.mrf.mxu0  ;;  %v10566_v4 = vld [vmem:[#allocation4_spill] sm:$0xff] }
 0x1b2   : > { %v2689_v50 = vpop.f32.mrf.mxu1 }
 0x1b3   : > { %v2816_v27 = vadd.f32 %v2689_v50, %v9580_v60  ;;  %v9854_v57 = vadd.f32 %v7181_v59, %v2818_v42  ;;  %v3478_v47 = vpop.f32.mrf.mxu0 }
 0x1b4   : > { %v7142_v21 = vpop.f32.mrf.mxu1 }
 0x1b5   : > { %v2819_v0 = vadd.f32 %v7142_v21, %v9583_v31  ;;  %v9857_v40 = vadd.f32 %v3443_v51, %v2816_v27  ;;  %v7193_v55 = vpop.f32.mrf.mxu0  ;;  %v10567_v27 = vld [vmem:[#allocation5_spill] sm:$0xff] }
 0x1b6   : > { %v2692_v56 = vpop.f32.mrf.mxu1 }
 0x1b7   : > { %v2817_v19 = vadd.f32 %v2692_v56, %v9590_v2  ;;  %v9860_v44 = vadd.f32 %v7182_v26, %v2819_v0  ;;  %v3491_v49 = vpop.f32.mrf.mxu0  ;;  %v10568_v56 = vld [vmem:[#allocation6_spill] sm:$0xff] }
 0x1b8   : > { %v7145_v20 = vpop.f32.mrf.mxu1 }
 0x1b9   : > { %v2822_v43 = vadd.f32 %v7145_v20, %v9602_v11  ;;  %v9863_v8 = vadd.f32 %v3446_v41, %v2817_v19  ;;  %v7194_v59 = vpop.f32.mrf.mxu0 }
 0x1ba   : > { %v2705_v60 = vpop.f32.mrf.mxu1 }
 0x1bb   : > { %v2820_v46 = vadd.f32 %v2705_v60, %v9605_v48  ;;  %v9866_v37 = vadd.f32 %v7185_v24, %v2822_v43  ;;  %v3494_v51 = vpop.f32.mrf.mxu0 }
 0x1bc   : > { %v7146_v31 = vpop.f32.mrf.mxu1 }
 0x1bd   : > { %v2823_v32 = vadd.f32 %v7146_v31, %v9631_v3  ;;  %v9869_v34 = vadd.f32 %v3459_v54, %v2820_v46  ;;  %v7197_v26 = vpop.f32.mrf.mxu0 }
 0x1be   : > { %v2708_v2 = vpop.f32.mrf.mxu1 }
 0x1bf   : > { %v2821_v53 = vadd.f32 %v2708_v2, %v9649_v18  ;;  %v9872_v22 = vadd.f32 %v7186_v10, %v2823_v32  ;;  %v3507_v41 = vpop.f32.mrf.mxu0 }
 0x1c0   : > { %v7149_v11 = vpop.f32.mrf.mxu1 }
 0x1c1   : > { %v2826_v30 = vadd.f32 %v7149_v11, %v10565_v45  ;;  %v9875_v1 = vadd.f32 %v3462_v17, %v2821_v53  ;;  %v7198_v24 = vpop.f32.mrf.mxu0 }
 0x1c2   : > { %v2721_v48 = vpop.f32.mrf.mxu1 }
 0x1c3   : > { %v2824_v42 = vadd.f32 %v2721_v48, %v10566_v4  ;;  %v9878_v50 = vadd.f32 %v7189_v16, %v2826_v30  ;;  %v3510_v54 = vpop.f32.mrf.mxu0 }
 0x1c4   : > { %v7150_v3 = vpop.f32.mrf.mxu1 }
 0x1c5   : > { %v2827_v21 = vadd.f32 %v7150_v3, %v10567_v27  ;;  %v9881_v0 = vadd.f32 %v3475_v7, %v2824_v42  ;;  %v7201_v10 = vpop.f32.mrf.mxu0 }
 0x1c6   : > { %v2724_v18 = vpop.f32.mrf.mxu1 }
 0x1c7   : > { %v2825_v19 = vadd.f32 %v2724_v18, %v10568_v56  ;;  %v9884_v20 = vadd.f32 %v7190_v39, %v2827_v21  ;;  %v3523_v43 = vpop.f32.mrf.mxu0 }
 0x1c8   : > { %v7153_v17 = vpop.f32.mrf.mxu1 }
 0x1c9   : > { %v2830_v60 = vadd.f32 %v7153_v17, %v9717_v23  ;;  %v9887_v46 = vadd.f32 %v3478_v47, %v2825_v19  ;;  %v7202_v31 = vpop.f32.mrf.mxu0 }
 0x1ca   : > { %v2737_v16 = vpop.f32.mrf.mxu1 }
 0x1cb   : > { %v2828_v32 = vadd.f32 %v2737_v16, %v9733_v6  ;;  %v9890_v2 = vadd.f32 %v7193_v55, %v2830_v60  ;;  %v3526_v53 = vpop.f32.mrf.mxu0 }
 0x1cc   : > { %v7154_v7 = vpop.f32.mrf.mxu1 }
 0x1cd   : > { %v2831_v11 = vadd.f32 %v7154_v7, %v9749_v36  ;;  %v9893_v45 = vadd.f32 %v3491_v49, %v2828_v32  ;;  %v7205_v30 = vpop.f32.mrf.mxu0 }
 0x1ce   : > { %v2740_v39 = vpop.f32.mrf.mxu1 }
 0x1cf   : > { %v2829_v48 = vadd.f32 %v2740_v39, %v9762_v38  ;;  %v9896_v4 = vadd.f32 %v7194_v59, %v2831_v11  ;;  %v3539_v47 = vpop.f32.mrf.mxu0 }
 0x1d0   : > { %v7157_v23 = vpop.f32.mrf.mxu1 }
 0x1d1   : > { %v2834_v42 = vadd.f32 %v7157_v23, %v9768_v62  ;;  %v9899_v3 = vadd.f32 %v3494_v51, %v2829_v48  ;;  %v7206_v55 = vpop.f32.mrf.mxu0 }
 0x1d2   : > { %v2753_v6 = vpop.f32.mrf.mxu1 }
 0x1d3   : > { %v2832_v27 = vadd.f32 %v2753_v6, %v9774_v29  ;;  %v9902_v21 = vadd.f32 %v7197_v26, %v2834_v42  ;;  %v3542_v49 = vpop.f32.mrf.mxu0 }
 0x1d4   : > { %v7158_v36 = vpop.f32.mrf.mxu1 }
 0x1d5   : > { %v2835_v18 = vadd.f32 %v7158_v36, %v9784_v63  ;;  %v9905_v56 = vadd.f32 %v3507_v41, %v2832_v27  ;;  %v7209_v59 = vpop.f32.mrf.mxu0 }
 0x1d6   : > { %v2756_v38 = vpop.f32.mrf.mxu1 }
 0x1d7   : > { %v2833_v19 = vadd.f32 %v2756_v38, %v9799_v9  ;;  %v9908_v17 = vadd.f32 %v7198_v24, %v2835_v18  ;;  %v3555_v51 = vpop.f32.mrf.mxu0 }
 0x1d8   : > { %v7161_v62 = vpop.f32.mrf.mxu1 }
 0x1d9   : > { %v2838_v60 = vadd.f32 %v7161_v62, %v9803_v52  ;;  %v9911_v16 = vadd.f32 %v3510_v54, %v2833_v19  ;;  %v7210_v26 = vpop.f32.mrf.mxu0 }
 0x1da   : > { %v2769_v29 = vpop.f32.mrf.mxu1 }
 0x1db   : > { %10569 = vst [vmem:[#allocation9_spill] sm:$0xff] %v9911_v16  ;;  %v2836_v32 = vadd.f32 %v2769_v29, %v9807_v14  ;;  %v9914_v7 = vadd.f32 %v7201_v10, %v2838_v60  ;;  %v3558_v41 = vpop.f32.mrf.mxu0 }
 0x1dc   : > { %v7162_v63 = vpop.f32.mrf.mxu1 }
 0x1dd   : > { %10570 = vst [vmem:[#allocation11_spill] sm:$0xff] %v9914_v7  ;;  %v2839_v11 = vadd.f32 %v7162_v63, %v9811_v15  ;;  %v9917_v39 = vadd.f32 %v3523_v43, %v2836_v32  ;;  %v9919_v24 = vpop.f32.mrf.mxu0 }
 0x1de   : > { %v2772_v9 = vpop.f32.mrf.mxu1 }
 0x1df   : > { %10571 = vst [vmem:[#allocation13_spill] sm:$0xff] %v9917_v39  ;;  %v2837_v48 = vadd.f32 %v2772_v9, %v9821_v33  ;;  %v9922_v52 = vadd.f32 %v7202_v31, %v2839_v11  ;;  %v9924_v23 = vpop.f32.mrf.mxu0 }
 0x1e0   : > { %v7165_v54 = vpop.f32.mrf.mxu1 }
 0x1e1   : > { %10572 = vst [vmem:[#allocation15_spill] sm:$0xff] %v9922_v52  ;;  %v2842_v14 = vadd.f32 %v7165_v54, %v9825_v61  ;;  %v9927_v10 = vadd.f32 %v3526_v53, %v2837_v48  ;;  %v9929_v6 = vpop.f32.mrf.mxu0 }
 0x1e2   : > { %v2785_v42 = vpop.f32.mrf.mxu1 }
 0x1e3   : > { %10573 = vst [vmem:[#allocation17_spill] sm:$0xff] %v9927_v10  ;;  %v2840_v15 = vadd.f32 %v2785_v42, %v9829_v35  ;;  %v9932_v43 = vadd.f32 %v7205_v30, %v2842_v14  ;;  %v9934_v36 = vpop.f32.mrf.mxu0 }
 0x1e4   : > { %v7166_v27 = vpop.f32.mrf.mxu1 }
 0x1e5   : > { %10574 = vst [vmem:[#allocation19_spill] sm:$0xff] %v9932_v43  ;;  %v2843_v33 = vadd.f32 %v7166_v27, %v9833_v58  ;;  %v9937_v31 = vadd.f32 %v3539_v47, %v2840_v15  ;;  %v9939_v38 = vpop.f32.mrf.mxu0 }
 0x1e6   : > { %v2788_v18 = vpop.f32.mrf.mxu1 }
 0x1e7   : > { %10575 = vst [vmem:[#allocation21_spill] sm:$0xff] %v9937_v31  ;;  %v2841_v61 = vadd.f32 %v2788_v18, %v9838_v25  ;;  %v9942_v53 = vadd.f32 %v7206_v55, %v2843_v33  ;;  %v9944_v62 = vpop.f32.mrf.mxu0 }
 0x1e8   : > { %v7169_v19 = vpop.f32.mrf.mxu1 }
 0x1e9   : > { %10576 = vst [vmem:[#allocation23_spill] sm:$0xff] %v9942_v53  ;;  %v2846_v35 = vadd.f32 %v7169_v19, %v9842_v13  ;;  %v9947_v30 = vadd.f32 %v3542_v49, %v2841_v61  ;;  %v9949_v29 = vpop.f32.mrf.mxu0 }
 0x1ea   : > { %v2801_v60 = vpop.f32.mrf.mxu1 }
 0x1eb   : > { %10577 = vst [vmem:[#allocation24_spill] sm:$0xff] %v9947_v30  ;;  %v2844_v58 = vadd.f32 %v2801_v60, %v9845_v28  ;;  %v9952_v47 = vadd.f32 %v7209_v59, %v2846_v35  ;;  %v9954_v63 = vpop.f32.mrf.mxu0 }
 0x1ec   : > { %v7170_v32 = vpop.f32.mrf.mxu1 }
 0x1ed   : > { %10578 = vst [vmem:[#allocation26_spill] sm:$0xff] %v9952_v47  ;;  %v2847_v25 = vadd.f32 %v7170_v32, %v9848_v12  ;;  %v9957_v55 = vadd.f32 %v3555_v51, %v2844_v58  ;;  %v9959_v9 = vpop.f32.mrf.mxu0 }
 0x1ee   : > { %v2804_v11 = vpop.f32.mrf.mxu1 }
 0x1ef   : > { %10579 = vst [vmem:[#allocation7_spill] sm:$0xff] %v9957_v55  ;;  %v2845_v13 = vadd.f32 %v2804_v11, %v9851_v5  ;;  %v9962_v49 = vadd.f32 %v7210_v26, %v2847_v25  ;;  %v9964_v54 = vpop.f32.mrf.mxu0 }
 0x1f0   : > { %v7221_v48 = vpop.f32.mrf.mxu1 }
 0x1f1   : > { %10580 = vst [vmem:[#allocation8_spill] sm:$0xff] %v9962_v49  ;;  %v9966_v28 = vadd.f32 %v3558_v41, %v2845_v13  ;;  %v9968_v14 = vpop.f32.mrf.mxu0 }
 0x1f2   : > { %v3941_v59 = vpop.f32.mrf.mxu1 }
 0x1f3   : > { %10581 = vst [vmem:[#allocation10_spill] sm:$0xff] %v9966_v28  ;;  %v9970_v15 = vpop.f32.mrf.mxu0 }
 0x1f4   : > { %v7222_v42 = vpop.f32.mrf.mxu1 }
 0x1f5   : > { %v9972_v51 = vpop.f32.mrf.mxu0 }
 0x1f6   : > { %v3944_v12 = vpop.f32.mrf.mxu1 }
 0x1f7   : > { %v9974_v33 = vpop.f32.mrf.mxu0 }
 0x1f8   : > { %v7225_v27 = vpop.f32.mrf.mxu1 }
 0x1f9   : > { %v9976_v26 = vpop.f32.mrf.mxu0 }
 0x1fa   : > { %v3957_v5 = vpop.f32.mrf.mxu1 }
 0x1fb   : > { %v9978_v61 = vpop.f32.mrf.mxu0 }
 0x1fc   : > { %v7226_v18 = vpop.f32.mrf.mxu1  ;;  %10582 = vst [vmem:[#allocation12_spill] sm:$0xff] %v9978_v61 }
 0x1fd   : > { %v9980_v19 = vpop.f32.mrf.mxu0 }
 0x1fe   : > { %v3960_v41 = vpop.f32.mrf.mxu1  ;;  %10583 = vst [vmem:[#allocation14_spill] sm:$0xff] %v9980_v19 }
 0x1ff   : > { %v9982_v60 = vpop.f32.mrf.mxu0 }
 0x200   : > { %v7229_v35 = vpop.f32.mrf.mxu1  ;;  %10584 = vst [vmem:[#allocation16_spill] sm:$0xff] %v9982_v60 }
 0x201   : > { %v9984_v32 = vpop.f32.mrf.mxu0 }
 0x202   : > { %v3973_v58 = vpop.f32.mrf.mxu1  ;;  %10585 = vst [vmem:[#allocation18_spill] sm:$0xff] %v9984_v32 }
 0x203   : > { %v9986_v11 = vpop.f32.mrf.mxu0 }
 0x204   : > { %v7230_v25 = vpop.f32.mrf.mxu1  ;;  %10586 = vst [vmem:[#allocation20_spill] sm:$0xff] %v9986_v11 }
 0x205   : > { %v9988_v28 = vpop.f32.mrf.mxu0 }
 0x206   : > { %v3976_v13 = vpop.f32.mrf.mxu1  ;;  %10587 = vst [vmem:[#allocation22_spill] sm:$0xff] %v9988_v28 }
 0x207   : > { %v9990_v55 = vpop.f32.mrf.mxu0 }
 0x208   : > { %v7233_v49 = vpop.f32.mrf.mxu1  ;;  %10588 = vst [vmem:[#allocation25_spill] sm:$0xff] %v9990_v55 }
 0x209   : > { %v9992_v30 = vpop.f32.mrf.mxu0 }
 0x20a   : > { %v3989_v47 = vpop.f32.mrf.mxu1  ;;  %10589 = vst [vmem:[#allocation27_spill] sm:$0xff] %v9992_v30 }
 0x20b   : > { %v9994_v31 = vpop.f32.mrf.mxu0 }
 0x20c   : > { %v7234_v53 = vpop.f32.mrf.mxu1  ;;  %10590 = vst [vmem:[#allocation28_spill] sm:$0xff] %v9994_v31 }
 0x20d   : > { %v9996_v60 = vpop.f32.mrf.mxu0 }
 0x20e   : > { %v3992_v43 = vpop.f32.mrf.mxu1  ;;  %10591 = vst [vmem:[#allocation29_spill] sm:$0xff] %v9996_v60 }
 0x20f   : > { %v9998_v32 = vpop.f32.mrf.mxu0 }
 0x210   : > { %v7237_v10 = vpop.f32.mrf.mxu1  ;;  %10592 = vst [vmem:[#allocation30_spill] sm:$0xff] %v9998_v32 }
 0x211   : > { %v10000_v11 = vpop.f32.mrf.mxu0 }
 0x212   : > { %v4005_v52 = vpop.f32.mrf.mxu1  ;;  %10593 = vst [vmem:[#allocation31_spill] sm:$0xff] %v10000_v11 }
 0x213   : > { %v10002_v28 = vpop.f32.mrf.mxu0 }
 0x214   : > { %v7238_v19 = vpop.f32.mrf.mxu1  ;;  %10594 = vst [vmem:[#allocation3_spill] sm:$0xff] %v10002_v28 }
 0x215   : > { %v10006_v55 = vpop.f32.mrf.mxu0 }
 0x216   : > { %v10004_v39 = vpop.f32.mrf.mxu1  ;;  %10596 = vst [vmem:[#allocation5_spill] sm:$0xff] %v10006_v55 }
 0x217   : > { %10595 = vst [vmem:[#allocation4_spill] sm:$0xff] %v10004_v39  ;;  %v10010_v7 = vpop.f32.mrf.mxu0 }
 0x218   : > { %v10008_v30 = vpop.f32.mrf.mxu1  ;;  %10598 = vst [vmem:[#allocation32_spill] sm:$0xff] %v10010_v7 }
 0x219   : > { %10597 = vst [vmem:[#allocation6_spill] sm:$0xff] %v10008_v30  ;;  %v10014_v60 = vpop.f32.mrf.mxu0 }
 0x21a   : > { %v10012_v31 = vpop.f32.mrf.mxu1  ;;  %10600 = vst [vmem:[#allocation34_spill] sm:$0xff] %v10014_v60  ;;  %v4070_v60 = vadd.f32 %v7221_v48, %v9854_v57  ;;  %v4075_v57 = vadd.f32 %v7226_v18, %v9872_v22 }
 0x21b   : > { %10599 = vst [vmem:[#allocation33_spill] sm:$0xff] %v10012_v31  ;;  %v10018_v32 = vpop.f32.mrf.mxu0 }
 0x21c   : > { %v10016_v16 = vpop.f32.mrf.mxu1  ;;  %10602 = vst [vmem:[#allocation36_spill] sm:$0xff] %v10018_v32 }
 0x21d   : > { %10601 = vst [vmem:[#allocation35_spill] sm:$0xff] %v10016_v16  ;;  %v10022_v61 = vpop.f32.mrf.mxu0 }
 0x21e   : > { %v10020_v11 = vpop.f32.mrf.mxu1  ;;  %10604 = vst [vmem:[#allocation38_spill] sm:$0xff] %v10022_v61  ;;  %v4068_v61 = vadd.f32 %v3941_v59, %v9857_v40  ;;  %v4073_v40 = vadd.f32 %v3960_v41, %v9875_v1  ;;  %v4076_v59 = vadd.f32 %v3973_v58, %v9881_v0  ;;  %v4080_v1 = vadd.f32 %v3989_v47, %v9893_v45  ;;  %v10614_v47 = vld [vmem:[#allocation4_spill] sm:$0xff] }
 0x21f   : > { %10603 = vst [vmem:[#allocation37_spill] sm:$0xff] %v10020_v11  ;;  %v10026_v39 = vpop.f32.mrf.mxu0  ;;  %v4081_v0 = vadd.f32 %v3992_v43, %v9899_v3  ;;  %v4087_v43 = vadd.f32 %v7238_v19, %v9908_v17  ;;  %v10613_v17 = vld [vmem:[#allocation9_spill] sm:$0xff] }
 0x220   : > { %v10024_v28 = vpop.f32.mrf.mxu1  ;;  %10606 = vst [vmem:[#allocation40_spill] sm:$0xff] %v10026_v39  ;;  %v4455_v22 = vadd.f32 %v9924_v23, %v4068_v61  ;;  %v10622_v19 = vld [vmem:[#allocation17_spill] sm:$0xff] }
 0x221   : > { %10605 = vst [vmem:[#allocation39_spill] sm:$0xff] %v10024_v28  ;;  %v10030_v30 = vpop.f32.mrf.mxu0  ;;  %v4071_v28 = vadd.f32 %v7222_v42, %v9860_v44  ;;  %v4078_v44 = vadd.f32 %v7229_v35, %v9878_v50  ;;  %v4083_v50 = vadd.f32 %v7234_v53, %v9896_v4  ;;  %v10085_v4 = vadd.f32 %v9954_v63, %v4073_v40 }
 0x222   : > { %v10028_v55 = vpop.f32.mrf.mxu1  ;;  %10607 = vst [vmem:[#allocation41_spill] sm:$0xff] %v10030_v30  ;;  %v4069_v30 = vadd.f32 %v3944_v12, %v9863_v8  ;;  %v4079_v8 = vadd.f32 %v7230_v25, %v9884_v20  ;;  %v4085_v63 = vadd.f32 %v10614_v47, %v10613_v17 }
 0x223   : > { %v10034_v31 = vpop.f32.mrf.mxu0  ;;  %v10088_v3 = vadd.f32 %v9959_v9, %v4078_v44  ;;  %v10615_v9 = vld [vmem:[#allocation11_spill] sm:$0xff]  ;;  %v10627_v44 = vld [vmem:[#allocation21_spill] sm:$0xff] }
 0x224   : > { %v10032_v7 = vpop.f32.mrf.mxu1  ;;  %10609 = vst [vmem:[#allocation43_spill] sm:$0xff] %v10034_v31  ;;  %v4072_v31 = vadd.f32 %v3957_v5, %v9869_v34  ;;  %v4082_v34 = vadd.f32 %v7233_v49, %v9890_v2  ;;  %v4456_v20 = vadd.f32 %v9934_v36, %v4069_v30  ;;  %v10108_v30 = vadd.f32 %v9974_v33, %v4080_v1  ;;  %v10619_v33 = vld [vmem:[#allocation14_spill] sm:$0xff]  ;;  %v10621_v61 = vld [vmem:[#allocation35_spill] sm:$0xff] }
 0x225   : > { %10608 = vst [vmem:[#allocation42_spill] sm:$0xff] %v10032_v7  ;;  %v10039_v32 = vpop.f32.mrf.mxu0  ;;  %v4074_v7 = vadd.f32 %v7225_v27, %v9866_v37  ;;  %v4077_v37 = vadd.f32 %v3976_v13, %v9887_v46  ;;  %v4086_v46 = vadd.f32 %v7237_v10, %v9902_v21  ;;  %v10091_v21 = vadd.f32 %v9964_v54, %v4076_v59  ;;  %v10616_v54 = vld [vmem:[#allocation6_spill] sm:$0xff]  ;;  %v10625_v13 = vld [vmem:[#allocation19_spill] sm:$0xff] }
 0x226   : > { %v10037_v16 = vpop.f32.mrf.mxu1  ;;  %10611 = vst [vmem:[#allocation45_spill] sm:$0xff] %v10039_v32  ;;  %v4457_v32 = vadd.f32 %v9919_v24, %v4070_v60  ;;  %v4458_v24 = vadd.f32 %v9929_v6, %v4071_v28  ;;  %v10077_v23 = vadd.f32 %v9944_v62, %v4072_v31  ;;  %v10080_v6 = vadd.f32 %v9949_v29, %v4075_v57  ;;  %v10623_v35 = vld [vmem:[#allocation37_spill] sm:$0xff]  ;;  %v10624_v58 = vld [vmem:[#allocation38_spill] sm:$0xff] }
 0x227   : > { %10610 = vst [vmem:[#allocation44_spill] sm:$0xff] %v10037_v16  ;;  %v10045_v39 = vpop.f32.mrf.mxu0  ;;  %v4461_v49 = vadd.f32 %v9939_v38, %v4074_v7  ;;  %v10094_v10 = vadd.f32 %v9968_v14, %v4079_v8  ;;  %v4084_v7 = vadd.f32 %v4005_v52, %v9905_v56  ;;  %v10101_v38 = vadd.f32 %v9970_v15, %v4077_v37  ;;  %v10612_v56 = vld [vmem:[#allocation12_spill] sm:$0xff]  ;;  %v10617_v14 = vld [vmem:[#allocation13_spill] sm:$0xff] }
 0x228   : > { %v10043_v11 = vpop.f32.mrf.mxu1  ;;  %v10104_v53 = vadd.f32 %v9972_v51, %v4082_v34  ;;  %v10111_v29 = vadd.f32 %v9976_v26, %v4083_v50  ;;  %v10114_v52 = vadd.f32 %v10612_v56, %v4081_v0  ;;  %v4090_v28 = vadd.f32 %v10616_v54, %v10615_v9  ;;  %v10618_v15 = vld [vmem:[#allocation33_spill] sm:$0xff]  ;;  %v10620_v26 = vld [vmem:[#allocation15_spill] sm:$0xff]  ;;  %v10628_v34 = vld [vmem:[#allocation16_spill] sm:$0xff] }
 0x229   : > { %v10054_v16 = vpop.f32.mrf.mxu0  ;;  %v4088_v51 = vadd.f32 %v10618_v15, %v10617_v14  ;;  %v10125_v18 = vadd.f32 %v10619_v33, %v4086_v46  ;;  %v4091_v41 = vadd.f32 %v10621_v61, %v10620_v26  ;;  %v4089_v60 = vadd.f32 %v10623_v35, %v10622_v19  ;;  %v10626_v57 = vld [vmem:[#allocation39_spill] sm:$0xff]  ;;  %v10629_v50 = vld [vmem:[#allocation18_spill] sm:$0xff]  ;;  %v10634_v47 = vld [vmem:[#allocation40_spill] sm:$0xff] }
 0x22a   : > { %v10051_v48 = vpop.f32.mrf.mxu1  ;;  %v4094_v40 = vadd.f32 %v10626_v57, %v10625_v13  ;;  %v4092_v59 = vadd.f32 %v10028_v55, %v10627_v44  ;;  %v10144_v1 = vadd.f32 %v10628_v34, %v4084_v7  ;;  %v10630_v0 = vld [vmem:[#allocation23_spill] sm:$0xff]  ;;  %v10635_v54 = vld [vmem:[#allocation26_spill] sm:$0xff]  ;;  %v10636_v33 = vld [vmem:[#allocation20_spill] sm:$0xff] }
 0x22b   : > { %v10066_v12 = vpop.f32.mrf.mxu0  ;;  %v4098_v14 = vadd.f32 %v10043_v11, %v10635_v54  ;;  %v10637_v26 = vld [vmem:[#allocation22_spill] sm:$0xff]  ;;  %v10638_v35 = vld [vmem:[#allocation25_spill] sm:$0xff]  ;;  %v10640_v11 = vld [vmem:[#allocation28_spill] sm:$0xff] }
 0x22c   : > { %v10062_v42 = vpop.f32.mrf.mxu1  ;;  %v10631_v46 = vld [vmem:[#allocation42_spill] sm:$0xff]  ;;  %v10162_v61 = vadd.f32 %v10637_v26, %v4090_v28  ;;  %v10641_v57 = vld [vmem:[#allocation41_spill] sm:$0xff]  ;;  %v10647_v54 = vld [vmem:[#allocation43_spill] sm:$0xff] }
 0x22d   : > { %v10082_v45 = vpop.f32.mrf.mxu0  ;;  %v10642_v28 = vld [vmem:[#allocation29_spill] sm:$0xff] }
 0x22e   : > { %v10073_v2 = vpop.f32.mrf.mxu1  ;;  %v10633_v55 = vld [vmem:[#allocation44_spill] sm:$0xff] }
 0x22f   : > { %v10098_v31 = vpop.f32.mrf.mxu0 }
 0x230   : > { %v7301_v36 = vpop.f32.mrf.mxu1 }
 0x231   : > { %v5211_v62 = vadd.f32 %v7301_v36, %v4457_v32  ;;  %v10122_v5 = vpop.f32.mrf.mxu0  ;;  %v4095_v36 = vadd.f32 %v10631_v46, %v10630_v0  ;;  %v10643_v0 = vld [vmem:[#allocation30_spill] sm:$0xff] }
 0x232   : > { %v5082_v27 = vpop.f32.mrf.mxu1  ;;  %v10182_v46 = vadd.f32 %v10643_v0, %v4092_v59 }
 0x233   : > { %v5709_v32 = vadd.f32 %v10624_v58, %v5211_v62  ;;  %v5209_v25 = vadd.f32 %v5082_v27, %v4455_v22  ;;  %v10141_v37 = vpop.f32.mrf.mxu0  ;;  %v10147_v22 = vadd.f32 %v10629_v50, %v4087_v43  ;;  %v10632_v62 = vld [vmem:[#allocation24_spill] sm:$0xff]  ;;  %v10159_v43 = vadd.f32 %v10636_v33, %v4085_v63  ;;  %v10648_v33 = vld [vmem:[#allocation5_spill] sm:$0xff] }
 0x234   : > { %v7302_v8 = vpop.f32.mrf.mxu1  ;;  %v4093_v56 = vadd.f32 %v10633_v55, %v10632_v62  ;;  %v10167_v58 = vadd.f32 %v10638_v35, %v4088_v51  ;;  %v10179_v50 = vadd.f32 %v10642_v28, %v4094_v40  ;;  %v10644_v62 = vld [vmem:[#allocation31_spill] sm:$0xff]  ;;  %v10200_v26 = vadd.f32 %v10648_v33, %v4098_v14 }
 0x235   : > { %v6761_v17 = vpack.c.bf16 %v5709_v32, %v5709_v32  ;;  %v5707_v9 = vadd.f32 %v10634_v47, %v5209_v25  ;;  %v5212_v15 = vadd.f32 %v7302_v8, %v4458_v24  ;;  %v10156_v7 = vpop.f32.mrf.mxu0  ;;  %v10639_v25 = vld [vmem:[#allocation27_spill] sm:$0xff]  ;;  %v10173_v24 = vadd.f32 %v10640_v11, %v4089_v60 }
 0x236   : > { %v5085_v27 = vpop.f32.mrf.mxu1  ;;  %v10170_v13 = vadd.f32 %v10639_v25, %v4091_v41  ;;  %v10187_v60 = vadd.f32 %v10644_v62, %v4095_v36  ;;  %v10645_v55 = vld [vmem:[#allocation3_spill] sm:$0xff] }
 0x237   : > { %5869 = vst.msk [vmem:[%s10139_s7 + $0x8] sm:$0xf] %vm873_vm0, %v6761_v17  ;;  %v6759_v19 = vpack.c.bf16 %v5707_v9, %v5707_v9  ;;  %v5710_v44 = vadd.f32 %v10641_v57, %v5212_v15  ;;  %v5210_v8 = vadd.f32 %v5085_v27, %v4456_v20  ;;  %v10176_v34 = vpop.f32.mrf.mxu0  ;;  %v5969_v51 = vmul.f32 %v5707_v9, %v5707_v9  ;;  %v10646_v20 = vld [vmem:[#allocation7_spill] sm:$0xff] }
 0x238   : > { %v7305_v63 = vpop.f32.mrf.mxu1  ;;  %v10190_v17 = vadd.f32 %v10645_v55, %v4093_v56  ;;  %v10194_v47 = vadd.f32 %v10051_v48, %v10646_v20  ;;  %v5971_v56 = vmul.f32 %v5709_v32, %v5709_v32  ;;  %v5899_v25 = vsel %vm1453_vm5, %v5707_v9, 0.0 }
 0x239   : > { %5867 = vst.msk [vmem:[%s10139_s7] sm:$0xf] %vm873_vm0, %v6759_v19  ;;  %v5215_v41 = vadd.f32 %v7305_v63, %v4461_v49  ;;  %v6762_v40 = vpack.c.bf16 %v5710_v44, %v5710_v44  ;;  %v5708_v15 = vadd.f32 %v10647_v54, %v5210_v8  ;;  %v10197_v27 = vpop.f32.mrf.mxu0  ;;  %v10649_v49 = vld [vmem:[#allocation8_spill] sm:$0xff]  ;;  %v10650_v19 = vld [vmem:[#allocation45_spill] sm:$0xff]  ;;  %v6001_v28 = vsel %vm1453_vm5, %v5969_v51, 0.0 }
 0x23a   : > { %v5098_v59 = vpop.f32.mrf.mxu1  ;;  %v10204_v36 = vadd.f32 %v10062_v42, %v10649_v49  ;;  %v5902_v42 = vsel %vm1453_vm5, %v5709_v32, 0.0  ;;  %v5972_v62 = vmul.f32 %v5710_v44, %v5710_v44  ;;  %v6004_v54 = vsel %vm1453_vm5, %v5971_v56, 0.0 }
 0x23b   : > { %v5713_v35 = vadd.f32 %v10650_v19, %v5215_v41  ;;  %v5213_v48 = vadd.f32 %v5098_v59, %v10077_v23  ;;  %5870 = vst.msk [vmem:[%s10139_s7 + $0xc] sm:$0xf] %vm873_vm0, %v6762_v40  ;;  %v6760_v11 = vpack.c.bf16 %v5708_v15, %v5708_v15  ;;  %v5900_v57 = vsel %vm1453_vm5, %v5708_v15, 0.0  ;;  %v10212_v63 = vpop.f32.mrf.mxu0 }
 0x23c   : > { %v5970_v8 = vmul.f32 %v5708_v15, %v5708_v15  ;;  %v7306_v14 = vpop.f32.mrf.mxu1  ;;  %v5901_v0 = vadd.f32 %v5900_v57, %v5899_v25  ;;  %v5904_v59 = vsel %vm1453_vm5, %v5710_v44, 0.0  ;;  %v6006_v57 = vsel %vm1453_vm5, %v5972_v62, 0.0 }
 0x23d   : > { %v6765_v41 = vpack.c.bf16 %v5713_v35, %v5713_v35  ;;  %5868 = vst.msk [vmem:[%s10139_s7 + $0x4] sm:$0xf] %vm873_vm0, %v6760_v11  ;;  %v5711_v9 = vadd.f32 %v10045_v39, %v5213_v48  ;;  %v5216_v55 = vadd.f32 %v7306_v14, %v10080_v6  ;;  %v10221_v40 = vpop.f32.mrf.mxu0 }
 0x23e   : > { %v6002_v23 = vsel %vm1453_vm5, %v5970_v8, 0.0  ;;  %v5101_v20 = vpop.f32.mrf.mxu1  ;;  %v5903_v15 = vadd.f32 %v5902_v42, %v5901_v0  ;;  %v5975_v8 = vmul.f32 %v5713_v35, %v5713_v35 }
 0x23f   : > { %v6003_v32 = vadd.f32 %v6002_v23, %v6001_v28  ;;  %5873 = vst.msk [vmem:[%s10139_s7 + $0x18] sm:$0xf] %vm873_vm0, %v6765_v41  ;;  %v5214_v51 = vadd.f32 %v5101_v20, %v10085_v4  ;;  %v6763_v33 = vpack.c.bf16 %v5711_v9, %v5711_v9  ;;  %v5973_v49 = vmul.f32 %v5711_v9, %v5711_v9  ;;  %v10229_v6 = vpop.f32.mrf.mxu0 }
 0x240   : > { %v5714_v39 = vadd.f32 %v10054_v16, %v5216_v55  ;;  %v7309_v19 = vpop.f32.mrf.mxu1  ;;  %v5905_v25 = vadd.f32 %v5904_v59, %v5903_v15  ;;  %v5906_v4 = vsel %vm1453_vm5, %v5711_v9, 0.0  ;;  %v5910_v59 = vsel %vm1453_vm5, %v5713_v35, 0.0 }
 0x241   : > { %v6005_v48 = vadd.f32 %v6004_v54, %v6003_v32  ;;  %v5712_v56 = vadd.f32 %v10066_v12, %v5214_v51  ;;  %v5219_v11 = vadd.f32 %v7309_v19, %v10088_v3  ;;  %5871 = vst.msk [vmem:[%s10139_s7 + $0x10] sm:$0xf] %vm873_vm0, %v6763_v33  ;;  %v10237_v14 = vpop.f32.mrf.mxu0  ;;  %v6008_v12 = vsel %vm1453_vm5, %v5973_v49, 0.0  ;;  %v10651_v32 = vld [vmem:[#allocation32_spill] sm:$0xff] }
 0x242   : > { %v6766_v44 = vpack.c.bf16 %v5714_v39, %v5714_v39  ;;  %v5114_v16 = vpop.f32.mrf.mxu1  ;;  %v5907_v42 = vadd.f32 %v5906_v4, %v5905_v25  ;;  %v10252_v51 = vadd.f32 %v10651_v32, %v10194_v47  ;;  %v5976_v33 = vmul.f32 %v5714_v39, %v5714_v39 }
 0x243   : > { %v6007_v28 = vadd.f32 %v6006_v57, %v6005_v48  ;;  %v6764_v0 = vpack.c.bf16 %v5712_v56, %v5712_v56  ;;  %v5908_v41 = vsel %vm1453_vm5, %v5712_v56, 0.0  ;;  %v5974_v3 = vmul.f32 %v5712_v56, %v5712_v56  ;;  %v10245_v55 = vpop.f32.mrf.mxu0 }
 0x244   : > { %5874 = vst.msk [vmem:[%s10139_s7 + $0x1c] sm:$0xf] %vm873_vm0, %v6766_v44  ;;  %v5717_v62 = vadd.f32 %v10082_v45, %v5219_v11  ;;  %v5217_v23 = vadd.f32 %v5114_v16, %v10091_v21  ;;  %v7310_v9 = vpop.f32.mrf.mxu1  ;;  %v5909_v54 = vadd.f32 %v5908_v41, %v5907_v42  ;;  %v6012_v47 = vsel %vm1453_vm5, %v5975_v8, 0.0 }
 0x245   : > { %v6009_v20 = vadd.f32 %v6008_v12, %v6007_v28  ;;  %5872 = vst.msk [vmem:[%s10139_s7 + $0x14] sm:$0xf] %vm873_vm0, %v6764_v0  ;;  %v5220_v15 = vadd.f32 %v7310_v9, %v10094_v10  ;;  %v6010_v45 = vsel %vm1453_vm5, %v5974_v3, 0.0  ;;  %v10256_v19 = vpop.f32.mrf.mxu0  ;;  %v10652_v10 = vld [vmem:[#allocation10_spill] sm:$0xff]  ;;  %v5912_v35 = vsel %vm1453_vm5, %v5714_v39, 0.0 }
 0x246   : > { %v6769_v21 = vpack.c.bf16 %v5717_v62, %v5717_v62  ;;  %v5117_v49 = vpop.f32.mrf.mxu1  ;;  %v5911_v48 = vadd.f32 %v5910_v59, %v5909_v54  ;;  %v5715_v56 = vadd.f32 %v10098_v31, %v5217_v23  ;;  %v4097_v57 = vadd.f32 %v10073_v2, %v10652_v10 }
 0x247   : > { %v6011_v25 = vadd.f32 %v6010_v45, %v6009_v20  ;;  %v5718_v11 = vadd.f32 %v10122_v5, %v5220_v15  ;;  %v5218_v4 = vadd.f32 %v5117_v49, %v10101_v38  ;;  %v10267_v31 = vpop.f32.mrf.mxu0  ;;  %v10653_v5 = vld [vmem:[#allocation34_spill] sm:$0xff]  ;;  %v6014_v2 = vsel %vm1453_vm5, %v5976_v33, 0.0 }
 0x248   : > { %5877 = vst.msk [vmem:[%s10139_s7 + $0x28] sm:$0xf] %vm873_vm0, %v6769_v21  ;;  %v7313_v44 = vpop.f32.mrf.mxu1  ;;  %v6767_v42 = vpack.c.bf16 %v5715_v56, %v5715_v56  ;;  %v5913_v28 = vadd.f32 %v5912_v35, %v5911_v48  ;;  %v10271_v0 = vadd.f32 %v10653_v5, %v10204_v36  ;;  %v5914_v8 = vsel %vm1453_vm5, %v5715_v56, 0.0  ;;  %v10654_v35 = vld [vmem:[#allocation36_spill] sm:$0xff] }
 0x249   : > { %v6013_v16 = vadd.f32 %v6012_v47, %v6011_v25  ;;  %v5977_v39 = vmul.f32 %v5715_v56, %v5715_v56  ;;  %v6770_v41 = vpack.c.bf16 %v5718_v11, %v5718_v11  ;;  %v5716_v23 = vadd.f32 %v10141_v37, %v5218_v4  ;;  %v10284_v49 = vpop.f32.mrf.mxu0 }
 0x24a   : > { %v5130_v12 = vpop.f32.mrf.mxu1  ;;  %5875 = vst.msk [vmem:[%s10139_s7 + $0x20] sm:$0xf] %vm873_vm0, %v6767_v42  ;;  %v5915_v38 = vadd.f32 %v5914_v8, %v5913_v28  ;;  %v5223_v9 = vadd.f32 %v7313_v44, %v10104_v53  ;;  %v5979_v20 = vmul.f32 %v5717_v62, %v5717_v62  ;;  %v5980_v36 = vmul.f32 %v5718_v11, %v5718_v11 }
 0x24b   : > { %v6015_v3 = vadd.f32 %v6014_v2, %v6013_v16  ;;  %v6016_v54 = vsel %vm1453_vm5, %v5977_v39, 0.0  ;;  %5878 = vst.msk [vmem:[%s10139_s7 + $0x2c] sm:$0xf] %vm873_vm0, %v6770_v41  ;;  %v5221_v15 = vadd.f32 %v5130_v12, %v10108_v30  ;;  %v6768_v33 = vpack.c.bf16 %v5716_v23, %v5716_v23  ;;  %v10300_v2 = vpop.f32.mrf.mxu0 }
 0x24c   : > { %v7314_v32 = vpop.f32.mrf.mxu1  ;;  %v5916_v45 = vsel %vm1453_vm5, %v5716_v23, 0.0  ;;  %v5978_v21 = vmul.f32 %v5716_v23, %v5716_v23  ;;  %v5721_v53 = vadd.f32 %v10156_v7, %v5223_v9  ;;  %v5918_v10 = vsel %vm1453_vm5, %v5717_v62, 0.0 }
 0x24d   : > { %v6017_v59 = vadd.f32 %v6016_v54, %v6015_v3  ;;  %v5917_v37 = vadd.f32 %v5916_v45, %v5915_v38  ;;  %v5719_v48 = vadd.f32 %v10176_v34, %v5221_v15  ;;  %v5224_v25 = vadd.f32 %v7314_v32, %v10111_v29  ;;  %5876 = vst.msk [vmem:[%s10139_s7 + $0x24] sm:$0xf] %vm873_vm0, %v6768_v33 }
 0x24e   : > { %v5133_v56 = vpop.f32.mrf.mxu1  ;;  %v6018_v30 = vsel %vm1453_vm5, %v5978_v21, 0.0  ;;  %v10295_v4 = vadd.f32 %v10654_v35, %v4097_v57  ;;  %v6020_v44 = vsel %vm1453_vm5, %v5979_v20, 0.0  ;;  %v6773_v16 = vpack.c.bf16 %v5721_v53, %v5721_v53 }
 0x24f   : > { %v5222_v47 = vadd.f32 %v5133_v56, %v10114_v52  ;;  %v5919_v7 = vadd.f32 %v5918_v10, %v5917_v37  ;;  %v6019_v34 = vadd.f32 %v6018_v30, %v6017_v59  ;;  %v5920_v42 = vsel %vm1453_vm5, %v5718_v11, 0.0  ;;  %v10313_v59 = vpop.f32.mrf.mxu0 }
 0x250   : > { %v7317_v29 = vpop.f32.mrf.mxu1  ;;  %v6022_v62 = vsel %vm1453_vm5, %v5980_v36, 0.0  ;;  %v6771_v28 = vpack.c.bf16 %v5719_v48, %v5719_v48  ;;  %v5981_v5 = vmul.f32 %v5719_v48, %v5719_v48  ;;  %5881 = vst.msk [vmem:[%s10139_s7 + $0x38] sm:$0xf] %vm873_vm0, %v6773_v16  ;;  %v5722_v57 = vadd.f32 %v10197_v27, %v5224_v25 }
 0x251   : > { %v6021_v8 = vadd.f32 %v6020_v44, %v6019_v34  ;;  %v5921_v52 = vadd.f32 %v5920_v42, %v5919_v7  ;;  %v5720_v39 = vadd.f32 %v10212_v63, %v5222_v47  ;;  %v5983_v12 = vmul.f32 %v5721_v53, %v5721_v53  ;;  %v10328_v34 = vpop.f32.mrf.mxu0 }
 0x252   : > { %v5146_v41 = vpop.f32.mrf.mxu1  ;;  %5879 = vst.msk [vmem:[%s10139_s7 + $0x30] sm:$0xf] %vm873_vm0, %v6771_v28  ;;  %v5922_v11 = vsel %vm1453_vm5, %v5719_v48, 0.0  ;;  %v5227_v38 = vadd.f32 %v7317_v29, %v10125_v18  ;;  %v6024_v20 = vsel %vm1453_vm5, %v5981_v5, 0.0  ;;  %v6774_v54 = vpack.c.bf16 %v5722_v57, %v5722_v57 }
 0x253   : > { %v5225_v3 = vadd.f32 %v5146_v41, %v10144_v1  ;;  %v5923_v23 = vadd.f32 %v5922_v11, %v5921_v52  ;;  %v6023_v9 = vadd.f32 %v6022_v62, %v6021_v8  ;;  %v5984_v36 = vmul.f32 %v5722_v57, %v5722_v57 }
 0x254   : > { %v7318_v27 = vpop.f32.mrf.mxu1  ;;  %v6772_v63 = vpack.c.bf16 %v5720_v39, %v5720_v39  ;;  %v5924_v15 = vsel %vm1453_vm5, %v5720_v39, 0.0  ;;  %v5982_v32 = vmul.f32 %v5720_v39, %v5720_v39  ;;  %5882 = vst.msk [vmem:[%s10139_s7 + $0x3c] sm:$0xf] %vm873_vm0, %v6774_v54  ;;  %v5725_v1 = vadd.f32 %v10221_v40, %v5227_v38 }
 0x255   : > { %v6025_v33 = vadd.f32 %v6024_v20, %v6023_v9  ;;  %v5925_v18 = vadd.f32 %v5924_v15, %v5923_v23  ;;  %v5723_v45 = vadd.f32 %v10229_v6, %v5225_v3  ;;  %v5926_v37 = vsel %vm1453_vm5, %v5721_v53, 0.0  ;;  %v10341_v3 = vpop.f32.mrf.mxu0 }
 0x256   : > { %v5149_v21 = vpop.f32.mrf.mxu1  ;;  %5880 = vst.msk [vmem:[%s10139_s7 + $0x34] sm:$0xf] %vm873_vm0, %v6772_v63  ;;  %v6026_v48 = vsel %vm1453_vm5, %v5982_v32, 0.0  ;;  %v5228_v25 = vadd.f32 %v7318_v27, %v10147_v22  ;;  %v6028_v10 = vsel %vm1453_vm5, %v5983_v12, 0.0  ;;  %v6777_v40 = vpack.c.bf16 %v5725_v1, %v5725_v1 }
 0x257   : > { %v5226_v56 = vadd.f32 %v5149_v21, %v10159_v43  ;;  %v5927_v30 = vadd.f32 %v5926_v37, %v5925_v18  ;;  %v6027_v47 = vadd.f32 %v6026_v48, %v6025_v33  ;;  %v5928_v6 = vsel %vm1453_vm5, %v5722_v57, 0.0  ;;  %v5679_v37 = vpop.f32.mrf.mxu0 }
 0x258   : > { %v7321_v35 = vpop.f32.mrf.mxu1  ;;  %v6030_v53 = vsel %vm1453_vm5, %v5984_v36, 0.0  ;;  %v6775_v44 = vpack.c.bf16 %v5723_v45, %v5723_v45  ;;  %v5985_v7 = vmul.f32 %v5723_v45, %v5723_v45  ;;  %5885 = vst.msk [vmem:[%s10139_s7 + $0x48] sm:$0xf] %vm873_vm0, %v6777_v40  ;;  %v5726_v43 = vadd.f32 %v10237_v14, %v5228_v25 }
 0x259   : > { %v6029_v16 = vadd.f32 %v6028_v10, %v6027_v47  ;;  %v5929_v22 = vadd.f32 %v5928_v6, %v5927_v30  ;;  %v5724_v29 = vadd.f32 %v10245_v55, %v5226_v56  ;;  %v5987_v62 = vmul.f32 %v5725_v1, %v5725_v1 }
 0x25a   : > { %v5162_v42 = vpop.f32.mrf.mxu1  ;;  %5883 = vst.msk [vmem:[%s10139_s7 + $0x40] sm:$0xf] %vm873_vm0, %v6775_v44  ;;  %v5930_v28 = vsel %vm1453_vm5, %v5723_v45, 0.0  ;;  %v5231_v5 = vadd.f32 %v7321_v35, %v10162_v61  ;;  %v6032_v39 = vsel %vm1453_vm5, %v5985_v7, 0.0  ;;  %v6778_v41 = vpack.c.bf16 %v5726_v43, %v5726_v43 }
 0x25b   : > { %v5229_v8 = vadd.f32 %v5162_v42, %v10167_v58  ;;  %v5931_v52 = vadd.f32 %v5930_v28, %v5929_v22  ;;  %v6031_v57 = vadd.f32 %v6030_v53, %v6029_v16  ;;  %v5988_v12 = vmul.f32 %v5726_v43, %v5726_v43 }
 0x25c   : > { %v7322_v14 = vpop.f32.mrf.mxu1  ;;  %v6776_v55 = vpack.c.bf16 %v5724_v29, %v5724_v29  ;;  %v5932_v11 = vsel %vm1453_vm5, %v5724_v29, 0.0  ;;  %v5986_v38 = vmul.f32 %v5724_v29, %v5724_v29  ;;  %5886 = vst.msk [vmem:[%s10139_s7 + $0x4c] sm:$0xf] %vm873_vm0, %v6778_v41  ;;  %v5729_v58 = vadd.f32 %v10256_v19, %v5231_v5 }
 0x25d   : > { %v6033_v23 = vadd.f32 %v6032_v39, %v6031_v57  ;;  %v5933_v61 = vadd.f32 %v5932_v11, %v5931_v52  ;;  %v5727_v9 = vadd.f32 %v10267_v31, %v5229_v8  ;;  %v5934_v54 = vsel %vm1453_vm5, %v5725_v1, 0.0 }
 0x25e   : > { %v5165_v20 = vpop.f32.mrf.mxu1  ;;  %5884 = vst.msk [vmem:[%s10139_s7 + $0x44] sm:$0xf] %vm873_vm0, %v6776_v55  ;;  %v6034_v27 = vsel %vm1453_vm5, %v5986_v38, 0.0  ;;  %v5232_v36 = vadd.f32 %v7322_v14, %v10170_v13  ;;  %v6036_v15 = vsel %vm1453_vm5, %v5987_v62, 0.0  ;;  %v6781_v19 = vpack.c.bf16 %v5729_v58, %v5729_v58 }
 0x25f   : > { %v5230_v63 = vadd.f32 %v5165_v20, %v10173_v24  ;;  %v5935_v32 = vadd.f32 %v5934_v54, %v5933_v61  ;;  %v6035_v33 = vadd.f32 %v6034_v27, %v6033_v23  ;;  %v5936_v31 = vsel %vm1453_vm5, %v5726_v43, 0.0  ;;  %v7369_v43 = vpop.f32.mrf.mxu0 }
 0x260   : > { %v7325_v18 = vpop.f32.mrf.mxu1  ;;  %v6038_v1 = vsel %vm1453_vm5, %v5988_v12, 0.0  ;;  %v6779_v45 = vpack.c.bf16 %v5727_v9, %v5727_v9  ;;  %v5989_v21 = vmul.f32 %v5727_v9, %v5727_v9  ;;  %5889 = vst.msk [vmem:[%s10139_s7 + $0x58] sm:$0xf] %vm873_vm0, %v6781_v19  ;;  %v5730_v24 = vadd.f32 %v10284_v49, %v5232_v36 }
 0x261   : > { %v6037_v48 = vadd.f32 %v6036_v15, %v6035_v33  ;;  %v5937_v13 = vadd.f32 %v5936_v31, %v5935_v32  ;;  %v5728_v25 = vadd.f32 %v10300_v2, %v5230_v63  ;;  %v5991_v10 = vmul.f32 %v5729_v58, %v5729_v58  ;;  %v5692_v38 = vpop.f32.mrf.mxu0 }
 0x262   : > { %v5178_v56 = vpop.f32.mrf.mxu1  ;;  %5887 = vst.msk [vmem:[%s10139_s7 + $0x50] sm:$0xf] %vm873_vm0, %v6779_v45  ;;  %v5938_v30 = vsel %vm1453_vm5, %v5727_v9, 0.0  ;;  %v5235_v47 = vadd.f32 %v7325_v18, %v10179_v50  ;;  %v6040_v53 = vsel %vm1453_vm5, %v5989_v21, 0.0  ;;  %v6782_v44 = vpack.c.bf16 %v5730_v24, %v5730_v24 }
 0x263   : > { %v5233_v40 = vadd.f32 %v5178_v56, %v10182_v46  ;;  %v5939_v35 = vadd.f32 %v5938_v30, %v5937_v13  ;;  %v6039_v6 = vadd.f32 %v6038_v1, %v6037_v48  ;;  %v5992_v7 = vmul.f32 %v5730_v24, %v5730_v24  ;;  %v7370_v1 = vpop.f32.mrf.mxu0 }
 0x264   : > { %v7326_v49 = vpop.f32.mrf.mxu1  ;;  %v6780_v2 = vpack.c.bf16 %v5728_v25, %v5728_v25  ;;  %v5940_v16 = vsel %vm1453_vm5, %v5728_v25, 0.0  ;;  %v5990_v22 = vmul.f32 %v5728_v25, %v5728_v25  ;;  %5890 = vst.msk [vmem:[%s10139_s7 + $0x5c] sm:$0xf] %vm873_vm0, %v6782_v44  ;;  %v5733_v50 = vadd.f32 %v10313_v59, %v5235_v47 }
 0x265   : > { %v6041_v29 = vadd.f32 %v6040_v53, %v6039_v6  ;;  %v5941_v42 = vadd.f32 %v5940_v16, %v5939_v35  ;;  %v5731_v46 = vadd.f32 %v10328_v34, %v5233_v40  ;;  %v5942_v28 = vsel %vm1453_vm5, %v5729_v58, 0.0  ;;  %v5695_v53 = vpop.f32.mrf.mxu0 }
 0x266   : > { %v5181_v62 = vpop.f32.mrf.mxu1  ;;  %5888 = vst.msk [vmem:[%s10139_s7 + $0x54] sm:$0xf] %vm873_vm0, %v6780_v2  ;;  %v6042_v5 = vsel %vm1453_vm5, %v5990_v22, 0.0  ;;  %v5236_v8 = vadd.f32 %v7326_v49, %v10187_v60  ;;  %v6044_v57 = vsel %vm1453_vm5, %v5991_v10, 0.0  ;;  %v6785_v59 = vpack.c.bf16 %v5733_v50, %v5733_v50 }
 0x267   : > { %v5234_v52 = vadd.f32 %v5181_v62, %v10190_v17  ;;  %v5943_v39 = vadd.f32 %v5942_v28, %v5941_v42  ;;  %v6043_v41 = vadd.f32 %v6042_v5, %v6041_v29  ;;  %v5944_v34 = vsel %vm1453_vm5, %v5730_v24, 0.0 }
 0x268   : > { %v7329_v14 = vpop.f32.mrf.mxu1  ;;  %v6046_v12 = vsel %vm1453_vm5, %v5992_v7, 0.0  ;;  %v6783_v55 = vpack.c.bf16 %v5731_v46, %v5731_v46  ;;  %v5993_v11 = vmul.f32 %v5731_v46, %v5731_v46  ;;  %5893 = vst.msk [vmem:[%s10139_s7 + $0x68] sm:$0xf] %vm873_vm0, %v6785_v59  ;;  %v5734_v17 = vadd.f32 %v10341_v3, %v5236_v8 }
 0x269   : > { %v6045_v23 = vadd.f32 %v6044_v57, %v6043_v41  ;;  %v5945_v60 = vadd.f32 %v5944_v34, %v5943_v39  ;;  %v5732_v61 = vadd.f32 %v5679_v37, %v5234_v52  ;;  %v5950_v9 = vsel %vm1453_vm5, %v5733_v50, 0.0 }
 0x26a   : > { %v5194_v58 = vpop.f32.mrf.mxu1  ;;  %5891 = vst.msk [vmem:[%s10139_s7 + $0x60] sm:$0xf] %vm873_vm0, %v6783_v55  ;;  %v5946_v20 = vsel %vm1453_vm5, %v5731_v46, 0.0  ;;  %v5239_v54 = vadd.f32 %v7329_v14, %v10200_v26  ;;  %v5995_v36 = vmul.f32 %v5733_v50, %v5733_v50  ;;  %v6786_v32 = vpack.c.bf16 %v5734_v17, %v5734_v17 }
 0x26b   : > { %v5237_v27 = vadd.f32 %v5194_v58, %v10252_v51  ;;  %v5947_v63 = vadd.f32 %v5946_v20, %v5945_v60  ;;  %v6047_v15 = vadd.f32 %v6046_v12, %v6045_v23  ;;  %v6048_v3 = vsel %vm1453_vm5, %v5993_v11, 0.0 }
 0x26c   : > { %v7330_v33 = vpop.f32.mrf.mxu1  ;;  %v6784_v19 = vpack.c.bf16 %v5732_v61, %v5732_v61  ;;  %v5948_v18 = vsel %vm1453_vm5, %v5732_v61, 0.0  ;;  %v5994_v31 = vmul.f32 %v5732_v61, %v5732_v61  ;;  %5894 = vst.msk [vmem:[%s10139_s7 + $0x6c] sm:$0xf] %vm873_vm0, %v6786_v32  ;;  %v5737_v26 = vadd.f32 %v7369_v43, %v5239_v54 }
 0x26d   : > { %v6049_v45 = vadd.f32 %v6048_v3, %v6047_v15  ;;  %v5949_v21 = vadd.f32 %v5948_v18, %v5947_v63  ;;  %v5735_v37 = vadd.f32 %v5692_v38, %v5237_v27  ;;  %v5996_v48 = vmul.f32 %v5734_v17, %v5734_v17 }
 0x26e   : > { %v5197_v51 = vpop.f32.mrf.mxu1  ;;  %5892 = vst.msk [vmem:[%s10139_s7 + $0x64] sm:$0xf] %vm873_vm0, %v6784_v19  ;;  %v6050_v13 = vsel %vm1453_vm5, %v5994_v31, 0.0  ;;  %v5240_v24 = vadd.f32 %v7330_v33, %v10271_v0  ;;  %v6789_v30 = vpack.c.bf16 %v5737_v26, %v5737_v26  ;;  %v6052_v47 = vsel %vm1453_vm5, %v5995_v36, 0.0 }
 0x26f   : > { %v5238_v25 = vadd.f32 %v5197_v51, %v10295_v4  ;;  %v5951_v56 = vadd.f32 %v5950_v9, %v5949_v21  ;;  %v6051_v10 = vadd.f32 %v6050_v13, %v6049_v45  ;;  %v5952_v40 = vsel %vm1453_vm5, %v5734_v17, 0.0 }
 0x270   : > { %v6787_v35 = vpack.c.bf16 %v5735_v37, %v5735_v37  ;;  %v5997_v6 = vmul.f32 %v5735_v37, %v5735_v37  ;;  %5897 = vst.msk [vmem:[%s10139_s7 + $0x78] sm:$0xf] %vm873_vm0, %v6789_v30  ;;  %v5738_v7 = vadd.f32 %v7370_v1, %v5240_v24  ;;  %v6054_v2 = vsel %vm1453_vm5, %v5996_v48, 0.0 }
 0x271   : > { %v6053_v44 = vadd.f32 %v6052_v47, %v6051_v10  ;;  %v5953_v49 = vadd.f32 %v5952_v40, %v5951_v56  ;;  %v5736_v0 = vadd.f32 %v5695_v53, %v5238_v25  ;;  %v5954_v4 = vsel %vm1453_vm5, %v5735_v37, 0.0 }
 0x272   : > { %5895 = vst.msk [vmem:[%s10139_s7 + $0x70] sm:$0xf] %vm873_vm0, %v6787_v35  ;;  %v5999_v16 = vmul.f32 %v5737_v26, %v5737_v26  ;;  %v6790_v29 = vpack.c.bf16 %v5738_v7, %v5738_v7  ;;  %v6056_v42 = vsel %vm1453_vm5, %v5997_v6, 0.0  ;;  %v5958_v8 = vsel %vm1453_vm5, %v5737_v26, 0.0 }
 0x273   : > { %v5955_v22 = vadd.f32 %v5954_v4, %v5953_v49  ;;  %v6055_v43 = vadd.f32 %v6054_v2, %v6053_v44  ;;  %v6788_v50 = vpack.c.bf16 %v5736_v0, %v5736_v0  ;;  %v5956_v46 = vsel %vm1453_vm5, %v5736_v0, 0.0 }
 0x274   : > { %v5998_v62 = vmul.f32 %v5736_v0, %v5736_v0  ;;  %5898 = vst.msk [vmem:[%s10139_s7 + $0x7c] sm:$0xf] %vm873_vm0, %v6790_v29  ;;  %v6000_v52 = vmul.f32 %v5738_v7, %v5738_v7  ;;  %v6060_v59 = vsel %vm1453_vm5, %v5999_v16, 0.0  ;;  %v5960_v14 = vsel %vm1453_vm5, %v5738_v7, 0.0 }
 0x275   : > { %v6057_v28 = vadd.f32 %v6056_v42, %v6055_v43  ;;  %v5957_v5 = vadd.f32 %v5956_v46, %v5955_v22  ;;  %5896 = vst.msk [vmem:[%s10139_s7 + $0x74] sm:$0xf] %vm873_vm0, %v6788_v50 }
 0x276   : > { %v6058_v57 = vsel %vm1453_vm5, %v5998_v62, 0.0  ;;  %v6062_v55 = vsel %vm1453_vm5, %v6000_v52, 0.0 }
 0x277   : > { %v5959_v39 = vadd.f32 %v5958_v8, %v5957_v5  ;;  %v6059_v41 = vadd.f32 %v6058_v57, %v6057_v28 }
 0x279   : > { %v5961_v34 = vadd.f32 %v5960_v14, %v5959_v39  ;;  %v6061_v12 = vadd.f32 %v6060_v59, %v6059_v41 }
 0x27b   : > { %v5962_v11 = vrot.slane %v5961_v34, 4  ;;  %v6063_v38 = vadd.f32 %v6062_v55, %v6061_v12 }
 0x27d   : > { %v5963_v23 = vadd.f32 %v5962_v11, %v5961_v34  ;;  %v6064_v60 = vrot.slane %v6063_v38, 4 }
 0x27f   : > { %v5964_v17 = vrot.slane %v5963_v23, 2  ;;  %v6065_v61 = vadd.f32 %v6064_v60, %v6063_v38 }
 0x281   : > { %v5965_v58 = vadd.f32 %v5964_v17, %v5963_v23  ;;  %v6066_v9 = vrot.slane %v6065_v61, 2 }
 0x283   : > { %v5966_v20 = vrot.slane %v5965_v58, 1  ;;  %v6067_v54 = vadd.f32 %v6066_v9, %v6065_v61 }
 0x285   : > { %v5967_v27 = vadd.f32 %v5966_v20, %v5965_v58  ;;  %v6068_v36 = vrot.slane %v6067_v54, 1 }
 0x287   : > { %5968 = vst.msk [vmem:[%s265_s10] sm:$0x1] %vm876_vm1, %v5967_v27  ;;  %v6069_v63 = vadd.f32 %v6068_v36, %v6067_v54 }
 0x289   : > { %6070 = vst.msk [vmem:[%s268_s14] sm:$0x1] %vm876_vm1, %v6069_v63 }
 0x28a PF: > { %s17_s21 = sadd.s32 1, %s7496_s21  }
 0x28b   : > { %p14_p4 = scmp.ge.s32.totalorder %s17_s21, 4  }
 0x28d   :  { %16 = sbr.rel (!%p14_p4) target bundleno = 1 (0x1), region = 100 }

</bundles_post_ra>
